<compile_context>
chip_gen: v7x
topology: tpu7x:2x2x1
jax: 0.10.0
libtpu: 0.0.40
codegen_flags: <defaults>
</compile_context>

<pallas_src>
import functools
import math

import jax
import jax.numpy as jnp
import numpy as np
from jax.experimental import pallas as pl
from jax.experimental.pallas import tpu as pltpu


# ----------------------------- glue (plain JAX) -----------------------------

def positional_encoding(x, freqs):
    """TensoRF positional encoding: (..., C) -> (..., 2*freqs*C), sin block then cos block."""
    freq_bands = (2.0 ** jnp.arange(freqs)).astype(x.dtype)
    pts = (x[..., None] * freq_bands).reshape(x.shape[:-1] + (freqs * x.shape[-1],))
    return jnp.concatenate([jnp.sin(pts), jnp.cos(pts)], axis=-1)


def _round_up(x, m):
    return (x + m - 1) // m * m


# ------------------------------ Pallas kernel -------------------------------

def _plt_render_kernel(feat_ref, view_ref, w1_ref, b1_ref, w2_ref, b2_ref,
                       w3_ref, b3_ref, palm_ref, pall_ref, out_ref, x_scr,
                       *, feape, viewpe, c_f, c_v, soft_l0_sharpness):
    # --- fused positional encoding, assembled channel-major in VMEM scratch ---
    feat = feat_ref[...]                       # (c_f, TN) f32, zero-padded channels
    view = view_ref[...]                       # (c_v, TN) f32, rows 3..7 are zero

    x_scr[0:c_f, :] = feat                     # raw features
    x_scr[c_f:c_f + c_v, :] = view             # raw viewdirs (padded)

    off_sf = c_f + c_v                         # sin(features * 2^k), frequency-major
    off_cf = off_sf + feape * c_f              # cos(features * 2^k)
    off_sv = off_cf + feape * c_f              # sin(viewdirs * 2^k)
    off_cv = off_sv + viewpe * c_v             # cos(viewdirs * 2^k)

    for k in range(feape):                     # static python loop (unrolled)
        arg = feat * (2.0 ** k)
        x_scr[off_sf + k * c_f: off_sf + (k + 1) * c_f, :] = jnp.sin(arg)
        x_scr[off_cf + k * c_f: off_cf + (k + 1) * c_f, :] = jnp.cos(arg)
    for k in range(viewpe):
        arg = view * (2.0 ** k)
        x_scr[off_sv + k * c_v: off_sv + (k + 1) * c_v, :] = jnp.sin(arg)
        x_scr[off_cv + k * c_v: off_cv + (k + 1) * c_v, :] = jnp.cos(arg)

    x = x_scr[...]                             # (K_pad, TN)

    # --- MLP: Linear -> LeakyReLU(0.01) -> Linear -> LeakyReLU(0.01) -> Linear
    # (channel-major: weights are (out, in), activations are (ch, points))
    h = jnp.dot(w1_ref[...], x, preferred_element_type=jnp.float32) + b1_ref[...]
    h = jnp.where(h > 0, h, 0.01 * h)
    h = jnp.dot(w2_ref[...], h, preferred_element_type=jnp.float32) + b2_ref[...]
    h = jnp.where(h > 0, h, 0.01 * h)
    logits = jnp.dot(w3_ref[...], h, preferred_element_type=jnp.float32) + b3_ref[...]  # (P-1, TN)

    # --- alpha_blend == False branch ---
    opaque = jax.nn.sigmoid(logits)                               # (P-1, TN)
    opq_sum = jnp.sum(opaque, axis=0, keepdims=True)              # (1, TN)
    residual = jnp.maximum(1.0 - opq_sum, 0.0)                    # relu(1 - sum)

    # rgb = bary @ palette, split so the bary concat never materializes.
    rgb = (jnp.dot(palm_ref[...], opaque, preferred_element_type=jnp.float32)
           + pall_ref[...] * residual)                            # (3, TN)

    # sparsity_weight == ones -> plain sum of soft-L0 over the palette axis.
    # TODO(synk): soft_L0_norm is not defined in the provided snippet; assumed
    # soft_L0_norm(x, scale) = 2*sigmoid(scale*x) - 1 (standard soft-L0 for x >= 0).
    soft_l0 = lambda v: 2.0 * jax.nn.sigmoid(soft_l0_sharpness * v) - 1.0
    sparsity = jnp.sum(soft_l0(opaque), axis=0, keepdims=True) + soft_l0(residual)

    conv_residual = jnp.abs(1.0 - (opq_sum + residual))           # (1, TN)

    # rend_buf rows (channel-major): [rgb(3), opaque(P-1), residual(1),
    #                                 sparsity(1), convexity_residual(1)]
    pm1 = opaque.shape[0]
    out_ref[0:3, :] = rgb
    out_ref[3:3 + pm1, :] = opaque
    out_ref[3 + pm1:4 + pm1, :] = residual
    out_ref[4 + pm1:5 + pm1, :] = sparsity
    out_ref[5 + pm1:6 + pm1, :] = conv_residual


# ------------------------------- wrapper -------------------------------------

def plt_render_forward(pts, viewdirs, features, params, *, feape=6, viewpe=6,
                       soft_l0_sharpness=24.0, tile_n=512):
    del pts  # pts are only used for device placement in the torch module
    w1, b1, w2, b2, w3, b3, palette = params
    n, in_ch = features.shape
    featureC = w1.shape[1]
    n_pal = palette.shape[0]
    n_dim = 3 + n_pal + 1 + 1   # rgb + bary(P) + sparsity_norm + convexity_residual

    assert tile_n % 128 == 0
    n_pad = _round_up(n, tile_n)
    grid = n_pad // tile_n

    c_f = _round_up(in_ch, 8)   # feature channels padded to sublane multiple
    c_v = 8                     # viewdir channels (3) padded to sublane multiple

    # Channel-major (transposed), zero-padded inputs: (C, N_pad).
    feat_t = jnp.pad(features.astype(jnp.float32),
                     ((0, n_pad - n), (0, c_f - in_ch))).T
    view_t = jnp.pad(viewdirs.astype(jnp.float32),
                     ((0, n_pad - n), (0, c_v - 3))).T

    # Repack layer-1 weight rows to the kernel's padded, frequency-major x layout.
    off_sf = c_f + c_v
    off_cf = off_sf + feape * c_f
    off_sv = off_cf + feape * c_f
    off_cv = off_sv + viewpe * c_v
    k_pad = off_cv + viewpe * c_v

    new_idx = []
    new_idx += list(range(in_ch))                                        # features
    new_idx += [c_f + c for c in range(3)]                               # viewdirs
    new_idx += [off_sf + k * c_f + c for c in range(in_ch) for k in range(feape)]  # sin(feat)
    new_idx += [off_cf + k * c_f + c for c in range(in_ch) for k in range(feape)]  # cos(feat)
    new_idx += [off_sv + k * c_v + c for c in range(3) for k in range(viewpe)]     # sin(view)
    new_idx += [off_cv + k * c_v + c for c in range(3) for k in range(viewpe)]     # cos(view)
    assert len(new_idx) == w1.shape[0]
    w1_pad = jnp.zeros((k_pad, featureC), jnp.float32).at[
        jnp.asarray(np.array(new_idx, np.int32))].set(w1.astype(jnp.float32))

    # Channel-major ("weight @ activation") parameter layouts.
    w1_t = w1_pad.T                                      # (featureC, k_pad)
    b1_t = b1.reshape(featureC, 1).astype(jnp.float32)
    w2_t = w2.T.astype(jnp.float32)                      # (featureC, featureC)
    b2_t = b2.reshape(featureC, 1).astype(jnp.float32)
    w3_t = w3.T.astype(jnp.float32)                      # (P-1, featureC)
    b3_t = b3.reshape(n_pal - 1, 1).astype(jnp.float32)
    palm_t = palette[:n_pal - 1].T.astype(jnp.float32)   # (3, P-1)
    pall_t = palette[n_pal - 1:].T.astype(jnp.float32)   # (3, 1)

    kernel = functools.partial(_plt_render_kernel, feape=feape, viewpe=viewpe,
                               c_f=c_f, c_v=c_v,
                               soft_l0_sharpness=float(soft_l0_sharpness))

    row_block = lambda c: pl.BlockSpec((c, tile_n), lambda i: (0, i))
    resident = lambda a: pl.BlockSpec(a.shape, lambda i: (0, 0))  # DMA'd once, stays in VMEM

    out_t = pl.pallas_call(
        kernel,
        out_shape=jax.ShapeDtypeStruct((n_dim, n_pad), jnp.float32),
        grid_spec=pltpu.PrefetchScalarGridSpec(
            num_scalar_prefetch=0,
            grid=(grid,),
            in_specs=[
                row_block(c_f),            # features   (c_f, N_pad)
                row_block(c_v),            # viewdirs   (c_v, N_pad)
                resident(w1_t), resident(b1_t),
                resident(w2_t), resident(b2_t),
                resident(w3_t), resident(b3_t),
                resident(palm_t), resident(pall_t),
            ],
            out_specs=pl.BlockSpec((n_dim, tile_n), lambda i: (0, i)),
            scratch_shapes=[pltpu.VMEM((k_pad, tile_n), jnp.float32)],
        ),
        compiler_params=pltpu.CompilerParams(dimension_semantics=("parallel",)),
    )(feat_t, view_t, w1_t, b1_t, w2_t, b2_t, w3_t, b3_t, palm_t, pall_t)

    # Back to the module's (N, n_dim) row-major layout (downstream consumers
    # could keep the channel-major layout and skip this transpose entirely).
    return out_t.T[:n]


# ------------------------- deterministic param init --------------------------

def init_params(key, in_mlpC, featureC, n_palette):
    """Mimics torch.nn.Linear default init (uniform +-1/sqrt(fan_in)); layer3 bias = 0."""
    def linear(k, fan_in, fan_out):
        bound = 1.0 / math.sqrt(fan_in)
        kw, kb = jax.random.split(k)
        w = jax.random.uniform(kw, (fan_in, fan_out), jnp.float32, -bound, bound)
        b = jax.random.uniform(kb, (1, fan_out), jnp.float32, -bound, bound)
        return w, b

    k1, k2, k3 = jax.random.split(key, 3)
    w1, b1 = linear(k1, in_mlpC, featureC)
    w2, b2 = linear(k2, featureC, featureC)
    w3, b3 = linear(k3, featureC, n_palette - 1)
    b3 = jnp.zeros_like(b3)  # torch.nn.init.constant_(layer3.bias, 0)

    # Fixed "user input" palette (P, 3)
    palette = jnp.array([[0.90, 0.10, 0.10],
                         [0.10, 0.80, 0.20],
                         [0.15, 0.20, 0.85],
                         [0.95, 0.95, 0.90]], dtype=jnp.float32)
    return w1, b1, w2, b2, w3, b3, palette


# ------------------------------ reference ------------------------------------

def _reference(pts, viewdirs, features, params, *, feape, viewpe, soft_l0_sharpness):
    del pts
    w1, b1, w2, b2, w3, b3, palette = params
    x = jnp.concatenate([features, viewdirs,
                         positional_encoding(features, feape),
                         positional_encoding(viewdirs, viewpe)], axis=-1)
    leaky = lambda z: jnp.where(z > 0, z, 0.01 * z)
    hp = jax.lax.Precision.HIGHEST
    h = leaky(jnp.dot(x, w1, precision=hp) + b1)
    h = leaky(jnp.dot(h, w2, precision=hp) + b2)
    logits = jnp.dot(h, w3, precision=hp) + b3
    opaque = jax.nn.sigmoid(logits)
    bary = jnp.concatenate(
        [opaque, jnp.maximum(1.0 - jnp.sum(opaque, -1, keepdims=True), 0.0)], -1)
    conv_residual = jnp.abs(1.0 - jnp.sum(bary, -1, keepdims=True))
    rgb = jnp.dot(bary, palette, precision=hp)
    l0 = 2.0 * jax.nn.sigmoid(soft_l0_sharpness * bary) - 1.0
    sparsity = jnp.sum(l0, -1, keepdims=True)
    return jnp.concatenate([rgb, bary, sparsity, conv_residual], axis=-1)


# --------------------------------- main --------------------------------------

if __name__ == "__main__":
    key = jax.random.PRNGKey(0)
    N, inChanel, featureC, P = 1000, 8, 128, 4   # N not a tile multiple on purpose
    viewpe, feape = 6, 6
    soft_l0_sharpness = 24.0
    in_mlpC = 2 * viewpe * 3 + 2 * feape * inChanel + 3 + inChanel   # 143

    kp, kf, kv, kx = jax.random.split(key, 4)
    params = init_params(kp, in_mlpC, featureC, P)

    pts = jax.random.normal(kx, (N, 3), jnp.float32)          # unused by the math
    viewdirs = jax.random.normal(kv, (N, 3), jnp.float32)
    viewdirs = viewdirs / jnp.linalg.norm(viewdirs, axis=-1, keepdims=True)
    features = jax.random.normal(kf, (N, inChanel), jnp.float32)

    out = plt_render_forward(pts, viewdirs, features, params,
                             feape=feape, viewpe=viewpe,
                             soft_l0_sharpness=soft_l0_sharpness,
                             tile_n=512)
    out = jax.block_until_ready(out)

    ref = _reference(pts, viewdirs, features, params,
                     feape=feape, viewpe=viewpe,
                     soft_l0_sharpness=soft_l0_sharpness)
    if not np.allclose(np.asarray(out), np.asarray(ref), rtol=1e-3, atol=1e-3):
        raise RuntimeError("Pallas kernel output mismatch vs JAX reference")

    assert out.shape == (N, 3 + P + 1 + 1)
    print("KERNEL_OK")
</pallas_src>

<mosaic_0001>
module attributes {stable_mosaic.version = 11 : i64} {
  func.func @_plt_render_kernel(%arg0: i32, %arg1: memref<8x512xf32, #tpu.memory_space<vmem>>, %arg2: memref<8x512xf32, #tpu.memory_space<vmem>>, %arg3: memref<128x208xf32, #tpu.memory_space<vmem>>, %arg4: memref<128x1xf32, #tpu.memory_space<vmem>>, %arg5: memref<128x128xf32, #tpu.memory_space<vmem>>, %arg6: memref<128x1xf32, #tpu.memory_space<vmem>>, %arg7: memref<3x128xf32, #tpu.memory_space<vmem>>, %arg8: memref<3x1xf32, #tpu.memory_space<vmem>>, %arg9: memref<3x3xf32, #tpu.memory_space<vmem>>, %arg10: memref<3x1xf32, #tpu.memory_space<vmem>>, %arg11: memref<9x512xf32, #tpu.memory_space<vmem>>, %arg12: memref<208x512xf32, #tpu.memory_space<vmem>>) attributes {dimension_semantics = [#tpu.dimension_semantics<parallel>], iteration_bounds = array<i64: 2>, scalar_prefetch = 0 : i64, scratch_operands = 1 : i64, tpu.core_type = #tpu.core_type<tc>, window_params = [{transform_indices = @transform_0, window_bounds = array<i64: 8, 512>}, {transform_indices = @transform_1, window_bounds = array<i64: 8, 512>}, {pipeline_mode = #tpu.pipeline_mode<synchronous>, transform_indices = @transform_2, window_bounds = array<i64: 128, 208>}, {pipeline_mode = #tpu.pipeline_mode<synchronous>, transform_indices = @transform_3, window_bounds = array<i64: 128, 1>}, {pipeline_mode = #tpu.pipeline_mode<synchronous>, transform_indices = @transform_4, window_bounds = array<i64: 128, 128>}, {pipeline_mode = #tpu.pipeline_mode<synchronous>, transform_indices = @transform_5, window_bounds = array<i64: 128, 1>}, {pipeline_mode = #tpu.pipeline_mode<synchronous>, transform_indices = @transform_6, window_bounds = array<i64: 3, 128>}, {pipeline_mode = #tpu.pipeline_mode<synchronous>, transform_indices = @transform_7, window_bounds = array<i64: 3, 1>}, {pipeline_mode = #tpu.pipeline_mode<synchronous>, transform_indices = @transform_8, window_bounds = array<i64: 3, 3>}, {pipeline_mode = #tpu.pipeline_mode<synchronous>, transform_indices = @transform_9, window_bounds = array<i64: 3, 1>}, {transform_indices = @transform_10, window_bounds = array<i64: 9, 512>}]} {
    %c0 = arith.constant 0 : index
    %c0_0 = arith.constant 0 : index
    %0 = vector.load %arg1[%c0, %c0_0] : memref<8x512xf32, #tpu.memory_space<vmem>>, vector<8x512xf32>
    %c0_1 = arith.constant 0 : index
    %c0_2 = arith.constant 0 : index
    %1 = vector.load %arg2[%c0_1, %c0_2] : memref<8x512xf32, #tpu.memory_space<vmem>>, vector<8x512xf32>
    %c0_3 = arith.constant 0 : index
    %c0_4 = arith.constant 0 : index
    %2 = vector.load %arg12[%c0_3, %c0_4] : memref<208x512xf32, #tpu.memory_space<vmem>>, vector<8x512xf32>
    tpu.vector_store %arg12[%c0_3, %c0_4], %0 {strides = array<i32>} : memref<208x512xf32, #tpu.memory_space<vmem>>, vector<8x512xf32>,
    %c8 = arith.constant 8 : index
    %c0_5 = arith.constant 0 : index
    %3 = vector.load %arg12[%c8, %c0_5] : memref<208x512xf32, #tpu.memory_space<vmem>>, vector<8x512xf32>
    tpu.vector_store %arg12[%c8, %c0_5], %1 {strides = array<i32>} : memref<208x512xf32, #tpu.memory_space<vmem>>, vector<8x512xf32>,
    %cst = arith.constant 1.000000e+00 : f32
    %4 = vector.broadcast %cst : f32 to vector<8x512xf32>
    %5 = arith.mulf %0, %4 : vector<8x512xf32>
    %6 = math.sin %5 : vector<8x512xf32>
    %c16 = arith.constant 16 : index
    %c0_6 = arith.constant 0 : index
    %7 = vector.load %arg12[%c16, %c0_6] : memref<208x512xf32, #tpu.memory_space<vmem>>, vector<8x512xf32>
    tpu.vector_store %arg12[%c16, %c0_6], %6 {strides = array<i32>} : memref<208x512xf32, #tpu.memory_space<vmem>>, vector<8x512xf32>,
    %8 = math.cos %5 : vector<8x512xf32>
    %c64 = arith.constant 64 : index
    %c0_7 = arith.constant 0 : index
    %9 = vector.load %arg12[%c64, %c0_7] : memref<208x512xf32, #tpu.memory_space<vmem>>, vector<8x512xf32>
    tpu.vector_store %arg12[%c64, %c0_7], %8 {strides = array<i32>} : memref<208x512xf32, #tpu.memory_space<vmem>>, vector<8x512xf32>,
    %cst_8 = arith.constant 2.000000e+00 : f32
    %10 = vector.broadcast %cst_8 : f32 to vector<8x512xf32>
    %11 = arith.mulf %0, %10 : vector<8x512xf32>
    %12 = math.sin %11 : vector<8x512xf32>
    %c24 = arith.constant 24 : index
    %c0_9 = arith.constant 0 : index
    %13 = vector.load %arg12[%c24, %c0_9] : memref<208x512xf32, #tpu.memory_space<vmem>>, vector<8x512xf32>
    tpu.vector_store %arg12[%c24, %c0_9], %12 {strides = array<i32>} : memref<208x512xf32, #tpu.memory_space<vmem>>, vector<8x512xf32>,
    %14 = math.cos %11 : vector<8x512xf32>
    %c72 = arith.constant 72 : index
    %c0_10 = arith.constant 0 : index
    %15 = vector.load %arg12[%c72, %c0_10] : memref<208x512xf32, #tpu.memory_space<vmem>>, vector<8x512xf32>
    tpu.vector_store %arg12[%c72, %c0_10], %14 {strides = array<i32>} : memref<208x512xf32, #tpu.memory_space<vmem>>, vector<8x512xf32>,
    %cst_11 = arith.constant 4.000000e+00 : f32
    %16 = vector.broadcast %cst_11 : f32 to vector<8x512xf32>
    %17 = arith.mulf %0, %16 : vector<8x512xf32>
    %18 = math.sin %17 : vector<8x512xf32>
    %c32 = arith.constant 32 : index
    %c0_12 = arith.constant 0 : index
    %19 = vector.load %arg12[%c32, %c0_12] : memref<208x512xf32, #tpu.memory_space<vmem>>, vector<8x512xf32>
    tpu.vector_store %arg12[%c32, %c0_12], %18 {strides = array<i32>} : memref<208x512xf32, #tpu.memory_space<vmem>>, vector<8x512xf32>,
    %20 = math.cos %17 : vector<8x512xf32>
    %c80 = arith.constant 80 : index
    %c0_13 = arith.constant 0 : index
    %21 = vector.load %arg12[%c80, %c0_13] : memref<208x512xf32, #tpu.memory_space<vmem>>, vector<8x512xf32>
    tpu.vector_store %arg12[%c80, %c0_13], %20 {strides = array<i32>} : memref<208x512xf32, #tpu.memory_space<vmem>>, vector<8x512xf32>,
    %cst_14 = arith.constant 8.000000e+00 : f32
    %22 = vector.broadcast %cst_14 : f32 to vector<8x512xf32>
    %23 = arith.mulf %0, %22 : vector<8x512xf32>
    %24 = math.sin %23 : vector<8x512xf32>
    %c40 = arith.constant 40 : index
    %c0_15 = arith.constant 0 : index
    %25 = vector.load %arg12[%c40, %c0_15] : memref<208x512xf32, #tpu.memory_space<vmem>>, vector<8x512xf32>
    tpu.vector_store %arg12[%c40, %c0_15], %24 {strides = array<i32>} : memref<208x512xf32, #tpu.memory_space<vmem>>, vector<8x512xf32>,
    %26 = math.cos %23 : vector<8x512xf32>
    %c88 = arith.constant 88 : index
    %c0_16 = arith.constant 0 : index
    %27 = vector.load %arg12[%c88, %c0_16] : memref<208x512xf32, #tpu.memory_space<vmem>>, vector<8x512xf32>
    tpu.vector_store %arg12[%c88, %c0_16], %26 {strides = array<i32>} : memref<208x512xf32, #tpu.memory_space<vmem>>, vector<8x512xf32>,
    %cst_17 = arith.constant 1.600000e+01 : f32
    %28 = vector.broadcast %cst_17 : f32 to vector<8x512xf32>
    %29 = arith.mulf %0, %28 : vector<8x512xf32>
    %30 = math.sin %29 : vector<8x512xf32>
    %c48 = arith.constant 48 : index
    %c0_18 = arith.constant 0 : index
    %31 = vector.load %arg12[%c48, %c0_18] : memref<208x512xf32, #tpu.memory_space<vmem>>, vector<8x512xf32>
    tpu.vector_store %arg12[%c48, %c0_18], %30 {strides = array<i32>} : memref<208x512xf32, #tpu.memory_space<vmem>>, vector<8x512xf32>,
    %32 = math.cos %29 : vector<8x512xf32>
    %c96 = arith.constant 96 : index
    %c0_19 = arith.constant 0 : index
    %33 = vector.load %arg12[%c96, %c0_19] : memref<208x512xf32, #tpu.memory_space<vmem>>, vector<8x512xf32>
    tpu.vector_store %arg12[%c96, %c0_19], %32 {strides = array<i32>} : memref<208x512xf32, #tpu.memory_space<vmem>>, vector<8x512xf32>,
    %cst_20 = arith.constant 3.200000e+01 : f32
    %34 = vector.broadcast %cst_20 : f32 to vector<8x512xf32>
    %35 = arith.mulf %0, %34 : vector<8x512xf32>
    %36 = math.sin %35 : vector<8x512xf32>
    %c56 = arith.constant 56 : index
    %c0_21 = arith.constant 0 : index
    %37 = vector.load %arg12[%c56, %c0_21] : memref<208x512xf32, #tpu.memory_space<vmem>>, vector<8x512xf32>
    tpu.vector_store %arg12[%c56, %c0_21], %36 {strides = array<i32>} : memref<208x512xf32, #tpu.memory_space<vmem>>, vector<8x512xf32>,
    %38 = math.cos %35 : vector<8x512xf32>
    %c104 = arith.constant 104 : index
    %c0_22 = arith.constant 0 : index
    %39 = vector.load %arg12[%c104, %c0_22] : memref<208x512xf32, #tpu.memory_space<vmem>>, vector<8x512xf32>
    tpu.vector_store %arg12[%c104, %c0_22], %38 {strides = array<i32>} : memref<208x512xf32, #tpu.memory_space<vmem>>, vector<8x512xf32>,
    %cst_23 = arith.constant 1.000000e+00 : f32
    %40 = vector.broadcast %cst_23 : f32 to vector<8x512xf32>
    %41 = arith.mulf %1, %40 : vector<8x512xf32>
    %42 = math.sin %41 : vector<8x512xf32>
    %c112 = arith.constant 112 : index
    %c0_24 = arith.constant 0 : index
    %43 = vector.load %arg12[%c112, %c0_24] : memref<208x512xf32, #tpu.memory_space<vmem>>, vector<8x512xf32>
    tpu.vector_store %arg12[%c112, %c0_24], %42 {strides = array<i32>} : memref<208x512xf32, #tpu.memory_space<vmem>>, vector<8x512xf32>,
    %44 = math.cos %41 : vector<8x512xf32>
    %c160 = arith.constant 160 : index
    %c0_25 = arith.constant 0 : index
    %45 = vector.load %arg12[%c160, %c0_25] : memref<208x512xf32, #tpu.memory_space<vmem>>, vector<8x512xf32>
    tpu.vector_store %arg12[%c160, %c0_25], %44 {strides = array<i32>} : memref<208x512xf32, #tpu.memory_space<vmem>>, vector<8x512xf32>,
    %cst_26 = arith.constant 2.000000e+00 : f32
    %46 = vector.broadcast %cst_26 : f32 to vector<8x512xf32>
    %47 = arith.mulf %1, %46 : vector<8x512xf32>
    %48 = math.sin %47 : vector<8x512xf32>
    %c120 = arith.constant 120 : index
    %c0_27 = arith.constant 0 : index
    %49 = vector.load %arg12[%c120, %c0_27] : memref<208x512xf32, #tpu.memory_space<vmem>>, vector<8x512xf32>
    tpu.vector_store %arg12[%c120, %c0_27], %48 {strides = array<i32>} : memref<208x512xf32, #tpu.memory_space<vmem>>, vector<8x512xf32>,
    %50 = math.cos %47 : vector<8x512xf32>
    %c168 = arith.constant 168 : index
    %c0_28 = arith.constant 0 : index
    %51 = vector.load %arg12[%c168, %c0_28] : memref<208x512xf32, #tpu.memory_space<vmem>>, vector<8x512xf32>
    tpu.vector_store %arg12[%c168, %c0_28], %50 {strides = array<i32>} : memref<208x512xf32, #tpu.memory_space<vmem>>, vector<8x512xf32>,
    %cst_29 = arith.constant 4.000000e+00 : f32
    %52 = vector.broadcast %cst_29 : f32 to vector<8x512xf32>
    %53 = arith.mulf %1, %52 : vector<8x512xf32>
    %54 = math.sin %53 : vector<8x512xf32>
    %c128 = arith.constant 128 : index
    %c0_30 = arith.constant 0 : index
    %55 = vector.load %arg12[%c128, %c0_30] : memref<208x512xf32, #tpu.memory_space<vmem>>, vector<8x512xf32>
    tpu.vector_store %arg12[%c128, %c0_30], %54 {strides = array<i32>} : memref<208x512xf32, #tpu.memory_space<vmem>>, vector<8x512xf32>,
    %56 = math.cos %53 : vector<8x512xf32>
    %c176 = arith.constant 176 : index
    %c0_31 = arith.constant 0 : index
    %57 = vector.load %arg12[%c176, %c0_31] : memref<208x512xf32, #tpu.memory_space<vmem>>, vector<8x512xf32>
    tpu.vector_store %arg12[%c176, %c0_31], %56 {strides = array<i32>} : memref<208x512xf32, #tpu.memory_space<vmem>>, vector<8x512xf32>,
    %cst_32 = arith.constant 8.000000e+00 : f32
    %58 = vector.broadcast %cst_32 : f32 to vector<8x512xf32>
    %59 = arith.mulf %1, %58 : vector<8x512xf32>
    %60 = math.sin %59 : vector<8x512xf32>
    %c136 = arith.constant 136 : index
    %c0_33 = arith.constant 0 : index
    %61 = vector.load %arg12[%c136, %c0_33] : memref<208x512xf32, #tpu.memory_space<vmem>>, vector<8x512xf32>
    tpu.vector_store %arg12[%c136, %c0_33], %60 {strides = array<i32>} : memref<208x512xf32, #tpu.memory_space<vmem>>, vector<8x512xf32>,
    %62 = math.cos %59 : vector<8x512xf32>
    %c184 = arith.constant 184 : index
    %c0_34 = arith.constant 0 : index
    %63 = vector.load %arg12[%c184, %c0_34] : memref<208x512xf32, #tpu.memory_space<vmem>>, vector<8x512xf32>
    tpu.vector_store %arg12[%c184, %c0_34], %62 {strides = array<i32>} : memref<208x512xf32, #tpu.memory_space<vmem>>, vector<8x512xf32>,
    %cst_35 = arith.constant 1.600000e+01 : f32
    %64 = vector.broadcast %cst_35 : f32 to vector<8x512xf32>
    %65 = arith.mulf %1, %64 : vector<8x512xf32>
    %66 = math.sin %65 : vector<8x512xf32>
    %c144 = arith.constant 144 : index
    %c0_36 = arith.constant 0 : index
    %67 = vector.load %arg12[%c144, %c0_36] : memref<208x512xf32, #tpu.memory_space<vmem>>, vector<8x512xf32>
    tpu.vector_store %arg12[%c144, %c0_36], %66 {strides = array<i32>} : memref<208x512xf32, #tpu.memory_space<vmem>>, vector<8x512xf32>,
    %68 = math.cos %65 : vector<8x512xf32>
    %c192 = arith.constant 192 : index
    %c0_37 = arith.constant 0 : index
    %69 = vector.load %arg12[%c192, %c0_37] : memref<208x512xf32, #tpu.memory_space<vmem>>, vector<8x512xf32>
    tpu.vector_store %arg12[%c192, %c0_37], %68 {strides = array<i32>} : memref<208x512xf32, #tpu.memory_space<vmem>>, vector<8x512xf32>,
    %cst_38 = arith.constant 3.200000e+01 : f32
    %70 = vector.broadcast %cst_38 : f32 to vector<8x512xf32>
    %71 = arith.mulf %1, %70 : vector<8x512xf32>
    %72 = math.sin %71 : vector<8x512xf32>
    %c152 = arith.constant 152 : index
    %c0_39 = arith.constant 0 : index
    %73 = vector.load %arg12[%c152, %c0_39] : memref<208x512xf32, #tpu.memory_space<vmem>>, vector<8x512xf32>
    tpu.vector_store %arg12[%c152, %c0_39], %72 {strides = array<i32>} : memref<208x512xf32, #tpu.memory_space<vmem>>, vector<8x512xf32>,
    %74 = math.cos %71 : vector<8x512xf32>
    %c200 = arith.constant 200 : index
    %c0_40 = arith.constant 0 : index
    %75 = vector.load %arg12[%c200, %c0_40] : memref<208x512xf32, #tpu.memory_space<vmem>>, vector<8x512xf32>
    tpu.vector_store %arg12[%c200, %c0_40], %74 {strides = array<i32>} : memref<208x512xf32, #tpu.memory_space<vmem>>, vector<8x512xf32>,
    %c0_41 = arith.constant 0 : index
    %c0_42 = arith.constant 0 : index
    %76 = vector.load %arg12[%c0_41, %c0_42] : memref<208x512xf32, #tpu.memory_space<vmem>>, vector<208x512xf32>
    %c0_43 = arith.constant 0 : index
    %c0_44 = arith.constant 0 : index
    %77 = vector.load %arg3[%c0_43, %c0_44] : memref<128x208xf32, #tpu.memory_space<vmem>>, vector<128x208xf32>
    %cst_45 = arith.constant dense<0.000000e+00> : vector<128x512xf32>
    %78 = tpu.matmul %77, %76, %cst_45 {dimension_numbers = #tpu.dot_dimension_numbers<[1], [0], [0], [1], [0, 0, 1, 1], [], []>} : vector<128x208xf32>, vector<208x512xf32>, vector<128x512xf32> -> vector<128x512xf32>
    %c0_46 = arith.constant 0 : index
    %c0_47 = arith.constant 0 : index
    %79 = vector.load %arg4[%c0_46, %c0_47] : memref<128x1xf32, #tpu.memory_space<vmem>>, vector<128x1xf32>
    %80 = vector.broadcast %79 : vector<128x1xf32> to vector<128x512xf32>
    %81 = arith.addf %78, %80 : vector<128x512xf32>
    %cst_48 = arith.constant 0.000000e+00 : f32
    %82 = vector.broadcast %cst_48 : f32 to vector<128x512xf32>
    %83 = arith.cmpf ogt, %81, %82 : vector<128x512xf32>
    %cst_49 = arith.constant 0.00999999977 : f32
    %84 = vector.broadcast %cst_49 : f32 to vector<128x512xf32>
    %85 = arith.mulf %84, %81 : vector<128x512xf32>
    %86 = arith.select %83, %81, %85 : vector<128x512xi1>, vector<128x512xf32>
    %c0_50 = arith.constant 0 : index
    %c0_51 = arith.constant 0 : index
    %87 = vector.load %arg5[%c0_50, %c0_51] : memref<128x128xf32, #tpu.memory_space<vmem>>, vector<128x128xf32>
    %cst_52 = arith.constant dense<0.000000e+00> : vector<128x512xf32>
    %88 = tpu.matmul %87, %86, %cst_52 {dimension_numbers = #tpu.dot_dimension_numbers<[1], [0], [0], [1], [0, 0, 1, 1], [], []>} : vector<128x128xf32>, vector<128x512xf32>, vector<128x512xf32> -> vector<128x512xf32>
    %c0_53 = arith.constant 0 : index
    %c0_54 = arith.constant 0 : index
    %89 = vector.load %arg6[%c0_53, %c0_54] : memref<128x1xf32, #tpu.memory_space<vmem>>, vector<128x1xf32>
    %90 = vector.broadcast %89 : vector<128x1xf32> to vector<128x512xf32>
    %91 = arith.addf %88, %90 : vector<128x512xf32>
    %cst_55 = arith.constant 0.000000e+00 : f32
    %92 = vector.broadcast %cst_55 : f32 to vector<128x512xf32>
    %93 = arith.cmpf ogt, %91, %92 : vector<128x512xf32>
    %cst_56 = arith.constant 0.00999999977 : f32
    %94 = vector.broadcast %cst_56 : f32 to vector<128x512xf32>
    %95 = arith.mulf %94, %91 : vector<128x512xf32>
    %96 = arith.select %93, %91, %95 : vector<128x512xi1>, vector<128x512xf32>
    %c0_57 = arith.constant 0 : index
    %c0_58 = arith.constant 0 : index
    %97 = vector.load %arg7[%c0_57, %c0_58] : memref<3x128xf32, #tpu.memory_space<vmem>>, vector<3x128xf32>
    %cst_59 = arith.constant dense<0.000000e+00> : vector<3x512xf32>
    %98 = tpu.matmul %97, %96, %cst_59 {dimension_numbers = #tpu.dot_dimension_numbers<[1], [0], [0], [1], [0, 0, 1, 1], [], []>} : vector<3x128xf32>, vector<128x512xf32>, vector<3x512xf32> -> vector<3x512xf32>
    %c0_60 = arith.constant 0 : index
    %c0_61 = arith.constant 0 : index
    %99 = vector.load %arg8[%c0_60, %c0_61] : memref<3x1xf32, #tpu.memory_space<vmem>>, vector<3x1xf32>
    %100 = vector.broadcast %99 : vector<3x1xf32> to vector<3x512xf32>
    %101 = arith.addf %98, %100 : vector<3x512xf32>
    %102 = arith.negf %101 : vector<3x512xf32>
    %103 = math.exp %102 : vector<3x512xf32>
    %cst_62 = arith.constant 1.000000e+00 : f32
    %104 = vector.broadcast %cst_62 : f32 to vector<3x512xf32>
    %105 = arith.addf %104, %103 : vector<3x512xf32>
    %106 = arith.divf %104, %105 : vector<3x512xf32>
    %cst_63 = arith.constant dense<0.000000e+00> : vector<512xf32>
    %107 = vector.multi_reduction <add>, %106, %cst_63 [0] : vector<3x512xf32> to vector<512xf32>
    %108 = vector.shape_cast %107 : vector<512xf32> to vector<1x512xf32>
    %cst_64 = arith.constant 1.000000e+00 : f32
    %109 = vector.broadcast %cst_64 : f32 to vector<1x512xf32>
    %110 = arith.subf %109, %108 : vector<1x512xf32>
    %cst_65 = arith.constant 0.000000e+00 : f32
    %111 = vector.broadcast %cst_65 : f32 to vector<1x512xf32>
    %112 = arith.maximumf %110, %111 : vector<1x512xf32>
    %c0_66 = arith.constant 0 : index
    %c0_67 = arith.constant 0 : index
    %113 = vector.load %arg9[%c0_66, %c0_67] : memref<3x3xf32, #tpu.memory_space<vmem>>, vector<3x3xf32>
    %cst_68 = arith.constant dense<0.000000e+00> : vector<3x512xf32>
    %114 = tpu.matmul %113, %106, %cst_68 {dimension_numbers = #tpu.dot_dimension_numbers<[1], [0], [0], [1], [0, 0, 1, 1], [], []>} : vector<3x3xf32>, vector<3x512xf32>, vector<3x512xf32> -> vector<3x512xf32>
    %c0_69 = arith.constant 0 : index
    %c0_70 = arith.constant 0 : index
    %115 = vector.load %arg10[%c0_69, %c0_70] : memref<3x1xf32, #tpu.memory_space<vmem>>, vector<3x1xf32>
    %116 = vector.broadcast %115 : vector<3x1xf32> to vector<3x512xf32>
    %117 = vector.broadcast %112 : vector<1x512xf32> to vector<3x512xf32>
    %118 = arith.mulf %116, %117 : vector<3x512xf32>
    %119 = arith.addf %114, %118 : vector<3x512xf32>
    %cst_71 = arith.constant 2.400000e+01 : f32
    %120 = vector.broadcast %cst_71 : f32 to vector<3x512xf32>
    %121 = arith.mulf %120, %106 : vector<3x512xf32>
    %122 = arith.negf %121 : vector<3x512xf32>
    %123 = math.exp %122 : vector<3x512xf32>
    %cst_72 = arith.constant 1.000000e+00 : f32
    %124 = vector.broadcast %cst_72 : f32 to vector<3x512xf32>
    %125 = arith.addf %124, %123 : vector<3x512xf32>
    %126 = arith.divf %124, %125 : vector<3x512xf32>
    %cst_73 = arith.constant 2.000000e+00 : f32
    %127 = vector.broadcast %cst_73 : f32 to vector<3x512xf32>
    %128 = arith.mulf %127, %126 : vector<3x512xf32>
    %cst_74 = arith.constant 1.000000e+00 : f32
    %129 = vector.broadcast %cst_74 : f32 to vector<3x512xf32>
    %130 = arith.subf %128, %129 : vector<3x512xf32>
    %cst_75 = arith.constant dense<0.000000e+00> : vector<512xf32>
    %131 = vector.multi_reduction <add>, %130, %cst_75 [0] : vector<3x512xf32> to vector<512xf32>
    %132 = vector.shape_cast %131 : vector<512xf32> to vector<1x512xf32>
    %cst_76 = arith.constant 2.400000e+01 : f32
    %133 = vector.broadcast %cst_76 : f32 to vector<1x512xf32>
    %134 = arith.mulf %133, %112 : vector<1x512xf32>
    %135 = arith.negf %134 : vector<1x512xf32>
    %136 = math.exp %135 : vector<1x512xf32>
    %cst_77 = arith.constant 1.000000e+00 : f32
    %137 = vector.broadcast %cst_77 : f32 to vector<1x512xf32>
    %138 = arith.addf %137, %136 : vector<1x512xf32>
    %139 = arith.divf %137, %138 : vector<1x512xf32>
    %cst_78 = arith.constant 2.000000e+00 : f32
    %140 = vector.broadcast %cst_78 : f32 to vector<1x512xf32>
    %141 = arith.mulf %140, %139 : vector<1x512xf32>
    %cst_79 = arith.constant 1.000000e+00 : f32
    %142 = vector.broadcast %cst_79 : f32 to vector<1x512xf32>
    %143 = arith.subf %141, %142 : vector<1x512xf32>
    %144 = arith.addf %132, %143 : vector<1x512xf32>
    %145 = arith.addf %108, %112 : vector<1x512xf32>
    %cst_80 = arith.constant 1.000000e+00 : f32
    %146 = vector.broadcast %cst_80 : f32 to vector<1x512xf32>
    %147 = arith.subf %146, %145 : vector<1x512xf32>
    %148 = math.absf %147 : vector<1x512xf32>
    %c0_81 = arith.constant 0 : index
    %c0_82 = arith.constant 0 : index
    %149 = vector.load %arg11[%c0_81, %c0_82] : memref<9x512xf32, #tpu.memory_space<vmem>>, vector<3x512xf32>
    tpu.vector_store %arg11[%c0_81, %c0_82], %119 {strides = array<i32>} : memref<9x512xf32, #tpu.memory_space<vmem>>, vector<3x512xf32>,
    %c3 = arith.constant 3 : index
    %c0_83 = arith.constant 0 : index
    %150 = vector.load %arg11[%c3, %c0_83] : memref<9x512xf32, #tpu.memory_space<vmem>>, vector<3x512xf32>
    tpu.vector_store %arg11[%c3, %c0_83], %106 {strides = array<i32>} : memref<9x512xf32, #tpu.memory_space<vmem>>, vector<3x512xf32>,
    %c6 = arith.constant 6 : index
    %c0_84 = arith.constant 0 : index
    %151 = vector.load %arg11[%c6, %c0_84] : memref<9x512xf32, #tpu.memory_space<vmem>>, vector<1x512xf32>
    tpu.vector_store %arg11[%c6, %c0_84], %112 {strides = array<i32>} : memref<9x512xf32, #tpu.memory_space<vmem>>, vector<1x512xf32>,
    %c7 = arith.constant 7 : index
    %c0_85 = arith.constant 0 : index
    %152 = vector.load %arg11[%c7, %c0_85] : memref<9x512xf32, #tpu.memory_space<vmem>>, vector<1x512xf32>
    tpu.vector_store %arg11[%c7, %c0_85], %144 {strides = array<i32>} : memref<9x512xf32, #tpu.memory_space<vmem>>, vector<1x512xf32>,
    %c8_86 = arith.constant 8 : index
    %c0_87 = arith.constant 0 : index
    %153 = vector.load %arg11[%c8_86, %c0_87] : memref<9x512xf32, #tpu.memory_space<vmem>>, vector<1x512xf32>
    tpu.vector_store %arg11[%c8_86, %c0_87], %148 {strides = array<i32>} : memref<9x512xf32, #tpu.memory_space<vmem>>, vector<1x512xf32>,
    return
  }
  func.func @transform_0(%arg0: i32) -> (i32, i32) {
    %c0_i32 = arith.constant 0 : i32
    %c0_i32_0 = arith.constant 0 : i32
    return %c0_i32, %arg0 : i32, i32
  }
  func.func @transform_1(%arg0: i32) -> (i32, i32) {
    %c0_i32 = arith.constant 0 : i32
    %c0_i32_0 = arith.constant 0 : i32
    return %c0_i32, %arg0 : i32, i32
  }
  func.func @transform_2(%arg0: i32) -> (i32, i32) {
    %c0_i32 = arith.constant 0 : i32
    %c0_i32_0 = arith.constant 0 : i32
    %c0_i32_1 = arith.constant 0 : i32
    return %c0_i32, %c0_i32_0 : i32, i32
  }
  func.func @transform_3(%arg0: i32) -> (i32, i32) {
    %c0_i32 = arith.constant 0 : i32
    %c0_i32_0 = arith.constant 0 : i32
    %c0_i32_1 = arith.constant 0 : i32
    return %c0_i32, %c0_i32_0 : i32, i32
  }
  func.func @transform_4(%arg0: i32) -> (i32, i32) {
    %c0_i32 = arith.constant 0 : i32
    %c0_i32_0 = arith.constant 0 : i32
    %c0_i32_1 = arith.constant 0 : i32
    return %c0_i32, %c0_i32_0 : i32, i32
  }
  func.func @transform_5(%arg0: i32) -> (i32, i32) {
    %c0_i32 = arith.constant 0 : i32
    %c0_i32_0 = arith.constant 0 : i32
    %c0_i32_1 = arith.constant 0 : i32
    return %c0_i32, %c0_i32_0 : i32, i32
  }
  func.func @transform_6(%arg0: i32) -> (i32, i32) {
    %c0_i32 = arith.constant 0 : i32
    %c0_i32_0 = arith.constant 0 : i32
    %c0_i32_1 = arith.constant 0 : i32
    return %c0_i32, %c0_i32_0 : i32, i32
  }
  func.func @transform_7(%arg0: i32) -> (i32, i32) {
    %c0_i32 = arith.constant 0 : i32
    %c0_i32_0 = arith.constant 0 : i32
    %c0_i32_1 = arith.constant 0 : i32
    return %c0_i32, %c0_i32_0 : i32, i32
  }
  func.func @transform_8(%arg0: i32) -> (i32, i32) {
    %c0_i32 = arith.constant 0 : i32
    %c0_i32_0 = arith.constant 0 : i32
    %c0_i32_1 = arith.constant 0 : i32
    return %c0_i32, %c0_i32_0 : i32, i32
  }
  func.func @transform_9(%arg0: i32) -> (i32, i32) {
    %c0_i32 = arith.constant 0 : i32
    %c0_i32_0 = arith.constant 0 : i32
    %c0_i32_1 = arith.constant 0 : i32
    return %c0_i32, %c0_i32_0 : i32, i32
  }
  func.func @transform_10(%arg0: i32) -> (i32, i32) {
    %c0_i32 = arith.constant 0 : i32
    %c0_i32_0 = arith.constant 0 : i32
    return %c0_i32, %arg0 : i32, i32
  }
}

</mosaic_0001>

<bundles_post_ra>
// kernel: tpu_custom_call.1
= control target key start
LH: loop header
LB: loop body
LE: loop exit
PB: predicated region body
PF: predicated region fallthrough
CT: control target
= control target key end

     0   :  { %15 = vsyncpa [#allocation4], 0  ;;  %s20240_s0 = inlined_call_operand.vmem [shape: f32[8,1024], index: 0, kind: input, shape index: {}]   ;;  %s20241_s1 = inlined_call_operand.vmem [shape: f32[8,1024], index: 1, kind: input, shape index: {}]   ;;  %s20242_s2 = inlined_call_operand.vmem [shape: f32[128,208], index: 2, kind: input, shape index: {}]   ;;  %s20243_s3 = inlined_call_operand.vmem [shape: f32[128,1], index: 3, kind: input, shape index: {}]   ;;  %s20244_s4 = inlined_call_operand.vmem [shape: f32[128,128], index: 4, kind: input, shape index: {}]   ;;  %s20245_s5 = inlined_call_operand.vmem [shape: f32[128,1], index: 5, kind: input, shape index: {}]   ;;  %s20246_s6 = inlined_call_operand.vmem [shape: f32[3,128], index: 6, kind: input, shape index: {}]   ;;  %s20247_s7 = inlined_call_operand.vmem [shape: f32[3,1], index: 7, kind: input, shape index: {}]   ;;  %s20248_s8 = inlined_call_operand.vmem [shape: f32[3,3], index: 8, kind: input, shape index: {}]   ;;  %s20249_s9 = inlined_call_operand.vmem [shape: f32[3,1], index: 9, kind: input, shape index: {}]   ;;  %s20250_s10 = inlined_call_operand.hbm [shape: f32[9,1024], index: 10, kind: output, shape index: {}]  }
   0x1   :  { %17 = vsyncpa [#allocation4 + $0x1], 0  ;;  %s13922_s13 = smov 0   ;;  %s13924_s14 = smov 0  }
   0x2   :  { %s13926_s15 = smov 0   ;;  %s13928_s16 = smov 0  }
   0x3 LB: > { %s13943_s17 = sadd.s32 4294967295, %s13852_s16   ;;  %s12591_s18 = sadd.s32 4294967294, %s13852_s16   ;;  %s13852_s16 = sphi %s13928_s16, %s21123_s16   ;;  %s13848_s15 = sphi %s13926_s15, %s21122_s15   ;;  %s13844_s14 = sphi %s13924_s14, %s21121_s14   ;;  %s13840_s13 = sphi %s13922_s13, %s21120_s13  }
   0x4   : > { %s13947_s19 = sadd.s32 1, %s13852_s16   ;;  %s250_s20 = sadd.s32 1, %s13848_s15 }
   0x5   : > { %s247_s21 = ssub.s32 %s13852_s16, %s13947_s19  ;;  %p260_p0 = scmp.ne.s32.totalorder %s13848_s15, %s13844_s14 }
   0x6   : > { %p248_p1 = scmp.eq.s32.totalorder %s247_s21, 0  ;;  %p261_p2 = scmp.eq.s32.totalorder %s13943_s17, 1 }
   0x7   : > { %p266_p3 = scmp.ne.s32.totalorder %s13844_s14, %s13840_s13  ;;  %p267_p4 = scmp.eq.s32.totalorder %s12591_s18, 1 }
   0x8   : > { %s13958_s22 = scalar_select %p248_p1, %s13848_s15, %s250_s20  }
   0x9   : > { %p13960_p5 = por %p261_p2, %p260_p0  ;;  %p13964_p6 = por %p267_p4, %p266_p3 }
   0xa   : > { %p12594_p7 = scmp.ge.s32.totalorder %s13852_s16, 1  ;;  %p327_p8 = scmp.lt.s32.totalorder %s13852_s16, 3 }
   0xc   : > { %p328_p9 = pnand %p12594_p7, %p327_p8 }
   0xe   : > { %331 = sbr.rel (%p328_p9) target bundleno = 2435 (0x983), region = 60 }
  0x15   : > { %s12596_s25 = sshll.u32 %s13943_s17, 2  ;;  %v20288_v37 = vmov 683565275   ;;  %v20264_v39 = vmov 2475754826   ;;  %s367_s20 = sand.u32 1, %s13844_s14  }
  0x16   : > { %p371_p10 = scmp.lt.s32.totalorder %s12596_s25, 7  ;;  %v20262_v41 = vmov 2131351028   ;;  %v20260_v43 = vmov 2102212464   ;;  %s12595_s21 = sshll.u32 %s367_s20, 6 }
  0x17   : > { %v20305_v45 = vmov 920167782   ;;  %v20278_v53 = vmov 1326507024   ;;  %s20120_s27 = scalar_lea.vmem [#allocation3], %s12595_s21  ;;  %s13050_s28 = sshll.u32 %s13943_s17, 9 }
  0x18   : > { %s21125_s25 = smov (!%p371_p10, %s12596_s25), 7  ;;  %s20189_s17 = scalar_lea.hbm %s20250_s10, %s13050_s28 }
  0x19   : > { %s12597_s26 = sshll.u32 %s21125_s25, 3  ;;  %s13863_s21 = smov [#allocation3]  }
  0x1a   : > { %s13974_s29 = scalar_lea.vmem %s20240_s0, %s12597_s26  ;;  %s13979_s12 = scalar_lea.vmem %s20241_s1, %s12597_s26 }
  0x1b   : > { %v13982_v0 = vld [vmem:[%s13974_s29 + $0x8] sm:$0xff]  ;;  %v13986_v2 = vld [vmem:[%s13974_s29 + $0x18] sm:$0xff]  ;;  %v13991_v5 = vld [vmem:[%s13974_s29] sm:$0xff]  ;;  %s13794_s25 = sshll.u32 %s13863_s21, 4  ;;  %s13795_s25 = int_to_ptr.vmem [resolvable:$false] %s13794_s25 }
  0x1c   : > { %v388_v1 = vld [vmem:[%s13979_s12 + $0x8] sm:$0xff]  ;;  %20589 = vst [vmem:[#allocation6_spill] sm:$0xff] %v13986_v2  ;;  %v390_v4 = vld [vmem:[%s13979_s12 + $0x18] sm:$0xff]  ;;  %v387_v6 = vld [vmem:[%s13979_s12] sm:$0xff]  ;;  %v503_v7 = vand.u32 2147483647, %v13982_v0 }
  0x1d   : > { %v13051_v3 = vpack.c.bf16 %v388_v1, %v13982_v0  ;;  %v13103_v8 = vpack.c.bf16 %v390_v4, %v13986_v2  ;;  %v13053_v9 = vpack.c.bf16 %v387_v6, %v13991_v5  ;;  %v13998_v10 = vld [vmem:[%s13974_s29 + $0x10] sm:$0xff]  ;;  %v506_v12 = vand.u32 2139095040, %v13982_v0  ;;  %s13796_s26 = scalar_lea.vmem %s13795_s25, 2048 }
  0x1e   : > { %v389_v11 = vld [vmem:[%s13979_s12 + $0x10] sm:$0xff]  ;;  %v14003_v13 = vmul.f32 2.0, %v13982_v0  ;;  %v510_v18 = vand.u32 8388607, %v503_v7  ;;  %v714_v22 = vand.u32 2139095040, %v13986_v2  ;;  %vm505_vm14 = vcmp.lt.s32.totalorder %v13982_v0, 0 }
  0x1f   : > { %13052 = vmatprep.subr.bf16.mxu0 %v13051_v3  ;;  %v13105_v14 = vpack.c.bf16 %v389_v11, %v13998_v10  ;;  %13104 = vmatprep.subr.bf16.mxu1 %v13103_v8  ;;  %v507_v15 = vshrl.u32 %v506_v12, 23 }
  0x20   : > { %13054 = vmatpush1.bf16.msra.mxu0 %v13053_v9  ;;  %v1343_v16 = vand.u32 2147483647, %v14003_v13  ;;  %v1346_v17 = vand.u32 2139095040, %v14003_v13  ;;  %v511_v25 = vor.u32 8388608, %v510_v18  ;;  %v715_v27 = vshrl.u32 %v714_v22, 23 }
  0x21   : > { %13106 = vmatpush1.bf16.msra.mxu1 %v13105_v14  ;;  %v12604_v19 = vadd.s32 4294967169, %v507_v15 }
  0x22   : > { %v1347_v20 = vshrl.u32 %v1346_v17, 23  ;;  %v1350_v21 = vand.u32 8388607, %v1343_v16  ;;  %v12612_v30 = vadd.s32 4294967169, %v715_v27  ;;  %v14013_v33 = vshll.u32 %v511_v25, 8 }
  0x23   : > { %v513_v23 = vadd.s32 1, %v12604_v19 }
  0x24   : > { %v12636_v24 = vadd.s32 4294967169, %v1347_v20  ;;  %v1351_v26 = vor.u32 8388608, %v1350_v21  ;;  %v14022_v47 = vadd.s32 1, %v12612_v30 }
  0x25   : > { %vm514_vm0 = vcmp.gt.s32.totalorder %v513_v23, 0 }
  0x26   : > { %v1353_v28 = vadd.s32 1, %v12636_v24  ;;  %v515_v29 = vsel %vm514_vm0, %v513_v23, 0  ;;  %v14015_v35 = vshll.u32 %v1351_v26, 8  ;;  %vm722_vm8 = vcmp.gt.s32.totalorder %v14022_v47, 0 }
  0x27   : > { %v516_v31 = vshrl.u32 %v515_v29, 5  ;;  %v517_v32 = vand.u32 31, %v515_v29 }
  0x28   : > { %vm1354_vm1 = vcmp.gt.s32.totalorder %v1353_v28, 0 }
  0x29   : > { %v1355_v34 = vsel %vm1354_vm1, %v1353_v28, 0  ;;  %v518_v36 = vsub.s32 32, %v517_v32  ;;  %v520_v38 = vshll.u32 %v20288_v37, %v517_v32  ;;  %v523_v40 = vshll.u32 %v20264_v39, %v517_v32 }
  0x2a   : > { %v526_v42 = vshll.u32 %v20262_v41, %v517_v32  ;;  %v529_v44 = vshll.u32 %v20260_v43, %v517_v32  ;;  %v532_v46 = vshll.u32 %v20305_v45, %v517_v32  ;;  %vm535_vm2 = vcmp.lt.s32.totalorder %v516_v31, 1 }
  0x2b   : > { %v519_v48 = vshrl.u32 %v20288_v37, %v518_v36  ;;  %v521_v49 = vshrl.u32 %v20264_v39, %v518_v36  ;;  %v524_v50 = vshrl.u32 %v20262_v41, %v518_v36  ;;  %v527_v51 = vshrl.u32 %v20260_v43, %v518_v36 }
  0x2c   : > { %v530_v52 = vshrl.u32 %v20305_v45, %v518_v36  ;;  %v533_v54 = vshrl.u32 %v20278_v53, %v518_v36  ;;  %vm536_vm3 = vcmp.lt.s32.totalorder %v516_v31, 2  ;;  %vm537_vm4 = vcmp.lt.s32.totalorder %v516_v31, 3 }
  0x2d   : > { %v522_v55 = vor.u32 %v521_v49, %v520_v38  ;;  %v525_v56 = vor.u32 %v524_v50, %v523_v40  ;;  %v528_v57 = vor.u32 %v527_v51, %v526_v42  ;;  %vm538_vm5 = vcmp.lt.s32.totalorder %v516_v31, 4 }
  0x2e   : > { %v531_v58 = vor.u32 %v530_v52, %v529_v44  ;;  %v534_v59 = vor.u32 %v533_v54, %v532_v46  ;;  %v1356_v60 = vshrl.u32 %v1355_v34, 5  ;;  %v1357_v61 = vand.u32 31, %v1355_v34 }
  0x2f   : > { %v539_v62 = vsel %vm535_vm2, %v519_v48, %v522_v55  ;;  %v540_v63 = vsel %vm538_vm5, %v528_v57, 2102212464  ;;  %v543_v1 = vsel %vm535_vm2, %v522_v55, %v525_v56  ;;  %v547_v3 = vsel %vm535_vm2, %v525_v56, %v528_v57 }
  0x30   : > { %v541_v4 = vsel %vm537_vm4, %v525_v56, %v540_v63  ;;  %v544_v6 = vsel %vm538_vm5, %v531_v58, 920167782  ;;  %v548_v8 = vsel %vm538_vm5, %v534_v59, 1326507024  ;;  %v1358_v9 = vsub.s32 32, %v1357_v61 }
  0x31   : > { %v542_v11 = vsel %vm536_vm3, %v539_v62, %v541_v4  ;;  %v545_v12 = vsel %vm537_vm4, %v528_v57, %v544_v6  ;;  %v549_v14 = vsel %vm537_vm4, %v531_v58, %v548_v8  ;;  %v1360_v15 = vshll.u32 %v20288_v37, %v1357_v61 }
  0x32   : > { %v546_v17 = vsel %vm536_vm3, %v543_v1, %v545_v12  ;;  %v550_v18 = vsel %vm536_vm3, %v547_v3, %v549_v14  ;;  %v558_v19 = vmul.u32 %v14013_v33, %v542_v11  ;;  %v1359_v20 = vshrl.u32 %v20288_v37, %v1358_v9 }
  0x33   : > { %v14043_v21 = vmul.u32.u64.low %v14013_v33, %v550_v18  ;;  %v14044_v22 = vmul.u32.u64.high %v14013_v33, %v550_v18, %v14043_v21  ;;  %v14047_v23 = vmul.u32.u64.low %v14013_v33, %v546_v17  ;;  %v14048_v24 = vmul.u32.u64.high %v14013_v33, %v546_v17, %v14047_v23 }
  0x34   : > { %v1361_v25 = vshrl.u32 %v20264_v39, %v1358_v9  ;;  %v1363_v26 = vshll.u32 %v20264_v39, %v1357_v61  ;;  %v1364_v27 = vshrl.u32 %v20262_v41, %v1358_v9  ;;  %v1366_v28 = vshll.u32 %v20262_v41, %v1357_v61 }
  0x35   : > { %v1367_v29 = vshrl.u32 %v20260_v43, %v1358_v9  ;;  %v1369_v30 = vshll.u32 %v20260_v43, %v1357_v61  ;;  %v1370_v31 = vshrl.u32 %v20305_v45, %v1358_v9  ;;  %v1372_v32 = vshll.u32 %v20305_v45, %v1357_v61 }
  0x36   : > { %v1362_v34 = vor.u32 %v1361_v25, %v1360_v15  ;;  %v1365_v33 = vor.u32 %v1364_v27, %v1363_v26  ;;  %v1373_v36 = vshrl.u32 %v20278_v53, %v1358_v9  ;;  %vm1375_vm6 = vcmp.lt.s32.totalorder %v1356_v60, 1 }
  0x37   : > { %vm560_vm7 = vc.u32 %v14044_v22, %v14047_v23  ;;  %v561_v38 = vadd.s32 1, %v14048_v24  ;;  %v1368_v40 = vor.u32 %v1367_v29, %v1366_v28  ;;  %v1371_v42 = vor.u32 %v1370_v31, %v1369_v30 }
  0x38   : > { %v1374_v44 = vor.u32 %v1373_v36, %v1372_v32  ;;  %vm1376_vm9 = vcmp.lt.s32.totalorder %v1356_v60, 2  ;;  %vm1377_vm10 = vcmp.lt.s32.totalorder %v1356_v60, 3  ;;  %vm1378_vm11 = vcmp.lt.s32.totalorder %v1356_v60, 4 }
  0x39   : > { %v562_v46 = vsel %vm560_vm7, %v561_v38, %v14048_v24  ;;  %v1379_v48 = vsel %vm1375_vm6, %v1359_v20, %v1362_v34  ;;  %v1383_v49 = vsel %vm1375_vm6, %v1362_v34, %v1365_v33  ;;  %v1380_v51 = vsel %vm1378_vm11, %v1368_v40, 2102212464 }
  0x3a   : > { %v563_v50 = vadd.s32 %v562_v46, %v558_v19  ;;  %v1384_v52 = vsel %vm1378_vm11, %v1371_v42, 920167782  ;;  %v1387_v54 = vsel %vm1375_vm6, %v1365_v33, %v1368_v40  ;;  %v1381_v55 = vsel %vm1377_vm10, %v1365_v33, %v1380_v51 }
  0x3b   : > { %v1385_v56 = vsel %vm1377_vm10, %v1368_v40, %v1384_v52  ;;  %v1388_v57 = vsel %vm1378_vm11, %v1374_v44, 1326507024  ;;  %v711_v58 = vand.u32 2147483647, %v13986_v2  ;;  %v723_v63 = vsel %vm722_vm8, %v14022_v47, 0 }
  0x3c   : > { %v564_v59 = vadd.s32 536870912, %v563_v50  ;;  %v1386_v61 = vsel %vm1376_vm9, %v1383_v49, %v1385_v56  ;;  %v1389_v62 = vsel %vm1377_vm10, %v1371_v42, %v1388_v57  ;;  %v1382_v1 = vsel %vm1376_vm9, %v1379_v48, %v1381_v55 }
  0x3d   : > { %v1390_v3 = vsel %vm1376_vm9, %v1387_v54, %v1389_v62  ;;  %v14076_v4 = vmul.u32.u64.low %v14015_v35, %v1386_v61  ;;  %v14077_v6 = vmul.u32.u64.high %v14015_v35, %v1386_v61, %v14076_v4  ;;  %v718_v12 = vand.u32 8388607, %v711_v58 }
  0x3e   : > { %v14080_v8 = vshrl.u32 %v564_v59, 30  ;;  %v14083_v9 = vmul.u32.u64.low %v14015_v35, %v1390_v3  ;;  %v14084_v11 = vmul.u32.u64.high %v14015_v35, %v1390_v3, %v14083_v9  ;;  %v725_v14 = vand.u32 31, %v723_v63 }
  0x3f   : > { %v1398_v60 = vmul.u32 %v14015_v35, %v1382_v1  ;;  %v1401_v15 = vadd.s32 1, %v14077_v6  ;;  %v14096_v19 = vmul.f32 2.0, %v13986_v2  ;;  %v719_v21 = vor.u32 8388608, %v718_v12 }
  0x40   : > { %v566_v47 = vshll.u32 %v14080_v8, 30  ;;  %v726_v17 = vsub.s32 32, %v725_v14  ;;  %vm1400_vm12 = vc.u32 %v14084_v11, %v14076_v4  ;;  %v728_v24 = vshll.u32 %v20288_v37, %v725_v14 }
  0x41   : > { %20590 = vst [vmem:[#allocation7_spill] sm:$0xff] %v14096_v19  ;;  %v1402_v20 = vsel %vm1400_vm12, %v1401_v15, %v14077_v6  ;;  %v731_v25 = vshll.u32 %v20264_v39, %v725_v14  ;;  %v724_v29 = vshrl.u32 %v723_v63, 5  ;;  %v734_v30 = vshll.u32 %v20262_v41, %v725_v14 }
  0x42   : > { %v14091_v18 = vsub.s32 %v563_v50, %v566_v47  ;;  %v1403_v26 = vadd.s32 %v1402_v20, %v1398_v60  ;;  %v729_v27 = vshrl.u32 %v20264_v39, %v726_v17  ;;  %v732_v28 = vshrl.u32 %v20262_v41, %v726_v17 }
  0x43   : > { %v735_v31 = vshrl.u32 %v20260_v43, %v726_v17  ;;  %v737_v32 = vshll.u32 %v20260_v43, %v725_v14  ;;  %v1554_v36 = vand.u32 2139095040, %v14096_v19  ;;  %v738_v38 = vshrl.u32 %v20305_v45, %v726_v17 }
  0x44   : > { %v569_v35 = vsub.s32 0, %v14091_v18  ;;  %v1404_v33 = vadd.s32 536870912, %v1403_v26  ;;  %v740_v40 = vshll.u32 %v20305_v45, %v725_v14  ;;  %v741_v42 = vshrl.u32 %v20278_v53, %v726_v17 }
  0x45   : > { %v14112_v44 = vshll.u32 %v719_v21, 8  ;;  %v559_v46 = vadd.s32 %v14047_v23, %v14044_v22  ;;  %v730_v49 = vor.u32 %v729_v27, %v728_v24  ;;  %v733_v50 = vor.u32 %v732_v28, %v731_v25 }
  0x46   : > { %v12605_v34 = vmin.u32 %v569_v35, %v14091_v18  ;;  %v1405_v51 = vshrl.u32 %v1404_v33, 30  ;;  %v736_v52 = vor.u32 %v735_v31, %v734_v30  ;;  %v739_v54 = vor.u32 %v738_v38, %v737_v32 }
  0x47   : > { %vm743_vm13 = vcmp.lt.s32.totalorder %v724_v29, 1  ;;  %vm745_vm15 = vcmp.lt.s32.totalorder %v724_v29, 3  ;;  %vm746_vm0 = vcmp.lt.s32.totalorder %v724_v29, 4  ;;  %v1555_v56 = vshrl.u32 %v1554_v36, 23 }
  0x48   : > { %v571_v48 = vclz %v12605_v34  ;;  %v1406_v57 = vshll.u32 %v1405_v51, 30  ;;  %v727_v59 = vshrl.u32 %v20288_v37, %v726_v17  ;;  %v742_v61 = vor.u32 %v741_v42, %v740_v40 }
  0x49   : > { %v752_v62 = vsel %vm746_vm0, %v739_v54, 920167782  ;;  %v589_v22 = vsub.s32 4, %v14080_v8  ;;  %vm744_vm2 = vcmp.lt.s32.totalorder %v724_v29, 2  ;;  %v751_v23 = vsel %vm743_vm13, %v730_v49, %v733_v50 }
  0x4a   : > { %v12606_v55 = vadd.s32 4294967294, %v571_v48  ;;  %vm14123_vm3 = vcmp.le.f32.partialorder %v503_v7, 0.7853982  ;;  %v14127_v3 = vsub.s32 %v1403_v26, %v1406_v57  ;;  %v748_v6 = vsel %vm746_vm0, %v736_v52, 2102212464 }
  0x4b   : > { %v753_v9 = vsel %vm745_vm15, %v736_v52, %v752_v62  ;;  %v755_v60 = vsel %vm743_vm13, %v733_v50, %v736_v52  ;;  %v1429_v17 = vsub.s32 4, %v1405_v51  ;;  %v747_v7 = vsel %vm743_vm13, %v727_v59, %v730_v49 }
  0x4c   : > { %vm12607_vm1 = vcmp.lt.s32.totalorder %v12606_v55, 0  ;;  %v1409_v15 = vsub.s32 0, %v14127_v3  ;;  %v756_v20 = vsel %vm746_vm0, %v742_v61, 1326507024  ;;  %v749_v25 = vsel %vm745_vm15, %v733_v50, %v748_v6 }
  0x4d   : > { %v574_v1 = vsel %vm12607_vm1, 0, %v12606_v55  ;;  %v757_v35 = vsel %vm745_vm15, %v739_v54, %v756_v20  ;;  %v12644_v28 = vadd.s32 4294967169, %v1555_v56  ;;  %v590_v33 = vsel %vm505_vm14, %v589_v22, %v14080_v8 }
  0x4e   : > { %v575_v12 = vsub.s32 32, %v574_v1  ;;  %v576_v14 = vshll.u32 %v14091_v18, %v574_v1  ;;  %v579_v47 = vsub.s32 4294967266, %v574_v1  ;;  %v12637_v26 = vmin.u32 %v1409_v15, %v14127_v3 }
  0x4f   : > { %v754_v18 = vsel %vm744_vm2, %v751_v23, %v753_v9  ;;  %v758_v27 = vsel %vm744_vm2, %v755_v60, %v757_v35  ;;  %vm1345_vm4 = vcmp.lt.s32.totalorder %v14003_v13, 0  ;;  %v750_v38 = vsel %vm744_vm2, %v747_v7, %v749_v25 }
  0x50   : > { %v577_v21 = vshrl.u32 %v559_v46, %v575_v12  ;;  %v580_v24 = vadd.s32 127, %v579_v47  ;;  %v14142_v32 = vmul.u32.u64.low %v14112_v44, %v758_v27  ;;  %v14143_v34 = vmul.u32.u64.high %v14112_v44, %v758_v27, %v14142_v32 }
  0x51   : > { %v1411_v36 = vclz %v12637_v26  ;;  %v14151_v46 = vmul.u32.u64.low %v14112_v44, %v754_v18  ;;  %v14152_v48 = vmul.u32.u64.high %v14112_v44, %v754_v18, %v14151_v46  ;;  %vm14157_vm5 = vcmp.le.f32.partialorder %v1343_v16, 0.7853982 }
  0x52   : > { %v578_v30 = vor.u32 %v577_v21, %v576_v14  ;;  %v581_v31 = vshll.u32 %v580_v24, 23  ;;  %v1551_v8 = vand.u32 2147483647, %v14096_v19  ;;  %v1561_v52 = vadd.s32 1, %v12644_v28 }
  0x53   : > { %v12638_v50 = vadd.s32 4294967294, %v1411_v36  ;;  %v14164_v29 = vsel %vm14123_vm3, 0, %v590_v33  ;;  %v1399_v55 = vadd.s32 %v14076_v4, %v14084_v11  ;;  %v1430_v56 = vsel %vm1345_vm4, %v1429_v17, %v1405_v51 }
  0x54   : > { %v582_v40 = vor.u32 4788187, %v581_v31  ;;  %v585_v42 = vcvt.s32.f32 %v578_v30  ;;  %v766_v16 = vmul.u32 %v14112_v44, %v750_v38  ;;  %vm768_vm7 = vc.u32 %v14143_v34, %v14151_v46 }
  0x55   : > { %vm12639_vm6 = vcmp.lt.s32.totalorder %v12638_v50, 0  ;;  %vm1562_vm8 = vcmp.gt.s32.totalorder %v1561_v52, 0  ;;  %v769_v61 = vadd.s32 1, %v14152_v48  ;;  %v14177_v4 = vsel %vm14157_vm5, 0, %v1430_v56 }
  0x56   : > { %v583_v54 = vand.u32 2147483647, %v582_v40  ;;  %v1414_v59 = vsel %vm12639_vm6, 0, %v12638_v50  ;;  %v1563_v62 = vsel %vm1562_vm8, %v1561_v52, 0  ;;  %v399_v6 = vand.u32 2147483647, %v13991_v5 }
  0x57   : > { %v1415_v22 = vsub.s32 32, %v1414_v59  ;;  %v1416_v23 = vshll.u32 %v14127_v3, %v1414_v59  ;;  %v1419_v1 = vsub.s32 4294967266, %v1414_v59  ;;  %v770_v44 = vsel %vm768_vm7, %v769_v61, %v14152_v48 }
  0x58   : > { %v586_v57 = vmul.f32 %v585_v42, %v583_v54  ;;  %v1565_v51 = vand.u32 31, %v1563_v62  ;;  %v771_v14 = vadd.s32 %v770_v44, %v766_v16  ;;  %v1558_v47 = vand.u32 8388607, %v1551_v8 }
  0x59   : > { %v1417_v9 = vshrl.u32 %v1399_v55, %v1415_v22  ;;  %v1420_v12 = vadd.s32 127, %v1419_v1  ;;  %v596_v60 = vadd.s32 3, %v14164_v29  ;;  %v1436_v15 = vadd.s32 3, %v14177_v4 }
  0x5a   : > { %v587_v11 = vxor.u32 2147483648, %v586_v57  ;;  %v1566_v17 = vsub.s32 32, %v1565_v51  ;;  %v772_v24 = vadd.s32 536870912, %v771_v14  ;;  %v14190_v25 = vshrl.u32 %v1563_v62, 5 }
  0x5b   : > { %v1418_v20 = vor.u32 %v1417_v9, %v1416_v23  ;;  %v1421_v21 = vshll.u32 %v1420_v12, 23  ;;  %v1568_v35 = vshll.u32 %v20288_v37, %v1565_v51  ;;  %v1571_v26 = vshll.u32 %v20264_v39, %v1565_v51 }
  0x5c   : > { %v588_v3 = vsel %vm505_vm14, %v587_v11, %v586_v57  ;;  %v14194_v28 = vshrl.u32 %v772_v24, 30  ;;  %v1569_v30 = vshrl.u32 %v20264_v39, %v1566_v17  ;;  %v1572_v63 = vshrl.u32 %v20262_v41, %v1566_v17 }
  0x5d   : > { %v591_v7 = vsel %vm14123_vm3, %v13982_v0, %v588_v3  ;;  %v1422_v18 = vor.u32 4788187, %v1421_v21  ;;  %v1425_v27 = vcvt.s32.f32 %v1418_v20  ;;  %v1574_v31 = vshll.u32 %v20262_v41, %v1565_v51 }
  0x5e   : > { %13528 = vcosq.f32 %v591_v7  ;;  %v1575_v32 = vshrl.u32 %v20260_v43, %v1566_v17  ;;  %v14200_v33 = vand.u32 3, %v596_v60  ;;  %v774_v38 = vshll.u32 %v14194_v28, 30 }
  0x5f   : > { %13530 = vsinq.f32 %v591_v7  ;;  %v1423_v36 = vand.u32 2147483647, %v1422_v18  ;;  %v1577_v40 = vshll.u32 %v20260_v43, %v1565_v51  ;;  %v14204_v42 = vand.u32 3, %v1436_v15 }
  0x60   : > { %v1559_v48 = vor.u32 8388608, %v1558_v47  ;;  %v1578_v50 = vshrl.u32 %v20305_v45, %v1566_v17  ;;  %vm1583_vm9 = vcmp.lt.s32.totalorder %v14190_v25, 1  ;;  %v14208_v54 = vsub.s32 %v771_v14, %v774_v38 }
  0x61   : > { %v1426_v52 = vmul.f32 %v1425_v27, %v1423_v36  ;;  %v1580_v55 = vshll.u32 %v20305_v45, %v1565_v51  ;;  %v1581_v56 = vshrl.u32 %v20278_v53, %v1566_v17  ;;  %v1570_v16 = vor.u32 %v1569_v30, %v1568_v35 }
  0x62   : > { %v1573_v57 = vor.u32 %v1572_v63, %v1571_v26  ;;  %v1576_v59 = vor.u32 %v1575_v32, %v1574_v31  ;;  %v1579_v61 = vor.u32 %v1578_v50, %v1577_v40  ;;  %vm602_vm10 = vcmp.eq.s32.totalorder %v14200_v33, 2 }
  0x63   : > { %v1427_v62 = vxor.u32 2147483648, %v1426_v52  ;;  %vm713_vm11 = vcmp.lt.s32.totalorder %v13986_v2, 0  ;;  %v777_v22 = vsub.s32 0, %v14208_v54  ;;  %vm1585_vm12 = vcmp.lt.s32.totalorder %v14190_v25, 3 }
  0x64   : > { %vm1586_vm13 = vcmp.lt.s32.totalorder %v14190_v25, 4  ;;  %vm599_vm14 = vcmp.eq.s32.totalorder %v14200_v33, 0  ;;  %v1567_v23 = vshrl.u32 %v20288_v37, %v1566_v17  ;;  %v14221_v11 = vshll.u32 %v1559_v48, 8 }
  0x65   : > { %v1592_v1 = vsel %vm1586_vm13, %v1579_v61, 920167782  ;;  %v402_v44 = vand.u32 2139095040, %v13991_v5  ;;  %v1428_v51 = vsel %vm1345_vm4, %v1427_v62, %v1426_v52  ;;  %v12613_v9 = vmin.u32 %v777_v22, %v14208_v54 }
  0x66   : > { %v1582_v12 = vor.u32 %v1581_v56, %v1580_v55  ;;  %v1588_v14 = vsel %vm1586_vm13, %v1576_v59, 2102212464  ;;  %v1431_v3 = vsel %vm14157_vm5, %v14003_v13, %v1428_v51  ;;  %vm1584_vm15 = vcmp.lt.s32.totalorder %v14190_v25, 2 }
  0x67   : > { %v1591_v60 = vsel %vm1583_vm9, %v1570_v16, %v1573_v57  ;;  %v1593_v15 = vsel %vm1585_vm12, %v1576_v59, %v1592_v1  ;;  %vm598_vm0 = vcmp.lt.s32.totalorder %v14200_v33, 2  ;;  %13532 = vcosq.f32 %v1431_v3 }
  0x68   : > { %v14229_v47 = vpop.eup %13528  ;;  %vm14242_vm1 = vcmp.le.f32.partialorder %v711_v58, 0.7853982  ;;  %v767_v49 = vadd.s32 %v14151_v46, %v14143_v34  ;;  %v779_v7 = vclz %v12613_v9  ;;  %v797_v20 = vsub.s32 4, %v14194_v28 }
  0x69   : > { %v14249_v21 = vpop.eup %13530  ;;  %13534 = vsinq.f32 %v1431_v3  ;;  %v1587_v24 = vsel %vm1583_vm9, %v1567_v23, %v1570_v16  ;;  %v1589_v35 = vsel %vm1585_vm12, %v1573_v57, %v1588_v14  ;;  %v1595_v58 = vsel %vm1583_vm9, %v1573_v57, %v1576_v59 }
  0x6a   : > { %v12614_v26 = vadd.s32 4294967294, %v779_v7  ;;  %v1594_v18 = vsel %vm1584_vm15, %v1591_v60, %v1593_v15  ;;  %v1596_v34 = vsel %vm1586_vm13, %v1582_v12, 1326507024  ;;  %v403_v46 = vshrl.u32 %v402_v44, 23 }
  0x6b   : > { %vm595_vm2 = vweird.f32 %v13982_v0  ;;  %v20257_v27 = vxor.u32 2147483648, %v14229_v47  ;;  %v1597_v30 = vsel %vm1585_vm12, %v1579_v61, %v1596_v34  ;;  %v20258_v32 = vxor.u32 2147483648, %v14249_v21 }
  0x6c   : > { %v14266_v63 = vmul.u32.u64.low %v14221_v11, %v1594_v18  ;;  %v14267_v31 = vmul.u32.u64.high %v14221_v11, %v1594_v18, %v14266_v63  ;;  %vm12615_vm3 = vcmp.lt.s32.totalorder %v12614_v26, 0  ;;  %v1590_v36 = vsel %vm1584_vm15, %v1587_v24, %v1589_v35 }
  0x6d   : > { %v1598_v38 = vsel %vm1584_vm15, %v1595_v58, %v1597_v30  ;;  %v782_v40 = vsel %vm12615_vm3, 0, %v12614_v26  ;;  %v798_v48 = vsel %vm713_vm11, %v797_v20, %v14194_v28  ;;  %v12600_v57 = vadd.s32 4294967169, %v403_v46 }
  0x6e   : > { %v14279_v50 = vmul.u32.u64.low %v14221_v11, %v1598_v38  ;;  %v14280_v52 = vmul.u32.u64.high %v14221_v11, %v1598_v38, %v14279_v50  ;;  %v783_v55 = vsub.s32 32, %v782_v40  ;;  %v784_v56 = vshll.u32 %v14208_v54, %v782_v40 }
  0x6f   : > { %v787_v16 = vsub.s32 4294967266, %v782_v40  ;;  %v604_v25 = vsel %vm602_vm10, %v20257_v27, %v14249_v21  ;;  %vm1439_vm4 = vcmp.eq.s32.totalorder %v14204_v42, 0  ;;  %v1606_v59 = vmul.u32 %v14221_v11, %v1590_v36 }
  0x70   : > { %v1609_v28 = vadd.s32 1, %v14267_v31  ;;  %v601_v54 = vsel %vm599_vm14, %v14229_v47, %v20258_v32  ;;  %v785_v61 = vshrl.u32 %v767_v49, %v783_v55  ;;  %v409_v22 = vadd.s32 1, %v12600_v57 }
  0x71   : > { %v788_v62 = vadd.s32 127, %v787_v16  ;;  %vm1442_vm5 = vcmp.eq.s32.totalorder %v14204_v42, 2  ;;  %v14299_v23 = vsel %vm14242_vm1, 0, %v798_v48  ;;  %vm1608_vm6 = vc.u32 %v14280_v52, %v14266_v63  ;;  %v14305_v11 = vpop.eup %13532 }
  0x72   : > { %v406_v1 = vand.u32 8388607, %v399_v6  ;;  %v786_v44 = vor.u32 %v785_v61, %v784_v56  ;;  %v1610_v9 = vsel %vm1608_vm6, %v1609_v28, %v14267_v31  ;;  %vm410_vm7 = vcmp.gt.s32.totalorder %v409_v22, 0 }
  0x73   : > { %v789_v51 = vshll.u32 %v788_v62, 23  ;;  %v14308_v12 = vpop.eup %13534  ;;  %v605_v14 = vsel %vm598_vm0, %v601_v54, %v604_v25  ;;  %v20255_v3 = vxor.u32 2147483648, %v14305_v11  ;;  %v1611_v60 = vadd.s32 %v1610_v9, %v1606_v59 }
  0x74   : > { %v411_v15 = vsel %vm410_vm7, %v409_v22, 0  ;;  %vm1438_vm8 = vcmp.lt.s32.totalorder %v14204_v42, 2  ;;  %v20256_v49 = vxor.u32 2147483648, %v14308_v12  ;;  %v793_v20 = vcvt.s32.f32 %v786_v44 }
  0x75   : > { %v790_v7 = vor.u32 4788187, %v789_v51  ;;  %vm1435_vm9 = vweird.f32 %v14003_v13  ;;  %v1444_v24 = vsel %vm1442_vm5, %v20255_v3, %v14308_v12  ;;  %v1612_v33 = vadd.s32 536870912, %v1611_v60 }
  0x76   : > { %v413_v35 = vand.u32 31, %v411_v15  ;;  %v606_v58 = vsel %vm595_vm2, nan, %v605_v14  ;;  %v1441_v26 = vsel %vm1439_vm4, %v14305_v11, %v20256_v49  ;;  %v14329_v34 = vadd.s32 3, %v14299_v23 }
  0x77   : > { %v791_v18 = vand.u32 2147483647, %v790_v7  ;;  %v1445_v46 = vsel %vm1438_vm8, %v1441_v26, %v1444_v24  ;;  %vm1553_vm10 = vcmp.lt.s32.totalorder %v14096_v19, 0  ;;  %v1613_v30 = vshrl.u32 %v1612_v33, 30 }
  0x78   : > { %v407_v31 = vor.u32 8388608, %v406_v1  ;;  %v414_v36 = vsub.s32 32, %v413_v35  ;;  %v1446_v38 = vsel %vm1435_vm9, nan, %v1445_v46  ;;  %v412_v48 = vshrl.u32 %v411_v15, 5 }
  0x79   : > { %v794_v40 = vmul.f32 %v793_v20, %v791_v18  ;;  %v416_v50 = vshll.u32 %v20288_v37, %v413_v35  ;;  %v13055_v55 = vpack.c.bf16 %v1446_v38, %v606_v58  ;;  %v1614_v42 = vshll.u32 %v1613_v30, 30 }
  0x7a   : > { %v419_v56 = vshll.u32 %v20264_v39, %v413_v35  ;;  %v422_v16 = vshll.u32 %v20262_v41, %v413_v35  ;;  %v417_v25 = vshrl.u32 %v20264_v39, %v414_v36  ;;  %v420_v59 = vshrl.u32 %v20262_v41, %v414_v36 }
  0x7b   : > { %v795_v57 = vxor.u32 2147483648, %v794_v40  ;;  %v423_v28 = vshrl.u32 %v20260_v43, %v414_v36  ;;  %13056 = vmatprep.subr.bf16.mxu0 %v13055_v55  ;;  %v14340_v54 = vsub.s32 %v1611_v60, %v1614_v42  ;;  %v425_v61 = vshll.u32 %v20260_v43, %v413_v35 }
  0x7c   : > { %v426_v62 = vshrl.u32 %v20305_v45, %v414_v36  ;;  %v14345_v22 = vmul.f32 2.0, %v13991_v5  ;;  %v1637_v44 = vsub.s32 4, %v1613_v30  ;;  %v415_v51 = vshrl.u32 %v20288_v37, %v414_v36 }
  0x7d   : > { %v796_v1 = vsel %vm713_vm11, %v795_v57, %v794_v40  ;;  %vm431_vm12 = vcmp.lt.s32.totalorder %v412_v48, 1  ;;  %v1617_v14 = vsub.s32 0, %v14340_v54  ;;  %v418_v60 = vor.u32 %v417_v25, %v416_v50 }
  0x7e   : > { %20597 = vst [vmem:[#allocation8_spill] sm:$0xff] %v14345_v22  ;;  %v799_v9 = vsel %vm14242_vm1, %v13986_v2, %v796_v1  ;;  %v421_v15 = vor.u32 %v420_v59, %v419_v56  ;;  %v424_v7 = vor.u32 %v423_v28, %v422_v16  ;;  %v427_v20 = vor.u32 %v426_v62, %v425_v61 }
  0x7f   : > { %v428_v24 = vshll.u32 %v20305_v45, %v413_v35  ;;  %v429_v33 = vshrl.u32 %v20278_v53, %v414_v36  ;;  %v1607_v58 = vadd.s32 %v14266_v63, %v14280_v52  ;;  %v12645_v26 = vmin.u32 %v1617_v14, %v14340_v54 }
  0x80   : > { %vm432_vm11 = vcmp.lt.s32.totalorder %v412_v48, 2  ;;  %v447_v18 = vshll.u32 %v407_v31, 8  ;;  %v1638_v17 = vsel %vm1553_vm10, %v1637_v44, %v1613_v30  ;;  %vm433_vm13 = vcmp.lt.s32.totalorder %v412_v48, 3 }
  0x81   : > { %v430_v46 = vor.u32 %v429_v33, %v428_v24  ;;  %vm434_vm14 = vcmp.lt.s32.totalorder %v412_v48, 4  ;;  %13536 = vcosq.f32 %v799_v9  ;;  %v1619_v38 = vclz %v12645_v26 }
  0x82   : > { %v435_v40 = vsel %vm431_vm12, %v415_v51, %v418_v60  ;;  %v439_v35 = vsel %vm431_vm12, %v418_v60, %v421_v15  ;;  %v436_v36 = vsel %vm434_vm14, %v424_v7, 2102212464  ;;  %v440_v50 = vsel %vm434_vm14, %v427_v20, 920167782 }
  0x83   : > { %v443_v63 = vsel %vm431_vm12, %v421_v15, %v424_v7  ;;  %v444_v52 = vsel %vm434_vm14, %v430_v46, 1326507024  ;;  %v12646_v55 = vadd.s32 4294967294, %v1619_v38  ;;  %v437_v42 = vsel %vm433_vm13, %v421_v15, %v436_v36 }
  0x84   : > { %v441_v31 = vsel %vm433_vm13, %v424_v7, %v440_v50  ;;  %v445_v56 = vsel %vm433_vm13, %v427_v20, %v444_v52  ;;  %13538 = vsinq.f32 %v799_v9  ;;  %v1242_v57 = vand.u32 2139095040, %v14345_v22 }
  0x85   : > { %v442_v30 = vsel %vm432_vm11, %v439_v35, %v441_v31  ;;  %v446_v16 = vsel %vm432_vm11, %v443_v63, %v445_v56  ;;  %vm12647_vm15 = vcmp.lt.s32.totalorder %v12646_v55, 0  ;;  %v438_v25 = vsel %vm432_vm11, %v435_v40, %v437_v42 }
  0x86   : > { %v14368_v59 = vmul.u32.u64.low %v447_v18, %v446_v16  ;;  %v14369_v28 = vmul.u32.u64.high %v447_v18, %v446_v16, %v14368_v59  ;;  %v1622_v61 = vsel %vm12647_vm15, 0, %v12646_v55  ;;  %v1243_v44 = vshrl.u32 %v1242_v57, 23 }
  0x87   : > { %v14371_v62 = vmul.u32.u64.low %v447_v18, %v442_v30  ;;  %v14372_v1 = vmul.u32.u64.high %v447_v18, %v442_v30, %v14371_v62  ;;  %v1623_v51 = vsub.s32 32, %v1622_v61  ;;  %v1624_v9 = vshll.u32 %v14340_v54, %v1622_v61 }
  0x88   : > { %v1627_v14 = vsub.s32 4294967266, %v1622_v61  ;;  %vm14377_vm0 = vcmp.le.f32.partialorder %v1551_v8, 0.7853982  ;;  %v12632_v48 = vadd.s32 4294967169, %v1243_v44  ;;  %v454_v24 = vmul.u32 %v447_v18, %v438_v25 }
  0x89   : > { %v1625_v15 = vshrl.u32 %v1607_v58, %v1623_v51  ;;  %v14383_v20 = vsel %vm14377_vm0, 0, %v1638_v17  ;;  %v14386_v33 = vand.u32 3, %v14329_v34  ;;  %vm456_vm1 = vc.u32 %v14369_v28, %v14371_v62 }
  0x8a   : > { %v1628_v7 = vadd.s32 127, %v1627_v14  ;;  %v457_v54 = vadd.s32 1, %v14372_v1  ;;  %v1239_v8 = vand.u32 2147483647, %v14345_v22  ;;  %v1249_v58 = vadd.s32 1, %v12632_v48 }
  0x8b   : > { %v14391_v26 = vpop.eup %13536  ;;  %v1626_v46 = vor.u32 %v1625_v15, %v1624_v9  ;;  %v1644_v40 = vadd.s32 3, %v14383_v20  ;;  %vm807_vm3 = vcmp.eq.s32.totalorder %v14386_v33, 0  ;;  %v610_v63 = vand.u32 2139095040, %v13998_v10 }
  0x8c   : > { %v1629_v38 = vshll.u32 %v1628_v7, 23  ;;  %v458_v17 = vsel %vm456_vm1, %v457_v54, %v14372_v1  ;;  %v1246_v50 = vand.u32 8388607, %v1239_v8  ;;  %vm1250_vm4 = vcmp.gt.s32.totalorder %v1249_v58, 0 }
  0x8d   : > { %v1633_v18 = vcvt.s32.f32 %v1626_v46  ;;  %v459_v36 = vadd.s32 %v458_v17, %v454_v24  ;;  %vm810_vm5 = vcmp.eq.s32.totalorder %v14386_v33, 2  ;;  %v1251_v42 = vsel %vm1250_vm4, %v1249_v58, 0 }
  0x8e   : > { %v1630_v35 = vor.u32 4788187, %v1629_v38  ;;  %v14395_v34 = vpop.eup %13538  ;;  %v20253_v31 = vxor.u32 2147483648, %v14391_v26  ;;  %v14403_v56 = vand.u32 3, %v1644_v40  ;;  %v1253_v30 = vand.u32 31, %v1251_v42 }
  0x8f   : > { %v460_v55 = vadd.s32 536870912, %v459_v36  ;;  %v20266_v16 = vand.u32 2147483647, %v13998_v10  ;;  %v20254_v57 = vxor.u32 2147483648, %v14395_v34  ;;  %v14408_v59 = vadd.s32 %v14371_v62, %v14369_v28 }
  0x90   : > { %v1631_v52 = vand.u32 2147483647, %v1630_v35  ;;  %v1247_v1 = vor.u32 8388608, %v1246_v50  ;;  %v1254_v44 = vsub.s32 32, %v1253_v30  ;;  %v1256_v51 = vshll.u32 %v20288_v37, %v1253_v30 }
  0x91   : > { %v14410_v61 = vshrl.u32 %v460_v55, 30  ;;  %v611_v9 = vshrl.u32 %v610_v63, 23  ;;  %v1259_v15 = vshll.u32 %v20264_v39, %v1253_v30  ;;  %v1262_v7 = vshll.u32 %v20262_v41, %v1253_v30 }
  0x92   : > { %v1634_v25 = vmul.f32 %v1633_v18, %v1631_v52  ;;  %v1257_v24 = vshrl.u32 %v20264_v39, %v1254_v44  ;;  %v1260_v54 = vshrl.u32 %v20262_v41, %v1254_v44  ;;  %v1263_v28 = vshrl.u32 %v20260_v43, %v1254_v44 }
  0x93   : > { %v462_v48 = vshll.u32 %v14410_v61, 30  ;;  %v1265_v62 = vshll.u32 %v20260_v43, %v1253_v30  ;;  %vm806_vm6 = vcmp.lt.s32.totalorder %v14386_v33, 2  ;;  %v1252_v58 = vshrl.u32 %v1251_v42, 5 }
  0x94   : > { %v1635_v14 = vxor.u32 2147483648, %v1634_v25  ;;  %v1266_v40 = vshrl.u32 %v20305_v45, %v1254_v44  ;;  %v1255_v35 = vshrl.u32 %v20288_v37, %v1254_v44  ;;  %v1258_v18 = vor.u32 %v1257_v24, %v1256_v51 }
  0x95   : > { %v14423_v38 = vsub.s32 %v459_v36, %v462_v48  ;;  %v12608_v50 = vadd.s32 4294967169, %v611_v9  ;;  %v1261_v52 = vor.u32 %v1260_v54, %v1259_v15  ;;  %v1264_v55 = vor.u32 %v1263_v28, %v1262_v7 }
  0x96   : > { %v1636_v46 = vsel %vm1553_vm10, %v1635_v14, %v1634_v25  ;;  %v1267_v25 = vor.u32 %v1266_v40, %v1265_v62  ;;  %v1268_v36 = vshll.u32 %v20305_v45, %v1253_v30  ;;  %v1269_v42 = vshrl.u32 %v20278_v53, %v1254_v44 }
  0x97   : > { %v1639_v17 = vsel %vm14377_vm0, %v14096_v19, %v1636_v46  ;;  %v465_v63 = vsub.s32 0, %v14423_v38  ;;  %vm803_vm7 = vweird.f32 %v13986_v2  ;;  %v809_v60 = vsel %vm807_vm3, %v14391_v26, %v20254_v57 }
  0x98   : > { %13540 = vcosq.f32 %v1639_v17  ;;  %v812_v51 = vsel %vm810_vm5, %v20253_v31, %v14395_v34  ;;  %vm1650_vm8 = vcmp.eq.s32.totalorder %v14403_v56, 2  ;;  %vm1271_vm10 = vcmp.lt.s32.totalorder %v1252_v58, 1 }
  0x99   : > { %13542 = vsinq.f32 %v1639_v17  ;;  %v12601_v30 = vmin.u32 %v465_v63, %v14423_v38  ;;  %v1270_v44 = vor.u32 %v1269_v42, %v1268_v36  ;;  %vm1273_vm12 = vcmp.lt.s32.totalorder %v1252_v58, 3 }
  0x9a   : > { %vm1274_vm11 = vcmp.lt.s32.totalorder %v1252_v58, 4  ;;  %v617_v9 = vadd.s32 1, %v12608_v50  ;;  %vm1646_vm13 = vcmp.lt.s32.totalorder %v14403_v56, 2  ;;  %vm1272_vm14 = vcmp.lt.s32.totalorder %v1252_v58, 2 }
  0x9b   : > { %v467_v14 = vclz %v12601_v30  ;;  %v1275_v48 = vsel %vm1271_vm10, %v1255_v35, %v1258_v18  ;;  %v1287_v15 = vshll.u32 %v1247_v1, 8  ;;  %vm20424_vm15 = vweird.f32 %v14096_v19 }
  0x9c   : > { %v1276_v7 = vsel %vm1274_vm11, %v1264_v55, 2102212464  ;;  %v1279_v24 = vsel %vm1271_vm10, %v1258_v18, %v1261_v52  ;;  %v1280_v54 = vsel %vm1274_vm11, %v1267_v25, 920167782  ;;  %v1283_v28 = vsel %vm1271_vm10, %v1261_v52, %v1264_v55 }
  0x9d   : > { %v12602_v62 = vadd.s32 4294967294, %v467_v14  ;;  %v1277_v46 = vsel %vm1273_vm12, %v1261_v52, %v1276_v7  ;;  %v1281_v40 = vsel %vm1273_vm12, %v1264_v55, %v1280_v54  ;;  %v1284_v17 = vsel %vm1274_vm11, %v1270_v44, 1326507024 }
  0x9e   : > { %v1278_v50 = vsel %vm1272_vm14, %v1275_v48, %v1277_v46  ;;  %v1282_v63 = vsel %vm1272_vm14, %v1279_v24, %v1281_v40  ;;  %v1285_v36 = vsel %vm1273_vm12, %v1267_v25, %v1284_v17  ;;  %vm618_vm0 = vcmp.gt.s32.totalorder %v617_v9, 0 }
  0x9f   : > { %vm12603_vm1 = vcmp.lt.s32.totalorder %v12602_v62, 0  ;;  %v1286_v1 = vsel %vm1272_vm14, %v1283_v28, %v1285_v36  ;;  %v14454_v35 = vmul.u32.u64.low %v1287_v15, %v1282_v63  ;;  %v14455_v18 = vmul.u32.u64.high %v1287_v15, %v1282_v63, %v14454_v35 }
  0xa0   : > { %v813_v52 = vsel %vm806_vm6, %v809_v60, %v812_v51  ;;  %v470_v42 = vsel %vm12603_vm1, 0, %v12602_v62  ;;  %v14460_v55 = vmul.u32.u64.low %v1287_v15, %v1286_v1  ;;  %v14461_v30 = vmul.u32.u64.high %v1287_v15, %v1286_v1, %v14460_v55 }
  0xa1   : > { %v471_v14 = vsub.s32 32, %v470_v42  ;;  %v472_v25 = vshll.u32 %v14423_v38, %v470_v42  ;;  %v475_v48 = vsub.s32 4294967266, %v470_v42  ;;  %v619_v7 = vsel %vm618_vm0, %v617_v9, 0 }
  0xa2   : > { %v14463_v44 = vpop.eup %13540  ;;  %vm1647_vm3 = vcmp.eq.s32.totalorder %v14403_v56, 0  ;;  %v1294_v54 = vmul.u32 %v1287_v15, %v1278_v50  ;;  %v621_v33 = vand.u32 31, %v619_v7  ;;  %v1297_v62 = vadd.s32 1, %v14455_v18 }
  0xa3   : > { %v14466_v58 = vpop.eup %13542  ;;  %v20251_v24 = vxor.u32 2147483648, %v14463_v44  ;;  %v473_v51 = vshrl.u32 %v14408_v59, %v471_v14  ;;  %v476_v28 = vadd.s32 127, %v475_v48  ;;  %v814_v38 = vsel %vm803_vm7, nan, %v813_v52 }
  0xa4   : > { %v20252_v60 = vxor.u32 2147483648, %v14466_v58  ;;  %vm1296_vm4 = vc.u32 %v14461_v30, %v14454_v35  ;;  %v622_v15 = vsub.s32 32, %v621_v33  ;;  %v624_v36 = vshll.u32 %v20288_v37, %v621_v33 }
  0xa5   : > { %v1652_v9 = vsel %vm1650_vm8, %v20251_v24, %v14466_v58  ;;  %v474_v46 = vor.u32 %v473_v51, %v472_v25  ;;  %v477_v40 = vshll.u32 %v476_v28, 23  ;;  %v1298_v17 = vsel %vm1296_vm4, %v1297_v62, %v14455_v18 }
  0xa6   : > { %v1649_v59 = vsel %vm1647_vm3, %v14463_v44, %v20252_v60  ;;  %v1299_v63 = vadd.s32 %v1298_v17, %v1294_v54  ;;  %v625_v55 = vshrl.u32 %v20264_v39, %v622_v15  ;;  %v627_v25 = vshll.u32 %v20264_v39, %v621_v33 }
  0xa7   : > { %v1653_v50 = vsel %vm1646_vm13, %v1649_v59, %v1652_v9  ;;  %v478_v52 = vor.u32 4788187, %v477_v40  ;;  %v481_v42 = vcvt.s32.f32 %v474_v46  ;;  %v628_v18 = vshrl.u32 %v20262_v41, %v622_v15 }
  0xa8   : > { %v1654_v1 = vsel %vm20424_vm15, nan, %v1653_v50  ;;  %v1300_v48 = vadd.s32 536870912, %v1299_v63  ;;  %v614_v56 = vand.u32 8388607, %v20266_v16  ;;  %v620_v54 = vshrl.u32 %v619_v7, 5 }
  0xa9   : > { %v13107_v14 = vpack.c.bf16 %v1654_v1, %v814_v38  ;;  %v479_v51 = vand.u32 2147483647, %v478_v52  ;;  %v630_v28 = vshll.u32 %v20262_v41, %v621_v33  ;;  %v631_v9 = vshrl.u32 %v20260_v43, %v622_v15  ;;  %v14504_v1 = vld [vmem:[%s13974_s29] sm:$0xff] }
  0xaa   : > { %v1301_v62 = vshrl.u32 %v1300_v48, 30  ;;  %v633_v59 = vshll.u32 %v20260_v43, %v621_v33  ;;  %v634_v38 = vshrl.u32 %v20305_v45, %v622_v15  ;;  %v485_v40 = vsub.s32 4, %v14410_v61  ;;  %20600 = vst [vmem:[#allocation9_spill] sm:$0xff] %v14504_v1 }
  0xab   : > { %13108 = vmatprep.subr.bf16.mxu1 %v13107_v14  ;;  %v482_v46 = vmul.f32 %v481_v42, %v479_v51  ;;  %v636_v17 = vshll.u32 %v20305_v45, %v621_v33  ;;  %v637_v50 = vshrl.u32 %v20278_v53, %v622_v15  ;;  %vm401_vm5 = vcmp.lt.s32.totalorder %v14504_v1, 0 }
  0xac   : > { %v1302_v7 = vshll.u32 %v1301_v62, 30  ;;  %v626_v52 = vor.u32 %v625_v55, %v624_v36  ;;  %v629_v14 = vor.u32 %v628_v18, %v627_v25  ;;  %v615_v24 = vor.u32 8388608, %v614_v56  ;;  %v14526_v56 = vld [vmem:[%s13974_s29 + $0x10] sm:$0xff] }
  0xad   : > { %v483_v48 = vxor.u32 2147483648, %v482_v46  ;;  %v635_v60 = vor.u32 %v634_v38, %v633_v59  ;;  %vm639_vm6 = vcmp.lt.s32.totalorder %v620_v54, 1  ;;  %v623_v42 = vshrl.u32 %v20288_v37, %v622_v15  ;;  %20603 = vst [vmem:[#allocation10_spill] sm:$0xff] %v14526_v56 }
  0xae   : > { %v14507_v31 = vsub.s32 %v1299_v63, %v1302_v7  ;;  %v632_v51 = vor.u32 %v631_v9, %v630_v28  ;;  %vm642_vm8 = vcmp.lt.s32.totalorder %v620_v54, 4  ;;  %vm14512_vm10 = vcmp.le.f32.partialorder %v399_v6, 0.7853982 }
  0xaf   : > { %v486_v36 = vsel %vm401_vm5, %v485_v40, %v14410_v61  ;;  %v638_v55 = vor.u32 %v637_v50, %v636_v17  ;;  %vm641_vm12 = vcmp.lt.s32.totalorder %v620_v54, 3  ;;  %vm640_vm11 = vcmp.lt.s32.totalorder %v620_v54, 2 }
  0xb0   : > { %v1305_v25 = vsub.s32 0, %v14507_v31  ;;  %v644_v63 = vsel %vm642_vm8, %v632_v51, 2102212464  ;;  %v647_v15 = vsel %vm639_vm6, %v626_v52, %v629_v14  ;;  %v484_v5 = vsel %vm401_vm5, %v483_v48, %v482_v46 }
  0xb1   : > { %v648_v6 = vsel %vm642_vm8, %v635_v60, 920167782  ;;  %v655_v18 = vshll.u32 %v615_v24, 8  ;;  %v14529_v28 = vmul.f32 2.0, %v14526_v56  ;;  %v14533_v61 = vsel %vm14512_vm10, 0, %v486_v36 }
  0xb2   : > { %vm14537_vm13 = vcmp.le.f32.partialorder %v1239_v8, 0.7853982  ;;  %v12633_v59 = vmin.u32 %v1305_v25, %v14507_v31  ;;  %v643_v38 = vsel %vm639_vm6, %v623_v42, %v626_v52  ;;  %v649_v24 = vsel %vm641_vm12, %v632_v51, %v648_v6 }
  0xb3   : > { %20604 = vst [vmem:[#allocation11_spill] sm:$0xff] %v14529_v28  ;;  %v645_v46 = vsel %vm641_vm12, %v629_v14, %v644_v63  ;;  %v650_v40 = vsel %vm640_vm11, %v647_v15, %v649_v24  ;;  %v651_v17 = vsel %vm639_vm6, %v629_v14, %v632_v51  ;;  %v652_v50 = vsel %vm642_vm8, %v638_v55, 1326507024 }
  0xb4   : > { %v487_v8 = vsel %vm14512_vm10, %v14504_v1, %v484_v5  ;;  %vm1241_vm14 = vcmp.lt.s32.totalorder %v14345_v22, 0  ;;  %v1307_v7 = vclz %v12633_v59  ;;  %v1325_v48 = vsub.s32 4, %v1301_v62 }
  0xb5   : > { %v492_v52 = vadd.s32 3, %v14533_v61  ;;  %v653_v42 = vsel %vm641_vm12, %v635_v60, %v652_v50  ;;  %v14554_v36 = vmul.u32.u64.low %v655_v18, %v650_v40  ;;  %v14555_v25 = vmul.u32.u64.high %v655_v18, %v650_v40, %v14554_v36 }
  0xb6   : > { %v12634_v63 = vadd.s32 4294967294, %v1307_v7  ;;  %v646_v14 = vsel %vm640_vm11, %v643_v38, %v645_v46  ;;  %v654_v51 = vsel %vm640_vm11, %v651_v17, %v653_v42  ;;  %v1450_v55 = vand.u32 2139095040, %v14529_v28 }
  0xb7   : > { %13544 = vcosq.f32 %v487_v8  ;;  %v14560_v33 = vmul.u32.u64.low %v655_v18, %v654_v51  ;;  %v14561_v15 = vmul.u32.u64.high %v655_v18, %v654_v51, %v14560_v33  ;;  %v20259_v5 = vand.u32 2147483647, %v14529_v28 }
  0xb8   : > { %v1295_v60 = vadd.s32 %v14454_v35, %v14461_v30  ;;  %vm12635_vm0 = vcmp.lt.s32.totalorder %v12634_v63, 0  ;;  %v1326_v6 = vsel %vm1241_vm14, %v1325_v48, %v1301_v62  ;;  %v1451_v59 = vshrl.u32 %v1450_v55, 23  ;;  %v14578_v30 = vld [vmem:[%s13974_s29 + $0x8] sm:$0xff] }
  0xb9   : > { %13546 = vsinq.f32 %v487_v8  ;;  %v1310_v54 = vsel %vm12635_vm0, 0, %v12634_v63  ;;  %v662_v38 = vmul.u32 %v655_v18, %v646_v14  ;;  %v665_v24 = vadd.s32 1, %v14555_v25 }
  0xba   : > { %v1311_v46 = vsub.s32 32, %v1310_v54  ;;  %v1312_v40 = vshll.u32 %v14507_v31, %v1310_v54  ;;  %v1315_v17 = vsub.s32 4294967266, %v1310_v54  ;;  %v12640_v50 = vadd.s32 4294967169, %v1451_v59 }
  0xbb   : > { %v14572_v7 = vsel %vm14537_vm13, 0, %v1326_v6  ;;  %vm664_vm1 = vc.u32 %v14561_v15, %v14554_v36  ;;  %v1454_v35 = vand.u32 8388607, %v20259_v5  ;;  %v14581_v62 = vmul.f32 4.0, %v14578_v30 }
  0xbc   : > { %20607 = vst [vmem:[#allocation12_spill] sm:$0xff] %v14572_v7  ;;  %v1313_v18 = vshrl.u32 %v1295_v60, %v1311_v46  ;;  %v1316_v8 = vadd.s32 127, %v1315_v17  ;;  %v666_v31 = vsel %vm664_vm1, %v665_v24, %v14555_v25  ;;  %v14584_v48 = vand.u32 3, %v492_v52 }
  0xbd   : > { %20608 = vst [vmem:[#allocation13_spill] sm:$0xff] %v14581_v62  ;;  %v667_v42 = vadd.s32 %v666_v31, %v662_v38  ;;  %v1457_v63 = vadd.s32 1, %v12640_v50  ;;  %v1332_v55 = vadd.s32 3, %v14572_v7  ;;  %v1455_v6 = vor.u32 8388608, %v1454_v35 }
  0xbe   : > { %v1314_v14 = vor.u32 %v1313_v18, %v1312_v40  ;;  %v1317_v51 = vshll.u32 %v1316_v8, 23  ;;  %v2186_v59 = vand.u32 2139095040, %v14581_v62  ;;  %vm498_vm4 = vcmp.eq.s32.totalorder %v14584_v48, 2 }
  0xbf   : > { %v668_v33 = vadd.s32 536870912, %v667_v42  ;;  %vm1458_vm3 = vcmp.gt.s32.totalorder %v1457_v63, 0  ;;  %v14593_v24 = vand.u32 3, %v1332_v55  ;;  %v14596_v46 = vadd.s32 %v14554_v36, %v14561_v15 }
  0xc0   : > { %v1318_v54 = vor.u32 4788187, %v1317_v51  ;;  %v1321_v57 = vcvt.s32.f32 %v1314_v14  ;;  %v1459_v3 = vsel %vm1458_vm3, %v1457_v63, 0  ;;  %v14602_v18 = vshll.u32 %v1455_v6, 8 }
  0xc1   : > { %v14588_v60 = vpop.eup %13544  ;;  %v14591_v52 = vshrl.u32 %v668_v33, 30  ;;  %v1461_v25 = vand.u32 31, %v1459_v3  ;;  %v2187_v8 = vshrl.u32 %v2186_v59, 23  ;;  %vm495_vm5 = vcmp.eq.s32.totalorder %v14584_v48, 0 }
  0xc2   : > { %20609 = vst [vmem:[#allocation14_spill] sm:$0xff] %v14588_v60  ;;  %v1319_v38 = vand.u32 2147483647, %v1318_v54  ;;  %v20269_v31 = vxor.u32 2147483648, %v14588_v60  ;;  %v1460_v14 = vshrl.u32 %v1459_v3, 5  ;;  %vm494_vm6 = vcmp.lt.s32.totalorder %v14584_v48, 2 }
  0xc3   : > { %v14599_v17 = vpop.eup %13546  ;;  %v670_v50 = vshll.u32 %v14591_v52, 30  ;;  %v1462_v35 = vsub.s32 32, %v1461_v25  ;;  %v1464_v51 = vshll.u32 %v20288_v37, %v1461_v25  ;;  %v1467_v55 = vshll.u32 %v20264_v39, %v1461_v25 }
  0xc4   : > { %20610 = vst [vmem:[#allocation15_spill] sm:$0xff] %v14599_v17  ;;  %v1322_v63 = vmul.f32 %v1321_v57, %v1319_v38  ;;  %v1470_v33 = vshll.u32 %v20262_v41, %v1461_v25  ;;  %v1473_v49 = vshll.u32 %v20260_v43, %v1461_v25  ;;  %v20270_v57 = vxor.u32 2147483648, %v14599_v17 }
  0xc5   : > { %v14607_v36 = vsub.s32 %v667_v42, %v670_v50  ;;  %v1465_v15 = vshrl.u32 %v20264_v39, %v1462_v35  ;;  %v1468_v6 = vshrl.u32 %v20262_v41, %v1462_v35  ;;  %v1471_v59 = vshrl.u32 %v20260_v43, %v1462_v35 }
  0xc6   : > { %v1323_v54 = vxor.u32 2147483648, %v1322_v63  ;;  %v1474_v42 = vshrl.u32 %v20305_v45, %v1462_v35  ;;  %v12668_v38 = vadd.s32 4294967169, %v2187_v8  ;;  %v1463_v27 = vshrl.u32 %v20288_v37, %v1462_v35 }
  0xc7   : > { %v673_v3 = vsub.s32 0, %v14607_v36  ;;  %v1466_v32 = vor.u32 %v1465_v15, %v1464_v51  ;;  %v1476_v5 = vshll.u32 %v20305_v45, %v1461_v25  ;;  %v1469_v39 = vor.u32 %v1468_v6, %v1467_v55 }
  0xc8   : > { %v1324_v50 = vsel %vm1241_vm14, %v1323_v54, %v1322_v63  ;;  %v1472_v16 = vor.u32 %v1471_v59, %v1470_v33  ;;  %v1475_v8 = vor.u32 %v1474_v42, %v1473_v49  ;;  %v1477_v40 = vshrl.u32 %v20278_v53, %v1462_v35 }
  0xc9   : > { %v1327_v43 = vsel %vm14537_vm13, %v14345_v22, %v1324_v50  ;;  %v12609_v41 = vmin.u32 %v673_v3, %v14607_v36  ;;  %vm1479_vm8 = vcmp.lt.s32.totalorder %v1460_v14, 1  ;;  %vm20353_vm10 = vweird.f32 %v14504_v1 }
  0xca   : > { %13548 = vcosq.f32 %v1327_v43  ;;  %v500_v25 = vsel %vm498_vm4, %v20269_v31, %v14599_v17  ;;  %v2193_v63 = vadd.s32 1, %v12668_v38  ;;  %v1478_v51 = vor.u32 %v1477_v40, %v1476_v5 }
  0xcb   : > { %13550 = vsinq.f32 %v1327_v43  ;;  %v675_v9 = vclz %v12609_v41  ;;  %vm1480_vm12 = vcmp.lt.s32.totalorder %v1460_v14, 2  ;;  %vm1481_vm11 = vcmp.lt.s32.totalorder %v1460_v14, 3 }
  0xcc   : > { %vm1482_vm13 = vcmp.lt.s32.totalorder %v1460_v14, 4  ;;  %v1483_v49 = vsel %vm1479_vm8, %v1463_v27, %v1466_v32  ;;  %v1487_v55 = vsel %vm1479_vm8, %v1466_v32, %v1469_v39  ;;  %vm1334_vm14 = vcmp.lt.s32.totalorder %v14593_v24, 2 }
  0xcd   : > { %v12610_v15 = vadd.s32 4294967294, %v675_v9  ;;  %v1484_v35 = vsel %vm1482_vm13, %v1472_v16, 2102212464  ;;  %v1488_v54 = vsel %vm1482_vm13, %v1475_v8, 920167782  ;;  %v1491_v6 = vsel %vm1479_vm8, %v1469_v39, %v1472_v16 }
  0xce   : > { %v1485_v33 = vsel %vm1481_vm11, %v1469_v39, %v1484_v35  ;;  %v1492_v59 = vsel %vm1482_vm13, %v1478_v51, 1326507024  ;;  %v497_v41 = vsel %vm495_vm5, %v14588_v60, %v20270_v57  ;;  %vm20310_vm0 = vweird.f32 %v14345_v22 }
  0xcf   : > { %vm12611_vm1 = vcmp.lt.s32.totalorder %v12610_v15, 0  ;;  %v1489_v43 = vsel %vm1481_vm11, %v1472_v16, %v1488_v54  ;;  %v1493_v27 = vsel %vm1481_vm11, %v1475_v8, %v1492_v59  ;;  %v1486_v32 = vsel %vm1480_vm12, %v1483_v49, %v1485_v33 }
  0xd0   : > { %v678_v5 = vsel %vm12611_vm1, 0, %v12610_v15  ;;  %v1490_v40 = vsel %vm1480_vm12, %v1487_v55, %v1489_v43  ;;  %v1494_v3 = vsel %vm1480_vm12, %v1491_v6, %v1493_v27  ;;  %vm2194_vm3 = vcmp.gt.s32.totalorder %v2193_v63, 0 }
  0xd1   : > { %v679_v39 = vsub.s32 32, %v678_v5  ;;  %v680_v42 = vshll.u32 %v14607_v36, %v678_v5  ;;  %v683_v38 = vsub.s32 4294967266, %v678_v5  ;;  %v501_v8 = vsel %vm494_vm6, %v497_v41, %v500_v25 }
  0xd2   : > { %v14649_v50 = vmul.u32.u64.low %v14602_v18, %v1494_v3  ;;  %v14650_v9 = vmul.u32.u64.high %v14602_v18, %v1494_v3, %v14649_v50  ;;  %v14653_v51 = vmul.u32.u64.low %v14602_v18, %v1490_v40  ;;  %v14654_v16 = vmul.u32.u64.high %v14602_v18, %v1490_v40, %v14653_v51 }
  0xd3   : > { %v681_v14 = vshrl.u32 %v14596_v46, %v679_v39  ;;  %v684_v15 = vadd.s32 127, %v683_v38  ;;  %v2195_v49 = vsel %vm2194_vm3, %v2193_v63, 0  ;;  %vm1335_vm4 = vcmp.eq.s32.totalorder %v14593_v24, 0 }
  0xd4   : > { %v14660_v35 = vpop.eup %13548  ;;  %vm1338_vm5 = vcmp.eq.s32.totalorder %v14593_v24, 2  ;;  %vm609_vm8 = vcmp.lt.s32.totalorder %v14526_v56, 0  ;;  %v20612_v36 = vand.u32 2147483647, %v14581_v62  ;;  %v2197_v33 = vand.u32 31, %v2195_v49 }
  0xd5   : > { %20611 = vst [vmem:[#allocation16_spill] sm:$0xff] %v14660_v35  ;;  %v14667_v54 = vpop.eup %13550  ;;  %v20267_v48 = vxor.u32 2147483648, %v14660_v35  ;;  %v682_v25 = vor.u32 %v681_v14, %v680_v42  ;;  %v685_v46 = vshll.u32 %v684_v15, 23  ;;  %v1502_v63 = vmul.u32 %v14602_v18, %v1486_v32 }
  0xd6   : > { %v2190_v55 = vand.u32 8388607, %v20612_v36  ;;  %20613 = vst [vmem:[#allocation17_spill] sm:$0xff] %v14667_v54  ;;  %v502_v6 = vsel %vm20353_vm10, nan, %v501_v8  ;;  %v20268_v59 = vxor.u32 2147483648, %v14667_v54  ;;  %vm1504_vm12 = vc.u32 %v14650_v9, %v14653_v51 }
  0xd7   : > { %v20614_v41 = vand.u32 2147483647, %v13998_v10  ;;  %v1505_v27 = vadd.s32 1, %v14654_v16  ;;  %v1340_v18 = vsel %vm1338_vm5, %v20267_v48, %v14667_v54  ;;  %v686_v5 = vor.u32 4788187, %v685_v46 }
  0xd8   : > { %v689_v32 = vcvt.s32.f32 %v682_v25  ;;  %v2198_v40 = vsub.s32 32, %v2197_v33  ;;  %v1337_v10 = vsel %vm1335_vm4, %v14660_v35, %v20268_v59  ;;  %v693_v3 = vsub.s32 4, %v14591_v52 }
  0xd9   : > { %vm14676_vm6 = vcmp.le.f32.partialorder %v20614_v41, 0.7853982  ;;  %v1506_v39 = vsel %vm1504_vm12, %v1505_v27, %v14654_v16  ;;  %v2191_v42 = vor.u32 8388608, %v2190_v55  ;;  %v1341_v38 = vsel %vm1334_vm14, %v1337_v10, %v1340_v18 }
  0xda   : > { %v687_v50 = vand.u32 2147483647, %v686_v5  ;;  %v1507_v8 = vadd.s32 %v1506_v39, %v1502_v63  ;;  %v2200_v14 = vshll.u32 %v20288_v37, %v2197_v33  ;;  %v1342_v15 = vsel %vm20310_vm0, nan, %v1341_v38 }
  0xdb   : > { %v20617_v36 = vmov 2475754826   ;;  %v20618_v41 = vmov 2131351028   ;;  %v13057_v59 = vpack.c.bf16 %v1342_v15, %v502_v6  ;;  %v2196_v55 = vshrl.u32 %v2195_v49, 5 }
  0xdc   : > { %v2201_v25 = vshrl.u32 %v20617_v36, %v2198_v40  ;;  %v2203_v46 = vshll.u32 %v20617_v36, %v2197_v33  ;;  %v2204_v48 = vshrl.u32 %v20618_v41, %v2198_v40  ;;  %v690_v31 = vmul.f32 %v689_v32, %v687_v50 }
  0xdd   : > { %v1508_v16 = vadd.s32 536870912, %v1507_v8  ;;  %v2206_v24 = vshll.u32 %v20618_v41, %v2197_v33  ;;  %v20619_v27 = vmov 2102212464   ;;  %v2210_v5 = vshrl.u32 %v20305_v45, %v2198_v40  ;;  %13058 = vmatpush1.bf16.msra.mxu0 %v13057_v59 }
  0xde   : > { %v2207_v18 = vshrl.u32 %v20619_v27, %v2198_v40  ;;  %v2209_v63 = vshll.u32 %v20619_v27, %v2197_v33  ;;  %v691_v10 = vxor.u32 2147483648, %v690_v31  ;;  %v694_v39 = vsel %vm609_vm8, %v693_v3, %v14591_v52 }
  0xdf   : > { %v1509_v38 = vshrl.u32 %v1508_v16, 30  ;;  %v2212_v6 = vshll.u32 %v20305_v45, %v2197_v33  ;;  %v2199_v32 = vshrl.u32 %v20288_v37, %v2198_v40  ;;  %v2202_v49 = vor.u32 %v2201_v25, %v2200_v14 }
  0xe0   : > { %v2205_v50 = vor.u32 %v2204_v48, %v2203_v46  ;;  %v2213_v15 = vshrl.u32 %v20278_v53, %v2198_v40  ;;  %v692_v57 = vsel %vm609_vm8, %v691_v10, %v690_v31  ;;  %v2211_v35 = vor.u32 %v2210_v5, %v2209_v63 }
  0xe1   : > { %v1510_v22 = vshll.u32 %v1509_v38, 30  ;;  %vm2215_vm11 = vcmp.lt.s32.totalorder %v2196_v55, 1  ;;  %v2208_v59 = vor.u32 %v2207_v18, %v2206_v24  ;;  %vm2218_vm13 = vcmp.lt.s32.totalorder %v2196_v55, 4 }
  0xe2   : > { %v2214_v54 = vor.u32 %v2213_v15, %v2212_v6  ;;  %v695_v52 = vsel %vm14676_vm6, %v14526_v56, %v692_v57  ;;  %v14720_v33 = vsel %vm14676_vm6, 0, %v694_v39  ;;  %vm2217_vm14 = vcmp.lt.s32.totalorder %v2196_v55, 3 }
  0xe3   : > { %20620 = vst [vmem:[#allocation18_spill] sm:$0xff] %v14720_v33  ;;  %v1511_v48 = vsub.s32 %v1507_v8, %v1510_v22  ;;  %vm2216_vm1 = vcmp.lt.s32.totalorder %v2196_v55, 2  ;;  %v2220_v40 = vsel %vm2218_vm13, %v2208_v59, 2102212464  ;;  %v2223_v31 = vsel %vm2215_vm11, %v2202_v49, %v2205_v50 }
  0xe4   : > { %v2231_v3 = vshll.u32 %v2191_v42, 8  ;;  %v2219_v25 = vsel %vm2215_vm11, %v2199_v32, %v2202_v49  ;;  %v2224_v46 = vsel %vm2218_vm13, %v2211_v35, 920167782  ;;  %v14727_v16 = vmul.f32 8.0, %v14578_v30 }
  0xe5   : > { %v1513_v14 = vsub.s32 0, %v1511_v48  ;;  %13552 = vcosq.f32 %v695_v52  ;;  %v2225_v57 = vsel %vm2217_vm14, %v2208_v59, %v2224_v46  ;;  %v2227_v22 = vsel %vm2215_vm11, %v2205_v50, %v2208_v59 }
  0xe6   : > { %20621 = vst [vmem:[#allocation19_spill] sm:$0xff] %v14727_v16  ;;  %v2228_v43 = vsel %vm2218_vm13, %v2214_v54, 1326507024  ;;  %v2221_v24 = vsel %vm2217_vm14, %v2205_v50, %v2220_v40  ;;  %v2226_v42 = vsel %vm2216_vm1, %v2223_v31, %v2225_v57  ;;  %v1533_v63 = vsub.s32 4, %v1509_v38 }
  0xe7   : > { %v12641_v8 = vmin.u32 %v1513_v14, %v1511_v48  ;;  %v2229_v18 = vsel %vm2217_vm14, %v2211_v35, %v2228_v43  ;;  %v14736_v10 = vmul.u32.u64.low %v2231_v3, %v2226_v42  ;;  %v14737_v30 = vmul.u32.u64.high %v2231_v3, %v2226_v42, %v14736_v10  ;;  %v13771_v42 = vld [vmem:[%s13974_s29 + $0x18] sm:$0xff] }
  0xe8   : > { %v2230_v5 = vsel %vm2216_vm1, %v2227_v22, %v2229_v18  ;;  %v700_v39 = vadd.s32 3, %v14720_v33  ;;  %13554 = vsinq.f32 %v695_v52  ;;  %v2222_v32 = vsel %vm2216_vm1, %v2219_v25, %v2221_v24 }
  0xe9   : > { %v1515_v6 = vclz %v12641_v8  ;;  %v14741_v54 = vmul.u32.u64.low %v2231_v3, %v2230_v5  ;;  %v14742_v49 = vmul.u32.u64.high %v2231_v3, %v2230_v5, %v14741_v54  ;;  %vm1449_vm3 = vcmp.lt.s32.totalorder %v14529_v28, 0 }
  0xea   : > { %v3026_v35 = vand.u32 2139095040, %v14727_v16  ;;  %v1534_v15 = vsel %vm1449_vm3, %v1533_v63, %v1509_v38  ;;  %v2241_v59 = vadd.s32 1, %v14737_v30  ;;  %v20276_v40 = vand.u32 2147483647, %v14727_v16 }
  0xeb   : > { %v12642_v50 = vadd.s32 4294967294, %v1515_v6  ;;  %v1503_v52 = vadd.s32 %v14653_v51, %v14650_v9  ;;  %v2238_v55 = vmul.u32 %v2231_v3, %v2222_v32  ;;  %v14752_v14 = vand.u32 3, %v700_v39 }
  0xec   : > { %v3027_v31 = vshrl.u32 %v3026_v35, 23  ;;  %v20622_v25 = vand.u32 2147483647, %v14529_v28  ;;  %vm2240_vm8 = vc.u32 %v14742_v49, %v14736_v10  ;;  %v3030_v24 = vand.u32 8388607, %v20276_v40 }
  0xed   : > { %vm12643_vm4 = vcmp.lt.s32.totalorder %v12642_v50, 0  ;;  %v2242_v3 = vsel %vm2240_vm8, %v2241_v59, %v14737_v30  ;;  %v14771_v18 = vmul.f32 4.0, %v13771_v42  ;;  %vm706_vm6 = vcmp.eq.s32.totalorder %v14752_v14, 2 }
  0xee   : > { %vm14756_vm5 = vcmp.le.f32.partialorder %v20622_v25, 0.7853982  ;;  %v1518_v38 = vsel %vm12643_vm4, 0, %v12642_v50  ;;  %v12700_v8 = vadd.s32 4294967169, %v3027_v31  ;;  %v2243_v39 = vadd.s32 %v2242_v3, %v2238_v55 }
  0xef   : > { %v1519_v57 = vsub.s32 32, %v1518_v38  ;;  %v1520_v22 = vshll.u32 %v1511_v48, %v1518_v38  ;;  %v1523_v43 = vsub.s32 4294967266, %v1518_v38  ;;  %v14763_v9 = vsel %vm14756_vm5, 0, %v1534_v15  ;;  %v14765_v51 = vpop.eup %13552  ;;  %20627 = vst [vmem:[#allocation22_spill] sm:$0xff] %v14771_v18 }
  0xf0   : > { %20625 = vst [vmem:[#allocation20_spill] sm:$0xff] %v14763_v9  ;;  %20626 = vst [vmem:[#allocation21_spill] sm:$0xff] %v14765_v51  ;;  %v1540_v48 = vadd.s32 3, %v14763_v9  ;;  %v3033_v6 = vadd.s32 1, %v12700_v8  ;;  %v2244_v50 = vadd.s32 536870912, %v2243_v39  ;;  %vm703_vm12 = vcmp.eq.s32.totalorder %v14752_v14, 0 }
  0xf1   : > { %v1521_v63 = vshrl.u32 %v1503_v52, %v1519_v57  ;;  %v1524_v5 = vadd.s32 127, %v1523_v43  ;;  %v20277_v30 = vxor.u32 2147483648, %v14765_v51  ;;  %v3031_v15 = vor.u32 8388608, %v3030_v24 }
  0xf2   : > { %v14775_v35 = vpop.eup %13554  ;;  %vm3034_vm11 = vcmp.gt.s32.totalorder %v3033_v6, 0  ;;  %v2394_v59 = vand.u32 2139095040, %v14771_v18  ;;  %v14780_v31 = vshrl.u32 %v2244_v50, 30  ;;  %v14782_v38 = vand.u32 3, %v1540_v48 }
  0xf3   : > { %v1522_v32 = vor.u32 %v1521_v63, %v1520_v22  ;;  %v1525_v54 = vshll.u32 %v1524_v5, 23  ;;  %20628 = vst [vmem:[#allocation23_spill] sm:$0xff] %v14775_v35  ;;  %v3035_v25 = vsel %vm3034_vm11, %v3033_v6, 0  ;;  %v14785_v43 = vmul.f32 8.0, %v13771_v42 }
  0xf4   : > { %v3037_v57 = vand.u32 31, %v3035_v25  ;;  %v14789_v24 = vadd.s32 %v14736_v10, %v14742_v49  ;;  %v2246_v63 = vshll.u32 %v14780_v31, 30  ;;  %v14797_v5 = vsel %vm706_vm6, %v20277_v30, %v14775_v35 }
  0xf5   : > { %v1526_v52 = vor.u32 4788187, %v1525_v54  ;;  %v1529_v55 = vcvt.s32.f32 %v1522_v32  ;;  %20629 = vst [vmem:[#allocation24_spill] sm:$0xff] %v14785_v43  ;;  %v14799_v6 = vshll.u32 %v3031_v15, 8  ;;  %v2395_v42 = vshrl.u32 %v2394_v59, 23 }
  0xf6   : > { %v3038_v48 = vsub.s32 32, %v3037_v57  ;;  %v14801_v54 = vsub.s32 %v2243_v39, %v2246_v63  ;;  %v3040_v50 = vshll.u32 %v20288_v37, %v3037_v57  ;;  %v3043_v10 = vshll.u32 %v20617_v36, %v3037_v57 }
  0xf7   : > { %v1527_v8 = vand.u32 2147483647, %v1526_v52  ;;  %v3046_v40 = vshll.u32 %v20618_v41, %v3037_v57  ;;  %v3049_v30 = vshll.u32 %v20619_v27, %v3037_v57  ;;  %v3036_v3 = vshrl.u32 %v3035_v25, 5 }
  0xf8   : > { %v3041_v49 = vshrl.u32 %v20617_v36, %v3038_v48  ;;  %v3044_v52 = vshrl.u32 %v20618_v41, %v3038_v48  ;;  %v2249_v15 = vsub.s32 0, %v14801_v54  ;;  %v3047_v59 = vshrl.u32 %v20619_v27, %v3038_v48 }
  0xf9   : > { %v1530_v32 = vmul.f32 %v1529_v55, %v1527_v8  ;;  %vm702_vm13 = vcmp.lt.s32.totalorder %v14752_v14, 2  ;;  %v3039_v39 = vshrl.u32 %v20288_v37, %v3038_v48  ;;  %v3050_v55 = vshrl.u32 %v20305_v45, %v3038_v48 }
  0xfa   : > { %v3052_v8 = vshll.u32 %v20305_v45, %v3037_v57  ;;  %v12676_v63 = vadd.s32 4294967169, %v2395_v42  ;;  %v12669_v9 = vmin.u32 %v2249_v15, %v14801_v54  ;;  %v3042_v33 = vor.u32 %v3041_v49, %v3040_v50 }
  0xfb   : > { %v1531_v22 = vxor.u32 2147483648, %v1530_v32  ;;  %v3045_v19 = vor.u32 %v3044_v52, %v3043_v10  ;;  %v3048_v7 = vor.u32 %v3047_v59, %v3046_v40  ;;  %v3051_v60 = vor.u32 %v3050_v55, %v3049_v30 }
  0xfc   : > { %v20630_v17 = vmov 1326507024   ;;  %vm20309_vm14 = vweird.f32 %v14526_v56  ;;  %v20631_v57 = vxor.u32 2147483648, %v14775_v35  ;;  %v2251_v42 = vclz %v12669_v9 }
  0xfd   : > { %v1532_v53 = vsel %vm1449_vm3, %v1531_v22, %v1530_v32  ;;  %v3053_v37 = vshrl.u32 %v20630_v17, %v3038_v48  ;;  %vm3055_vm1 = vcmp.lt.s32.totalorder %v3036_v3, 1  ;;  %vm3056_vm3 = vcmp.lt.s32.totalorder %v3036_v3, 2 }
  0xfe   : > { %v1535_v25 = vsel %vm14756_vm5, %v14529_v28, %v1532_v53  ;;  %v705_v22 = vsel %vm703_vm12, %v14765_v51, %v20631_v57  ;;  %v2401_v46 = vadd.s32 1, %v12676_v63  ;;  %v12670_v53 = vadd.s32 4294967294, %v2251_v42 }
  0xff   : > { %13556 = vcosq.f32 %v1535_v25  ;;  %v3054_v32 = vor.u32 %v3053_v37, %v3052_v8  ;;  %vm3057_vm4 = vcmp.lt.s32.totalorder %v3036_v3, 3  ;;  %vm3058_vm5 = vcmp.lt.s32.totalorder %v3036_v3, 4 }
 0x100   : > { %13558 = vsinq.f32 %v1535_v25  ;;  %v3059_v40 = vsel %vm3055_vm1, %v3039_v39, %v3042_v33  ;;  %v3060_v30 = vsel %vm3058_vm5, %v3048_v7, 2102212464  ;;  %v3063_v48 = vsel %vm3055_vm1, %v3042_v33, %v3045_v19 }
 0x101   : > { %v3064_v50 = vsel %vm3058_vm5, %v3051_v60, 920167782  ;;  %v3067_v10 = vsel %vm3055_vm1, %v3045_v19, %v3048_v7  ;;  %vm1542_vm8 = vcmp.lt.s32.totalorder %v14782_v38, 2  ;;  %vm12671_vm6 = vcmp.lt.s32.totalorder %v12670_v53, 0 }
 0x102   : > { %v3061_v49 = vsel %vm3057_vm4, %v3045_v19, %v3060_v30  ;;  %v3065_v9 = vsel %vm3057_vm4, %v3048_v7, %v3064_v50  ;;  %v3068_v52 = vsel %vm3058_vm5, %v3054_v32, 1326507024  ;;  %vm20308_vm12 = vweird.f32 %v14529_v28 }
 0x103   : > { %v2254_v37 = vsel %vm12671_vm6, 0, %v12670_v53  ;;  %v3062_v15 = vsel %vm3056_vm3, %v3059_v40, %v3061_v49  ;;  %v3066_v59 = vsel %vm3056_vm3, %v3063_v48, %v3065_v9  ;;  %v3069_v39 = vsel %vm3057_vm4, %v3051_v60, %v3068_v52 }
 0x104   : > { %v2255_v33 = vsub.s32 32, %v2254_v37  ;;  %v2256_v55 = vshll.u32 %v14801_v54, %v2254_v37  ;;  %v2259_v8 = vsub.s32 4294967266, %v2254_v37  ;;  %v3070_v63 = vsel %vm3056_vm3, %v3067_v10, %v3069_v39 }
 0x105   : > { %v14838_v19 = vmul.u32.u64.low %v14799_v6, %v3070_v63  ;;  %v14839_v25 = vmul.u32.u64.high %v14799_v6, %v3070_v63, %v14838_v19  ;;  %v14842_v7 = vmul.u32.u64.low %v14799_v6, %v3066_v59  ;;  %v14843_v57 = vmul.u32.u64.high %v14799_v6, %v3066_v59, %v14842_v7 }
 0x106   : > { %v709_v42 = vsel %vm702_vm13, %v705_v22, %v14797_v5  ;;  %v2257_v60 = vshrl.u32 %v14789_v24, %v2255_v33  ;;  %v2260_v32 = vadd.s32 127, %v2259_v8  ;;  %vm2402_vm11 = vcmp.gt.s32.totalorder %v2401_v46, 0 }
 0x107   : > { %vm1543_vm1 = vcmp.eq.s32.totalorder %v14782_v38, 0  ;;  %vm1546_vm3 = vcmp.eq.s32.totalorder %v14782_v38, 2  ;;  %vm2185_vm4 = vcmp.lt.s32.totalorder %v14581_v62, 0  ;;  %v20632_v3 = vand.u32 2147483647, %v14771_v18 }
 0x108   : > { %v2403_v53 = vsel %vm2402_vm11, %v2401_v46, 0  ;;  %v20634_v30 = vand.u32 2147483647, %v14581_v62  ;;  %v2258_v24 = vor.u32 %v2257_v60, %v2256_v55  ;;  %v2261_v5 = vshll.u32 %v2260_v32, 23 }
 0x109   : > { %v2398_v54 = vand.u32 8388607, %v20632_v3  ;;  %v14855_v40 = vpop.eup %13556  ;;  %v3078_v22 = vmul.u32 %v14799_v6, %v3062_v15  ;;  %v2405_v48 = vand.u32 31, %v2403_v53  ;;  %v710_v10 = vsel %vm20309_vm14, nan, %v709_v42 }
 0x10a   : > { %20633 = vst [vmem:[#allocation25_spill] sm:$0xff] %v14855_v40  ;;  %vm14859_vm5 = vcmp.le.f32.partialorder %v20634_v30, 0.7853982  ;;  %v14864_v50 = vpop.eup %13558  ;;  %v20290_v46 = vxor.u32 2147483648, %v14855_v40  ;;  %vm3080_vm13 = vc.u32 %v14839_v25, %v14842_v7  ;;  %v3081_v49 = vadd.s32 1, %v14843_v57 }
 0x10b   : > { %20637 = vst [vmem:[#allocation26_spill] sm:$0xff] %v14864_v50  ;;  %v20291_v9 = vxor.u32 2147483648, %v14864_v50  ;;  %v2262_v52 = vor.u32 4788187, %v2261_v5  ;;  %v2265_v37 = vcvt.s32.f32 %v2258_v24  ;;  %v2406_v59 = vsub.s32 32, %v2405_v48 }
 0x10c   : > { %v1548_v6 = vsel %vm1546_vm3, %v20290_v46, %v14864_v50  ;;  %v2269_v15 = vsub.s32 4, %v14780_v31  ;;  %v3082_v39 = vsel %vm3080_vm13, %v3081_v49, %v14843_v57  ;;  %v2399_v33 = vor.u32 8388608, %v2398_v54 }
 0x10d   : > { %v1545_v55 = vsel %vm1543_vm1, %v14855_v40, %v20291_v9  ;;  %v2263_v8 = vand.u32 2147483647, %v2262_v52  ;;  %v3083_v63 = vadd.s32 %v3082_v39, %v3078_v22  ;;  %v20638_v19 = vmov 683565275  }
 0x10e   : > { %v2408_v42 = vshll.u32 %v20638_v19, %v2405_v48  ;;  %v1549_v60 = vsel %vm1542_vm8, %v1545_v55, %v1548_v6  ;;  %v2409_v32 = vshrl.u32 %v20617_v36, %v2406_v59  ;;  %v2411_v3 = vshll.u32 %v20617_v36, %v2405_v48 }
 0x10f   : > { %v2412_v57 = vshrl.u32 %v20618_v41, %v2406_v59  ;;  %v1550_v54 = vsel %vm20308_vm12, nan, %v1549_v60  ;;  %v2266_v30 = vmul.f32 %v2265_v37, %v2263_v8  ;;  %v3084_v24 = vadd.s32 536870912, %v3083_v63 }
 0x110   : > { %v2404_v5 = vshrl.u32 %v2403_v53, 5  ;;  %v13109_v49 = vpack.c.bf16 %v1550_v54, %v710_v10  ;;  %v2414_v22 = vshll.u32 %v20618_v41, %v2405_v48  ;;  %v2415_v52 = vshrl.u32 %v20619_v27, %v2406_v59 }
 0x111   : > { %v2417_v38 = vshll.u32 %v20619_v27, %v2405_v48  ;;  %v2267_v6 = vxor.u32 2147483648, %v2266_v30  ;;  %v3085_v39 = vshrl.u32 %v3084_v24, 30  ;;  %v2407_v55 = vshrl.u32 %v20638_v19, %v2406_v59 }
 0x112   : > { %v2418_v46 = vshrl.u32 %v20305_v45, %v2406_v59  ;;  %13110 = vmatpush1.bf16.msra.mxu1 %v13109_v49  ;;  %v2410_v9 = vor.u32 %v2409_v32, %v2408_v42  ;;  %v2413_v28 = vor.u32 %v2412_v57, %v2411_v3  ;;  %v2420_v37 = vshll.u32 %v20305_v45, %v2405_v48 }
 0x113   : > { %v2421_v53 = vshrl.u32 %v20630_v17, %v2406_v59  ;;  %v2268_v10 = vsel %vm2185_vm4, %v2267_v6, %v2266_v30  ;;  %v3086_v8 = vshll.u32 %v3085_v39, 30  ;;  %vm2423_vm8 = vcmp.lt.s32.totalorder %v2404_v5, 1 }
 0x114   : > { %v2419_v60 = vor.u32 %v2418_v46, %v2417_v38  ;;  %v2271_v54 = vsel %vm14859_vm5, %v14581_v62, %v2268_v10  ;;  %v2416_v24 = vor.u32 %v2415_v52, %v2414_v22  ;;  %vm2426_vm6 = vcmp.lt.s32.totalorder %v2404_v5, 4 }
 0x115   : > { %v2422_v40 = vor.u32 %v2421_v53, %v2420_v37  ;;  %v2270_v42 = vsel %vm2185_vm4, %v2269_v15, %v14780_v31  ;;  %v3087_v48 = vsub.s32 %v3083_v63, %v3086_v8  ;;  %vm2425_vm11 = vcmp.lt.s32.totalorder %v2404_v5, 3 }
 0x116   : > { %v2439_v59 = vshll.u32 %v2399_v33, 8  ;;  %vm2424_vm1 = vcmp.lt.s32.totalorder %v2404_v5, 2  ;;  %v2428_v32 = vsel %vm2426_vm6, %v2416_v24, 2102212464  ;;  %v2431_v46 = vsel %vm2423_vm8, %v2410_v9, %v2413_v28 }
 0x117   : > { %v3234_v3 = vand.u32 2139095040, %v14785_v43  ;;  %13560 = vcosq.f32 %v2271_v54  ;;  %v3089_v57 = vsub.s32 0, %v3087_v48  ;;  %v3109_v30 = vsub.s32 4, %v3085_v39 }
 0x118   : > { %v2432_v49 = vsel %vm2426_vm6, %v2419_v60, 920167782  ;;  %v2427_v22 = vsel %vm2423_vm8, %v2407_v55, %v2410_v9  ;;  %v2435_v31 = vsel %vm2423_vm8, %v2413_v28, %v2416_v24  ;;  %v2436_v15 = vsel %vm2426_vm6, %v2422_v40, 1326507024 }
 0x119   : > { %v2433_v52 = vsel %vm2425_vm11, %v2416_v24, %v2432_v49  ;;  %v12701_v33 = vmin.u32 %v3089_v57, %v3087_v48  ;;  %v2429_v63 = vsel %vm2425_vm11, %v2413_v28, %v2428_v32  ;;  %v2437_v6 = vsel %vm2425_vm11, %v2419_v60, %v2436_v15 }
 0x11a   : > { %v2434_v38 = vsel %vm2424_vm1, %v2431_v46, %v2433_v52  ;;  %v2438_v37 = vsel %vm2424_vm1, %v2435_v31, %v2437_v6  ;;  %v14925_v9 = vsel %vm14859_vm5, 0, %v2270_v42  ;;  %vm3025_vm3 = vcmp.lt.s32.totalorder %v14727_v16, 0 }
 0x11b   : > { %v14920_v53 = vmul.u32.u64.low %v2439_v59, %v2434_v38  ;;  %v14921_v10 = vmul.u32.u64.high %v2439_v59, %v2434_v38, %v14920_v53  ;;  %20639 = vst [vmem:[#allocation27_spill] sm:$0xff] %v14925_v9  ;;  %v3091_v55 = vclz %v12701_v33  ;;  %v2430_v40 = vsel %vm2424_vm1, %v2427_v22, %v2429_v63 }
 0x11c   : > { %v14929_v8 = vmul.u32.u64.low %v2439_v59, %v2438_v37  ;;  %v14930_v28 = vmul.u32.u64.high %v2439_v59, %v2438_v37, %v14929_v8  ;;  %v3235_v24 = vshrl.u32 %v3234_v3, 23  ;;  %13562 = vsinq.f32 %v2271_v54 }
 0x11d   : > { %v12702_v60 = vadd.s32 4294967294, %v3091_v55  ;;  %v3110_v32 = vsel %vm3025_vm3, %v3109_v30, %v3085_v39  ;;  %v20640_v46 = vand.u32 2147483647, %v14727_v16  ;;  %v2449_v42 = vadd.s32 1, %v14921_v10 }
 0x11e   : > { %v12708_v57 = vadd.s32 4294967169, %v3235_v24  ;;  %v2276_v5 = vadd.s32 3, %v14925_v9  ;;  %v3079_v49 = vadd.s32 %v14842_v7, %v14839_v25  ;;  %v2446_v54 = vmul.u32 %v2439_v59, %v2430_v40 }
 0x11f   : > { %vm14936_vm4 = vcmp.le.f32.partialorder %v20640_v46, 0.7853982  ;;  %vm12703_vm5 = vcmp.lt.s32.totalorder %v12702_v60, 0  ;;  %vm2448_vm13 = vc.u32 %v14930_v28, %v14920_v53  ;;  %v20296_v30 = vand.u32 2147483647, %v14785_v43 }
 0x120   : > { %v3094_v3 = vsel %vm12703_vm5, 0, %v12702_v60  ;;  %v14946_v39 = vsel %vm14936_vm4, 0, %v3110_v32  ;;  %v14953_v33 = vmul.f32 4.0, %v14504_v1  ;;  %v2450_v25 = vsel %vm2448_vm13, %v2449_v42, %v14921_v10 }
 0x121   : > { %20643 = vst [vmem:[#allocation28_spill] sm:$0xff] %v14946_v39  ;;  %v14950_v22 = vpop.eup %13560  ;;  %v3095_v52 = vsub.s32 32, %v3094_v3  ;;  %v3096_v31 = vshll.u32 %v3087_v48, %v3094_v3  ;;  %v3099_v15 = vsub.s32 4294967266, %v3094_v3  ;;  %v3241_v7 = vadd.s32 1, %v12708_v57 }
 0x122   : > { %20644 = vst [vmem:[#allocation29_spill] sm:$0xff] %v14950_v22  ;;  %20645 = vst [vmem:[#allocation30_spill] sm:$0xff] %v14953_v33  ;;  %v14956_v59 = vand.u32 3, %v2276_v5  ;;  %v2451_v6 = vadd.s32 %v2450_v25, %v2446_v54  ;;  %v3116_v37 = vadd.s32 3, %v14946_v39  ;;  %v3238_v55 = vand.u32 8388607, %v20296_v30 }
 0x123   : > { %v3097_v63 = vshrl.u32 %v3079_v49, %v3095_v52  ;;  %v3100_v38 = vadd.s32 127, %v3099_v15  ;;  %vm3242_vm8 = vcmp.gt.s32.totalorder %v3241_v7, 0  ;;  %v2082_v24 = vand.u32 2139095040, %v14953_v33 }
 0x124   : > { %v2452_v8 = vadd.s32 536870912, %v2451_v6  ;;  %v20295_v60 = vxor.u32 2147483648, %v14950_v22  ;;  %v3243_v10 = vsel %vm3242_vm8, %v3241_v7, 0  ;;  %vm2282_vm6 = vcmp.eq.s32.totalorder %v14956_v59, 2 }
 0x125   : > { %v3098_v40 = vor.u32 %v3097_v63, %v3096_v31  ;;  %v3101_v48 = vshll.u32 %v3100_v38, 23  ;;  %v14968_v5 = vand.u32 3, %v3116_v37  ;;  %v3239_v49 = vor.u32 8388608, %v3238_v55 }
 0x126   : > { %v14963_v32 = vpop.eup %13562  ;;  %v14966_v57 = vshrl.u32 %v2452_v8, 30  ;;  %v3245_v54 = vand.u32 31, %v3243_v10  ;;  %v14972_v31 = vadd.s32 %v14920_v53, %v14930_v28  ;;  %v2083_v25 = vshrl.u32 %v2082_v24, 23 }
 0x127   : > { %20646 = vst [vmem:[#allocation31_spill] sm:$0xff] %v14963_v32  ;;  %v3102_v46 = vor.u32 4788187, %v3101_v48  ;;  %v3105_v42 = vcvt.s32.f32 %v3098_v40  ;;  %v14979_v63 = vsel %vm2282_vm6, %v20295_v60, %v14963_v32  ;;  %v3244_v38 = vshrl.u32 %v3243_v10, 5 }
 0x128   : > { %v2454_v15 = vshll.u32 %v14966_v57, 30  ;;  %v3246_v37 = vsub.s32 32, %v3245_v54  ;;  %vm2279_vm11 = vcmp.eq.s32.totalorder %v14956_v59, 0  ;;  %v3248_v53 = vshll.u32 %v20638_v19, %v3245_v54 }
 0x129   : > { %v3103_v52 = vand.u32 2147483647, %v3102_v46  ;;  %v3251_v28 = vshll.u32 %v20617_v36, %v3245_v54  ;;  %v3254_v24 = vshll.u32 %v20618_v41, %v3245_v54  ;;  %v3257_v46 = vshll.u32 %v20619_v27, %v3245_v54 }
 0x12a   : > { %v14982_v40 = vsub.s32 %v2451_v6, %v2454_v15  ;;  %v3249_v48 = vshrl.u32 %v20617_v36, %v3246_v37  ;;  %v3252_v8 = vshrl.u32 %v20618_v41, %v3246_v37  ;;  %v3255_v30 = vshrl.u32 %v20619_v27, %v3246_v37 }
 0x12b   : > { %v3106_v55 = vmul.f32 %v3105_v42, %v3103_v52  ;;  %v12664_v42 = vadd.s32 4294967169, %v2083_v25  ;;  %vm2278_vm1 = vcmp.lt.s32.totalorder %v14956_v59, 2  ;;  %v3247_v6 = vshrl.u32 %v20638_v19, %v3246_v37 }
 0x12c   : > { %v2457_v10 = vsub.s32 0, %v14982_v40  ;;  %v3258_v52 = vshrl.u32 %v20305_v45, %v3246_v37  ;;  %v3260_v15 = vshll.u32 %v20305_v45, %v3245_v54  ;;  %vm3263_vm5 = vcmp.lt.s32.totalorder %v3244_v38, 1 }
 0x12d   : > { %v3107_v60 = vxor.u32 2147483648, %v3106_v55  ;;  %v3250_v50 = vor.u32 %v3249_v48, %v3248_v53  ;;  %v3253_v56 = vor.u32 %v3252_v8, %v3251_v28  ;;  %v3256_v51 = vor.u32 %v3255_v30, %v3254_v24 }
 0x12e   : > { %v12677_v7 = vmin.u32 %v2457_v10, %v14982_v40  ;;  %v3259_v35 = vor.u32 %v3258_v52, %v3257_v46  ;;  %v3261_v39 = vshrl.u32 %v20630_v17, %v3246_v37  ;;  %vm20352_vm13 = vweird.f32 %v14581_v62 }
 0x12f   : > { %v3108_v3 = vsel %vm3025_vm3, %v3107_v60, %v3106_v55  ;;  %v15004_v45 = vshll.u32 %v3239_v49, 8  ;;  %v2089_v9 = vadd.s32 1, %v12664_v42  ;;  %vm3264_vm3 = vcmp.lt.s32.totalorder %v3244_v38, 2 }
 0x130   : > { %v3111_v25 = vsel %vm14936_vm4, %v14727_v16, %v3108_v3  ;;  %v2459_v54 = vclz %v12677_v7  ;;  %v3262_v60 = vor.u32 %v3261_v39, %v3260_v15  ;;  %vm3265_vm8 = vcmp.lt.s32.totalorder %v3244_v38, 3 }
 0x131   : > { %13564 = vcosq.f32 %v3111_v25  ;;  %vm3266_vm6 = vcmp.lt.s32.totalorder %v3244_v38, 4  ;;  %v3267_v14 = vsel %vm3263_vm5, %v3247_v6, %v3250_v50  ;;  %v3271_v30 = vsel %vm3263_vm5, %v3250_v50, %v3253_v56 }
 0x132   : > { %13566 = vsinq.f32 %v3111_v25  ;;  %v12678_v55 = vadd.s32 4294967294, %v2459_v54  ;;  %vm3119_vm4 = vcmp.eq.s32.totalorder %v14968_v5, 0  ;;  %v3268_v3 = vsel %vm3266_vm6, %v3256_v51, 2102212464 }
 0x133   : > { %v3272_v37 = vsel %vm3266_vm6, %v3259_v35, 920167782  ;;  %v3275_v53 = vsel %vm3263_vm5, %v3253_v56, %v3256_v51  ;;  %v3276_v7 = vsel %vm3266_vm6, %v3262_v60, 1326507024  ;;  %vm3118_vm12 = vcmp.lt.s32.totalorder %v14968_v5, 2 }
 0x134   : > { %vm12679_vm14 = vcmp.lt.s32.totalorder %v12678_v55, 0  ;;  %v3269_v49 = vsel %vm3265_vm8, %v3253_v56, %v3268_v3  ;;  %v3273_v39 = vsel %vm3265_vm8, %v3256_v51, %v3272_v37  ;;  %v3277_v28 = vsel %vm3265_vm8, %v3259_v35, %v3276_v7 }
 0x135   : > { %v20647_v48 = vxor.u32 2147483648, %v14963_v32  ;;  %vm20351_vm0 = vweird.f32 %v14727_v16  ;;  %v2462_v50 = vsel %vm12679_vm14, 0, %v12678_v55  ;;  %v3274_v24 = vsel %vm3264_vm3, %v3271_v30, %v3273_v39 }
 0x136   : > { %v3278_v46 = vsel %vm3264_vm3, %v3275_v53, %v3277_v28  ;;  %v2463_v10 = vsub.s32 32, %v2462_v50  ;;  %v2464_v42 = vshll.u32 %v14982_v40, %v2462_v50  ;;  %v2467_v56 = vsub.s32 4294967266, %v2462_v50 }
 0x137   : > { %v2281_v8 = vsel %vm2279_vm11, %v14950_v22, %v20647_v48  ;;  %v3270_v51 = vsel %vm3264_vm3, %v3267_v14, %v3269_v49  ;;  %v15022_v35 = vmul.u32.u64.low %v15004_v45, %v3278_v46  ;;  %v15023_v6 = vmul.u32.u64.high %v15004_v45, %v3278_v46, %v15022_v35  ;;  %v13772_v14 = vld [vmem:[%s13974_s29] sm:$0xff] }
 0x138   : > { %v15026_v52 = vmul.u32.u64.low %v15004_v45, %v3274_v24  ;;  %v15027_v15 = vmul.u32.u64.high %v15004_v45, %v3274_v24, %v15026_v52  ;;  %v2285_v25 = vsel %vm2278_vm1, %v2281_v8, %v14979_v63  ;;  %v2465_v54 = vshrl.u32 %v14972_v31, %v2463_v10 }
 0x139   : > { %v2468_v60 = vadd.s32 127, %v2467_v56  ;;  %vm2090_vm14 = vcmp.gt.s32.totalorder %v2089_v9, 0  ;;  %vm3122_vm11 = vcmp.eq.s32.totalorder %v14968_v5, 2  ;;  %vm2393_vm5 = vcmp.lt.s32.totalorder %v14771_v18, 0 }
 0x13a   : > { %v20648_v38 = vand.u32 2147483647, %v14953_v33  ;;  %v2091_v55 = vsel %vm2090_vm14, %v2089_v9, 0  ;;  %v15039_v30 = vmul.f32 8.0, %v13772_v14  ;;  %v20651_v59 = vand.u32 2147483647, %v14771_v18 }
 0x13b   : > { %v15041_v3 = vpop.eup %13564  ;;  %v2466_v31 = vor.u32 %v2465_v54, %v2464_v42  ;;  %v2469_v37 = vshll.u32 %v2468_v60, 23  ;;  %v3286_v53 = vmul.u32 %v15004_v45, %v3270_v51  ;;  %v2093_v7 = vand.u32 31, %v2091_v55 }
 0x13c   : > { %v2086_v40 = vand.u32 8388607, %v20648_v38  ;;  %20649 = vst [vmem:[#allocation32_spill] sm:$0xff] %v15039_v30  ;;  %20650 = vst [vmem:[#allocation33_spill] sm:$0xff] %v15041_v3  ;;  %vm15045_vm1 = vcmp.le.f32.partialorder %v20651_v59, 0.7853982  ;;  %v15050_v49 = vpop.eup %13566  ;;  %vm3288_vm3 = vc.u32 %v15023_v6, %v15026_v52 }
 0x13d   : > { %20654 = vst [vmem:[#allocation34_spill] sm:$0xff] %v15050_v49  ;;  %v2286_v9 = vsel %vm20352_vm13, nan, %v2285_v25  ;;  %v20311_v39 = vxor.u32 2147483648, %v15041_v3  ;;  %v3289_v28 = vadd.s32 1, %v15027_v15  ;;  %v20312_v48 = vxor.u32 2147483648, %v15050_v49 }
 0x13e   : > { %v2470_v8 = vor.u32 4788187, %v2469_v37  ;;  %v2473_v50 = vcvt.s32.f32 %v2466_v31  ;;  %v2094_v24 = vsub.s32 32, %v2093_v7  ;;  %v2477_v46 = vsub.s32 4, %v14966_v57 }
 0x13f   : > { %v3124_v45 = vsel %vm3122_vm11, %v20311_v39, %v15050_v49  ;;  %v3290_v10 = vsel %vm3288_vm3, %v3289_v28, %v15027_v15  ;;  %v2087_v42 = vor.u32 8388608, %v2086_v40  ;;  %v3121_v56 = vsel %vm3119_vm4, %v15041_v3, %v20312_v48 }
 0x140   : > { %v2471_v51 = vand.u32 2147483647, %v2470_v8  ;;  %v3291_v35 = vadd.s32 %v3290_v10, %v3286_v53  ;;  %v2096_v25 = vshll.u32 %v20638_v19, %v2093_v7  ;;  %v3125_v54 = vsel %vm3118_vm12, %v3121_v56, %v3124_v45 }
 0x141   : > { %v2097_v60 = vshrl.u32 %v20617_v36, %v2094_v24  ;;  %v2099_v38 = vshll.u32 %v20617_v36, %v2093_v7  ;;  %v2100_v15 = vshrl.u32 %v20618_v41, %v2094_v24  ;;  %v3126_v40 = vsel %vm20351_vm0, nan, %v3125_v54 }
 0x142   : > { %v2474_v14 = vmul.f32 %v2473_v50, %v2471_v51  ;;  %v3292_v59 = vadd.s32 536870912, %v3291_v35  ;;  %v2092_v31 = vshrl.u32 %v2091_v55, 5  ;;  %v13059_v37 = vpack.c.bf16 %v3126_v40, %v2286_v9 }
 0x143   : > { %v2102_v53 = vshll.u32 %v20618_v41, %v2093_v7  ;;  %v2103_v28 = vshrl.u32 %v20619_v27, %v2094_v24  ;;  %v2105_v5 = vshll.u32 %v20619_v27, %v2093_v7  ;;  %v2095_v10 = vshrl.u32 %v20638_v19, %v2094_v24 }
 0x144   : > { %v2475_v8 = vxor.u32 2147483648, %v2474_v14  ;;  %v3293_v45 = vshrl.u32 %v3292_v59, 30  ;;  %v20655_v56 = vmov 920167782   ;;  %13060 = vmatprep.subr.bf16.mxu0 %v13059_v37  ;;  %v2098_v48 = vor.u32 %v2097_v60, %v2096_v25 }
 0x145   : > { %v2106_v39 = vshrl.u32 %v20655_v56, %v2094_v24  ;;  %v2101_v16 = vor.u32 %v2100_v15, %v2099_v38  ;;  %v2108_v50 = vshll.u32 %v20655_v56, %v2093_v7  ;;  %v2109_v55 = vshrl.u32 %v20630_v17, %v2094_v24 }
 0x146   : > { %v2476_v9 = vsel %vm2393_vm5, %v2475_v8, %v2474_v14  ;;  %v3294_v51 = vshll.u32 %v3293_v45, 30  ;;  %vm2111_vm12 = vcmp.lt.s32.totalorder %v2092_v31, 1  ;;  %v2104_v59 = vor.u32 %v2103_v28, %v2102_v53 }
 0x147   : > { %v2107_v54 = vor.u32 %v2106_v39, %v2105_v5  ;;  %v2479_v40 = vsel %vm15045_vm1, %v14771_v18, %v2476_v9  ;;  %v2110_v62 = vor.u32 %v2109_v55, %v2108_v50  ;;  %vm2114_vm8 = vcmp.lt.s32.totalorder %v2092_v31, 4 }
 0x148   : > { %v2478_v25 = vsel %vm2393_vm5, %v2477_v46, %v14966_v57  ;;  %v15094_v7 = vsub.s32 %v3291_v35, %v3294_v51  ;;  %vm2113_vm6 = vcmp.lt.s32.totalorder %v2092_v31, 3  ;;  %v2127_v24 = vshll.u32 %v2087_v42, 8 }
 0x149   : > { %vm2112_vm4 = vcmp.lt.s32.totalorder %v2092_v31, 2  ;;  %v2116_v60 = vsel %vm2114_vm8, %v2104_v59, 2102212464  ;;  %v2119_v39 = vsel %vm2111_vm12, %v2098_v48, %v2101_v16  ;;  %v2922_v38 = vand.u32 2139095040, %v15039_v30 }
 0x14a   : > { %13568 = vcosq.f32 %v2479_v40  ;;  %v3297_v15 = vsub.s32 0, %v15094_v7  ;;  %v2115_v14 = vsel %vm2111_vm12, %v2095_v10, %v2098_v48  ;;  %v2120_v37 = vsel %vm2114_vm8, %v2107_v54, 920167782 }
 0x14b   : > { %13570 = vsinq.f32 %v2479_v40  ;;  %v2121_v57 = vsel %vm2113_vm6, %v2104_v59, %v2120_v37  ;;  %v2123_v46 = vsel %vm2111_vm12, %v2101_v16, %v2104_v59  ;;  %v2124_v42 = vsel %vm2114_vm8, %v2110_v62, 1326507024 }
 0x14c   : > { %v12709_v35 = vmin.u32 %v3297_v15, %v15094_v7  ;;  %v2117_v53 = vsel %vm2113_vm6, %v2101_v16, %v2116_v60  ;;  %v2122_v28 = vsel %vm2112_vm4, %v2119_v39, %v2121_v57  ;;  %v2125_v5 = vsel %vm2113_vm6, %v2107_v54, %v2124_v42  ;;  %v15137_v57 = vld [vmem:[%s13974_s29 + $0x10] sm:$0xff] }
 0x14d   : > { %v3317_v8 = vsub.s32 4, %v3293_v45  ;;  %v2126_v48 = vsel %vm2112_vm4, %v2123_v46, %v2125_v5  ;;  %v15110_v10 = vmul.u32.u64.low %v2127_v24, %v2122_v28  ;;  %v15111_v50 = vmul.u32.u64.high %v2127_v24, %v2122_v28, %v15110_v10 }
 0x14e   : > { %v15115_v55 = vsel %vm15045_vm1, 0, %v2478_v25  ;;  %v3299_v9 = vclz %v12709_v35  ;;  %v2118_v62 = vsel %vm2112_vm4, %v2115_v14, %v2117_v53  ;;  %v2923_v40 = vshrl.u32 %v2922_v38, 23 }
 0x14f   : > { %20656 = vst [vmem:[#allocation35_spill] sm:$0xff] %v15115_v55  ;;  %v15118_v51 = vmul.u32.u64.low %v2127_v24, %v2126_v48  ;;  %v15119_v16 = vmul.u32.u64.high %v2127_v24, %v2126_v48, %v15118_v51  ;;  %vm3233_vm14 = vcmp.lt.s32.totalorder %v14785_v43, 0  ;;  %v20316_v59 = vand.u32 2147483647, %v15039_v30 }
 0x150   : > { %v12710_v54 = vadd.s32 4294967294, %v3299_v9  ;;  %v2484_v60 = vadd.s32 3, %v15115_v55  ;;  %v3318_v63 = vsel %vm3233_vm14, %v3317_v8, %v3293_v45  ;;  %v2137_v25 = vadd.s32 1, %v15111_v50 }
 0x151   : > { %v12696_v39 = vadd.s32 4294967169, %v2923_v40  ;;  %v3287_v31 = vadd.s32 %v15026_v52, %v15023_v6  ;;  %v2134_v15 = vmul.u32 %v2127_v24, %v2118_v62  ;;  %v20657_v38 = vand.u32 2147483647, %v14785_v43 }
 0x152   : > { %vm12711_vm11 = vcmp.lt.s32.totalorder %v12710_v54, 0  ;;  %vm2136_vm1 = vc.u32 %v15119_v16, %v15110_v10  ;;  %v15140_v45 = vmul.f32 4.0, %v15137_v57  ;;  %v15151_v53 = vand.u32 3, %v2484_v60 }
 0x153   : > { %vm15131_vm5 = vcmp.le.f32.partialorder %v20657_v38, 0.7853982  ;;  %v3302_v37 = vsel %vm12711_vm11, 0, %v12710_v54  ;;  %v2138_v28 = vsel %vm2136_vm1, %v2137_v25, %v15111_v50  ;;  %v2926_v5 = vand.u32 8388607, %v20316_v59 }
 0x154   : > { %20660 = vst [vmem:[#allocation36_spill] sm:$0xff] %v15140_v45  ;;  %v15142_v46 = vpop.eup %13568  ;;  %v3303_v42 = vsub.s32 32, %v3302_v37  ;;  %v3304_v6 = vshll.u32 %v15094_v7, %v3302_v37  ;;  %v3307_v52 = vsub.s32 4294967266, %v3302_v37  ;;  %v15147_v24 = vsel %vm15131_vm5, 0, %v3318_v63 }
 0x155   : > { %20661 = vst [vmem:[#allocation37_spill] sm:$0xff] %v15142_v46  ;;  %20662 = vst [vmem:[#allocation38_spill] sm:$0xff] %v15147_v24  ;;  %v15149_v35 = vpop.eup %13570  ;;  %v2929_v8 = vadd.s32 1, %v12696_v39  ;;  %v2139_v62 = vadd.s32 %v2138_v28, %v2134_v15  ;;  %v3324_v7 = vadd.s32 3, %v15147_v24  ;;  %v20315_v51 = vand.u32 2147483647, %v15140_v45 }
 0x156   : > { %20663 = vst [vmem:[#allocation39_spill] sm:$0xff] %v15149_v35  ;;  %v3305_v48 = vshrl.u32 %v3287_v31, %v3303_v42  ;;  %v3308_v9 = vadd.s32 127, %v3307_v52  ;;  %v2290_v40 = vand.u32 2139095040, %v15140_v45  ;;  %v20317_v54 = vxor.u32 2147483648, %v15142_v46 }
 0x157   : > { %vm2930_vm3 = vcmp.gt.s32.totalorder %v2929_v8, 0  ;;  %v2140_v38 = vadd.s32 536870912, %v2139_v62  ;;  %vm2486_vm12 = vcmp.lt.s32.totalorder %v15151_v53, 2  ;;  %v20319_v50 = vxor.u32 2147483648, %v15149_v35 }
 0x158   : > { %v3306_v60 = vor.u32 %v3305_v48, %v3304_v6  ;;  %v3309_v63 = vshll.u32 %v3308_v9, 23  ;;  %vm2490_vm8 = vcmp.eq.s32.totalorder %v15151_v53, 2  ;;  %v2927_v25 = vor.u32 8388608, %v2926_v5 }
 0x159   : > { %v2931_v39 = vsel %vm2930_vm3, %v2929_v8, 0  ;;  %vm2487_vm6 = vcmp.eq.s32.totalorder %v15151_v53, 0  ;;  %v15164_v37 = vshrl.u32 %v2140_v38, 30  ;;  %v15166_v42 = vand.u32 3, %v3324_v7 }
 0x15a   : > { %v3310_v31 = vor.u32 4788187, %v3309_v63  ;;  %v3313_v15 = vcvt.s32.f32 %v3306_v60  ;;  %v15169_v6 = vadd.s32 %v15110_v10, %v15119_v16  ;;  %v2933_v52 = vand.u32 31, %v2931_v39 }
 0x15b   : > { %v15173_v28 = vand.u32 8388607, %v20315_v51  ;;  %v2492_v5 = vsel %vm2490_vm8, %v20317_v54, %v15149_v35  ;;  %v2142_v48 = vshll.u32 %v15164_v37, 30  ;;  %v2291_v9 = vshrl.u32 %v2290_v40, 23 }
 0x15c   : > { %v3311_v8 = vand.u32 2147483647, %v3310_v31  ;;  %v2489_v7 = vsel %vm2487_vm6, %v15142_v46, %v20319_v50  ;;  %v2932_v60 = vshrl.u32 %v2931_v39, 5  ;;  %v2934_v10 = vsub.s32 32, %v2933_v52 }
 0x15d   : > { %v15182_v16 = vshll.u32 %v2927_v25, 8  ;;  %v15184_v38 = vsub.s32 %v2139_v62, %v2142_v48  ;;  %v2936_v51 = vshll.u32 %v20638_v19, %v2933_v52  ;;  %v2939_v59 = vshll.u32 %v20617_v36, %v2933_v52 }
 0x15e   : > { %v3314_v63 = vmul.f32 %v3313_v15, %v3311_v8  ;;  %v2937_v31 = vshrl.u32 %v20617_v36, %v2934_v10  ;;  %v2940_v54 = vshrl.u32 %v20618_v41, %v2934_v10  ;;  %v2942_v40 = vshll.u32 %v20618_v41, %v2933_v52 }
 0x15f   : > { %v2945_v24 = vshll.u32 %v20619_v27, %v2933_v52  ;;  %v2145_v39 = vsub.s32 0, %v15184_v38  ;;  %v2943_v25 = vshrl.u32 %v20619_v27, %v2934_v10  ;;  %v12672_v15 = vadd.s32 4294967169, %v2291_v9 }
 0x160   : > { %v3315_v50 = vxor.u32 2147483648, %v3314_v63  ;;  %v2935_v62 = vshrl.u32 %v20638_v19, %v2934_v10  ;;  %v2946_v8 = vshrl.u32 %v20655_v56, %v2934_v10  ;;  %v2948_v48 = vshll.u32 %v20655_v56, %v2933_v52 }
 0x161   : > { %vm2951_vm4 = vcmp.lt.s32.totalorder %v2932_v60, 1  ;;  %vm20350_vm11 = vweird.f32 %v14771_v18  ;;  %v12665_v35 = vmin.u32 %v2145_v39, %v15184_v38  ;;  %v2938_v3 = vor.u32 %v2937_v31, %v2936_v51 }
 0x162   : > { %v3316_v46 = vsel %vm3233_vm14, %v3315_v50, %v3314_v63  ;;  %v2941_v49 = vor.u32 %v2940_v54, %v2939_v59  ;;  %v2944_v22 = vor.u32 %v2943_v25, %v2942_v40  ;;  %v2947_v32 = vor.u32 %v2946_v8, %v2945_v24 }
 0x163   : > { %v3319_v9 = vsel %vm15131_vm5, %v14785_v43, %v3316_v46  ;;  %v2949_v55 = vshrl.u32 %v20630_v17, %v2934_v10  ;;  %v2493_v52 = vsel %vm2486_vm12, %v2489_v7, %v2492_v5  ;;  %v2147_v1 = vclz %v12665_v35 }
 0x164   : > { %13572 = vcosq.f32 %v3319_v9  ;;  %v2297_v2 = vadd.s32 1, %v12672_v15  ;;  %vm2952_vm14 = vcmp.lt.s32.totalorder %v2932_v60, 2  ;;  %vm2953_vm1 = vcmp.lt.s32.totalorder %v2932_v60, 3 }
 0x165   : > { %13574 = vsinq.f32 %v3319_v9  ;;  %v2950_v50 = vor.u32 %v2949_v55, %v2948_v48  ;;  %v12666_v51 = vadd.s32 4294967294, %v2147_v1  ;;  %vm2954_vm3 = vcmp.lt.s32.totalorder %v2932_v60, 4 }
 0x166   : > { %v2955_v59 = vsel %vm2951_vm4, %v2935_v62, %v2938_v3  ;;  %v2959_v14 = vsel %vm2951_vm4, %v2938_v3, %v2941_v49  ;;  %v2956_v46 = vsel %vm2954_vm3, %v2944_v22, 2102212464  ;;  %v2960_v24 = vsel %vm2954_vm3, %v2947_v32, 920167782 }
 0x167   : > { %v2963_v54 = vsel %vm2951_vm4, %v2941_v49, %v2944_v22  ;;  %v2964_v10 = vsel %vm2954_vm3, %v2950_v50, 1326507024  ;;  %vm3326_vm5 = vcmp.lt.s32.totalorder %v15166_v42, 2  ;;  %vm2081_vm12 = vcmp.lt.s32.totalorder %v14953_v33, 0 }
 0x168   : > { %vm12667_vm8 = vcmp.lt.s32.totalorder %v12666_v51, 0  ;;  %v2957_v35 = vsel %vm2953_vm1, %v2941_v49, %v2956_v46  ;;  %v2961_v55 = vsel %vm2953_vm1, %v2944_v22, %v2960_v24  ;;  %v2965_v53 = vsel %vm2953_vm1, %v2947_v32, %v2964_v10 }
 0x169   : > { %vm20349_vm6 = vweird.f32 %v14785_v43  ;;  %v2150_v1 = vsel %vm12667_vm8, 0, %v12666_v51  ;;  %v2962_v5 = vsel %vm2952_vm14, %v2959_v14, %v2961_v55  ;;  %v2966_v3 = vsel %vm2952_vm14, %v2963_v54, %v2965_v53 }
 0x16a   : > { %v2295_v7 = vor.u32 8388608, %v15173_v28  ;;  %v2151_v63 = vsub.s32 32, %v2150_v1  ;;  %v2152_v31 = vshll.u32 %v15184_v38, %v2150_v1  ;;  %v2155_v40 = vsub.s32 4294967266, %v2150_v1 }
 0x16b   : > { %v2958_v39 = vsel %vm2952_vm14, %v2955_v59, %v2957_v35  ;;  %v15219_v25 = vmul.u32.u64.low %v15182_v16, %v2966_v3  ;;  %v15220_v49 = vmul.u32.u64.high %v15182_v16, %v2966_v3, %v15219_v25  ;;  %vm3327_vm4 = vcmp.eq.s32.totalorder %v15166_v42, 0 }
 0x16c   : > { %v15223_v22 = vmul.u32.u64.low %v15182_v16, %v2962_v5  ;;  %v15224_v32 = vmul.u32.u64.high %v15182_v16, %v2962_v5, %v15223_v22  ;;  %v2153_v15 = vshrl.u32 %v15169_v6, %v2151_v63  ;;  %v2156_v28 = vadd.s32 127, %v2155_v40 }
 0x16d   : > { %vm2298_vm1 = vcmp.gt.s32.totalorder %v2297_v2, 0  ;;  %v2494_v38 = vsel %vm20350_vm11, nan, %v2493_v52  ;;  %vm3330_vm14 = vcmp.eq.s32.totalorder %v15166_v42, 2  ;;  %v2165_v60 = vsub.s32 4, %v15164_v37 }
 0x16e   : > { %v2299_v62 = vsel %vm2298_vm1, %v2297_v2, 0  ;;  %v15233_v8 = vpop.eup %13572  ;;  %v20665_v48 = vand.u32 2147483647, %v14953_v33  ;;  %v2154_v50 = vor.u32 %v2153_v15, %v2152_v31  ;;  %v2157_v6 = vshll.u32 %v2156_v28, 23 }
 0x16f   : > { %20664 = vst [vmem:[#allocation40_spill] sm:$0xff] %v15233_v8  ;;  %v2974_v51 = vmul.u32 %v15182_v16, %v2958_v39  ;;  %v2301_v59 = vand.u32 31, %v2299_v62  ;;  %v15242_v14 = vpop.eup %13574  ;;  %v20336_v52 = vxor.u32 2147483648, %v15233_v8  ;;  %vm2976_vm8 = vc.u32 %v15220_v49, %v15223_v22 }
 0x170   : > { %vm15237_vm3 = vcmp.le.f32.partialorder %v20665_v48, 0.7853982  ;;  %20668 = vst [vmem:[#allocation41_spill] sm:$0xff] %v15242_v14  ;;  %v2977_v2 = vadd.s32 1, %v15224_v32  ;;  %v15248_v46 = vshll.u32 %v2295_v7, 8  ;;  %v20338_v24 = vxor.u32 2147483648, %v15242_v14 }
 0x171   : > { %v2158_v54 = vor.u32 4788187, %v2157_v6  ;;  %v2161_v10 = vcvt.s32.f32 %v2154_v50  ;;  %v2302_v35 = vsub.s32 32, %v2301_v59  ;;  %v3332_v16 = vsel %vm3330_vm14, %v20336_v52, %v15242_v14 }
 0x172   : > { %v2166_v55 = vsel %vm2081_vm12, %v2165_v60, %v15164_v37  ;;  %v2978_v53 = vsel %vm2976_vm8, %v2977_v2, %v15224_v32  ;;  %v15261_v1 = vmul.f32 8.0, %v15137_v57  ;;  %v3329_v5 = vsel %vm3327_vm4, %v15233_v8, %v20338_v24 }
 0x173   : > { %v2159_v3 = vand.u32 2147483647, %v2158_v54  ;;  %v2979_v7 = vadd.s32 %v2978_v53, %v2974_v51  ;;  %v2304_v63 = vshll.u32 %v20638_v19, %v2301_v59  ;;  %v3333_v31 = vsel %vm3326_vm5, %v3329_v5, %v3332_v16 }
 0x174   : > { %20669 = vst [vmem:[#allocation42_spill] sm:$0xff] %v15261_v1  ;;  %v2305_v37 = vshrl.u32 %v20617_v36, %v2302_v35  ;;  %v2307_v40 = vshll.u32 %v20617_v36, %v2301_v59  ;;  %v2308_v57 = vshrl.u32 %v20618_v41, %v2302_v35  ;;  %v3334_v39 = vsel %vm20349_vm6, nan, %v3333_v31 }
 0x175   : > { %v2162_v25 = vmul.f32 %v2161_v10, %v2159_v3  ;;  %v2980_v32 = vadd.s32 536870912, %v2979_v7  ;;  %v2300_v15 = vshrl.u32 %v2299_v62, 5  ;;  %v13111_v28 = vpack.c.bf16 %v3334_v39, %v2494_v38 }
 0x176   : > { %v2310_v60 = vshll.u32 %v20618_v41, %v2301_v59  ;;  %v2311_v48 = vshrl.u32 %v20619_v27, %v2302_v35  ;;  %v2313_v42 = vshll.u32 %v20619_v27, %v2301_v59  ;;  %v2303_v51 = vshrl.u32 %v20638_v19, %v2302_v35 }
 0x177   : > { %v2163_v50 = vxor.u32 2147483648, %v2162_v25  ;;  %v2981_v6 = vshrl.u32 %v2980_v32, 30  ;;  %v2314_v2 = vshrl.u32 %v20655_v56, %v2302_v35  ;;  %13112 = vmatprep.subr.bf16.mxu1 %v13111_v28  ;;  %v2306_v54 = vor.u32 %v2305_v37, %v2304_v63 }
 0x178   : > { %v2309_v16 = vor.u32 %v2308_v57, %v2307_v40  ;;  %v2316_v10 = vshll.u32 %v20655_v56, %v2301_v59  ;;  %v2317_v62 = vshrl.u32 %v20630_v17, %v2302_v35  ;;  %vm2319_vm5 = vcmp.lt.s32.totalorder %v2300_v15, 1 }
 0x179   : > { %v2164_v38 = vsel %vm2081_vm12, %v2163_v50, %v2162_v25  ;;  %v2982_v53 = vshll.u32 %v2981_v6, 30  ;;  %v2315_v5 = vor.u32 %v2314_v2, %v2313_v42  ;;  %v2312_v31 = vor.u32 %v2311_v48, %v2310_v60 }
 0x17a   : > { %v2167_v3 = vsel %vm15237_vm3, %v14953_v33, %v2164_v38  ;;  %v2318_v39 = vor.u32 %v2317_v62, %v2316_v10  ;;  %vm2322_vm4 = vcmp.lt.s32.totalorder %v2300_v15, 4  ;;  %v15290_v63 = vsel %vm15237_vm3, 0, %v2166_v55 }
 0x17b   : > { %v2983_v59 = vsub.s32 %v2979_v7, %v2982_v53  ;;  %vm2321_vm1 = vcmp.lt.s32.totalorder %v2300_v15, 3  ;;  %v3130_v35 = vand.u32 2139095040, %v15261_v1  ;;  %v3005_v37 = vsub.s32 4, %v2981_v6 }
 0x17c   : > { %vm2320_vm12 = vcmp.lt.s32.totalorder %v2300_v15, 2  ;;  %v2324_v40 = vsel %vm2322_vm4, %v2312_v31, 2102212464  ;;  %v2327_v57 = vsel %vm2319_vm5, %v2306_v54, %v2309_v16  ;;  %13576 = vcosq.f32 %v2167_v3 }
 0x17d   : > { %v2985_v25 = vsub.s32 0, %v2983_v59  ;;  %v2323_v32 = vsel %vm2319_vm5, %v2303_v51, %v2306_v54  ;;  %v2328_v28 = vsel %vm2322_vm4, %v2315_v5, 920167782  ;;  %13578 = vsinq.f32 %v2167_v3 }
 0x17e   : > { %v2329_v9 = vsel %vm2321_vm1, %v2312_v31, %v2328_v28  ;;  %v2331_v55 = vsel %vm2319_vm5, %v2309_v16, %v2312_v31  ;;  %v2332_v7 = vsel %vm2322_vm4, %v2318_v39, 1326507024  ;;  %v2325_v48 = vsel %vm2321_vm1, %v2309_v16, %v2324_v40 }
 0x17f   : > { %v12697_v60 = vmin.u32 %v2985_v25, %v2983_v59  ;;  %v2330_v42 = vsel %vm2320_vm12, %v2327_v57, %v2329_v9  ;;  %v2333_v50 = vsel %vm2321_vm1, %v2315_v5, %v2332_v7  ;;  %v2172_v10 = vadd.s32 3, %v15290_v63 }
 0x180   : > { %v2334_v2 = vsel %vm2320_vm12, %v2331_v55, %v2333_v50  ;;  %v15305_v51 = vmul.u32.u64.low %v15248_v46, %v2330_v42  ;;  %v15306_v54 = vmul.u32.u64.high %v15248_v46, %v2330_v42, %v15305_v51  ;;  %vm2921_vm14 = vcmp.lt.s32.totalorder %v15039_v30, 0  ;;  %v13774_v42 = vld [vmem:[%s13974_s29 + $0x8] sm:$0xff] }
 0x181   : > { %v2987_v62 = vclz %v12697_v60  ;;  %v20339_v38 = vand.u32 2147483647, %v15261_v1  ;;  %v2326_v53 = vsel %vm2320_vm12, %v2323_v32, %v2325_v48  ;;  %v3131_v5 = vshrl.u32 %v3130_v35, 23 }
 0x182   : > { %v15313_v16 = vmul.u32.u64.low %v15248_v46, %v2334_v2  ;;  %v15314_v3 = vmul.u32.u64.high %v15248_v46, %v2334_v2, %v15313_v16  ;;  %v3006_v39 = vsel %vm2921_vm14, %v3005_v37, %v2981_v6  ;;  %v20670_v40 = vand.u32 2147483647, %v15039_v30 }
 0x183   : > { %v12698_v31 = vadd.s32 4294967294, %v2987_v62  ;;  %v2345_v25 = vadd.s32 1, %v15306_v54  ;;  %v12704_v15 = vadd.s32 4294967169, %v3131_v5  ;;  %v15325_v32 = vand.u32 3, %v2172_v10 }
 0x184   : > { %vm15320_vm3 = vcmp.le.f32.partialorder %v20670_v40, 0.7853982  ;;  %v2975_v28 = vadd.s32 %v15223_v22, %v15220_v49  ;;  %v2342_v35 = vmul.u32 %v15248_v46, %v2326_v53  ;;  %vm2344_vm5 = vc.u32 %v15314_v3, %v15305_v51 }
 0x185   : > { %vm12699_vm8 = vcmp.lt.s32.totalorder %v12698_v31, 0  ;;  %v15332_v6 = vsel %vm15320_vm3, 0, %v3006_v39  ;;  %v3134_v37 = vand.u32 8388607, %v20339_v38  ;;  %v15340_v49 = vmul.f32 16.0, %v13774_v42 }
 0x186   : > { %v2990_v9 = vsel %vm12699_vm8, 0, %v12698_v31  ;;  %20673 = vst [vmem:[#allocation43_spill] sm:$0xff] %v15332_v6  ;;  %v15337_v55 = vpop.eup %13576  ;;  %v2346_v46 = vsel %vm2344_vm5, %v2345_v25, %v15306_v54  ;;  %v3137_v50 = vadd.s32 1, %v12704_v15  ;;  %v3012_v62 = vadd.s32 3, %v15332_v6 }
 0x187   : > { %20674 = vst [vmem:[#allocation44_spill] sm:$0xff] %v15337_v55  ;;  %v2991_v7 = vsub.s32 32, %v2990_v9  ;;  %v2992_v60 = vshll.u32 %v2983_v59, %v2990_v9  ;;  %v2995_v48 = vsub.s32 4294967266, %v2990_v9  ;;  %20675 = vst [vmem:[#allocation45_spill] sm:$0xff] %v15340_v49  ;;  %v15342_v22 = vpop.eup %13578  ;;  %v2347_v53 = vadd.s32 %v2346_v46, %v2342_v35 }
 0x188   : > { %20676 = vst [vmem:[#allocation46_spill] sm:$0xff] %v15342_v22  ;;  %vm2175_vm4 = vcmp.eq.s32.totalorder %v15325_v32, 0  ;;  %v3135_v16 = vor.u32 8388608, %v3134_v37  ;;  %vm3138_vm1 = vcmp.gt.s32.totalorder %v3137_v50, 0  ;;  %v3866_v39 = vand.u32 2139095040, %v15340_v49 }
 0x189   : > { %v2993_v2 = vshrl.u32 %v2975_v28, %v2991_v7  ;;  %v2996_v10 = vadd.s32 127, %v2995_v48  ;;  %v2348_v31 = vadd.s32 536870912, %v2347_v53  ;;  %v20335_v40 = vxor.u32 2147483648, %v15342_v22 }
 0x18a   : > { %vm2178_vm12 = vcmp.eq.s32.totalorder %v15325_v32, 2  ;;  %v20337_v54 = vxor.u32 2147483648, %v15337_v55  ;;  %v3139_v25 = vsel %vm3138_vm1, %v3137_v50, 0  ;;  %v15351_v9 = vand.u32 3, %v3012_v62 }
 0x18b   : > { %v2994_v5 = vor.u32 %v2993_v2, %v2992_v60  ;;  %v2997_v59 = vshll.u32 %v2996_v10, 23  ;;  %v15353_v35 = vshrl.u32 %v2348_v31, 30  ;;  %v3141_v37 = vand.u32 31, %v3139_v25 }
 0x18c   : > { %v15355_v7 = vshll.u32 %v3135_v16, 8  ;;  %v15358_v48 = vmul.f32 32.0, %v13774_v42  ;;  %v15361_v2 = vadd.s32 %v15305_v51, %v15314_v3  ;;  %v3867_v50 = vshrl.u32 %v3866_v39, 23 }
 0x18d   : > { %v2998_v15 = vor.u32 4788187, %v2997_v59  ;;  %v3001_v28 = vcvt.s32.f32 %v2994_v5  ;;  %v2350_v10 = vshll.u32 %v15353_v35, 30  ;;  %v15369_v62 = vsel %vm2175_vm4, %v15337_v55, %v20335_v40 }
 0x18e   : > { %20677 = vst [vmem:[#allocation47_spill] sm:$0xff] %v15358_v48  ;;  %v15376_v42 = vsel %vm2178_vm12, %v20337_v54, %v15342_v22  ;;  %v15378_v16 = vshrl.u32 %v3139_v25, 5  ;;  %v3142_v51 = vsub.s32 32, %v3141_v37  ;;  %v3144_v59 = vshll.u32 %v20638_v19, %v3141_v37 }
 0x18f   : > { %v2999_v46 = vand.u32 2147483647, %v2998_v15  ;;  %v15380_v5 = vsub.s32 %v2347_v53, %v2350_v10  ;;  %v3147_v31 = vshll.u32 %v20617_v36, %v3141_v37  ;;  %v3150_v40 = vshll.u32 %v20618_v41, %v3141_v37 }
 0x190   : > { %v3145_v39 = vshrl.u32 %v20617_v36, %v3142_v51  ;;  %v3148_v15 = vshrl.u32 %v20618_v41, %v3142_v51  ;;  %v3153_v52 = vshll.u32 %v20619_v27, %v3141_v37  ;;  %v3151_v24 = vshrl.u32 %v20619_v27, %v3142_v51 }
 0x191   : > { %v3002_v3 = vmul.f32 %v3001_v28, %v2999_v46  ;;  %v2353_v25 = vsub.s32 0, %v15380_v5  ;;  %v12732_v28 = vadd.s32 4294967169, %v3867_v50  ;;  %vm2174_vm8 = vcmp.lt.s32.totalorder %v15325_v32, 2 }
 0x192   : > { %v3143_v53 = vshrl.u32 %v20638_v19, %v3142_v51  ;;  %v3154_v46 = vshrl.u32 %v20655_v56, %v3142_v51  ;;  %v3156_v10 = vshll.u32 %v20655_v56, %v3141_v37  ;;  %vm3159_vm5 = vcmp.lt.s32.totalorder %v15378_v16, 1 }
 0x193   : > { %v3003_v54 = vxor.u32 2147483648, %v3002_v3  ;;  %v12673_v60 = vmin.u32 %v2353_v25, %v15380_v5  ;;  %v3146_v43 = vor.u32 %v3145_v39, %v3144_v59  ;;  %v3149_v55 = vor.u32 %v3148_v15, %v3147_v31 }
 0x194   : > { %v3152_v22 = vor.u32 %v3151_v24, %v3150_v40  ;;  %v3155_v8 = vor.u32 %v3154_v46, %v3153_v52  ;;  %v3157_v14 = vshrl.u32 %v20630_v17, %v3142_v51  ;;  %vm20423_vm4 = vweird.f32 %v14953_v33 }
 0x195   : > { %v3004_v38 = vsel %vm2921_vm14, %v3003_v54, %v3002_v3  ;;  %vm2289_vm1 = vcmp.lt.s32.totalorder %v15140_v45, 0  ;;  %v2355_v37 = vclz %v12673_v60  ;;  %v20678_v54 = vand.u32 2147483647, %v15340_v49 }
 0x196   : > { %v3007_v50 = vsel %vm15320_vm3, %v15039_v30, %v3004_v38  ;;  %v3873_v25 = vadd.s32 1, %v12732_v28  ;;  %v3158_v59 = vor.u32 %v3157_v14, %v3156_v10  ;;  %vm3160_vm14 = vcmp.lt.s32.totalorder %v15378_v16, 2 }
 0x197   : > { %13580 = vcosq.f32 %v3007_v50  ;;  %v3870_v3 = vand.u32 8388607, %v20678_v54  ;;  %vm3161_vm3 = vcmp.lt.s32.totalorder %v15378_v16, 3  ;;  %vm3018_vm12 = vcmp.eq.s32.totalorder %v15351_v9, 2 }
 0x198   : > { %13582 = vsinq.f32 %v3007_v50  ;;  %v12674_v52 = vadd.s32 4294967294, %v2355_v37  ;;  %vm3162_vm6 = vcmp.lt.s32.totalorder %v15378_v16, 4  ;;  %v3163_v24 = vsel %vm3159_vm5, %v3143_v53, %v3146_v43 }
 0x199   : > { %v3167_v38 = vsel %vm3159_vm5, %v3146_v43, %v3149_v55  ;;  %vm3015_vm11 = vcmp.eq.s32.totalorder %v15351_v9, 0  ;;  %v3164_v57 = vsel %vm3162_vm6, %v3152_v22, 2102212464  ;;  %v3168_v40 = vsel %vm3162_vm6, %v3155_v8, 920167782 }
 0x19a   : > { %v3171_v14 = vsel %vm3159_vm5, %v3149_v55, %v3152_v22  ;;  %v3172_v60 = vsel %vm3162_vm6, %v3158_v59, 1326507024  ;;  %vm3014_vm0 = vcmp.lt.s32.totalorder %v15351_v9, 2  ;;  %v20679_v51 = vand.u32 2147483647, %v15140_v45 }
 0x19b   : > { %vm12675_vm10 = vcmp.lt.s32.totalorder %v12674_v52, 0  ;;  %v3165_v43 = vsel %vm3161_vm3, %v3149_v55, %v3164_v57  ;;  %v3169_v39 = vsel %vm3161_vm3, %v3152_v22, %v3168_v40  ;;  %v3173_v15 = vsel %vm3161_vm3, %v3155_v8, %v3172_v60 }
 0x19c   : > { %vm15420_vm13 = vcmp.le.f32.partialorder %v20679_v51, 0.7853982  ;;  %vm20422_vm6 = vweird.f32 %v15039_v30  ;;  %v2358_v28 = vsel %vm12675_vm10, 0, %v12674_v52  ;;  %v2373_v53 = vsub.s32 4, %v15353_v35 }
 0x19d   : > { %v3170_v46 = vsel %vm3160_vm14, %v3167_v38, %v3169_v39  ;;  %v3174_v10 = vsel %vm3160_vm14, %v3171_v14, %v3173_v15  ;;  %v2359_v50 = vsub.s32 32, %v2358_v28  ;;  %v2360_v55 = vshll.u32 %v15380_v5, %v2358_v28  ;;  %v15457_v14 = vld [vmem:[%s13974_s29 + $0x18] sm:$0xff] }
 0x19e   : > { %v2363_v37 = vsub.s32 4294967266, %v2358_v28  ;;  %v3166_v22 = vsel %vm3160_vm14, %v3163_v24, %v3165_v43  ;;  %v15440_v8 = vmul.u32.u64.low %v15355_v7, %v3174_v10  ;;  %v15441_v54 = vmul.u32.u64.high %v15355_v7, %v3174_v10, %v15440_v8 }
 0x19f   : > { %v15444_v59 = vmul.u32.u64.low %v15355_v7, %v3170_v46  ;;  %v15445_v52 = vmul.u32.u64.high %v15355_v7, %v3170_v46, %v15444_v59  ;;  %v2181_v38 = vsel %vm2174_vm8, %v15369_v62, %v15376_v42  ;;  %v2361_v5 = vshrl.u32 %v15361_v2, %v2359_v50 }
 0x1a0   : > { %v2364_v57 = vadd.s32 127, %v2363_v37  ;;  %vm3874_vm10 = vcmp.gt.s32.totalorder %v3873_v25, 0  ;;  %v2374_v16 = vsel %vm2289_vm1, %v2373_v53, %v15353_v35  ;;  %v3871_v24 = vor.u32 8388608, %v3870_v3 }
 0x1a1   : > { %v3875_v40 = vsel %vm3874_vm10, %v3873_v25, 0  ;;  %v15460_v60 = vmul.f32 16.0, %v15457_v14  ;;  %v15462_v51 = vpop.eup %13580  ;;  %v2362_v43 = vor.u32 %v2361_v5, %v2360_v55  ;;  %v3182_v62 = vmul.u32 %v15355_v7, %v3166_v22 }
 0x1a2   : > { %20682 = vst [vmem:[#allocation48_spill] sm:$0xff] %v15462_v51  ;;  %v2365_v32 = vshll.u32 %v2364_v57, 23  ;;  %v3877_v2 = vand.u32 31, %v3875_v40  ;;  %v15465_v42 = vpop.eup %13582  ;;  %v2182_v39 = vsel %vm20423_vm4, nan, %v2181_v38  ;;  %v20354_v35 = vxor.u32 2147483648, %v15462_v51 }
 0x1a3   : > { %20683 = vst [vmem:[#allocation49_spill] sm:$0xff] %v15465_v42  ;;  %vm3184_vm8 = vc.u32 %v15441_v54, %v15444_v59  ;;  %v3185_v3 = vadd.s32 1, %v15445_v52  ;;  %v20355_v25 = vxor.u32 2147483648, %v15465_v42  ;;  %v2369_v28 = vcvt.s32.f32 %v2362_v43 }
 0x1a4   : > { %v2366_v15 = vor.u32 4788187, %v2365_v32  ;;  %v3878_v53 = vsub.s32 32, %v3877_v2  ;;  %v3020_v7 = vsel %vm3018_vm12, %v20354_v35, %v15465_v42  ;;  %v15481_v46 = vsel %vm15420_vm13, 0, %v2374_v16 }
 0x1a5   : > { %20684 = vst [vmem:[#allocation50_spill] sm:$0xff] %v15481_v46  ;;  %v3186_v10 = vsel %vm3184_vm8, %v3185_v3, %v15445_v52  ;;  %v15484_v50 = vshll.u32 %v3871_v24, 8  ;;  %v3017_v55 = vsel %vm3015_vm11, %v15462_v51, %v20355_v25  ;;  %v3880_v8 = vshll.u32 %v20638_v19, %v3877_v2 }
 0x1a6   : > { %v2367_v37 = vand.u32 2147483647, %v2366_v15  ;;  %v3187_v22 = vadd.s32 %v3186_v10, %v3182_v62  ;;  %v3021_v38 = vsel %vm3014_vm0, %v3017_v55, %v3020_v7  ;;  %v3881_v5 = vshrl.u32 %v20617_v36, %v3878_v53 }
 0x1a7   : > { %v3883_v57 = vshll.u32 %v20617_v36, %v3877_v2  ;;  %v3884_v52 = vshrl.u32 %v20618_v41, %v3878_v53  ;;  %v3022_v16 = vsel %vm20422_vm6, nan, %v3021_v38  ;;  %v3876_v32 = vshrl.u32 %v3875_v40, 5 }
 0x1a8   : > { %v2370_v24 = vmul.f32 %v2369_v28, %v2367_v37  ;;  %v3188_v43 = vadd.s32 536870912, %v3187_v22  ;;  %v13061_v3 = vpack.c.bf16 %v3022_v16, %v2182_v39  ;;  %v3886_v62 = vshll.u32 %v20618_v41, %v3877_v2 }
 0x1a9   : > { %v3887_v15 = vshrl.u32 %v20619_v27, %v3878_v53  ;;  %v3889_v9 = vshll.u32 %v20619_v27, %v3877_v2  ;;  %v3879_v55 = vshrl.u32 %v20638_v19, %v3878_v53  ;;  %v3890_v35 = vshrl.u32 %v20655_v56, %v3878_v53 }
 0x1aa   : > { %v2371_v7 = vxor.u32 2147483648, %v2370_v24  ;;  %v3189_v10 = vshrl.u32 %v3188_v43, 30  ;;  %13062 = vmatpush1.bf16.msra.mxu0 %v13061_v3  ;;  %v3882_v25 = vor.u32 %v3881_v5, %v3880_v8  ;;  %v3885_v30 = vor.u32 %v3884_v52, %v3883_v57 }
 0x1ab   : > { %v3892_v28 = vshll.u32 %v20655_v56, %v3877_v2  ;;  %v3893_v40 = vshrl.u32 %v20630_v17, %v3878_v53  ;;  %v3891_v38 = vor.u32 %v3890_v35, %v3889_v9  ;;  %vm3895_vm0 = vcmp.lt.s32.totalorder %v3876_v32, 1 }
 0x1ac   : > { %v2372_v39 = vsel %vm2289_vm1, %v2371_v7, %v2370_v24  ;;  %v3190_v37 = vshll.u32 %v3189_v10, 30  ;;  %v3888_v43 = vor.u32 %v3887_v15, %v3886_v62  ;;  %vm3898_vm11 = vcmp.lt.s32.totalorder %v3876_v32, 4 }
 0x1ad   : > { %v2375_v16 = vsel %vm15420_vm13, %v15140_v45, %v2372_v39  ;;  %v3894_v51 = vor.u32 %v3893_v40, %v3892_v28  ;;  %v2380_v8 = vadd.s32 3, %v15481_v46  ;;  %vm3897_vm5 = vcmp.lt.s32.totalorder %v3876_v32, 3 }
 0x1ae   : > { %13584 = vcosq.f32 %v2375_v16  ;;  %v15512_v5 = vsub.s32 %v3187_v22, %v3190_v37  ;;  %vm3896_vm14 = vcmp.lt.s32.totalorder %v3876_v32, 2  ;;  %v3900_v2 = vsel %vm3898_vm11, %v3888_v43, 2102212464 }
 0x1af   : > { %13586 = vsinq.f32 %v2375_v16  ;;  %v3903_v35 = vsel %vm3895_vm0, %v3882_v25, %v3885_v30  ;;  %v3213_v57 = vsub.s32 4, %v3189_v10  ;;  %v3904_v31 = vsel %vm3898_vm11, %v3891_v38, 920167782 }
 0x1b0   : > { %v3193_v53 = vsub.s32 0, %v15512_v5  ;;  %v4706_v52 = vand.u32 2139095040, %v15358_v48  ;;  %v3899_v24 = vsel %vm3895_vm0, %v3879_v55, %v3882_v25  ;;  %v3905_v3 = vsel %vm3897_vm5, %v3888_v43, %v3904_v31 }
 0x1b1   : > { %v3907_v22 = vsel %vm3895_vm0, %v3885_v30, %v3888_v43  ;;  %v3908_v62 = vsel %vm3898_vm11, %v3894_v51, 1326507024  ;;  %v3901_v9 = vsel %vm3897_vm5, %v3885_v30, %v3900_v2  ;;  %v3906_v7 = vsel %vm3896_vm14, %v3903_v35, %v3905_v3 }
 0x1b2   : > { %v12705_v15 = vmin.u32 %v3193_v53, %v15512_v5  ;;  %v3909_v28 = vsel %vm3897_vm5, %v3891_v38, %v3908_v62  ;;  %v2381_v40 = vand.u32 3, %v2380_v8  ;;  %vm3129_vm13 = vcmp.lt.s32.totalorder %v15261_v1, 0 }
 0x1b3   : > { %v3910_v39 = vsel %vm3896_vm14, %v3907_v22, %v3909_v28  ;;  %v15529_v37 = vmul.u32.u64.low %v15484_v50, %v3906_v7  ;;  %v15530_v25 = vmul.u32.u64.high %v15484_v50, %v3906_v7, %v15529_v37  ;;  %v20359_v51 = vand.u32 2147483647, %v15358_v48 }
 0x1b4   : > { %v3195_v55 = vclz %v12705_v15  ;;  %v3902_v16 = vsel %vm3896_vm14, %v3899_v24, %v3901_v9  ;;  %v15536_v30 = vmul.u32.u64.low %v15484_v50, %v3910_v39  ;;  %v15537_v43 = vmul.u32.u64.high %v15484_v50, %v3910_v39, %v15536_v30 }
 0x1b5   : > { %v4707_v2 = vshrl.u32 %v4706_v52, 23  ;;  %v20685_v38 = vand.u32 2147483647, %v15261_v1  ;;  %v3214_v53 = vsel %vm3129_vm13, %v3213_v57, %v3189_v10  ;;  %vm2383_vm3 = vcmp.eq.s32.totalorder %v2381_v40, 0 }
 0x1b6   : > { %v12706_v35 = vadd.s32 4294967294, %v3195_v55  ;;  %v3921_v31 = vadd.s32 1, %v15530_v25  ;;  %v4074_v24 = vand.u32 2139095040, %v15460_v60  ;;  %v3183_v52 = vadd.s32 %v15444_v59, %v15441_v54 }
 0x1b7   : > { %vm15541_vm1 = vcmp.le.f32.partialorder %v20685_v38, 0.7853982  ;;  %v12764_v32 = vadd.s32 4294967169, %v4707_v2  ;;  %v3918_v22 = vmul.u32 %v15484_v50, %v3902_v16  ;;  %v4710_v62 = vand.u32 8388607, %v20359_v51 }
 0x1b8   : > { %v15549_v3 = vpop.eup %13584  ;;  %vm12707_vm12 = vcmp.lt.s32.totalorder %v12706_v35, 0  ;;  %v15560_v57 = vsel %vm15541_vm1, 0, %v3214_v53  ;;  %vm3920_vm10 = vc.u32 %v15537_v43, %v15529_v37  ;;  %v4075_v16 = vshrl.u32 %v4074_v24, 23 }
 0x1b9   : > { %20688 = vst [vmem:[#allocation51_spill] sm:$0xff] %v15549_v3  ;;  %v15556_v15 = vpop.eup %13586  ;;  %v3198_v10 = vsel %vm12707_vm12, 0, %v12706_v35  ;;  %20690 = vst [vmem:[#allocation53_spill] sm:$0xff] %v15560_v57  ;;  %v3922_v39 = vsel %vm3920_vm10, %v3921_v31, %v15530_v25  ;;  %v4713_v55 = vadd.s32 1, %v12764_v32  ;;  %vm2386_vm8 = vcmp.eq.s32.totalorder %v2381_v40, 2 }
 0x1ba   : > { %20689 = vst [vmem:[#allocation52_spill] sm:$0xff] %v15556_v15  ;;  %v3199_v54 = vsub.s32 32, %v3198_v10  ;;  %v3200_v59 = vshll.u32 %v15512_v5, %v3198_v10  ;;  %v3203_v50 = vsub.s32 4294967266, %v3198_v10  ;;  %v20360_v28 = vxor.u32 2147483648, %v15556_v15 }
 0x1bb   : > { %v3923_v38 = vadd.s32 %v3922_v39, %v3918_v22  ;;  %vm2382_vm0 = vcmp.lt.s32.totalorder %v2381_v40, 2  ;;  %v3220_v35 = vadd.s32 3, %v15560_v57  ;;  %v4711_v53 = vor.u32 8388608, %v4710_v62 }
 0x1bc   : > { %v3201_v30 = vshrl.u32 %v3183_v52, %v3199_v54  ;;  %v3204_v2 = vadd.s32 127, %v3203_v50  ;;  %vm4714_vm11 = vcmp.gt.s32.totalorder %v4713_v55, 0  ;;  %v20691_v5 = vand.u32 2147483647, %v15460_v60 }
 0x1bd   : > { %v3924_v9 = vadd.s32 536870912, %v3923_v38  ;;  %v2385_v25 = vsel %vm2383_vm3, %v15549_v3, %v20360_v28  ;;  %v20692_v31 = vxor.u32 2147483648, %v15549_v3  ;;  %v4715_v24 = vsel %vm4714_vm11, %v4713_v55, 0 }
 0x1be   : > { %v3202_v51 = vor.u32 %v3201_v30, %v3200_v59  ;;  %v3205_v7 = vshll.u32 %v3204_v2, 23  ;;  %v15571_v10 = vand.u32 8388607, %v20691_v5  ;;  %v12740_v52 = vadd.s32 4294967169, %v4075_v16 }
 0x1bf   : > { %v2388_v32 = vsel %vm2386_vm8, %v20692_v31, %v15556_v15  ;;  %v3925_v54 = vshrl.u32 %v3924_v9, 30  ;;  %v15581_v59 = vmul.f32 32.0, %v15457_v14  ;;  %v15583_v50 = vand.u32 3, %v3220_v35 }
 0x1c0   : > { %v3206_v22 = vor.u32 4788187, %v3205_v7  ;;  %v3209_v62 = vcvt.s32.f32 %v3202_v51  ;;  %vm3865_vm5 = vcmp.lt.s32.totalorder %v15340_v49, 0  ;;  %v4717_v39 = vand.u32 31, %v4715_v24 }
 0x1c1   : > { %20693 = vst [vmem:[#allocation54_spill] sm:$0xff] %v15581_v59  ;;  %v15586_v30 = vshll.u32 %v4711_v53, 8  ;;  %v15589_v2 = vsel %vm2382_vm0, %v2385_v25, %v2388_v32  ;;  %v15592_v55 = vadd.s32 %v15529_v37, %v15537_v43  ;;  %v3926_v7 = vshll.u32 %v3925_v54, 30 }
 0x1c2   : > { %v3207_v5 = vand.u32 2147483647, %v3206_v22  ;;  %v4716_v51 = vshrl.u32 %v4715_v24, 5  ;;  %v4718_v9 = vsub.s32 32, %v4717_v39  ;;  %v4081_v16 = vadd.s32 1, %v12740_v52 }
 0x1c3   : > { %v15595_v31 = vsub.s32 %v3923_v38, %v3926_v7  ;;  %v4720_v28 = vshll.u32 %v20638_v19, %v4717_v39  ;;  %v4723_v53 = vshll.u32 %v20617_v36, %v4717_v39  ;;  %v4726_v37 = vshll.u32 %v20618_v41, %v4717_v39 }
 0x1c4   : > { %v3210_v35 = vmul.f32 %v3209_v62, %v3207_v5  ;;  %v4721_v40 = vshrl.u32 %v20617_v36, %v4718_v9  ;;  %v4724_v25 = vshrl.u32 %v20618_v41, %v4718_v9  ;;  %v4729_v43 = vshll.u32 %v20619_v27, %v4717_v39 }
 0x1c5   : > { %v20694_v24 = vand.u32 2147483647, %v15340_v49  ;;  %v3929_v38 = vsub.s32 0, %v15595_v31  ;;  %v3949_v22 = vsub.s32 4, %v3925_v54  ;;  %v4727_v62 = vshrl.u32 %v20619_v27, %v4718_v9 }
 0x1c6   : > { %v3211_v32 = vxor.u32 2147483648, %v3210_v35  ;;  %v4719_v5 = vshrl.u32 %v20638_v19, %v4718_v9  ;;  %v4730_v7 = vshrl.u32 %v20655_v56, %v4718_v9  ;;  %v4732_v14 = vshll.u32 %v20655_v56, %v4717_v39 }
 0x1c7   : > { %vm15605_vm14 = vcmp.le.f32.partialorder %v20694_v24, 0.7853982  ;;  %vm4735_vm3 = vcmp.lt.s32.totalorder %v4716_v51, 1  ;;  %v12733_v24 = vmin.u32 %v3929_v38, %v15595_v31  ;;  %v4722_v15 = vor.u32 %v4721_v40, %v4720_v28 }
 0x1c8   : > { %v3212_v3 = vsel %vm3129_vm13, %v3211_v32, %v3210_v35  ;;  %v4725_v57 = vor.u32 %v4724_v25, %v4723_v53  ;;  %vm20410_vm12 = vweird.f32 %v15140_v45  ;;  %v4728_v42 = vor.u32 %v4727_v62, %v4726_v37 }
 0x1c9   : > { %v3215_v46 = vsel %vm15541_vm1, %v15261_v1, %v3212_v3  ;;  %v4731_v33 = vor.u32 %v4730_v7, %v4729_v43  ;;  %v4733_v18 = vshrl.u32 %v20630_v17, %v4718_v9  ;;  %v3931_v39 = vclz %v12733_v24 }
 0x1ca   : > { %13588 = vcosq.f32 %v3215_v46  ;;  %v3950_v6 = vsel %vm3865_vm5, %v3949_v22, %v3925_v54  ;;  %vm4082_vm13 = vcmp.gt.s32.totalorder %v4081_v16, 0  ;;  %vm4736_vm10 = vcmp.lt.s32.totalorder %v4716_v51, 2 }
 0x1cb   : > { %13590 = vsinq.f32 %v3215_v46  ;;  %v4734_v35 = vor.u32 %v4733_v18, %v4732_v14  ;;  %vm4737_vm8 = vcmp.lt.s32.totalorder %v4716_v51, 3  ;;  %v12734_v28 = vadd.s32 4294967294, %v3931_v39 }
 0x1cc   : > { %vm4738_vm0 = vcmp.lt.s32.totalorder %v4716_v51, 4  ;;  %v4739_v53 = vsel %vm4735_vm3, %v4719_v5, %v4722_v15  ;;  %v4743_v8 = vsel %vm4735_vm3, %v4722_v15, %v4725_v57  ;;  %v4747_v9 = vsel %vm4735_vm3, %v4725_v57, %v4728_v42 }
 0x1cd   : > { %v4740_v3 = vsel %vm4738_vm0, %v4728_v42, 2102212464  ;;  %v4744_v40 = vsel %vm4738_vm0, %v4731_v33, 920167782  ;;  %v4748_v25 = vsel %vm4738_vm0, %v4734_v35, 1326507024  ;;  %vm20388_vm11 = vweird.f32 %v15261_v1 }
 0x1ce   : > { %vm12735_vm1 = vcmp.lt.s32.totalorder %v12734_v28, 0  ;;  %v4741_v37 = vsel %vm4737_vm8, %v4725_v57, %v4740_v3  ;;  %v4745_v43 = vsel %vm4737_vm8, %v4728_v42, %v4744_v40  ;;  %v4749_v54 = vsel %vm4737_vm8, %v4731_v33, %v4748_v25 }
 0x1cf   : > { %v3934_v18 = vsel %vm12735_vm1, 0, %v12734_v28  ;;  %v15630_v46 = vsel %vm15605_vm14, 0, %v3950_v6  ;;  %v4746_v14 = vsel %vm4736_vm10, %v4743_v8, %v4745_v43  ;;  %v4750_v15 = vsel %vm4736_vm10, %v4747_v9, %v4749_v54 }
 0x1d0   : > { %20697 = vst [vmem:[#allocation55_spill] sm:$0xff] %v15630_v46  ;;  %v3935_v32 = vsub.s32 32, %v3934_v18  ;;  %v3936_v38 = vshll.u32 %v15595_v31, %v3934_v18  ;;  %v3939_v22 = vsub.s32 4294967266, %v3934_v18  ;;  %v4742_v62 = vsel %vm4736_vm10, %v4739_v53, %v4741_v37 }
 0x1d1   : > { %v15637_v42 = vmul.u32.u64.low %v15586_v30, %v4750_v15  ;;  %v15638_v33 = vmul.u32.u64.high %v15586_v30, %v4750_v15, %v15637_v42  ;;  %v15641_v57 = vmul.u32.u64.low %v15586_v30, %v4746_v14  ;;  %v15642_v5 = vmul.u32.u64.high %v15586_v30, %v4746_v14, %v15641_v57 }
 0x1d2   : > { %vm3222_vm3 = vcmp.lt.s32.totalorder %v15583_v50, 2  ;;  %v3937_v6 = vshrl.u32 %v15592_v55, %v3935_v32  ;;  %v3940_v7 = vadd.s32 127, %v3939_v22  ;;  %v4083_v24 = vsel %vm4082_vm13, %v4081_v16, 0 }
 0x1d3   : > { %vm3223_vm8 = vcmp.eq.s32.totalorder %v15583_v50, 0  ;;  %vm3226_vm10 = vcmp.eq.s32.totalorder %v15583_v50, 2  ;;  %v3956_v51 = vadd.s32 3, %v15630_v46  ;;  %v4085_v31 = vand.u32 31, %v4083_v24 }
 0x1d4   : > { %v15651_v39 = vpop.eup %13588  ;;  %v2390_v35 = vsel %vm20410_vm12, nan, %v15589_v2  ;;  %v3938_v28 = vor.u32 %v3937_v6, %v3936_v38  ;;  %v3941_v53 = vshll.u32 %v3940_v7, 23  ;;  %v4758_v55 = vmul.u32 %v15586_v30, %v4742_v62 }
 0x1d5   : > { %20698 = vst [vmem:[#allocation56_spill] sm:$0xff] %v15651_v39  ;;  %v15657_v8 = vpop.eup %13590  ;;  %v20372_v16 = vxor.u32 2147483648, %v15651_v39  ;;  %vm4760_vm13 = vc.u32 %v15638_v33, %v15641_v57  ;;  %v4761_v3 = vadd.s32 1, %v15642_v5  ;;  %v20700_v40 = vor.u32 8388608, %v15571_v10 }
 0x1d6   : > { %20699 = vst [vmem:[#allocation57_spill] sm:$0xff] %v15657_v8  ;;  %v20375_v25 = vxor.u32 2147483648, %v15657_v8  ;;  %v3942_v2 = vor.u32 4788187, %v3941_v53  ;;  %v3945_v37 = vcvt.s32.f32 %v3938_v28  ;;  %v4086_v43 = vsub.s32 32, %v4085_v31 }
 0x1d7   : > { %v15665_v9 = vshll.u32 %v20700_v40, 8  ;;  %v3228_v30 = vsel %vm3226_vm10, %v20372_v16, %v15657_v8  ;;  %v15673_v54 = vand.u32 3, %v3956_v51  ;;  %v4762_v18 = vsel %vm4760_vm13, %v4761_v3, %v15642_v5 }
 0x1d8   : > { %v4914_v14 = vand.u32 2139095040, %v15581_v59  ;;  %v3225_v10 = vsel %vm3223_vm8, %v15651_v39, %v20375_v25  ;;  %v3943_v15 = vand.u32 2147483647, %v3942_v2  ;;  %v4763_v32 = vadd.s32 %v4762_v18, %v4758_v55 }
 0x1d9   : > { %v4088_v38 = vshll.u32 %v20638_v19, %v4085_v31  ;;  %v3229_v22 = vsel %vm3222_vm3, %v3225_v10, %v3228_v30  ;;  %v4089_v62 = vshrl.u32 %v20617_v36, %v4086_v43  ;;  %v4091_v42 = vshll.u32 %v20617_v36, %v4085_v31 }
 0x1da   : > { %v4092_v5 = vshrl.u32 %v20618_v41, %v4086_v43  ;;  %v3230_v6 = vsel %vm20388_vm11, nan, %v3229_v22  ;;  %v3946_v7 = vmul.f32 %v3945_v37, %v3943_v15  ;;  %v4764_v51 = vadd.s32 536870912, %v4763_v32 }
 0x1db   : > { %v4084_v28 = vshrl.u32 %v4083_v24, 5  ;;  %v13113_v53 = vpack.c.bf16 %v3230_v6, %v2390_v35  ;;  %v4094_v55 = vshll.u32 %v20618_v41, %v4085_v31  ;;  %v4095_v3 = vshrl.u32 %v20619_v27, %v4086_v43 }
 0x1dc   : > { %v4097_v50 = vshll.u32 %v20619_v27, %v4085_v31  ;;  %v3947_v40 = vxor.u32 2147483648, %v3946_v7  ;;  %v4765_v2 = vshrl.u32 %v4764_v51, 30  ;;  %v4087_v30 = vshrl.u32 %v20638_v19, %v4086_v43 }
 0x1dd   : > { %v4098_v18 = vshrl.u32 %v20655_v56, %v4086_v43  ;;  %13114 = vmatpush1.bf16.msra.mxu1 %v13113_v53  ;;  %vm4705_vm0 = vcmp.lt.s32.totalorder %v15358_v48, 0  ;;  %v4090_v10 = vor.u32 %v4089_v62, %v4088_v38  ;;  %v4093_v37 = vor.u32 %v4092_v5, %v4091_v42 }
 0x1de   : > { %v4100_v24 = vshll.u32 %v20655_v56, %v4085_v31  ;;  %v4101_v35 = vshrl.u32 %v20630_v17, %v4086_v43  ;;  %v3948_v15 = vsel %vm3865_vm5, %v3947_v40, %v3946_v7  ;;  %v4766_v22 = vshll.u32 %v4765_v2, 30  ;;  %v15710_v7 = vld [vmem:[%s13974_s29] sm:$0xff] }
 0x1df   : > { %v4099_v6 = vor.u32 %v4098_v18, %v4097_v50  ;;  %vm4103_vm1 = vcmp.lt.s32.totalorder %v4084_v28, 1  ;;  %v3951_v51 = vsel %vm15605_vm14, %v15340_v49, %v3948_v15  ;;  %v4096_v53 = vor.u32 %v4095_v3, %v4094_v55 }
 0x1e0   : > { %v4102_v16 = vor.u32 %v4101_v35, %v4100_v24  ;;  %vm4106_vm3 = vcmp.lt.s32.totalorder %v4084_v28, 4  ;;  %13592 = vcosq.f32 %v3951_v51  ;;  %v15703_v38 = vsub.s32 %v4763_v32, %v4766_v22 }
 0x1e1   : > { %vm4105_vm8 = vcmp.lt.s32.totalorder %v4084_v28, 3  ;;  %v4915_v31 = vshrl.u32 %v4914_v14, 23  ;;  %13594 = vsinq.f32 %v3951_v51  ;;  %vm4104_vm10 = vcmp.lt.s32.totalorder %v4084_v28, 2 }
 0x1e2   : > { %v4108_v43 = vsel %vm4106_vm3, %v4096_v53, 2102212464  ;;  %v4111_v62 = vsel %vm4103_vm1, %v4090_v10, %v4093_v37  ;;  %v4769_v42 = vsub.s32 0, %v15703_v38  ;;  %v4789_v5 = vsub.s32 4, %v4765_v2 }
 0x1e3   : > { %v4112_v52 = vsel %vm4106_vm3, %v4099_v6, 920167782  ;;  %v15713_v55 = vmul.f32 16.0, %v15710_v7  ;;  %v4107_v32 = vsel %vm4103_vm1, %v4087_v30, %v4090_v10  ;;  %v4115_v3 = vsel %vm4103_vm1, %v4093_v37, %v4096_v53 }
 0x1e4   : > { %v4113_v14 = vsel %vm4105_vm8, %v4096_v53, %v4112_v52  ;;  %v4116_v50 = vsel %vm4106_vm3, %v4102_v16, 1326507024  ;;  %v12765_v40 = vmin.u32 %v4769_v42, %v15703_v38  ;;  %v4109_v18 = vsel %vm4105_vm8, %v4093_v37, %v4108_v43 }
 0x1e5   : > { %v4114_v24 = vsel %vm4104_vm10, %v4111_v62, %v4113_v14  ;;  %v4117_v35 = vsel %vm4105_vm8, %v4099_v6, %v4116_v50  ;;  %v20376_v30 = vand.u32 2147483647, %v15581_v59  ;;  %v4790_v16 = vsel %vm4705_vm0, %v4789_v5, %v4765_v2 }
 0x1e6   : > { %v4118_v15 = vsel %vm4104_vm10, %v4115_v3, %v4117_v35  ;;  %v15725_v22 = vmul.u32.u64.low %v15665_v9, %v4114_v24  ;;  %v15726_v51 = vmul.u32.u64.high %v15665_v9, %v4114_v24, %v15725_v22  ;;  %v4771_v10 = vclz %v12765_v40 }
 0x1e7   : > { %v4110_v53 = vsel %vm4104_vm10, %v4107_v32, %v4109_v18  ;;  %v15734_v37 = vmul.u32.u64.low %v15665_v9, %v4118_v15  ;;  %v15735_v43 = vmul.u32.u64.high %v15665_v9, %v4118_v15, %v15734_v37  ;;  %v12772_v6 = vadd.s32 4294967169, %v4915_v31 }
 0x1e8   : > { %vm3959_vm5 = vcmp.eq.s32.totalorder %v15673_v54, 0  ;;  %v20701_v62 = vand.u32 2147483647, %v15358_v48  ;;  %v12766_v52 = vadd.s32 4294967294, %v4771_v10  ;;  %v3762_v14 = vand.u32 2139095040, %v15713_v55 }
 0x1e9   : > { %vm3962_vm13 = vcmp.eq.s32.totalorder %v15673_v54, 2  ;;  %v4129_v28 = vadd.s32 1, %v15726_v51  ;;  %v4918_v2 = vand.u32 8388607, %v20376_v30  ;;  %v4921_v5 = vadd.s32 1, %v12772_v6 }
 0x1ea   : > { %vm15740_vm14 = vcmp.le.f32.partialorder %v20701_v62, 0.7853982  ;;  %v15749_v31 = vpop.eup %13592  ;;  %v4759_v32 = vadd.s32 %v15641_v57, %v15638_v33  ;;  %vm12767_vm1 = vcmp.lt.s32.totalorder %v12766_v52, 0  ;;  %v4126_v50 = vmul.u32 %v15665_v9, %v4110_v53 }
 0x1eb   : > { %20704 = vst [vmem:[#allocation58_spill] sm:$0xff] %v15749_v31  ;;  %v15755_v3 = vsel %vm15740_vm14, 0, %v4790_v16  ;;  %v15758_v40 = vpop.eup %13594  ;;  %v20373_v18 = vxor.u32 2147483648, %v15749_v31  ;;  %v4774_v24 = vsel %vm12767_vm1, 0, %v12766_v52  ;;  %vm4128_vm3 = vc.u32 %v15735_v43, %v15725_v22 }
 0x1ec   : > { %20705 = vst [vmem:[#allocation59_spill] sm:$0xff] %v15755_v3  ;;  %20706 = vst [vmem:[#allocation60_spill] sm:$0xff] %v15758_v40  ;;  %v3763_v35 = vshrl.u32 %v3762_v14, 23  ;;  %v20374_v15 = vxor.u32 2147483648, %v15758_v40  ;;  %v4775_v10 = vsub.s32 32, %v4774_v24  ;;  %v4776_v33 = vshll.u32 %v15703_v38, %v4774_v24 }
 0x1ed   : > { %v4779_v57 = vsub.s32 4294967266, %v4774_v24  ;;  %v4796_v16 = vadd.s32 3, %v15755_v3  ;;  %v4130_v37 = vsel %vm4128_vm3, %v4129_v28, %v15726_v51  ;;  %v4919_v9 = vor.u32 8388608, %v4918_v2 }
 0x1ee   : > { %vm4922_vm8 = vcmp.gt.s32.totalorder %v4921_v5, 0  ;;  %v4777_v53 = vshrl.u32 %v4759_v32, %v4775_v10  ;;  %v4131_v62 = vadd.s32 %v4130_v37, %v4126_v50  ;;  %v20377_v52 = vand.u32 2147483647, %v15713_v55 }
 0x1ef   : > { %v4780_v6 = vadd.s32 127, %v4779_v57  ;;  %vm3958_vm10 = vcmp.lt.s32.totalorder %v15673_v54, 2  ;;  %v3964_v38 = vsel %vm3962_vm13, %v20373_v18, %v15758_v40  ;;  %v4923_v14 = vsel %vm4922_vm8, %v4921_v5, 0 }
 0x1f0   : > { %v12728_v24 = vadd.s32 4294967169, %v3763_v35  ;;  %v3961_v51 = vsel %vm3959_vm5, %v15749_v31, %v20374_v15  ;;  %v4778_v28 = vor.u32 %v4777_v53, %v4776_v33  ;;  %v4132_v32 = vadd.s32 536870912, %v4131_v62 }
 0x1f1   : > { %v4781_v2 = vshll.u32 %v4780_v6, 23  ;;  %vm20387_vm1 = vweird.f32 %v15340_v49  ;;  %v15780_v50 = vand.u32 3, %v4796_v16  ;;  %v4925_v10 = vand.u32 31, %v4923_v14 }
 0x1f2   : > { %v15782_v57 = vshll.u32 %v4919_v9, 8  ;;  %v4785_v18 = vcvt.s32.f32 %v4778_v28  ;;  %v15784_v5 = vshrl.u32 %v4132_v32, 30  ;;  %v3766_v35 = vand.u32 8388607, %v20377_v52 }
 0x1f3   : > { %v4782_v37 = vor.u32 4788187, %v4781_v2  ;;  %v3965_v15 = vsel %vm3958_vm10, %v3961_v51, %v3964_v38  ;;  %v4924_v33 = vshrl.u32 %v4923_v14, 5  ;;  %v4926_v53 = vsub.s32 32, %v4925_v10 }
 0x1f4   : > { %v3769_v6 = vadd.s32 1, %v12728_v24  ;;  %v4134_v16 = vshll.u32 %v15784_v5, 30  ;;  %v4928_v30 = vshll.u32 %v20638_v19, %v4925_v10  ;;  %v4931_v9 = vshll.u32 %v20617_v36, %v4925_v10 }
 0x1f5   : > { %v4783_v25 = vand.u32 2147483647, %v4782_v37  ;;  %v4929_v28 = vshrl.u32 %v20617_v36, %v4926_v53  ;;  %v4932_v2 = vshrl.u32 %v20618_v41, %v4926_v53  ;;  %v4934_v32 = vshll.u32 %v20618_v41, %v4925_v10 }
 0x1f6   : > { %v4935_v52 = vshrl.u32 %v20619_v27, %v4926_v53  ;;  %v15797_v38 = vsub.s32 %v4131_v62, %v4134_v16  ;;  %v4937_v14 = vshll.u32 %v20619_v27, %v4925_v10  ;;  %v4938_v24 = vshrl.u32 %v20655_v56, %v4926_v53 }
 0x1f7   : > { %v4786_v54 = vmul.f32 %v4785_v18, %v4783_v25  ;;  %v15803_v51 = vsel %vm20387_vm1, nan, %v3965_v15  ;;  %v4127_v37 = vadd.s32 %v15725_v22, %v15735_v43  ;;  %v3767_v1 = vor.u32 8388608, %v3766_v35 }
 0x1f8   : > { %vm3770_vm5 = vcmp.gt.s32.totalorder %v3769_v6, 0  ;;  %v4137_v40 = vsub.s32 0, %v15797_v38  ;;  %v4927_v25 = vshrl.u32 %v20638_v19, %v4926_v53  ;;  %v4930_v18 = vor.u32 %v4929_v28, %v4928_v30 }
 0x1f9   : > { %v4787_v31 = vxor.u32 2147483648, %v4786_v54  ;;  %v4933_v62 = vor.u32 %v4932_v2, %v4931_v9  ;;  %v4936_v16 = vor.u32 %v4935_v52, %v4934_v32  ;;  %v4940_v45 = vshll.u32 %v20655_v56, %v4925_v10 }
 0x1fa   : > { %v4941_v39 = vshrl.u32 %v20630_v17, %v4926_v53  ;;  %v12741_v49 = vmin.u32 %v4137_v40, %v15797_v38  ;;  %v4939_v22 = vor.u32 %v4938_v24, %v4937_v14  ;;  %vm4943_vm13 = vcmp.lt.s32.totalorder %v4924_v33, 1 }
 0x1fb   : > { %v4788_v15 = vsel %vm4705_vm0, %v4787_v31, %v4786_v54  ;;  %vm4946_vm3 = vcmp.lt.s32.totalorder %v4924_v33, 4  ;;  %v15817_v30 = vshll.u32 %v3767_v1, 8  ;;  %vm4945_vm8 = vcmp.lt.s32.totalorder %v4924_v33, 3 }
 0x1fc   : > { %v4791_v43 = vsel %vm15740_vm14, %v15358_v48, %v4788_v15  ;;  %v4942_v35 = vor.u32 %v4941_v39, %v4940_v45  ;;  %v4139_v52 = vclz %v12741_v49  ;;  %v4947_v10 = vsel %vm4943_vm13, %v4927_v25, %v4930_v18 }
 0x1fd   : > { %13596 = vcosq.f32 %v4791_v43  ;;  %vm4944_vm10 = vcmp.lt.s32.totalorder %v4924_v33, 2  ;;  %v4948_v31 = vsel %vm4946_vm3, %v4936_v16, 2102212464  ;;  %v4951_v40 = vsel %vm4943_vm13, %v4930_v18, %v4933_v62 }
 0x1fe   : > { %13598 = vsinq.f32 %v4791_v43  ;;  %vm4802_vm0 = vcmp.eq.s32.totalorder %v15780_v50, 2  ;;  %v12742_v53 = vadd.s32 4294967294, %v4139_v52  ;;  %v4949_v42 = vsel %vm4945_vm8, %v4933_v62, %v4948_v31 }
 0x1ff   : > { %v4952_v45 = vsel %vm4946_vm3, %v4939_v22, 920167782  ;;  %v4955_v1 = vsel %vm4943_vm13, %v4933_v62, %v4936_v16  ;;  %vm4799_vm14 = vcmp.eq.s32.totalorder %v15780_v50, 0  ;;  %v4950_v49 = vsel %vm4944_vm10, %v4947_v10, %v4949_v42 }
 0x200   : > { %v4953_v39 = vsel %vm4945_vm8, %v4936_v16, %v4952_v45  ;;  %v4956_v9 = vsel %vm4946_vm3, %v4942_v35, 1326507024  ;;  %v3771_v28 = vsel %vm3770_vm5, %v3769_v6, 0  ;;  %vm4798_vm1 = vcmp.lt.s32.totalorder %v15780_v50, 2 }
 0x201   : > { %vm12743_vm11 = vcmp.lt.s32.totalorder %v12742_v53, 0  ;;  %v4954_v2 = vsel %vm4944_vm10, %v4951_v40, %v4953_v39  ;;  %v4957_v32 = vsel %vm4945_vm8, %v4939_v22, %v4956_v9  ;;  %v15834_v54 = vshrl.u32 %v3771_v28, 5 }
 0x202   : > { %vm20409_vm13 = vweird.f32 %v15358_v48  ;;  %v4142_v14 = vsel %vm12743_vm11, 0, %v12742_v53  ;;  %v4958_v24 = vsel %vm4944_vm10, %v4955_v1, %v4957_v32  ;;  %v3773_v15 = vand.u32 31, %v3771_v28 }
 0x203   : > { %v15839_v25 = vmul.u32.u64.low %v15782_v57, %v4954_v2  ;;  %v15840_v18 = vmul.u32.u64.high %v15782_v57, %v4954_v2, %v15839_v25  ;;  %v4143_v6 = vsub.s32 32, %v4142_v14  ;;  %v4144_v62 = vshll.u32 %v15797_v38, %v4142_v14 }
 0x204   : > { %v4147_v16 = vsub.s32 4294967266, %v4142_v14  ;;  %v4157_v43 = vsub.s32 4, %v15784_v5  ;;  %v15846_v22 = vmul.u32.u64.low %v15782_v57, %v4958_v24  ;;  %v15847_v35 = vmul.u32.u64.high %v15782_v57, %v4958_v24, %v15846_v22 }
 0x205   : > { %v4966_v52 = vmul.u32 %v15782_v57, %v4950_v49  ;;  %vm4073_vm11 = vcmp.lt.s32.totalorder %v15460_v60, 0  ;;  %v4145_v33 = vshrl.u32 %v4127_v37, %v4143_v6  ;;  %v3774_v31 = vsub.s32 32, %v3773_v15 }
 0x206   : > { %v4148_v10 = vadd.s32 127, %v4147_v16  ;;  %vm3791_vm5 = vcmp.lt.s32.totalorder %v15834_v54, 1  ;;  %v4969_v40 = vadd.s32 1, %v15840_v18  ;;  %v3776_v38 = vshll.u32 %v20638_v19, %v3773_v15 }
 0x207   : > { %v3779_v53 = vshll.u32 %v20617_v36, %v3773_v15  ;;  %v3782_v42 = vshll.u32 %v20618_v41, %v3773_v15  ;;  %v15856_v45 = vpop.eup %13596  ;;  %v20708_v1 = vand.u32 2147483647, %v15460_v60  ;;  %v4146_v37 = vor.u32 %v4145_v33, %v4144_v62 }
 0x208   : > { %20707 = vst [vmem:[#allocation61_spill] sm:$0xff] %v15856_v45  ;;  %v4149_v49 = vshll.u32 %v4148_v10, 23  ;;  %v3777_v39 = vshrl.u32 %v20617_v36, %v3774_v31  ;;  %v3785_v9 = vshll.u32 %v20619_v27, %v3773_v15  ;;  %v15866_v28 = vpop.eup %13598  ;;  %v20392_v2 = vxor.u32 2147483648, %v15856_v45 }
 0x209   : > { %vm15860_vm3 = vcmp.le.f32.partialorder %v20708_v1, 0.7853982  ;;  %20711 = vst [vmem:[#allocation62_spill] sm:$0xff] %v15866_v28  ;;  %vm4968_vm8 = vc.u32 %v15847_v35, %v15839_v25  ;;  %v3775_v32 = vshrl.u32 %v20638_v19, %v3774_v31  ;;  %v3780_v14 = vshrl.u32 %v20618_v41, %v3774_v31 }
 0x20a   : > { %v20393_v24 = vxor.u32 2147483648, %v15866_v28  ;;  %v4150_v6 = vor.u32 4788187, %v4149_v49  ;;  %v4153_v62 = vcvt.s32.f32 %v4146_v37  ;;  %v4970_v16 = vsel %vm4968_vm8, %v4969_v40, %v15840_v18 }
 0x20b   : > { %v4804_v22 = vsel %vm4802_vm0, %v20392_v2, %v15866_v28  ;;  %v4971_v33 = vadd.s32 %v4970_v16, %v4966_v52  ;;  %v3778_v10 = vor.u32 %v3777_v39, %v3776_v38  ;;  %v3781_v1 = vor.u32 %v3780_v14, %v3779_v53 }
 0x20c   : > { %v4801_v8 = vsel %vm4799_vm14, %v15856_v45, %v20393_v24  ;;  %v4151_v3 = vand.u32 2147483647, %v4150_v6  ;;  %v3783_v37 = vshrl.u32 %v20619_v27, %v3774_v31  ;;  %v3786_v18 = vshrl.u32 %v20655_v56, %v3774_v31 }
 0x20d   : > { %v4805_v40 = vsel %vm4798_vm1, %v4801_v8, %v4804_v22  ;;  %v4972_v49 = vadd.s32 536870912, %v4971_v33  ;;  %v3788_v2 = vshll.u32 %v20655_v56, %v3773_v15  ;;  %v3789_v52 = vshrl.u32 %v20630_v17, %v3774_v31 }
 0x20e   : > { %v4806_v38 = vsel %vm20409_vm13, nan, %v4805_v40  ;;  %v4154_v53 = vmul.f32 %v4153_v62, %v4151_v3  ;;  %v3784_v39 = vor.u32 %v3783_v37, %v3782_v42  ;;  %v3787_v14 = vor.u32 %v3786_v18, %v3785_v9 }
 0x20f   : > { %v13063_v6 = vpack.c.bf16 %v4806_v38, %v15803_v51  ;;  %v4158_v16 = vsel %vm4073_vm11, %v4157_v43, %v15784_v5  ;;  %v4973_v24 = vshrl.u32 %v4972_v49, 30  ;;  %vm3793_vm1 = vcmp.lt.s32.totalorder %v15834_v54, 3 }
 0x210   : > { %v4155_v8 = vxor.u32 2147483648, %v4154_v53  ;;  %v3790_v50 = vor.u32 %v3789_v52, %v3788_v2  ;;  %vm3792_vm10 = vcmp.lt.s32.totalorder %v15834_v54, 2  ;;  %vm3794_vm0 = vcmp.lt.s32.totalorder %v15834_v54, 4 }
 0x211   : > { %13064 = vmatprep.subr.bf16.mxu0 %v13063_v6  ;;  %v4974_v15 = vshll.u32 %v4973_v24, 30  ;;  %v3796_v3 = vsel %vm3794_vm0, %v3784_v39, 2102212464  ;;  %v3799_v51 = vsel %vm3791_vm5, %v3778_v10, %v3781_v1  ;;  %v3800_v5 = vsel %vm3794_vm0, %v3787_v14, 920167782 }
 0x212   : > { %v4156_v43 = vsel %vm4073_vm11, %v4155_v8, %v4154_v53  ;;  %v3795_v31 = vsel %vm3791_vm5, %v3775_v32, %v3778_v10  ;;  %v3797_v42 = vsel %vm3793_vm1, %v3781_v1, %v3796_v3  ;;  %v3801_v9 = vsel %vm3793_vm1, %v3784_v39, %v3800_v5 }
 0x213   : > { %v4159_v2 = vsel %vm15860_vm3, %v15460_v60, %v4156_v43  ;;  %v4975_v62 = vsub.s32 %v4971_v33, %v4974_v15  ;;  %v3803_v22 = vsel %vm3791_vm5, %v3781_v1, %v3784_v39  ;;  %v15921_v37 = vsel %vm15860_vm3, 0, %v4158_v16 }
 0x214   : > { %20712 = vst [vmem:[#allocation63_spill] sm:$0xff] %v15921_v37  ;;  %v4997_v18 = vsub.s32 4, %v4973_v24  ;;  %v3802_v32 = vsel %vm3792_vm10, %v3799_v51, %v3801_v9  ;;  %v3804_v10 = vsel %vm3794_vm0, %v3790_v50, 1326507024  ;;  %13600 = vcosq.f32 %v4159_v2 }
 0x215   : > { %v4977_v40 = vsub.s32 0, %v4975_v62  ;;  %v3798_v49 = vsel %vm3792_vm10, %v3795_v31, %v3797_v42  ;;  %v3805_v33 = vsel %vm3793_vm1, %v3787_v14, %v3804_v10  ;;  %13602 = vsinq.f32 %v4159_v2  ;;  %v13777_v31 = vld [vmem:[%s13974_s29 + $0x10] sm:$0xff]  ;;  %s12517_s29 = sshll.u32 %s20120_s27, 4  ;;  %s20192_s29 = int_to_ptr.vmem [resolvable:$true] %s12517_s29 }
 0x216   : > { %v3806_v57 = vsel %vm3792_vm10, %v3803_v22, %v3805_v33  ;;  %v15934_v1 = vmul.u32.u64.low %v15817_v30, %v3802_v32  ;;  %v15935_v52 = vmul.u32.u64.high %v15817_v30, %v3802_v32, %v15934_v1  ;;  %v4164_v6 = vadd.s32 3, %v15921_v37  ;;  %s13790_s18 = scalar_lea.vmem %s20192_s29, 1024  ;;  %p13797_p0 = scmp.lt.s32.totalorder %s20192_s29, %s13795_s25 }
 0x217   : > { %v12773_v38 = vmin.u32 %v4977_v40, %v4975_v62  ;;  %v15938_v53 = vmul.u32.u64.low %v15817_v30, %v3806_v57  ;;  %v15939_v39 = vmul.u32.u64.high %v15817_v30, %v3806_v57, %v15938_v53  ;;  %v15943_v16 = vmul.f32 32.0, %v15710_v7  ;;  %p13791_p11 = scmp.ne.s32.totalorder %s20192_s29, %s13790_s18  ;;  %p13798_p1 = scmp.lt.s32.totalorder %s13796_s26, %s13790_s18 }
 0x218   : > { %vm4913_vm14 = vcmp.lt.s32.totalorder %v15581_v59, 0  ;;  %v3814_v54 = vmul.u32 %v15817_v30, %v3798_v49  ;;  %v3817_v50 = vadd.s32 1, %v15935_v52  ;;  %v20713_v51 = vand.u32 2147483647, %v15581_v59 }
 0x219   : > { %v4979_v14 = vclz %v12773_v38  ;;  %v4998_v8 = vsel %vm4913_vm14, %v4997_v18, %v4973_v24  ;;  %v20394_v15 = vand.u32 2147483647, %v15943_v16  ;;  %v4602_v3 = vand.u32 2139095040, %v15943_v16  ;;  %p13792_p12 = pnand %p13791_p11, %p13960_p5  ;;  %p13799_p2 = por %p13798_p1, %p13797_p0 }
 0x21a   : > { %vm15954_vm11 = vcmp.le.f32.partialorder %v20713_v51, 0.7853982  ;;  %vm3816_vm5 = vc.u32 %v15939_v39, %v15934_v1  ;;  %v15959_v43 = vand.u32 3, %v4164_v6  ;;  %v15963_v42 = vmul.f32 16.0, %v13777_v31 }
 0x21b   : > { %v12774_v7 = vadd.s32 4294967294, %v4979_v14  ;;  %v3818_v30 = vsel %vm3816_vm5, %v3817_v50, %v15935_v52  ;;  %v4603_v24 = vshrl.u32 %v4602_v3, 23  ;;  %v4967_v9 = vadd.s32 %v15839_v25, %v15847_v35  ;;  %p13793_p13 = pneg %p13792_p12 }
 0x21c   : > { %v15969_v2 = vsel %vm15954_vm11, 0, %v4998_v8  ;;  %v3819_v22 = vadd.s32 %v3818_v30, %v3814_v54  ;;  %v4606_v10 = vand.u32 8388607, %v20394_v15  ;;  %v3970_v53 = vand.u32 2139095040, %v15963_v42 }
 0x21d   : > { %vm12775_vm3 = vcmp.lt.s32.totalorder %v12774_v7, 0  ;;  %20716 = vst [vmem:[#allocation64_spill] sm:$0xff] %v15969_v2  ;;  %v12760_v32 = vadd.s32 4294967169, %v4603_v24  ;;  %v5004_v25 = vadd.s32 3, %v15969_v2  ;;  %vm4167_vm8 = vcmp.eq.s32.totalorder %v15959_v43, 0  ;;  %p13800_p3 = pnand %p13799_p2, %p13793_p13 }
 0x21e   : > { %v4982_v18 = vsel %vm12775_vm3, 0, %v12774_v7  ;;  %v15973_v40 = vpop.eup %13600  ;;  %v3820_v35 = vadd.s32 536870912, %v3819_v22  ;;  %vm4170_vm1 = vcmp.eq.s32.totalorder %v15959_v43, 2  ;;  %vm3761_vm10 = vcmp.lt.s32.totalorder %v15713_v55, 0 }
 0x21f   : > { %20717 = vst [vmem:[#allocation65_spill] sm:$0xff] %v15973_v40  ;;  %v4983_v49 = vsub.s32 32, %v4982_v18  ;;  %v4984_v33 = vshll.u32 %v4975_v62, %v4982_v18  ;;  %v4987_v57 = vsub.s32 4294967266, %v4982_v18  ;;  %v15975_v52 = vpop.eup %13602  ;;  %v4609_v38 = vadd.s32 1, %v12760_v32 }
 0x220   : > { %20718 = vst [vmem:[#allocation66_spill] sm:$0xff] %v15975_v52  ;;  %v20395_v54 = vxor.u32 2147483648, %v15973_v40  ;;  %v3821_v62 = vshrl.u32 %v3820_v35, 30  ;;  %v4607_v8 = vor.u32 8388608, %v4606_v10  ;;  %v20396_v50 = vxor.u32 2147483648, %v15975_v52 }
 0x221   : > { %v4985_v6 = vshrl.u32 %v4967_v9, %v4983_v49  ;;  %v4988_v14 = vadd.s32 127, %v4987_v57  ;;  %vm4610_vm0 = vcmp.gt.s32.totalorder %v4609_v38, 0  ;;  %v15984_v30 = vand.u32 3, %v5004_v25 }
 0x222   : > { %v4611_v7 = vsel %vm4610_vm0, %v4609_v38, 0  ;;  %v3822_v24 = vshll.u32 %v3821_v62, 30  ;;  %v3971_v18 = vshrl.u32 %v3970_v53, 23  ;;  %v15986_v32 = vmul.f32 32.0, %v13777_v31 }
 0x223   : > { %v4986_v3 = vor.u32 %v4985_v6, %v4984_v33  ;;  %v4989_v51 = vshll.u32 %v4988_v14, 23  ;;  %v3815_v57 = vadd.s32 %v15934_v1, %v15939_v39  ;;  %v4613_v15 = vand.u32 31, %v4611_v7 }
 0x224   : > { %v15994_v10 = vsel %vm4170_vm1, %v20395_v54, %v15975_v52  ;;  %v15996_v33 = vsub.s32 %v3819_v22, %v3822_v24  ;;  %v15998_v25 = vshll.u32 %v4607_v8, 8  ;;  %v16006_v1 = vsel %vm4167_vm8, %v15973_v40, %v20396_v50 }
 0x225   : > { %v4990_v9 = vor.u32 4788187, %v4989_v51  ;;  %v4993_v49 = vcvt.s32.f32 %v4986_v3  ;;  %v3845_v31 = vsub.s32 4, %v3821_v62  ;;  %v4614_v38 = vsub.s32 32, %v4613_v15 }
 0x226   : > { %v3825_v53 = vsub.s32 0, %v15996_v33  ;;  %v4612_v6 = vshrl.u32 %v4611_v7, 5  ;;  %v4616_v22 = vshll.u32 %v20638_v19, %v4613_v15  ;;  %v16010_v14 = vadd.s32 4294967169, %v3971_v18 }
 0x227   : > { %v4991_v39 = vand.u32 2147483647, %v4990_v9  ;;  %v4617_v3 = vshrl.u32 %v20617_v36, %v4614_v38  ;;  %v4619_v51 = vshll.u32 %v20617_v36, %v4613_v15  ;;  %v4620_v24 = vshrl.u32 %v20618_v41, %v4614_v38 }
 0x228   : > { %v20719_v54 = vand.u32 2147483647, %v15713_v55  ;;  %v12729_v50 = vmin.u32 %v3825_v53, %v15996_v33  ;;  %v4622_v7 = vshll.u32 %v20618_v41, %v4613_v15  ;;  %v4623_v18 = vshrl.u32 %v20619_v27, %v4614_v38 }
 0x229   : > { %v4994_v8 = vmul.f32 %v4993_v49, %v4991_v39  ;;  %v4625_v49 = vshll.u32 %v20619_v27, %v4613_v15  ;;  %v3846_v35 = vsel %vm3761_vm10, %v3845_v31, %v3821_v62  ;;  %v4615_v2 = vshrl.u32 %v20638_v19, %v4614_v38 }
 0x22a   : > { %vm16017_vm5 = vcmp.le.f32.partialorder %v20719_v54, 0.7853982  ;;  %v4626_v40 = vshrl.u32 %v20655_v56, %v4614_v38  ;;  %vm4166_vm3 = vcmp.lt.s32.totalorder %v15959_v43, 2  ;;  %v3827_v54 = vclz %v12729_v50 }
 0x22b   : > { %v4995_v39 = vxor.u32 2147483648, %v4994_v8  ;;  %v4618_v52 = vor.u32 %v4617_v3, %v4616_v22  ;;  %vm4631_vm8 = vcmp.lt.s32.totalorder %v4612_v6, 1  ;;  %vm4632_vm1 = vcmp.lt.s32.totalorder %v4612_v6, 2 }
 0x22c   : > { %v4621_v48 = vor.u32 %v4620_v24, %v4619_v51  ;;  %v4627_v45 = vor.u32 %v4626_v40, %v4625_v49  ;;  %v4628_v28 = vshll.u32 %v20655_v56, %v4613_v15  ;;  %v12730_v31 = vadd.s32 4294967294, %v3827_v54 }
 0x22d   : > { %v4996_v53 = vsel %vm4913_vm14, %v4995_v39, %v4994_v8  ;;  %v4624_v37 = vor.u32 %v4623_v18, %v4622_v7  ;;  %v4629_v46 = vshrl.u32 %v20630_v17, %v4614_v38  ;;  %vm4633_vm0 = vcmp.lt.s32.totalorder %v4612_v6, 3 }
 0x22e   : > { %v4999_v62 = vsel %vm15954_vm11, %v15581_v59, %v4996_v53  ;;  %vm4634_vm13 = vcmp.lt.s32.totalorder %v4612_v6, 4  ;;  %v4635_v50 = vsel %vm4631_vm8, %v4615_v2, %v4618_v52  ;;  %vm20421_vm12 = vweird.f32 %v15460_v60 }
 0x22f   : > { %13604 = vcosq.f32 %v4999_v62  ;;  %vm12731_vm14 = vcmp.lt.s32.totalorder %v12730_v31, 0  ;;  %v4630_v40 = vor.u32 %v4629_v46, %v4628_v28  ;;  %v4636_v15 = vsel %vm4634_vm13, %v4624_v37, 2102212464 }
 0x230   : > { %13606 = vsinq.f32 %v4999_v62  ;;  %v3830_v22 = vsel %vm12731_vm14, 0, %v12730_v31  ;;  %v4637_v5 = vsel %vm4633_vm0, %v4621_v48, %v4636_v15  ;;  %v4639_v8 = vsel %vm4631_vm8, %v4618_v52, %v4621_v48 }
 0x231   : > { %v4640_v3 = vsel %vm4634_vm13, %v4627_v45, 920167782  ;;  %v3831_v38 = vsub.s32 32, %v3830_v22  ;;  %v3832_v51 = vshll.u32 %v15996_v33, %v3830_v22  ;;  %v3835_v24 = vsub.s32 4294967266, %v3830_v22 }
 0x232   : > { %v4643_v2 = vsel %vm4631_vm8, %v4621_v48, %v4624_v37  ;;  %v16047_v7 = vsel %vm16017_vm5, 0, %v3846_v35  ;;  %v4638_v46 = vsel %vm4632_vm1, %v4635_v50, %v4637_v5  ;;  %v4641_v28 = vsel %vm4633_vm0, %v4624_v37, %v4640_v3 }
 0x233   : > { %v4644_v18 = vsel %vm4634_vm13, %v4630_v40, 1326507024  ;;  %vm20420_vm11 = vweird.f32 %v15581_v59  ;;  %v3833_v52 = vshrl.u32 %v3815_v57, %v3831_v38  ;;  %v3836_v49 = vadd.s32 127, %v3835_v24 }
 0x234   : > { %v4642_v39 = vsel %vm4632_vm1, %v4639_v8, %v4641_v28  ;;  %v4645_v33 = vsel %vm4633_vm0, %v4627_v45, %v4644_v18  ;;  %v20722_v53 = vand.u32 2147483647, %v15963_v42  ;;  %v4173_v45 = vsel %vm4166_vm3, %v16006_v1, %v15994_v10 }
 0x235   : > { %v4646_v48 = vsel %vm4632_vm1, %v4643_v2, %v4645_v33  ;;  %v16057_v54 = vmul.u32.u64.low %v15998_v25, %v4642_v39  ;;  %v16058_v35 = vmul.u32.u64.high %v15998_v25, %v4642_v39, %v16057_v54  ;;  %v3834_v62 = vor.u32 %v3833_v52, %v3832_v51 }
 0x236   : > { %v3974_v37 = vand.u32 8388607, %v20722_v53  ;;  %v3837_v31 = vshll.u32 %v3836_v49, 23  ;;  %v16064_v50 = vmul.u32.u64.low %v15998_v25, %v4646_v48  ;;  %v16065_v57 = vmul.u32.u64.high %v15998_v25, %v4646_v48, %v16064_v50 }
 0x237   : > { %vm5006_vm13 = vcmp.lt.s32.totalorder %v15984_v30, 2  ;;  %vm5007_vm8 = vcmp.eq.s32.totalorder %v15984_v30, 0  ;;  %v3977_v6 = vadd.s32 1, %v16010_v14  ;;  %v3841_v15 = vcvt.s32.f32 %v3834_v62 }
 0x238   : > { %v3838_v40 = vor.u32 4788187, %v3837_v31  ;;  %v3852_v22 = vadd.s32 3, %v16047_v7  ;;  %v4654_v5 = vmul.u32 %v15998_v25, %v4638_v46  ;;  %vm5010_vm1 = vcmp.eq.s32.totalorder %v15984_v30, 2 }
 0x239   : > { %v16076_v8 = vpop.eup %13604  ;;  %v4657_v3 = vadd.s32 1, %v16058_v35  ;;  %v3975_v43 = vor.u32 8388608, %v3974_v37  ;;  %vm3978_vm3 = vcmp.gt.s32.totalorder %v3977_v6, 0  ;;  %vm4656_vm0 = vc.u32 %v16065_v57, %v16057_v54 }
 0x23a   : > { %v16080_v10 = vpop.eup %13606  ;;  %v20411_v1 = vxor.u32 2147483648, %v16076_v8  ;;  %v3839_v38 = vand.u32 2147483647, %v3838_v40  ;;  %v4810_v14 = vand.u32 2139095040, %v15986_v32  ;;  %v4174_v25 = vsel %vm20421_vm12, nan, %v4173_v45 }
 0x23b   : > { %v20412_v51 = vxor.u32 2147483648, %v16080_v10  ;;  %v4658_v24 = vsel %vm4656_vm0, %v4657_v3, %v16058_v35  ;;  %v3979_v2 = vsel %vm3978_vm3, %v3977_v6, 0  ;;  %v16093_v18 = vand.u32 3, %v3852_v22 }
 0x23c   : > { %v5012_v46 = vsel %vm5010_vm1, %v20411_v1, %v16080_v10  ;;  %v3842_v28 = vmul.f32 %v3841_v15, %v3839_v38  ;;  %v4659_v52 = vadd.s32 %v4658_v24, %v4654_v5  ;;  %vm4601_vm14 = vcmp.lt.s32.totalorder %v15943_v16, 0 }
 0x23d   : > { %v5009_v49 = vsel %vm5007_vm8, %v16076_v8, %v20412_v51  ;;  %v3981_v39 = vand.u32 31, %v3979_v2  ;;  %v16101_v33 = vshll.u32 %v3975_v43, 8  ;;  %v20415_v48 = vand.u32 2147483647, %v15986_v32 }
 0x23e   : > { %v5013_v35 = vsel %vm5006_vm13, %v5009_v49, %v5012_v46  ;;  %v3843_v53 = vxor.u32 2147483648, %v3842_v28  ;;  %v4660_v37 = vadd.s32 536870912, %v4659_v52  ;;  %v4811_v62 = vshrl.u32 %v4810_v14, 23 }
 0x23f   : > { %v5014_v31 = vsel %vm20420_vm11, nan, %v5013_v35  ;;  %v3980_v50 = vshrl.u32 %v3979_v2, 5  ;;  %v3982_v45 = vsub.s32 32, %v3981_v39  ;;  %v3984_v6 = vshll.u32 %v20638_v19, %v3981_v39 }
 0x240   : > { %v13115_v40 = vpack.c.bf16 %v5014_v31, %v4174_v25  ;;  %v3844_v15 = vsel %vm3761_vm10, %v3843_v53, %v3842_v28  ;;  %v4661_v22 = vshrl.u32 %v4660_v37, 30  ;;  %v3987_v5 = vshll.u32 %v20617_v36, %v3981_v39 }
 0x241   : > { %v3847_v30 = vsel %vm16017_vm5, %v15713_v55, %v3844_v15  ;;  %v20723_v3 = vand.u32 2147483647, %v15943_v16  ;;  %v3985_v38 = vshrl.u32 %v20617_v36, %v3982_v45  ;;  %v3988_v14 = vshrl.u32 %v20618_v41, %v3982_v45 }
 0x242   : > { %v3990_v25 = vshll.u32 %v20618_v41, %v3981_v39  ;;  %13116 = vmatprep.subr.bf16.mxu1 %v13115_v40  ;;  %13608 = vcosq.f32 %v3847_v30  ;;  %v4662_v24 = vshll.u32 %v4661_v22, 30  ;;  %v4685_v2 = vsub.s32 4, %v4661_v22 }
 0x243   : > { %vm16117_vm13 = vcmp.le.f32.partialorder %v20723_v3, 0.7853982  ;;  %v3991_v46 = vshrl.u32 %v20619_v27, %v3982_v45  ;;  %13610 = vsinq.f32 %v3847_v30  ;;  %v3983_v9 = vshrl.u32 %v20638_v19, %v3982_v45 }
 0x244   : > { %v3993_v28 = vshll.u32 %v20619_v27, %v3981_v39  ;;  %v12768_v49 = vadd.s32 4294967169, %v4811_v62  ;;  %v16127_v35 = vsub.s32 %v4659_v52, %v4662_v24  ;;  %v3986_v53 = vor.u32 %v3985_v38, %v3984_v6 }
 0x245   : > { %v3989_v37 = vor.u32 %v3988_v14, %v3987_v5  ;;  %v3994_v31 = vshrl.u32 %v20655_v56, %v3982_v45  ;;  %v3992_v15 = vor.u32 %v3991_v46, %v3990_v25  ;;  %v3996_v40 = vshll.u32 %v20655_v56, %v3981_v39 }
 0x246   : > { %v3997_v3 = vshrl.u32 %v20630_v17, %v3982_v45  ;;  %vm3999_vm10 = vcmp.lt.s32.totalorder %v3980_v50, 1  ;;  %v4665_v1 = vsub.s32 0, %v16127_v35  ;;  %v4686_v30 = vsel %vm4601_vm14, %v4685_v2, %v4661_v22 }
 0x247   : > { %v3995_v51 = vor.u32 %v3994_v31, %v3993_v28  ;;  %vm4001_vm5 = vcmp.lt.s32.totalorder %v3980_v50, 3  ;;  %vm4000_vm8 = vcmp.lt.s32.totalorder %v3980_v50, 2  ;;  %vm4002_vm1 = vcmp.lt.s32.totalorder %v3980_v50, 4 }
 0x248   : > { %v3998_v62 = vor.u32 %v3997_v3, %v3996_v40  ;;  %v4003_v52 = vsel %vm3999_vm10, %v3983_v9, %v3986_v53  ;;  %v12761_v6 = vmin.u32 %v4665_v1, %v16127_v35  ;;  %v4004_v5 = vsel %vm4002_vm1, %v3992_v15, 2102212464 }
 0x249   : > { %v4007_v38 = vsel %vm3999_vm10, %v3986_v53, %v3989_v37  ;;  %v4008_v14 = vsel %vm4002_vm1, %v3995_v51, 920167782  ;;  %v4005_v39 = vsel %vm4001_vm5, %v3989_v37, %v4004_v5  ;;  %v4011_v25 = vsel %vm3999_vm10, %v3989_v37, %v3992_v15 }
 0x24a   : > { %v4009_v45 = vsel %vm4001_vm5, %v3992_v15, %v4008_v14  ;;  %v4012_v24 = vsel %vm4002_vm1, %v3998_v62, 1326507024  ;;  %v4667_v46 = vclz %v12761_v6  ;;  %v16140_v22 = vsel %vm16117_vm13, 0, %v4686_v30 }
 0x24b   : > { %v4814_v2 = vand.u32 8388607, %v20415_v48  ;;  %v4006_v9 = vsel %vm4000_vm8, %v4003_v52, %v4005_v39  ;;  %v4010_v1 = vsel %vm4000_vm8, %v4007_v38, %v4009_v45  ;;  %v4013_v28 = vsel %vm4001_vm5, %v3995_v51, %v4012_v24 }
 0x24c   : > { %v4817_v53 = vadd.s32 1, %v12768_v49  ;;  %v16147_v31 = vpop.eup %13608  ;;  %v12762_v40 = vadd.s32 4294967294, %v4667_v46  ;;  %v4014_v37 = vsel %vm4000_vm8, %v4011_v25, %v4013_v28  ;;  %vm3858_vm3 = vcmp.eq.s32.totalorder %v16093_v18, 2 }
 0x24d   : > { %v16151_v15 = vmul.u32.u64.low %v16101_v33, %v4010_v1  ;;  %v16152_v3 = vmul.u32.u64.high %v16101_v33, %v4010_v1, %v16151_v15  ;;  %v16155_v30 = vpop.eup %13610  ;;  %v4655_v62 = vadd.s32 %v16057_v54, %v16065_v57  ;;  %v4692_v50 = vadd.s32 3, %v16140_v22 }
 0x24e   : > { %v16161_v51 = vmul.u32.u64.low %v16101_v33, %v4014_v37  ;;  %v16162_v49 = vmul.u32.u64.high %v16101_v33, %v4014_v37, %v16161_v51  ;;  %vm12763_vm0 = vcmp.lt.s32.totalorder %v12762_v40, 0  ;;  %v4815_v52 = vor.u32 8388608, %v4814_v2 }
 0x24f   : > { %vm4818_vm10 = vcmp.gt.s32.totalorder %v4817_v53, 0  ;;  %v20414_v6 = vxor.u32 2147483648, %v16155_v30  ;;  %v20413_v5 = vxor.u32 2147483648, %v16147_v31  ;;  %v4670_v38 = vsel %vm12763_vm0, 0, %v12762_v40 }
 0x250   : > { %v4022_v14 = vmul.u32 %v16101_v33, %v4006_v9  ;;  %v4671_v39 = vsub.s32 32, %v4670_v38  ;;  %v4672_v45 = vshll.u32 %v16127_v35, %v4670_v38  ;;  %v4675_v54 = vsub.s32 4294967266, %v4670_v38 }
 0x251   : > { %v4819_v57 = vsel %vm4818_vm10, %v4817_v53, 0  ;;  %vm3855_vm5 = vcmp.eq.s32.totalorder %v16093_v18, 0  ;;  %vm4024_vm8 = vc.u32 %v16162_v49, %v16151_v15  ;;  %v4025_v25 = vadd.s32 1, %v16152_v3 }
 0x252   : > { %vm3854_vm1 = vcmp.lt.s32.totalorder %v16093_v18, 2  ;;  %v4673_v24 = vshrl.u32 %v4655_v62, %v4671_v39  ;;  %v4676_v46 = vadd.s32 127, %v4675_v54  ;;  %v16174_v2 = vand.u32 3, %v4692_v50 }
 0x253   : > { %v3860_v33 = vsel %vm3858_vm3, %v20413_v5, %v16155_v30  ;;  %v4026_v35 = vsel %vm4024_vm8, %v4025_v25, %v16152_v3  ;;  %v4821_v9 = vand.u32 31, %v4819_v57  ;;  %v16182_v1 = vshll.u32 %v4815_v52, 8 }
 0x254   : > { %v3857_v28 = vsel %vm3855_vm5, %v16147_v31, %v20414_v6  ;;  %v4674_v53 = vor.u32 %v4673_v24, %v4672_v45  ;;  %v4677_v40 = vshll.u32 %v4676_v46, 23  ;;  %v4027_v37 = vadd.s32 %v4026_v35, %v4022_v14 }
 0x255   : > { %vm3969_vm0 = vcmp.lt.s32.totalorder %v15963_v42, 0  ;;  %v16188_v62 = vshrl.u32 %v4819_v57, 5  ;;  %v4822_v51 = vsub.s32 32, %v4821_v9  ;;  %v4824_v50 = vshll.u32 %v20638_v19, %v4821_v9 }
 0x256   : > { %v4827_v38 = vshll.u32 %v20617_v36, %v4821_v9  ;;  %v4678_v3 = vor.u32 4788187, %v4677_v40  ;;  %v4681_v39 = vcvt.s32.f32 %v4674_v53  ;;  %v4028_v52 = vadd.s32 536870912, %v4027_v37 }
 0x257   : > { %v4833_v54 = vshll.u32 %v20619_v27, %v4821_v9  ;;  %v4825_v25 = vshrl.u32 %v20617_v36, %v4822_v51  ;;  %v4828_v45 = vshrl.u32 %v20618_v41, %v4822_v51  ;;  %v4830_v14 = vshll.u32 %v20618_v41, %v4821_v9 }
 0x258   : > { %v4831_v24 = vshrl.u32 %v20619_v27, %v4822_v51  ;;  %v4679_v57 = vand.u32 2147483647, %v4678_v3  ;;  %v4029_v46 = vshrl.u32 %v4028_v52, 30  ;;  %v4834_v35 = vshrl.u32 %v20655_v56, %v4822_v51 }
 0x259   : > { %v4836_v5 = vshll.u32 %v20655_v56, %v4821_v9  ;;  %v4826_v6 = vor.u32 %v4825_v25, %v4824_v50  ;;  %v4829_v40 = vor.u32 %v4828_v45, %v4827_v38  ;;  %v4837_v53 = vshrl.u32 %v20630_v17, %v4822_v51 }
 0x25a   : > { %vm4839_vm3 = vcmp.lt.s32.totalorder %v16188_v62, 1  ;;  %v4682_v48 = vmul.f32 %v4681_v39, %v4679_v57  ;;  %v20726_v36 = vand.u32 2147483647, %v15963_v42  ;;  %v4030_v27 = vshll.u32 %v4029_v46, 30 }
 0x25b   : > { %v4053_v3 = vsub.s32 4, %v4029_v46  ;;  %v4835_v52 = vor.u32 %v4834_v35, %v4833_v54  ;;  %v3861_v41 = vsel %vm3854_vm1, %v3857_v28, %v3860_v33  ;;  %v4823_v9 = vshrl.u32 %v20638_v19, %v4822_v51 }
 0x25c   : > { %vm16203_vm10 = vcmp.le.f32.partialorder %v20726_v36, 0.7853982  ;;  %v4832_v50 = vor.u32 %v4831_v24, %v4830_v14  ;;  %vm4842_vm5 = vcmp.lt.s32.totalorder %v16188_v62, 4  ;;  %v4683_v38 = vxor.u32 2147483648, %v4682_v48 }
 0x25d   : > { %v16211_v25 = vsub.s32 %v4027_v37, %v4030_v27  ;;  %v4838_v39 = vor.u32 %v4837_v53, %v4836_v5  ;;  %vm4841_vm8 = vcmp.lt.s32.totalorder %v16188_v62, 3  ;;  %vm4840_vm11 = vcmp.lt.s32.totalorder %v16188_v62, 2 }
 0x25e   : > { %v4844_v36 = vsel %vm4842_vm5, %v4832_v50, 2102212464  ;;  %v4847_v18 = vsel %vm4839_vm3, %v4826_v6, %v4829_v40  ;;  %v4848_v33 = vsel %vm4842_vm5, %v4835_v52, 920167782  ;;  %vm3851_vm1 = vweird.f32 %v15713_v55 }
 0x25f   : > { %v4684_v27 = vsel %vm4601_vm14, %v4683_v38, %v4682_v48  ;;  %v4033_v5 = vsub.s32 0, %v16211_v25  ;;  %v4054_v28 = vsel %vm3969_vm0, %v4053_v3, %v4029_v46  ;;  %v1015_v37 = vand.u32 3, %v14164_v29 }
 0x260   : > { %v4687_v51 = vsel %vm16117_vm13, %v15943_v16, %v4684_v27  ;;  %v4843_v54 = vsel %vm4839_vm3, %v4823_v9, %v4826_v6  ;;  %v4845_v45 = vsel %vm4841_vm8, %v4829_v40, %v4844_v36  ;;  %v4849_v48 = vsel %vm4841_vm8, %v4832_v50, %v4848_v33 }
 0x261   : > { %13612 = vcosq.f32 %v4687_v51  ;;  %v12737_v14 = vmin.u32 %v4033_v5, %v16211_v25  ;;  %v4850_v24 = vsel %vm4840_vm11, %v4847_v18, %v4849_v48  ;;  %v4851_v29 = vsel %vm4839_vm3, %v4829_v40, %v4832_v50 }
 0x262   : > { %13614 = vsinq.f32 %v4687_v51  ;;  %v4852_v43 = vsel %vm4842_vm5, %v4838_v39, 1326507024  ;;  %v16245_v6 = vmul.u32.u64.low %v16182_v1, %v4850_v24  ;;  %v16246_v57 = vmul.u32.u64.high %v16182_v1, %v4850_v24, %v16245_v6 }
 0x263   : > { %vm4698_vm14 = vcmp.eq.s32.totalorder %v16174_v2, 2  ;;  %v4023_v46 = vadd.s32 %v16151_v15, %v16162_v49  ;;  %v4035_v35 = vclz %v12737_v14  ;;  %v4846_v53 = vsel %vm4840_vm11, %v4843_v54, %v4845_v45 }
 0x264   : > { %v1855_v40 = vand.u32 3, %v14177_v4  ;;  %vm4695_vm13 = vcmp.eq.s32.totalorder %v16174_v2, 0  ;;  %v16258_v3 = vsel %vm16203_vm10, 0, %v4054_v28  ;;  %v4853_v9 = vsel %vm4841_vm8, %v4835_v52, %v4852_v43 }
 0x265   : > { %vm1016_vm3 = vcmp.lt.s32.totalorder %v1015_v37, 2  ;;  %vm1017_vm5 = vcmp.eq.s32.totalorder %v1015_v37, 0  ;;  %vm4694_vm12 = vcmp.lt.s32.totalorder %v16174_v2, 2  ;;  %v12738_v15 = vadd.s32 4294967294, %v4035_v35 }
 0x266   : > { %v4854_v49 = vsel %vm4840_vm11, %v4851_v29, %v4853_v9  ;;  %v20729_v50 = vxor.u32 2147483648, %v14249_v21  ;;  %vm1020_vm6 = vcmp.eq.s32.totalorder %v1015_v37, 2  ;;  %vm4691_vm4 = vweird.f32 %v15943_v16 }
 0x267   : > { %v16270_v38 = vmul.u32.u64.low %v16182_v1, %v4854_v49  ;;  %v16271_v39 = vmul.u32.u64.high %v16182_v1, %v4854_v49, %v16270_v38  ;;  %v4862_v52 = vmul.u32 %v16182_v1, %v4846_v53  ;;  %v20730_v36 = vxor.u32 2147483648, %v14229_v47 }
 0x268   : > { %v1019_v4 = vsel %vm1017_vm5, %v14229_v47, %v20729_v50  ;;  %vm12739_vm8 = vcmp.lt.s32.totalorder %v12738_v15, 0  ;;  %v4865_v62 = vadd.s32 1, %v16246_v57  ;;  %vm1856_vm11 = vcmp.lt.s32.totalorder %v1855_v40, 2 }
 0x269   : > { %v1022_v18 = vsel %vm1020_vm6, %v20730_v36, %v14249_v21  ;;  %vm1857_vm15 = vcmp.eq.s32.totalorder %v1855_v40, 0  ;;  %v4038_v33 = vsel %vm12739_vm8, 0, %v12738_v15  ;;  %v20731_v5 = vxor.u32 2147483648, %v14308_v12  ;;  %v20801_v15 = vld [vmem:[#allocation24_spill] sm:$0xff] }
 0x26a   : > { %v1023_v27 = vsel %vm1016_vm3, %v1019_v4, %v1022_v18  ;;  %vm1860_vm5 = vcmp.eq.s32.totalorder %v1855_v40, 2  ;;  %v4039_v51 = vsub.s32 32, %v4038_v33  ;;  %v4040_v1 = vshll.u32 %v16211_v25, %v4038_v33 }
 0x26b   : > { %v1859_v28 = vsel %vm1857_vm15, %v14305_v11, %v20731_v5  ;;  %v4043_v54 = vsub.s32 4294967266, %v4038_v33  ;;  %v20732_v47 = vxor.u32 2147483648, %v14305_v11  ;;  %v3862_v45 = vsel %vm3851_vm1, nan, %v3861_v41  ;;  %v16291_v14 = vpop.eup %13612 }
 0x26c   : > { %vm4864_vm6 = vc.u32 %v16271_v39, %v16245_v6  ;;  %v1221_v48 = vand.u32 3, %v14299_v23  ;;  %v4041_v24 = vshrl.u32 %v4023_v46, %v4039_v51  ;;  %v4060_v25 = vadd.s32 3, %v16258_v3 }
 0x26d   : > { %v1862_v21 = vsel %vm1860_vm5, %v20732_v47, %v14308_v12  ;;  %v4044_v29 = vadd.s32 127, %v4043_v54  ;;  %vm4809_vm15 = vcmp.lt.s32.totalorder %v15986_v32, 0  ;;  %v4866_v11 = vsel %vm4864_vm6, %v4865_v62, %v16246_v57  ;;  %v16296_v12 = vpop.eup %13614 }
 0x26e   : > { %v1863_v37 = vsel %vm1856_vm11, %v1859_v28, %v1862_v21  ;;  %v4699_v41 = vxor.u32 2147483648, %v16291_v14  ;;  %v4867_v43 = vadd.s32 %v4866_v11, %v4862_v52  ;;  %v1024_v35 = vsel %vm595_vm2, nan, %v1023_v27 }
 0x26f   : > { %v1864_v23 = vsel %vm1435_vm9, nan, %v1863_v37  ;;  %v4696_v46 = vxor.u32 2147483648, %v16296_v12  ;;  %v4042_v53 = vor.u32 %v4041_v24, %v4040_v1  ;;  %v4045_v40 = vshll.u32 %v4044_v29, 23 }
 0x270   : > { %vm1223_vm3 = vcmp.eq.s32.totalorder %v1221_v48, 0  ;;  %v4700_v57 = vsel %vm4698_vm14, %v4699_v41, %v16296_v12  ;;  %v20733_v9 = vand.u32 2147483647, %v15986_v32  ;;  %v4868_v0 = vadd.s32 536870912, %v4867_v43 }
 0x271   : > { %vm1222_vm2 = vcmp.lt.s32.totalorder %v1221_v48, 2  ;;  %vm1226_vm9 = vcmp.eq.s32.totalorder %v1221_v48, 2  ;;  %v4697_v13 = vsel %vm4695_vm13, %v16291_v14, %v4696_v46  ;;  %v4046_v49 = vor.u32 4788187, %v4045_v40  ;;  %v20743_v40 = vld [vmem:[#allocation14_spill] sm:$0xff] }
 0x272   : > { %vm16311_vm8 = vcmp.le.f32.partialorder %v20733_v9, 0.7853982  ;;  %v4049_v50 = vcvt.s32.f32 %v4042_v53  ;;  %v20736_v4 = vxor.u32 2147483648, %v14395_v34  ;;  %v4701_v52 = vsel %vm4694_vm12, %v4697_v13, %v4700_v57 }
 0x273   : > { %v4869_v36 = vshrl.u32 %v4868_v0, 30  ;;  %v20737_v18 = vxor.u32 2147483648, %v14391_v26  ;;  %v2061_v33 = vand.u32 3, %v14383_v20  ;;  %v4702_v27 = vsel %vm4691_vm4, nan, %v4701_v52 }
 0x274   : > { %v1225_v38 = vsel %vm1223_vm3, %v14391_v26, %v20736_v4  ;;  %v4047_v5 = vand.u32 2147483647, %v4046_v49  ;;  %v13067_v28 = vpack.c.bf16 %v1864_v23, %v1024_v35  ;;  %v912_v51 = vand.u32 3, %v14533_v61  ;;  %v20741_v23 = vld [vmem:[#allocation15_spill] sm:$0xff] }
 0x275   : > { %v1228_v62 = vsel %vm1226_vm9, %v20737_v18, %v14395_v34  ;;  %v13065_v1 = vpack.c.bf16 %v4702_v27, %v3862_v45  ;;  %v4870_v54 = vshll.u32 %v4869_v36, 30  ;;  %v4893_v47 = vsub.s32 4, %v4869_v36  ;;  %v20745_v49 = vld [vmem:[#allocation7_spill] sm:$0xff] }
 0x276   : > { %vm2062_vm14 = vcmp.lt.s32.totalorder %v2061_v33, 2  ;;  %v4050_v2 = vmul.f32 %v4049_v50, %v4047_v5  ;;  %v1229_v21 = vsel %vm1222_vm2, %v1225_v38, %v1228_v62  ;;  %vm2063_vm12 = vcmp.eq.s32.totalorder %v2061_v33, 0  ;;  %v20750_v5 = vld [vmem:[#allocation17_spill] sm:$0xff] }
 0x277   : > { %vm2066_vm13 = vcmp.eq.s32.totalorder %v2061_v33, 2  ;;  %13066 = vmatpush1.bf16.msra.mxu0 %v13065_v1  ;;  %v16333_v26 = vsub.s32 %v4867_v43, %v4870_v54  ;;  %v4894_v20 = vsel %vm4809_vm15, %v4893_v47, %v4869_v36  ;;  %v20738_v34 = vxor.u32 2147483648, %v14466_v58  ;;  %v20748_v33 = vld [vmem:[#allocation9_spill] sm:$0xff]  ;;  %v20754_v47 = vld [vmem:[#allocation18_spill] sm:$0xff]  ;;  %v20759_v43 = vld [vmem:[#allocation8_spill] sm:$0xff] }
 0x278   : > { %v20739_v61 = vxor.u32 2147483648, %v14463_v44  ;;  %v4051_v24 = vxor.u32 2147483648, %v4050_v2  ;;  %v16343_v29 = vand.u32 3, %v4060_v25  ;;  %13068 = vmatprep.subr.bf16.mxu0 %v13067_v28  ;;  %vm914_vm11 = vcmp.eq.s32.totalorder %v912_v51, 0  ;;  %v20744_v25 = vld [vmem:[#allocation12_spill] sm:$0xff] }
 0x279   : > { %v2065_v37 = vsel %vm2063_vm12, %v14463_v44, %v20738_v34  ;;  %v4873_v11 = vsub.s32 0, %v16333_v26  ;;  %v16348_v35 = vsel %vm803_vm7, nan, %v1229_v21  ;;  %vm913_vm5 = vcmp.lt.s32.totalorder %v912_v51, 2  ;;  %v20755_v21 = vld [vmem:[#allocation20_spill] sm:$0xff] }
 0x27a   : > { %v2068_v45 = vsel %vm2066_vm13, %v20739_v61, %v14466_v58  ;;  %v20742_v53 = vxor.u32 2147483648, %v20741_v23  ;;  %v4052_v44 = vsel %vm3969_vm0, %v4051_v24, %v4050_v2  ;;  %v16357_v58 = vsel %vm16311_vm8, 0, %v4894_v20 }
 0x27b   : > { %v2069_v48 = vsel %vm2062_vm14, %v2065_v37, %v2068_v45  ;;  %vm917_vm6 = vcmp.eq.s32.totalorder %v912_v51, 2  ;;  %v1752_v9 = vand.u32 3, %v20744_v25  ;;  %v4055_v0 = vsel %vm16203_vm10, %v15963_v42, %v4052_v44  ;;  %v20752_v51 = vld [vmem:[#allocation16_spill] sm:$0xff]  ;;  %v20756_v37 = vld [vmem:[#allocation27_spill] sm:$0xff]  ;;  %v20763_v25 = vld [vmem:[#allocation21_spill] sm:$0xff] }
 0x27c   : > { %v916_v57 = vsel %vm914_vm11, %v20743_v40, %v20742_v53  ;;  %v12769_v13 = vmin.u32 %v4873_v11, %v16333_v26  ;;  %vm20746_vm7 = vweird.f32 %v20745_v49  ;;  %v20747_v4 = vxor.u32 2147483648, %v20743_v40  ;;  %v20757_v45 = vld [vmem:[#allocation28_spill] sm:$0xff] }
 0x27d   : > { %v16366_v50 = vsel %vm20746_vm7, nan, %v2069_v48  ;;  %13616 = vcosq.f32 %v4055_v0  ;;  %v4863_v52 = vadd.s32 %v16245_v6, %v16271_v39  ;;  %vm1754_vm0 = vcmp.eq.s32.totalorder %v1752_v9, 0  ;;  %v20758_v48 = vld [vmem:[#allocation35_spill] sm:$0xff] }
 0x27e   : > { %v919_v38 = vsel %vm917_vm6, %v20747_v4, %v20741_v23  ;;  %13618 = vsinq.f32 %v4055_v0  ;;  %v4875_v18 = vclz %v12769_v13  ;;  %v4900_v59 = vadd.s32 3, %v16357_v58 }
 0x27f   : > { %v920_v36 = vsel %vm913_vm5, %v916_v57, %v919_v38  ;;  %vm1753_vm10 = vcmp.lt.s32.totalorder %v1752_v9, 2  ;;  %vm4066_vm3 = vcmp.eq.s32.totalorder %v16343_v29, 2  ;;  %v13119_v62 = vpack.c.bf16 %v16366_v50, %v16348_v35  ;;  %v20761_v57 = vld [vmem:[#allocation23_spill] sm:$0xff] }
 0x280   : > { %vm20749_vm2 = vweird.f32 %v20748_v33  ;;  %v20751_v28 = vxor.u32 2147483648, %v20750_v5  ;;  %vm1757_vm9 = vcmp.eq.s32.totalorder %v1752_v9, 2  ;;  %vm4063_vm14 = vcmp.eq.s32.totalorder %v16343_v29, 0  ;;  %v16612_v35 = vld [vmem:[%s13979_s12 + $0x8] sm:$0xff] }
 0x281   : > { %v921_v27 = vsel %vm20749_vm2, nan, %v920_v36  ;;  %v12770_v6 = vadd.s32 4294967294, %v4875_v18  ;;  %v20753_v39 = vxor.u32 2147483648, %v20752_v51  ;;  %v1118_v2 = vand.u32 3, %v20754_v47 }
 0x282   : > { %v1756_v1 = vsel %vm1754_vm0, %v20752_v51, %v20751_v28  ;;  %v1958_v20 = vand.u32 3, %v20755_v21  ;;  %vm4062_vm12 = vcmp.lt.s32.totalorder %v16343_v29, 2  ;;  %v2695_v61 = vand.u32 3, %v20756_v37  ;;  %v20767_v28 = vld [vmem:[#allocation26_spill] sm:$0xff] }
 0x283   : > { %v1759_v54 = vsel %vm1757_vm9, %v20753_v39, %v20750_v5  ;;  %v3535_v24 = vand.u32 3, %v20757_v45  ;;  %v16392_v11 = vand.u32 3, %v20758_v48  ;;  %vm12771_vm13 = vcmp.lt.s32.totalorder %v12770_v6, 0  ;;  %v20771_v45 = vld [vmem:[#allocation11_spill] sm:$0xff] }
 0x284   : > { %v1760_v34 = vsel %vm1753_vm10, %v1756_v1, %v1759_v54  ;;  %vm20760_vm11 = vweird.f32 %v20759_v43  ;;  %vm1119_vm5 = vcmp.lt.s32.totalorder %v1118_v2, 2  ;;  %vm1120_vm6 = vcmp.eq.s32.totalorder %v1118_v2, 0  ;;  %v20769_v1 = vld [vmem:[#allocation25_spill] sm:$0xff]  ;;  %v20773_v43 = vld [vmem:[#allocation31_spill] sm:$0xff] }
 0x285   : > { %v1761_v23 = vsel %vm20760_vm11, nan, %v1760_v34  ;;  %v4878_v53 = vsel %vm12771_vm13, 0, %v12770_v6  ;;  %v20762_v44 = vxor.u32 2147483648, %v20761_v57  ;;  %vm1123_vm7 = vcmp.eq.s32.totalorder %v1118_v2, 2 }
 0x286   : > { %v13069_v40 = vpack.c.bf16 %v1761_v23, %v921_v27  ;;  %v4879_v0 = vsub.s32 32, %v4878_v53  ;;  %v4880_v13 = vshll.u32 %v16333_v26, %v4878_v53  ;;  %v4883_v49 = vsub.s32 4294967266, %v4878_v53  ;;  %v20765_v27 = vld [vmem:[#allocation10_spill] sm:$0xff]  ;;  %v20775_v53 = vld [vmem:[#allocation29_spill] sm:$0xff] }
 0x287   : > { %v1122_v9 = vsel %vm1120_vm6, %v20763_v25, %v20762_v44  ;;  %v20764_v4 = vxor.u32 2147483648, %v20763_v25  ;;  %vm1959_vm0 = vcmp.lt.s32.totalorder %v1958_v20, 2  ;;  %vm1960_vm10 = vcmp.eq.s32.totalorder %v1958_v20, 0  ;;  %v16410_v6 = vpop.eup %13616 }
 0x288   : > { %13070 = vmatpush1.bf16.msra.mxu0 %v13069_v40  ;;  %vm1963_vm2 = vcmp.eq.s32.totalorder %v1958_v20, 2  ;;  %v4881_v18 = vshrl.u32 %v4863_v52, %v4879_v0  ;;  %v4884_v33 = vadd.s32 127, %v4883_v49  ;;  %vm20766_vm9 = vweird.f32 %v20765_v27  ;;  %v16415_v47 = vpop.eup %13618 }
 0x289   : > { %v1125_v38 = vsel %vm1123_vm7, %v20764_v4, %v20761_v57  ;;  %v20768_v51 = vxor.u32 2147483648, %v20767_v28  ;;  %v20770_v39 = vxor.u32 2147483648, %v20769_v1  ;;  %vm2696_vm13 = vcmp.lt.s32.totalorder %v2695_v61, 2 }
 0x28a   : > { %v1126_v36 = vsel %vm1119_vm5, %v1122_v9, %v1125_v38  ;;  %vm2697_vm11 = vcmp.eq.s32.totalorder %v2695_v61, 0  ;;  %vm2700_vm5 = vcmp.eq.s32.totalorder %v2695_v61, 2  ;;  %v4067_v52 = vxor.u32 2147483648, %v16410_v6 }
 0x28b   : > { %v16405_v5 = vsel %vm20766_vm9, nan, %v1126_v36  ;;  %v1962_v26 = vsel %vm1960_vm10, %v20769_v1, %v20768_v51  ;;  %v1965_v54 = vsel %vm1963_vm2, %v20770_v39, %v20767_v28  ;;  %v4882_v2 = vor.u32 %v4881_v18, %v4880_v13  ;;  %v20780_v28 = vld [vmem:[#allocation13_spill] sm:$0xff] }
 0x28c   : > { %v4885_v21 = vshll.u32 %v4884_v33, 23  ;;  %v1966_v34 = vsel %vm1959_vm0, %v1962_v26, %v1965_v54  ;;  %v4064_v37 = vxor.u32 2147483648, %v16415_v47  ;;  %vm20772_vm6 = vweird.f32 %v20771_v45  ;;  %v20779_v33 = vld [vmem:[#allocation33_spill] sm:$0xff]  ;;  %v20783_v26 = vld [vmem:[#allocation39_spill] sm:$0xff]  ;;  %v20787_v45 = vld [vmem:[#allocation38_spill] sm:$0xff] }
 0x28d   : > { %v16422_v48 = vsel %vm20772_vm6, nan, %v1966_v34  ;;  %v20774_v23 = vxor.u32 2147483648, %v20773_v43  ;;  %v20776_v57 = vxor.u32 2147483648, %v20775_v53  ;;  %v4068_v20 = vsel %vm4066_vm3, %v4067_v52, %v16415_v47  ;;  %v20785_v54 = vld [vmem:[#allocation37_spill] sm:$0xff] }
 0x28e   : > { %v4886_v25 = vor.u32 4788187, %v4885_v21  ;;  %v4889_v9 = vcvt.s32.f32 %v4882_v2  ;;  %v16435_v0 = vand.u32 3, %v4900_v59  ;;  %vm4059_vm7 = vweird.f32 %v15963_v42  ;;  %v20777_v59 = vld [vmem:[#allocation34_spill] sm:$0xff] }
 0x28f   : > { %v2699_v40 = vsel %vm2697_vm11, %v20775_v53, %v20774_v23  ;;  %v2702_v44 = vsel %vm2700_vm5, %v20776_v57, %v20773_v43  ;;  %v4065_v13 = vsel %vm4063_vm14, %v16410_v6, %v4064_v37  ;;  %v13121_v49 = vpack.c.bf16 %v16422_v48, %v16405_v5 }
 0x290   : > { %v2703_v4 = vsel %vm2696_vm13, %v2699_v40, %v2702_v44  ;;  %vm3537_vm0 = vcmp.eq.s32.totalorder %v3535_v24, 0  ;;  %v4069_v38 = vsel %vm4062_vm12, %v4065_v13, %v4068_v20  ;;  %v4887_v36 = vand.u32 2147483647, %v4886_v25  ;;  %v20788_v40 = vld [vmem:[#allocation19_spill] sm:$0xff]  ;;  %v20791_v13 = vld [vmem:[#allocation22_spill] sm:$0xff] }
 0x291   : > { %vm3536_vm3 = vcmp.lt.s32.totalorder %v3535_v24, 2  ;;  %v20778_v18 = vxor.u32 2147483648, %v20777_v59  ;;  %vm20781_vm10 = vweird.f32 %v20780_v28  ;;  %vm3540_vm2 = vcmp.eq.s32.totalorder %v3535_v24, 2  ;;  %v20790_v20 = vld [vmem:[#allocation43_spill] sm:$0xff] }
 0x292   : > { %v2704_v51 = vsel %vm20781_vm10, nan, %v2703_v4  ;;  %vm2902_vm14 = vcmp.lt.s32.totalorder %v16392_v11, 2  ;;  %vm2903_vm9 = vcmp.eq.s32.totalorder %v16392_v11, 0  ;;  %v4890_v61 = vmul.f32 %v4889_v9, %v4887_v36  ;;  %v20793_v36 = vld [vmem:[#allocation41_spill] sm:$0xff] }
 0x293   : > { %v3539_v27 = vsel %vm3537_vm0, %v20779_v33, %v20778_v18  ;;  %v20782_v1 = vxor.u32 2147483648, %v20779_v33  ;;  %v20784_v39 = vxor.u32 2147483648, %v20783_v26  ;;  %vm2906_vm12 = vcmp.eq.s32.totalorder %v16392_v11, 2 }
 0x294   : > { %v20786_v34 = vxor.u32 2147483648, %v20785_v54  ;;  %v3741_v43 = vand.u32 3, %v20787_v45  ;;  %v2592_v23 = vand.u32 3, %v15290_v63  ;;  %v4891_v53 = vxor.u32 2147483648, %v4890_v61  ;;  %v20795_v63 = vld [vmem:[#allocation40_spill] sm:$0xff] }
 0x295   : > { %v3542_v29 = vsel %vm3540_vm2, %v20782_v1, %v20777_v59  ;;  %v2905_v2 = vsel %vm2903_vm9, %v20785_v54, %v20784_v39  ;;  %vm20789_vm13 = vweird.f32 %v20788_v40  ;;  %v3432_v25 = vand.u32 3, %v20790_v20  ;;  %v20809_v20 = vld [vmem:[#allocation50_spill] sm:$0xff] }
 0x296   : > { %v3543_v21 = vsel %vm3536_vm3, %v3539_v27, %v3542_v29  ;;  %v2908_v24 = vsel %vm2906_vm12, %v20786_v34, %v20783_v26  ;;  %vm20792_vm11 = vweird.f32 %v20791_v13  ;;  %vm3742_vm5 = vcmp.lt.s32.totalorder %v3741_v43, 2  ;;  %v20799_v29 = vld [vmem:[#allocation44_spill] sm:$0xff] }
 0x297   : > { %v3544_v57 = vsel %vm20789_vm13, nan, %v3543_v21  ;;  %v2909_v44 = vsel %vm2902_vm14, %v2905_v2, %v2908_v24  ;;  %vm3743_vm6 = vcmp.eq.s32.totalorder %v3741_v43, 0  ;;  %v4892_v4 = vsel %vm4809_vm15, %v4891_v53, %v4890_v61  ;;  %v20797_v61 = vld [vmem:[#allocation46_spill] sm:$0xff]  ;;  %v20807_v53 = vld [vmem:[#allocation48_spill] sm:$0xff] }
 0x298   : > { %v13071_v9 = vpack.c.bf16 %v3544_v57, %v2704_v51  ;;  %v16472_v11 = vsel %vm20792_vm11, nan, %v2909_v44  ;;  %v20794_v59 = vxor.u32 2147483648, %v20793_v36  ;;  %vm3746_vm0 = vcmp.eq.s32.totalorder %v3741_v43, 2  ;;  %v20803_v24 = vld [vmem:[#allocation30_spill] sm:$0xff]  ;;  %v20805_v43 = vld [vmem:[#allocation49_spill] sm:$0xff] }
 0x299   : > { %vm2593_vm3 = vcmp.lt.s32.totalorder %v2592_v23, 2  ;;  %v4895_v33 = vsel %vm16311_vm8, %v15986_v32, %v4892_v4  ;;  %v20796_v27 = vxor.u32 2147483648, %v20795_v63  ;;  %vm2594_vm10 = vcmp.eq.s32.totalorder %v2592_v23, 0 }
 0x29a   : > { %v3745_v18 = vsel %vm3743_vm6, %v20795_v63, %v20794_v59  ;;  %13072 = vmatprep.subr.bf16.mxu0 %v13071_v9  ;;  %vm2597_vm2 = vcmp.eq.s32.totalorder %v2592_v23, 2  ;;  %13620 = vcosq.f32 %v4895_v33  ;;  %v20798_v1 = vxor.u32 2147483648, %v20797_v61  ;;  %v20810_v9 = vld [vmem:[#allocation53_spill] sm:$0xff]  ;;  %v20812_v63 = vld [vmem:[#allocation59_spill] sm:$0xff] }
 0x29b   : > { %v3748_v28 = vsel %vm3746_vm0, %v20796_v27, %v20793_v36  ;;  %v20800_v39 = vxor.u32 2147483648, %v20799_v29  ;;  %13622 = vsinq.f32 %v4895_v33  ;;  %vm20802_vm15 = vweird.f32 %v20801_v15  ;;  %v20811_v36 = vld [vmem:[#allocation55_spill] sm:$0xff]  ;;  %v20813_v33 = vld [vmem:[#allocation32_spill] sm:$0xff] }
 0x29c   : > { %v3749_v51 = vsel %vm3742_vm5, %v3745_v18, %v3748_v28  ;;  %v2596_v26 = vsel %vm2594_vm10, %v20799_v29, %v20798_v1  ;;  %vm3433_vm8 = vcmp.lt.s32.totalorder %v3432_v25, 2  ;;  %v16497_v34 = vsel %vm4059_vm7, nan, %v4069_v38  ;;  %v20817_v1 = vld [vmem:[#allocation51_spill] sm:$0xff] }
 0x29d   : > { %v2599_v54 = vsel %vm2597_vm2, %v20800_v39, %v20797_v61  ;;  %v16493_v2 = vsel %vm20802_vm15, nan, %v3749_v51  ;;  %vm4906_vm14 = vcmp.eq.s32.totalorder %v16435_v0, 2  ;;  %vm20804_vm9 = vweird.f32 %v20803_v24  ;;  %v20815_v51 = vld [vmem:[#allocation52_spill] sm:$0xff]  ;;  %v20819_v15 = vld [vmem:[#allocation63_spill] sm:$0xff]  ;;  %v20820_v24 = vld [vmem:[#allocation57_spill] sm:$0xff] }
 0x29e   : > { %v2600_v21 = vsel %vm2593_vm3, %v2596_v26, %v2599_v54  ;;  %vm3434_vm12 = vcmp.eq.s32.totalorder %v3432_v25, 0  ;;  %vm3437_vm13 = vcmp.eq.s32.totalorder %v3432_v25, 2  ;;  %vm4903_vm11 = vcmp.eq.s32.totalorder %v16435_v0, 0 }
 0x29f   : > { %v2601_v45 = vsel %vm20804_vm9, nan, %v2600_v21  ;;  %v20806_v23 = vxor.u32 2147483648, %v20805_v43  ;;  %v20808_v57 = vxor.u32 2147483648, %v20807_v53  ;;  %v2798_v38 = vand.u32 3, %v20809_v20 }
 0x2a0   : > { %v3638_v13 = vand.u32 3, %v20810_v9  ;;  %vm4902_vm5 = vcmp.lt.s32.totalorder %v16435_v0, 2  ;;  %v13123_v4 = vpack.c.bf16 %v16493_v2, %v16472_v11  ;;  %v4375_v59 = vand.u32 3, %v20811_v36 }
 0x2a1   : > { %v3436_v40 = vsel %vm3434_vm12, %v20807_v53, %v20806_v23  ;;  %v3439_v44 = vsel %vm3437_vm13, %v20808_v57, %v20805_v43  ;;  %v5215_v18 = vand.u32 3, %v20812_v63  ;;  %vm4899_vm6 = vweird.f32 %v15986_v32  ;;  %v20822_v23 = vld [vmem:[#allocation56_spill] sm:$0xff] }
 0x2a2   : > { %v3440_v25 = vsel %vm3433_vm8, %v3436_v40, %v3439_v44  ;;  %vm20814_vm0 = vweird.f32 %v20813_v33  ;;  %vm2799_vm3 = vcmp.lt.s32.totalorder %v2798_v38, 2  ;;  %vm2800_vm10 = vcmp.eq.s32.totalorder %v2798_v38, 0  ;;  %v20824_v57 = vld [vmem:[#allocation36_spill] sm:$0xff] }
 0x2a3   : > { %v3441_v27 = vsel %vm20814_vm0, nan, %v3440_v25  ;;  %vm2803_vm2 = vcmp.eq.s32.totalorder %v2798_v38, 2  ;;  %v20816_v61 = vxor.u32 2147483648, %v20815_v51  ;;  %v20818_v26 = vxor.u32 2147483648, %v20817_v1  ;;  %v20826_v38 = vld [vmem:[#allocation60_spill] sm:$0xff] }
 0x2a4   : > { %v13073_v28 = vpack.c.bf16 %v3441_v27, %v2601_v45  ;;  %vm3639_vm15 = vcmp.lt.s32.totalorder %v3638_v13, 2  ;;  %vm3640_vm8 = vcmp.eq.s32.totalorder %v3638_v13, 0  ;;  %vm3643_vm9 = vcmp.eq.s32.totalorder %v3638_v13, 2  ;;  %v20828_v13 = vld [vmem:[#allocation58_spill] sm:$0xff]  ;;  %v16539_v36 = vpop.eup %13620 }
 0x2a5   : > { %v2802_v29 = vsel %vm2800_vm10, %v20817_v1, %v20816_v61  ;;  %v2805_v39 = vsel %vm2803_vm2, %v20818_v26, %v20815_v51  ;;  %v4581_v21 = vand.u32 3, %v20819_v15  ;;  %v20821_v43 = vxor.u32 2147483648, %v20820_v24  ;;  %v16544_v27 = vpop.eup %13622  ;;  %v20830_v51 = vld [vmem:[#allocation42_spill] sm:$0xff]  ;;  %v20834_v26 = vld [vmem:[#allocation61_spill] sm:$0xff] }
 0x2a6   : > { %v2806_v54 = vsel %vm2799_vm3, %v2802_v29, %v2805_v39  ;;  %13074 = vmatpush1.bf16.msra.mxu0 %v13073_v28  ;;  %v20823_v45 = vxor.u32 2147483648, %v20822_v23  ;;  %vm4376_vm12 = vcmp.lt.s32.totalorder %v4375_v59, 2  ;;  %vm4377_vm13 = vcmp.eq.s32.totalorder %v4375_v59, 0  ;;  %v20832_v29 = vld [vmem:[#allocation62_spill] sm:$0xff]  ;;  %v20835_v15 = vld [vmem:[#allocation45_spill] sm:$0xff] }
 0x2a7   : > { %v3642_v53 = vsel %vm3640_vm8, %v20822_v23, %v20821_v43  ;;  %vm20825_vm0 = vweird.f32 %v20824_v57  ;;  %v20827_v9 = vxor.u32 2147483648, %v20826_v38  ;;  %vm4380_vm3 = vcmp.eq.s32.totalorder %v4375_v59, 2 }
 0x2a8   : > { %v3645_v40 = vsel %vm3643_vm9, %v20823_v45, %v20820_v24  ;;  %v16534_v44 = vsel %vm20825_vm0, nan, %v2806_v54  ;;  %v20829_v63 = vxor.u32 2147483648, %v20828_v13  ;;  %vm5216_vm10 = vcmp.lt.s32.totalorder %v5215_v18, 2 }
 0x2a9   : > { %v3646_v20 = vsel %vm3639_vm15, %v3642_v53, %v3645_v40  ;;  %v4379_v25 = vsel %vm4377_vm13, %v20828_v13, %v20827_v9  ;;  %vm5217_vm2 = vcmp.eq.s32.totalorder %v5215_v18, 0  ;;  %vm5220_vm8 = vcmp.eq.s32.totalorder %v5215_v18, 2  ;;  %v20838_v40 = vld [vmem:[#allocation47_spill] sm:$0xff]  ;;  %v20842_v9 = vld [vmem:[#allocation65_spill] sm:$0xff] }
 0x2aa   : > { %v4382_v33 = vsel %vm4380_vm3, %v20829_v63, %v20826_v38  ;;  %v4907_v28 = vxor.u32 2147483648, %v16539_v36  ;;  %vm20831_vm15 = vweird.f32 %v20830_v51  ;;  %v20833_v59 = vxor.u32 2147483648, %v20832_v29 }
 0x2ab   : > { %v16549_v61 = vsel %vm20831_vm15, nan, %v3646_v20  ;;  %v4383_v1 = vsel %vm4376_vm12, %v4379_v25, %v4382_v33  ;;  %v4904_v54 = vxor.u32 2147483648, %v16544_v27  ;;  %vm20836_vm9 = vweird.f32 %v20835_v15  ;;  %v20840_v20 = vld [vmem:[#allocation66_spill] sm:$0xff] }
 0x2ac   : > { %v5219_v39 = vsel %vm5217_vm2, %v20834_v26, %v20833_v59  ;;  %v4384_v24 = vsel %vm20836_vm9, nan, %v4383_v1  ;;  %v20837_v18 = vxor.u32 2147483648, %v20834_v26  ;;  %vm4582_vm13 = vcmp.lt.s32.totalorder %v4581_v21, 2  ;;  %v20844_v1 = vld [vmem:[#allocation64_spill] sm:$0xff] }
 0x2ad   : > { %v4908_v23 = vsel %vm4906_vm14, %v4907_v28, %v16544_v27  ;;  %vm4583_vm12 = vcmp.eq.s32.totalorder %v4581_v21, 0  ;;  %vm4586_vm0 = vcmp.eq.s32.totalorder %v4581_v21, 2  ;;  %v4905_v45 = vsel %vm4903_vm11, %v16539_v36, %v4904_v54 }
 0x2ae   : > { %v5222_v43 = vsel %vm5220_vm8, %v20837_v18, %v20832_v29  ;;  %vm20839_vm3 = vweird.f32 %v20838_v40  ;;  %v20841_v38 = vxor.u32 2147483648, %v20840_v20  ;;  %v20843_v25 = vxor.u32 2147483648, %v20842_v9 }
 0x2af   : > { %v5223_v53 = vsel %vm5216_vm10, %v5219_v39, %v5222_v43  ;;  %v4909_v21 = vsel %vm4902_vm5, %v4905_v45, %v4908_v23  ;;  %v5421_v29 = vand.u32 3, %v20844_v1  ;;  %vm20845_vm14 = vweird.f32 %v15460_v60 }
 0x2b0   : > { %v5224_v57 = vsel %vm20839_vm3, nan, %v5223_v53  ;;  %v4585_v13 = vsel %vm4583_vm12, %v20842_v9, %v20841_v38  ;;  %v4588_v63 = vsel %vm4586_vm0, %v20843_v25, %v20840_v20  ;;  %v4910_v59 = vsel %vm4899_vm6, nan, %v4909_v21  ;;  %v16656_v38 = vld [vmem:[%s13979_s12 + $0x18] sm:$0xff] }
 0x2b1   : > { %v13075_v33 = vpack.c.bf16 %v5224_v57, %v4384_v24  ;;  %v4589_v51 = vsel %vm4582_vm13, %v4585_v13, %v4588_v63  ;;  %v4272_v39 = vand.u32 3, %v16047_v7  ;;  %v5112_v15 = vand.u32 3, %v16140_v22  ;;  %20852 = vst [vmem:[#allocation6_spill] sm:$0xff] %v16656_v38 }
 0x2b2   : > { %v4590_v26 = vsel %vm20845_vm14, nan, %v4589_v51  ;;  %v13117_v18 = vpack.c.bf16 %v4910_v59, %v16497_v34  ;;  %vm5422_vm11 = vcmp.lt.s32.totalorder %v5421_v29, 2  ;;  %vm5423_vm10 = vcmp.eq.s32.totalorder %v5421_v29, 0  ;;  %v20849_v34 = vld [vmem:[#allocation54_spill] sm:$0xff] }
 0x2b3   : > { %13076 = vmatprep.subr.bf16.mxu0 %v13075_v33  ;;  %vm5426_vm5 = vcmp.eq.s32.totalorder %v5421_v29, 2  ;;  %v20846_v0 = vxor.u32 2147483648, %v16080_v10  ;;  %v20847_v43 = vxor.u32 2147483648, %v16076_v8  ;;  %vm4273_vm2 = vcmp.lt.s32.totalorder %v4272_v39, 2 }
 0x2b4   : > { %vm4274_vm8 = vcmp.eq.s32.totalorder %v4272_v39, 0  ;;  %13118 = vmatpush1.bf16.msra.mxu1 %v13117_v18  ;;  %v20848_v7 = vxor.u32 2147483648, %v16155_v30  ;;  %vm4277_vm15 = vcmp.eq.s32.totalorder %v4272_v39, 2  ;;  %vm5113_vm9 = vcmp.lt.s32.totalorder %v5112_v15, 2 }
 0x2b5   : > { %v5425_v24 = vsel %vm5423_vm10, %v16076_v8, %v20846_v0  ;;  %v5428_v23 = vsel %vm5426_vm5, %v20847_v43, %v16080_v10  ;;  %13120 = vmatprep.subr.bf16.mxu1 %v13119_v62  ;;  %vm20850_vm13 = vweird.f32 %v20849_v34  ;;  %v20851_v8 = vxor.u32 2147483648, %v16147_v31 }
 0x2b6   : > { %v5429_v60 = vsel %vm5422_vm11, %v5425_v24, %v5428_v23  ;;  %v4276_v22 = vsel %vm4274_vm8, %v16147_v31, %v20848_v7  ;;  %vm5114_vm12 = vcmp.eq.s32.totalorder %v5112_v15, 0  ;;  %vm5117_vm0 = vcmp.eq.s32.totalorder %v5112_v15, 2 }
 0x2b7   : > { %v5430_v53 = vsel %vm20850_vm13, nan, %v5429_v60  ;;  %v4279_v10 = vsel %vm4277_vm15, %v20851_v8, %v16155_v30  ;;  %v5116_v40 = vsel %vm5114_vm12, %v16291_v14, %v4696_v46  ;;  %v5119_v57 = vsel %vm5117_vm0, %v4699_v41, %v16296_v12 }
 0x2b8   : > { %v4280_v45 = vsel %vm4273_vm2, %v4276_v22, %v4279_v10  ;;  %v5539_v50 = vand.u32 2147483647, %v16612_v35  ;;  %v5120_v31 = vsel %vm5113_vm9, %v5116_v40, %v5119_v57  ;;  %v4478_v30 = vand.u32 3, %v16258_v3  ;;  %13122 = vmatpush1.bf16.msra.mxu1 %v13121_v49 }
 0x2b9   : > { %v4281_v62 = vsel %vm3851_vm1, nan, %v4280_v45  ;;  %v5318_v20 = vand.u32 3, %v16357_v58  ;;  %v13125_v14 = vpack.c.bf16 %v16549_v61, %v16534_v44  ;;  %v13127_v12 = vpack.c.bf16 %v5430_v53, %v4590_v26  ;;  %13124 = vmatprep.subr.bf16.mxu1 %v13123_v4 }
 0x2ba   : > { %v5121_v41 = vsel %vm4691_vm4, nan, %v5120_v31  ;;  %v5542_v46 = vand.u32 2139095040, %v16612_v35  ;;  %vm4479_vm1 = vcmp.lt.s32.totalorder %v4478_v30, 2  ;;  %vm4480_vm3 = vcmp.eq.s32.totalorder %v4478_v30, 0 }
 0x2bb   : > { %v13077_v55 = vpack.c.bf16 %v5121_v41, %v4281_v62  ;;  %vm4483_vm14 = vcmp.eq.s32.totalorder %v4478_v30, 2  ;;  %v4482_v3 = vsel %vm4480_vm3, %v16410_v6, %v4064_v37  ;;  %vm5319_vm11 = vcmp.lt.s32.totalorder %v5318_v20, 2 }
 0x2bc   : > { %v4485_v58 = vsel %vm4483_vm14, %v4067_v52, %v16415_v47  ;;  %vm5320_vm4 = vcmp.eq.s32.totalorder %v5318_v20, 0  ;;  %vm5323_vm10 = vcmp.eq.s32.totalorder %v5318_v20, 2  ;;  %v5543_v48 = vshrl.u32 %v5542_v46, 23  ;;  %13126 = vmatpush1.bf16.msra.mxu1 %v13125_v14 }
 0x2bd   : > { %13078 = vmatpush1.bf16.msra.mxu0 %v13077_v55  ;;  %v4486_v16 = vsel %vm4479_vm1, %v4482_v3, %v4485_v58  ;;  %v5322_v5 = vsel %vm5320_vm4, %v16539_v36, %v4904_v54  ;;  %v5325_v37 = vsel %vm5323_vm10, %v4907_v28, %v16544_v27  ;;  %v5546_v6 = vand.u32 8388607, %v5539_v50  ;;  %13128 = vmatprep.subr.bf16.mxu1 %v13127_v12 }
 0x2be   : > { %v4487_v49 = vsel %vm4059_vm7, nan, %v4486_v16  ;;  %v5326_v47 = vsel %vm5319_vm11, %v5322_v5, %v5325_v37  ;;  %v12796_v52 = vadd.s32 4294967169, %v5543_v48  ;;  %v16647_v11 = vmul.f32 2.0, %v16612_v35 }
 0x2bf   : > { %v5327_v2 = vsel %vm4899_vm6, nan, %v5326_v47  ;;  %v5547_v61 = vor.u32 8388608, %v5546_v6  ;;  %v5750_v9 = vand.u32 2139095040, %v16656_v38  ;;  %v20853_v51 = vmov 2475754826  }
 0x2c0   : > { %v13129_v4 = vpack.c.bf16 %v5327_v2, %v4487_v49  ;;  %v5549_v42 = vadd.s32 1, %v12796_v52  ;;  %v6379_v44 = vand.u32 2147483647, %v16647_v11  ;;  %v6382_v36 = vand.u32 2139095040, %v16647_v11 }
 0x2c1   : > { %v16659_v25 = vshll.u32 %v5547_v61, 8  ;;  %v20854_v29 = vmov 2131351028   ;;  %v20855_v26 = vmov 2102212464   ;;  %v5751_v0 = vshrl.u32 %v5750_v9, 23 }
 0x2c2   : > { %13130 = vmatpush1.bf16.msra.mxu1 %v13129_v4  ;;  %vm5550_vm7 = vcmp.gt.s32.totalorder %v5549_v42, 0  ;;  %v6383_v28 = vshrl.u32 %v6382_v36, 23  ;;  %v6386_v54 = vand.u32 8388607, %v6379_v44  ;;  %v5747_v2 = vand.u32 2147483647, %v16656_v38 }
 0x2c3   : > { %v5551_v27 = vsel %vm5550_vm7, %v5549_v42, 0  ;;  %v12804_v3 = vadd.s32 4294967169, %v5751_v0  ;;  %vm5541_vm14 = vcmp.lt.s32.totalorder %v16612_v35, 0 }
 0x2c4   : > { %v5553_v32 = vand.u32 31, %v5551_v27  ;;  %v5552_v13 = vshrl.u32 %v5551_v27, 5  ;;  %v12828_v63 = vadd.s32 4294967169, %v6383_v28  ;;  %v6387_v18 = vor.u32 8388608, %v6386_v54 }
 0x2c5   : > { %v5757_v61 = vadd.s32 1, %v12804_v3 }
 0x2c6   : > { %v5554_v21 = vsub.s32 32, %v5553_v32  ;;  %v5556_v33 = vshll.u32 %v20638_v19, %v5553_v32  ;;  %v5559_v1 = vshll.u32 %v20853_v51, %v5553_v32  ;;  %v5562_v59 = vshll.u32 %v20854_v29, %v5553_v32 }
 0x2c7   : > { %v5565_v39 = vshll.u32 %v20855_v26, %v5553_v32  ;;  %v5568_v15 = vshll.u32 %v20655_v56, %v5553_v32  ;;  %vm5571_vm6 = vcmp.lt.s32.totalorder %v5552_v13, 1  ;;  %vm5574_vm5 = vcmp.lt.s32.totalorder %v5552_v13, 4 }
 0x2c8   : > { %v5555_v24 = vshrl.u32 %v20638_v19, %v5554_v21  ;;  %v5557_v43 = vshrl.u32 %v20853_v51, %v5554_v21  ;;  %v5560_v23 = vshrl.u32 %v20854_v29, %v5554_v21  ;;  %v5563_v60 = vshrl.u32 %v20855_v26, %v5554_v21 }
 0x2c9   : > { %v5566_v7 = vshrl.u32 %v20655_v56, %v5554_v21  ;;  %v5569_v22 = vshrl.u32 %v20630_v17, %v5554_v21  ;;  %v6389_v10 = vadd.s32 1, %v12828_v63  ;;  %vm5572_vm2 = vcmp.lt.s32.totalorder %v5552_v13, 2 }
 0x2ca   : > { %v5558_v34 = vor.u32 %v5557_v43, %v5556_v33  ;;  %v5561_v53 = vor.u32 %v5560_v23, %v5559_v1  ;;  %v5564_v8 = vor.u32 %v5563_v60, %v5562_v59  ;;  %vm5573_vm8 = vcmp.lt.s32.totalorder %v5552_v13, 3 }
 0x2cb   : > { %v5567_v45 = vor.u32 %v5566_v7, %v5565_v39  ;;  %v5570_v40 = vor.u32 %v5569_v22, %v5568_v15  ;;  %vm6390_vm15 = vcmp.gt.s32.totalorder %v6389_v10, 0  ;;  %v16686_v42 = vshll.u32 %v6387_v18, 8 }
 0x2cc   : > { %v5575_v57 = vsel %vm5571_vm6, %v5555_v24, %v5558_v34  ;;  %v5576_v62 = vsel %vm5574_vm5, %v5564_v8, 2102212464  ;;  %v5579_v31 = vsel %vm5571_vm6, %v5558_v34, %v5561_v53  ;;  %v5583_v30 = vsel %vm5571_vm6, %v5561_v53, %v5564_v8 }
 0x2cd   : > { %v5577_v20 = vsel %vm5573_vm8, %v5561_v53, %v5576_v62  ;;  %v5580_v14 = vsel %vm5574_vm5, %v5567_v45, 920167782  ;;  %v5584_v12 = vsel %vm5574_vm5, %v5570_v40, 1326507024  ;;  %v6391_v55 = vsel %vm6390_vm15, %v6389_v10, 0 }
 0x2ce   : > { %v5581_v41 = vsel %vm5573_vm8, %v5564_v8, %v5580_v14  ;;  %v5585_v46 = vsel %vm5573_vm8, %v5567_v45, %v5584_v12  ;;  %v5578_v58 = vsel %vm5572_vm2, %v5575_v57, %v5577_v20  ;;  %v6392_v48 = vshrl.u32 %v6391_v55, 5 }
 0x2cf   : > { %v5582_v16 = vsel %vm5572_vm2, %v5579_v31, %v5581_v41  ;;  %v5586_v5 = vsel %vm5572_vm2, %v5583_v30, %v5585_v46  ;;  %v6393_v52 = vand.u32 31, %v6391_v55  ;;  %v5594_v4 = vmul.u32 %v16659_v25, %v5578_v58 }
 0x2d0   : > { %v16676_v49 = vmul.u32.u64.low %v16659_v25, %v5586_v5  ;;  %v16677_v37 = vmul.u32.u64.high %v16659_v25, %v5586_v5, %v16676_v49  ;;  %v16680_v6 = vmul.u32.u64.low %v16659_v25, %v5582_v16  ;;  %v16681_v47 = vmul.u32.u64.high %v16659_v25, %v5582_v16, %v16680_v6 }
 0x2d1   : > { %vm6411_vm9 = vcmp.lt.s32.totalorder %v6392_v48, 1  ;;  %v6394_v36 = vsub.s32 32, %v6393_v52  ;;  %v6396_v27 = vshll.u32 %v20638_v19, %v6393_v52  ;;  %v6399_v28 = vshll.u32 %v20853_v51, %v6393_v52 }
 0x2d2   : > { %v6402_v54 = vshll.u32 %v20854_v29, %v6393_v52  ;;  %vm5596_vm13 = vc.u32 %v16677_v37, %v16680_v6  ;;  %v5597_v9 = vadd.s32 1, %v16681_v47  ;;  %v6405_v32 = vshll.u32 %v20855_v26, %v6393_v52 }
 0x2d3   : > { %vm6413_vm12 = vcmp.lt.s32.totalorder %v6392_v48, 3  ;;  %v6397_v13 = vshrl.u32 %v20853_v51, %v6394_v36  ;;  %v6400_v25 = vshrl.u32 %v20854_v29, %v6394_v36  ;;  %v6403_v63 = vshrl.u32 %v20855_v26, %v6394_v36 }
 0x2d4   : > { %vm6414_vm0 = vcmp.lt.s32.totalorder %v6392_v48, 4  ;;  %v5598_v21 = vsel %vm5596_vm13, %v5597_v9, %v16681_v47  ;;  %v6406_v33 = vshrl.u32 %v20655_v56, %v6394_v36  ;;  %v6408_v1 = vshll.u32 %v20655_v56, %v6393_v52 }
 0x2d5   : > { %v6409_v59 = vshrl.u32 %v20630_v17, %v6394_v36  ;;  %v5599_v39 = vadd.s32 %v5598_v21, %v5594_v4  ;;  %v6398_v15 = vor.u32 %v6397_v13, %v6396_v27  ;;  %v6401_v18 = vor.u32 %v6400_v25, %v6399_v28 }
 0x2d6   : > { %v6404_v0 = vor.u32 %v6403_v63, %v6402_v54  ;;  %v6395_v24 = vshrl.u32 %v20638_v19, %v6394_v36  ;;  %v6407_v43 = vor.u32 %v6406_v33, %v6405_v32  ;;  %vm5758_vm1 = vcmp.gt.s32.totalorder %v5757_v61, 0 }
 0x2d7   : > { %v6410_v23 = vor.u32 %v6409_v59, %v6408_v1  ;;  %v5600_v60 = vadd.s32 536870912, %v5599_v39  ;;  %vm6412_vm3 = vcmp.lt.s32.totalorder %v6392_v48, 2  ;;  %v6419_v22 = vsel %vm6411_vm9, %v6398_v15, %v6401_v18 }
 0x2d8   : > { %v6416_v7 = vsel %vm6414_vm0, %v6404_v0, 2102212464  ;;  %v6420_v34 = vsel %vm6414_vm0, %v6407_v43, 920167782  ;;  %v6423_v53 = vsel %vm6411_vm9, %v6401_v18, %v6404_v0  ;;  %v5754_v10 = vand.u32 8388607, %v5747_v2 }
 0x2d9   : > { %v6424_v8 = vsel %vm6414_vm0, %v6410_v23, 1326507024  ;;  %v5601_v45 = vshrl.u32 %v5600_v60, 30  ;;  %v6421_v40 = vsel %vm6413_vm12, %v6404_v0, %v6420_v34  ;;  %v5759_v62 = vsel %vm5758_vm1, %v5757_v61, 0 }
 0x2da   : > { %v6425_v57 = vsel %vm6413_vm12, %v6407_v43, %v6424_v8  ;;  %v6415_v31 = vsel %vm6411_vm9, %v6395_v24, %v6398_v15  ;;  %v6417_v30 = vsel %vm6413_vm12, %v6401_v18, %v6416_v7  ;;  %v6422_v20 = vsel %vm6412_vm3, %v6419_v22, %v6421_v40 }
 0x2db   : > { %v6426_v14 = vsel %vm6412_vm3, %v6423_v53, %v6425_v57  ;;  %v5602_v12 = vshll.u32 %v5601_v45, 30  ;;  %v16721_v55 = vmul.u32.u64.low %v16686_v42, %v6422_v20  ;;  %v16722_v3 = vmul.u32.u64.high %v16686_v42, %v6422_v20, %v16721_v55 }
 0x2dc   : > { %v16717_v41 = vmul.u32.u64.low %v16686_v42, %v6426_v14  ;;  %v16718_v46 = vmul.u32.u64.high %v16686_v42, %v6426_v14, %v16717_v41  ;;  %v5761_v58 = vand.u32 31, %v5759_v62  ;;  %v6418_v5 = vsel %vm6412_vm3, %v6415_v31, %v6417_v30 }
 0x2dd   : > { %v16726_v16 = vsub.s32 %v5599_v39, %v5602_v12  ;;  %v5755_v49 = vor.u32 8388608, %v5754_v10  ;;  %v5625_v47 = vsub.s32 4, %v5601_v45  ;;  %v16729_v52 = vshrl.u32 %v5759_v62, 5 }
 0x2de   : > { %v5762_v4 = vsub.s32 32, %v5761_v58  ;;  %v16732_v61 = vmul.f32 2.0, %v16656_v38  ;;  %vm6436_vm11 = vc.u32 %v16718_v46, %v16721_v55  ;;  %v5764_v27 = vshll.u32 %v20638_v19, %v5761_v58 }
 0x2df   : > { %v5605_v36 = vsub.s32 0, %v16726_v16  ;;  %v5767_v28 = vshll.u32 %v20853_v51, %v5761_v58  ;;  %v6434_v48 = vmul.u32 %v16686_v42, %v6418_v5  ;;  %v6437_v54 = vadd.s32 1, %v16722_v3 }
 0x2e0   : > { %20856 = vst [vmem:[#allocation15_spill] sm:$0xff] %v16732_v61  ;;  %v5765_v9 = vshrl.u32 %v20853_v51, %v5762_v4  ;;  %v5768_v32 = vshrl.u32 %v20854_v29, %v5762_v4  ;;  %v5770_v25 = vshll.u32 %v20854_v29, %v5761_v58  ;;  %v5771_v63 = vshrl.u32 %v20855_v26, %v5762_v4 }
 0x2e1   : > { %v12797_v13 = vmin.u32 %v5605_v36, %v16726_v16  ;;  %v16746_v21 = vshll.u32 %v5755_v49, 8  ;;  %v5595_v33 = vadd.s32 %v16680_v6, %v16677_v37  ;;  %v6438_v1 = vsel %vm6436_vm11, %v6437_v54, %v16722_v3 }
 0x2e2   : > { %v5773_v42 = vshll.u32 %v20855_v26, %v5761_v58  ;;  %vm5779_vm4 = vcmp.lt.s32.totalorder %v16729_v52, 1  ;;  %v5626_v39 = vsel %vm5541_vm14, %v5625_v47, %v5601_v45  ;;  %v5766_v15 = vor.u32 %v5765_v9, %v5764_v27 }
 0x2e3   : > { %v5607_v59 = vclz %v12797_v13  ;;  %v5769_v18 = vor.u32 %v5768_v32, %v5767_v28  ;;  %v6439_v0 = vadd.s32 %v6438_v1, %v6434_v48  ;;  %v5772_v24 = vor.u32 %v5771_v63, %v5770_v25 }
 0x2e4   : > { %v5774_v43 = vshrl.u32 %v20655_v56, %v5762_v4  ;;  %v5776_v23 = vshll.u32 %v20655_v56, %v5761_v58  ;;  %v5777_v37 = vshrl.u32 %v20630_v17, %v5762_v4  ;;  %vm5780_vm10 = vcmp.lt.s32.totalorder %v16729_v52, 2 }
 0x2e5   : > { %v12798_v60 = vadd.s32 4294967294, %v5607_v59  ;;  %vm5782_vm7 = vcmp.lt.s32.totalorder %v16729_v52, 4  ;;  %v6440_v6 = vadd.s32 536870912, %v6439_v0  ;;  %v5763_v7 = vshrl.u32 %v20638_v19, %v5762_v4 }
 0x2e6   : > { %v5775_v22 = vor.u32 %v5774_v43, %v5773_v42  ;;  %vm5781_vm6 = vcmp.lt.s32.totalorder %v16729_v52, 3  ;;  %v5778_v34 = vor.u32 %v5777_v37, %v5776_v23  ;;  %v5784_v53 = vsel %vm5782_vm7, %v5772_v24, 2102212464 }
 0x2e7   : > { %vm12799_vm5 = vcmp.lt.s32.totalorder %v12798_v60, 0  ;;  %v5787_v8 = vsel %vm5779_vm4, %v5766_v15, %v5769_v18  ;;  %v6441_v45 = vshrl.u32 %v6440_v6, 30  ;;  %v5791_v57 = vsel %vm5779_vm4, %v5769_v18, %v5772_v24 }
 0x2e8   : > { %v5610_v10 = vsel %vm12799_vm5, 0, %v12798_v60  ;;  %v5788_v40 = vsel %vm5782_vm7, %v5775_v22, 920167782  ;;  %v5783_v12 = vsel %vm5779_vm4, %v5763_v7, %v5766_v15  ;;  %v5785_v41 = vsel %vm5781_vm6, %v5769_v18, %v5784_v53  ;;  %v16820_v7 = vld [vmem:[%s13979_s12] sm:$0xff] }
 0x2e9   : > { %v5611_v62 = vsub.s32 32, %v5610_v10  ;;  %v5612_v31 = vshll.u32 %v16726_v16, %v5610_v10  ;;  %v5615_v30 = vsub.s32 4294967266, %v5610_v10  ;;  %v5789_v20 = vsel %vm5781_vm6, %v5772_v24, %v5788_v40  ;;  %20861 = vst [vmem:[#allocation14_spill] sm:$0xff] %v16820_v7 }
 0x2ea   : > { %v6442_v14 = vshll.u32 %v6441_v45, 30  ;;  %v5792_v3 = vsel %vm5782_vm7, %v5778_v34, 1326507024  ;;  %vm16781_vm2 = vcmp.le.f32.partialorder %v5539_v50, 0.7853982  ;;  %v5790_v36 = vsel %vm5780_vm10, %v5787_v8, %v5789_v20 }
 0x2eb   : > { %v5613_v16 = vshrl.u32 %v5595_v33, %v5611_v62  ;;  %v5616_v5 = vadd.s32 127, %v5615_v30  ;;  %v5793_v49 = vsel %vm5781_vm6, %v5775_v22, %v5792_v3  ;;  %v16789_v47 = vsel %vm16781_vm2, 0, %v5626_v39 }
 0x2ec   : > { %v6443_v4 = vsub.s32 %v6439_v0, %v6442_v14  ;;  %v5794_v27 = vsel %vm5780_vm10, %v5791_v57, %v5793_v49  ;;  %v5786_v48 = vsel %vm5780_vm10, %v5783_v12, %v5785_v41  ;;  %v6590_v54 = vand.u32 2139095040, %v16732_v61 }
 0x2ed   : > { %v5614_v50 = vor.u32 %v5613_v16, %v5612_v31  ;;  %v5617_v28 = vshll.u32 %v5616_v5, 23  ;;  %v6465_v32 = vsub.s32 4, %v6441_v45  ;;  %v5632_v52 = vadd.s32 3, %v16789_v47 }
 0x2ee   : > { %v6445_v9 = vsub.s32 0, %v6443_v4  ;;  %v16799_v13 = vmul.u32.u64.low %v16746_v21, %v5794_v27  ;;  %v16800_v25 = vmul.u32.u64.high %v16746_v21, %v5794_v27, %v16799_v13  ;;  %v6591_v39 = vshrl.u32 %v6590_v54, 23 }
 0x2ef   : > { %v5618_v63 = vor.u32 4788187, %v5617_v28  ;;  %v5621_v33 = vcvt.s32.f32 %v5614_v50  ;;  %v16803_v1 = vmul.u32.u64.low %v16746_v21, %v5790_v36  ;;  %v16804_v42 = vmul.u32.u64.high %v16746_v21, %v5790_v36, %v16803_v1 }
 0x2f0   : > { %v12829_v59 = vmin.u32 %v6445_v9, %v6443_v4  ;;  %vm6381_vm8 = vcmp.lt.s32.totalorder %v16647_v11, 0  ;;  %v5802_v0 = vmul.u32 %v16746_v21, %v5786_v48  ;;  %vm16815_vm9 = vcmp.le.f32.partialorder %v6379_v44, 0.7853982 }
 0x2f1   : > { %v5619_v15 = vand.u32 2147483647, %v5618_v63  ;;  %v6466_v43 = vsel %vm6381_vm8, %v6465_v32, %v6441_v45  ;;  %vm5804_vm15 = vc.u32 %v16800_v25, %v16803_v1  ;;  %v5805_v23 = vadd.s32 1, %v16804_v42 }
 0x2f2   : > { %v6447_v18 = vclz %v12829_v59  ;;  %v12836_v6 = vadd.s32 4294967169, %v6591_v39  ;;  %v5435_v21 = vand.u32 2147483647, %v16820_v7  ;;  %v6435_v34 = vadd.s32 %v16721_v55, %v16718_v46 }
 0x2f3   : > { %v5622_v24 = vmul.f32 %v5621_v33, %v5619_v15  ;;  %v5806_v53 = vsel %vm5804_vm15, %v5805_v23, %v16804_v42  ;;  %v6587_v8 = vand.u32 2147483647, %v16732_v61  ;;  %v16829_v44 = vsel %vm16815_vm9, 0, %v6466_v43 }
 0x2f4   : > { %v12830_v37 = vadd.s32 4294967294, %v6447_v18  ;;  %v5807_v10 = vadd.s32 %v5806_v53, %v5802_v0  ;;  %v6597_v45 = vadd.s32 1, %v12836_v6  ;;  %v16833_v57 = vand.u32 3, %v5632_v52 }
 0x2f5   : > { %v5623_v22 = vxor.u32 2147483648, %v5622_v24  ;;  %v5438_v31 = vand.u32 2139095040, %v16820_v7  ;;  %v6472_v14 = vadd.s32 3, %v16829_v44  ;;  %v6594_v49 = vand.u32 8388607, %v6587_v8 }
 0x2f6   : > { %vm12831_vm13 = vcmp.lt.s32.totalorder %v12830_v37, 0  ;;  %v5808_v12 = vadd.s32 536870912, %v5807_v10  ;;  %vm6598_vm12 = vcmp.gt.s32.totalorder %v6597_v45, 0  ;;  %vm5638_vm0 = vcmp.eq.s32.totalorder %v16833_v57, 2 }
 0x2f7   : > { %v5624_v40 = vsel %vm5541_vm14, %v5623_v22, %v5622_v24  ;;  %v6450_v62 = vsel %vm12831_vm13, 0, %v12830_v37  ;;  %v6599_v16 = vsel %vm6598_vm12, %v6597_v45, 0  ;;  %v5439_v58 = vshrl.u32 %v5438_v31, 23 }
 0x2f8   : > { %v5627_v46 = vsel %vm16781_vm2, %v16612_v35, %v5624_v40  ;;  %v6451_v55 = vsub.s32 32, %v6450_v62  ;;  %v6452_v30 = vshll.u32 %v6443_v4, %v6450_v62  ;;  %v6455_v20 = vsub.s32 4294967266, %v6450_v62 }
 0x2f9   : > { %13624 = vcosq.f32 %v5627_v46  ;;  %v16840_v5 = vshrl.u32 %v5808_v12, 30  ;;  %v6601_v36 = vand.u32 31, %v6599_v16  ;;  %v16846_v9 = vand.u32 3, %v6472_v14 }
 0x2fa   : > { %13626 = vsinq.f32 %v5627_v46  ;;  %v6453_v41 = vshrl.u32 %v6435_v34, %v6451_v55  ;;  %v6456_v3 = vadd.s32 127, %v6455_v20  ;;  %v5803_v32 = vadd.s32 %v16803_v1, %v16800_v25 }
 0x2fb   : > { %v5810_v4 = vshll.u32 %v16840_v5, 30  ;;  %v6602_v28 = vsub.s32 32, %v6601_v36  ;;  %v6595_v63 = vor.u32 8388608, %v6594_v49  ;;  %v12792_v33 = vadd.s32 4294967169, %v5439_v58 }
 0x2fc   : > { %v6454_v27 = vor.u32 %v6453_v41, %v6452_v30  ;;  %v6457_v50 = vshll.u32 %v6456_v3, 23  ;;  %v16853_v42 = vand.u32 8388607, %v5435_v21  ;;  %v16855_v39 = vshrl.u32 %v6599_v16, 5 }
 0x2fd   : > { %v16849_v13 = vsub.s32 %v5807_v10, %v5810_v4  ;;  %v6604_v15 = vshll.u32 %v20638_v19, %v6601_v36  ;;  %v6607_v52 = vshll.u32 %v20853_v51, %v6601_v36  ;;  %vm5635_vm1 = vcmp.eq.s32.totalorder %v16833_v57, 0 }
 0x2fe   : > { %v6458_v48 = vor.u32 4788187, %v6457_v50  ;;  %v6461_v54 = vcvt.s32.f32 %v6454_v27  ;;  %v6605_v25 = vshrl.u32 %v20853_v51, %v6602_v28  ;;  %v6608_v1 = vshrl.u32 %v20854_v29, %v6602_v28 }
 0x2ff   : > { %v5813_v18 = vsub.s32 0, %v16849_v13  ;;  %v6610_v0 = vshll.u32 %v20854_v29, %v6601_v36  ;;  %v6611_v43 = vshrl.u32 %v20855_v26, %v6602_v28  ;;  %v6613_v23 = vshll.u32 %v20855_v26, %v6601_v36 }
 0x300   : > { %v6459_v59 = vand.u32 2147483647, %v6458_v48  ;;  %v6614_v37 = vshrl.u32 %v20655_v56, %v6602_v28  ;;  %v16870_v34 = vshll.u32 %v6595_v63, 8  ;;  %v5443_v53 = vor.u32 8388608, %v16853_v42 }
 0x301   : > { %v12805_v22 = vmin.u32 %v5813_v18, %v16849_v13  ;;  %v5445_v10 = vadd.s32 1, %v12792_v33  ;;  %v6616_v31 = vshll.u32 %v20655_v56, %v6601_v36  ;;  %v6617_v46 = vshrl.u32 %v20630_v17, %v6602_v28 }
 0x302   : > { %v6462_v24 = vmul.f32 %v6461_v54, %v6459_v59  ;;  %vm5634_vm3 = vcmp.lt.s32.totalorder %v16833_v57, 2  ;;  %v6603_v30 = vshrl.u32 %v20638_v19, %v6602_v28  ;;  %v6606_v20 = vor.u32 %v6605_v25, %v6604_v15 }
 0x303   : > { %v16867_v6 = vpop.eup %13624  ;;  %v5815_v55 = vclz %v12805_v22  ;;  %v6609_v14 = vor.u32 %v6608_v1, %v6607_v52  ;;  %v6612_v41 = vor.u32 %v6611_v43, %v6610_v0  ;;  %v6615_v3 = vor.u32 %v6614_v37, %v6613_v23 }
 0x304   : > { %v16873_v45 = vpop.eup %13626  ;;  %v20431_v40 = vxor.u32 2147483648, %v16867_v6  ;;  %v6463_v62 = vxor.u32 2147483648, %v6462_v24  ;;  %vm6619_vm14 = vcmp.lt.s32.totalorder %v16855_v39, 1  ;;  %v6618_v27 = vor.u32 %v6617_v46, %v6616_v31 }
 0x305   : > { %v20432_v16 = vxor.u32 2147483648, %v16873_v45  ;;  %v12806_v58 = vadd.s32 4294967294, %v5815_v55  ;;  %vm6620_vm11 = vcmp.lt.s32.totalorder %v16855_v39, 2  ;;  %vm6622_vm4 = vcmp.lt.s32.totalorder %v16855_v39, 4 }
 0x306   : > { %v6464_v12 = vsel %vm6381_vm8, %v6463_v62, %v6462_v24  ;;  %v5640_v49 = vsel %vm5638_vm0, %v20431_v40, %v16873_v45  ;;  %vm5631_vm10 = vweird.f32 %v16612_v35  ;;  %vm6621_vm6 = vcmp.lt.s32.totalorder %v16855_v39, 3 }
 0x307   : > { %v6467_v36 = vsel %vm16815_vm9, %v16647_v11, %v6464_v12  ;;  %vm12807_vm7 = vcmp.lt.s32.totalorder %v12806_v58, 0  ;;  %v6623_v50 = vsel %vm6619_vm14, %v6603_v30, %v6606_v20  ;;  %v6624_v60 = vsel %vm6622_vm4, %v6612_v41, 2102212464 }
 0x308   : > { %13628 = vcosq.f32 %v6467_v36  ;;  %v5818_v4 = vsel %vm12807_vm7, 0, %v12806_v58  ;;  %v6627_v28 = vsel %vm6619_vm14, %v6606_v20, %v6609_v14  ;;  %v6628_v48 = vsel %vm6622_vm4, %v6615_v3, 920167782 }
 0x309   : > { %13630 = vsinq.f32 %v6467_v36  ;;  %v5819_v54 = vsub.s32 32, %v5818_v4  ;;  %v5820_v63 = vshll.u32 %v16849_v13, %v5818_v4  ;;  %v5823_v33 = vsub.s32 4294967266, %v5818_v4 }
 0x30a   : > { %v6625_v59 = vsel %vm6621_vm6, %v6609_v14, %v6624_v60  ;;  %v5637_v15 = vsel %vm5635_vm1, %v16867_v6, %v20432_v16  ;;  %v6629_v52 = vsel %vm6621_vm6, %v6612_v41, %v6628_v48  ;;  %v6631_v18 = vsel %vm6619_vm14, %v6609_v14, %v6612_v41 }
 0x30b   : > { %v6632_v25 = vsel %vm6622_vm4, %v6618_v27, 1326507024  ;;  %v5821_v13 = vshrl.u32 %v5803_v32, %v5819_v54  ;;  %v5824_v1 = vadd.s32 127, %v5823_v33  ;;  %v6630_v0 = vsel %vm6620_vm11, %v6627_v28, %v6629_v52 }
 0x30c   : > { %v6633_v24 = vsel %vm6621_vm6, %v6615_v3, %v6632_v25  ;;  %vm5749_vm5 = vcmp.lt.s32.totalorder %v16656_v38, 0  ;;  %v6626_v43 = vsel %vm6620_vm11, %v6623_v50, %v6625_v59  ;;  %v5641_v55 = vsel %vm5634_vm3, %v5637_v15, %v5640_v49 }
 0x30d   : > { %v6634_v23 = vsel %vm6620_vm11, %v6631_v18, %v6633_v24  ;;  %v16928_v37 = vmul.u32.u64.low %v16870_v34, %v6630_v0  ;;  %v16929_v22 = vmul.u32.u64.high %v16870_v34, %v6630_v0, %v16928_v37  ;;  %v5822_v32 = vor.u32 %v5821_v13, %v5820_v63 }
 0x30e   : > { %v5825_v62 = vshll.u32 %v5824_v1, 23  ;;  %v16933_v31 = vmul.u32.u64.low %v16870_v34, %v6634_v23  ;;  %v16934_v46 = vmul.u32.u64.high %v16870_v34, %v6634_v23, %v16933_v31  ;;  %vm6471_vm2 = vweird.f32 %v16647_v11 }
 0x30f   : > { %vm6474_vm8 = vcmp.lt.s32.totalorder %v16846_v9, 2  ;;  %vm5446_vm15 = vcmp.gt.s32.totalorder %v5445_v10, 0  ;;  %vm16942_vm9 = vcmp.le.f32.partialorder %v5747_v2, 0.7853982  ;;  %v5829_v20 = vcvt.s32.f32 %v5822_v32 }
 0x310   : > { %v5826_v30 = vor.u32 4788187, %v5825_v62  ;;  %v6642_v14 = vmul.u32 %v16870_v34, %v6626_v43  ;;  %v5447_v12 = vsel %vm5446_vm15, %v5445_v10, 0  ;;  %vm6475_vm13 = vcmp.eq.s32.totalorder %v16846_v9, 0 }
 0x311   : > { %vm6478_vm12 = vcmp.eq.s32.totalorder %v16846_v9, 2  ;;  %v6645_v57 = vadd.s32 1, %v16929_v22  ;;  %v5449_v3 = vand.u32 31, %v5447_v12  ;;  %vm6644_vm0 = vc.u32 %v16934_v46, %v16928_v37 }
 0x312   : > { %v16947_v41 = vpop.eup %13628  ;;  %v5827_v36 = vand.u32 2147483647, %v5826_v30  ;;  %v16959_v34 = vshll.u32 %v5443_v53, 8  ;;  %v5642_v10 = vsel %vm5631_vm10, nan, %v5641_v55  ;;  %v5833_v15 = vsub.s32 4, %v16840_v5 }
 0x313   : > { %v16952_v49 = vpop.eup %13630  ;;  %v20425_v2 = vxor.u32 2147483648, %v16947_v41  ;;  %v6646_v27 = vsel %vm6644_vm0, %v6645_v57, %v16929_v22  ;;  %v5450_v50 = vsub.s32 32, %v5449_v3  ;;  %v5452_v48 = vshll.u32 %v20638_v19, %v5449_v3 }
 0x314   : > { %v20430_v58 = vxor.u32 2147483648, %v16952_v49  ;;  %v5830_v60 = vmul.f32 %v5829_v20, %v5827_v36  ;;  %v6647_v28 = vadd.s32 %v6646_v27, %v6642_v14  ;;  %v5455_v54 = vshll.u32 %v20853_v51, %v5449_v3 }
 0x315   : > { %v6480_v4 = vsel %vm6478_vm12, %v20425_v2, %v16952_v49  ;;  %v5453_v53 = vshrl.u32 %v20853_v51, %v5450_v50  ;;  %v5456_v63 = vshrl.u32 %v20854_v29, %v5450_v50  ;;  %v5448_v25 = vshrl.u32 %v5447_v12, 5 }
 0x316   : > { %v6477_v42 = vsel %vm6475_vm13, %v16947_v41, %v20430_v58  ;;  %v5831_v59 = vxor.u32 2147483648, %v5830_v60  ;;  %v6648_v52 = vadd.s32 536870912, %v6647_v28  ;;  %v5458_v13 = vshll.u32 %v20854_v29, %v5449_v3 }
 0x317   : > { %v6481_v33 = vsel %vm6474_vm8, %v6477_v42, %v6480_v4  ;;  %v5459_v1 = vshrl.u32 %v20855_v26, %v5450_v50  ;;  %v5461_v9 = vshll.u32 %v20855_v26, %v5449_v3  ;;  %v5454_v23 = vor.u32 %v5453_v53, %v5452_v48 }
 0x318   : > { %v6482_v18 = vsel %vm6471_vm2, nan, %v6481_v33  ;;  %v5832_v24 = vsel %vm5749_vm5, %v5831_v59, %v5830_v60  ;;  %v6649_v43 = vshrl.u32 %v6648_v52, 30  ;;  %v5457_v22 = vor.u32 %v5456_v63, %v5455_v54 }
 0x319   : > { %v13079_v0 = vpack.c.bf16 %v6482_v18, %v5642_v10  ;;  %v5462_v32 = vshrl.u32 %v20655_v56, %v5450_v50  ;;  %v5464_v62 = vshll.u32 %v20655_v56, %v5449_v3  ;;  %v5834_v31 = vsel %vm5749_vm5, %v5833_v15, %v16840_v5 }
 0x31a   : > { %v6650_v55 = vshll.u32 %v6649_v43, 30  ;;  %v5465_v30 = vshrl.u32 %v20630_v17, %v5450_v50  ;;  %v16994_v20 = vmul.f32 2.0, %v16820_v7  ;;  %v5835_v14 = vsel %vm16942_vm9, %v16656_v38, %v5832_v24 }
 0x31b   : > { %13080 = vmatprep.subr.bf16.mxu0 %v13079_v0  ;;  %v5460_v12 = vor.u32 %v5459_v1, %v5458_v13  ;;  %v5463_v57 = vor.u32 %v5462_v32, %v5461_v9  ;;  %vm5467_vm1 = vcmp.lt.s32.totalorder %v5448_v25, 1  ;;  %v5451_v3 = vshrl.u32 %v20638_v19, %v5450_v50 }
 0x31c   : > { %20864 = vst [vmem:[#allocation12_spill] sm:$0xff] %v16994_v20  ;;  %v16999_v36 = vsub.s32 %v6647_v28, %v6650_v55  ;;  %v5466_v10 = vor.u32 %v5465_v30, %v5464_v62  ;;  %vm5469_vm3 = vcmp.lt.s32.totalorder %v5448_v25, 3  ;;  %v17004_v5 = vsel %vm16942_vm9, 0, %v5834_v31 }
 0x31d   : > { %vm5468_vm14 = vcmp.lt.s32.totalorder %v5448_v25, 2  ;;  %vm5470_vm11 = vcmp.lt.s32.totalorder %v5448_v25, 4  ;;  %v5475_v27 = vsel %vm5467_vm1, %v5454_v23, %v5457_v22  ;;  %13632 = vcosq.f32 %v5835_v14 }
 0x31e   : > { %v6653_v4 = vsub.s32 0, %v16999_v36  ;;  %v5472_v60 = vsel %vm5470_vm11, %v5460_v12, 2102212464  ;;  %v5476_v48 = vsel %vm5470_vm11, %v5463_v57, 920167782  ;;  %13634 = vsinq.f32 %v5835_v14 }
 0x31f   : > { %v5477_v28 = vsel %vm5469_vm3, %v5460_v12, %v5476_v48  ;;  %v5480_v42 = vsel %vm5470_vm11, %v5466_v10, 1326507024  ;;  %v6278_v50 = vand.u32 2139095040, %v16994_v20  ;;  %v5471_v39 = vsel %vm5467_vm1, %v5451_v3, %v5454_v23 }
 0x320   : > { %v12837_v53 = vmin.u32 %v6653_v4, %v16999_v36  ;;  %v5478_v54 = vsel %vm5468_vm14, %v5475_v27, %v5477_v28  ;;  %v5479_v63 = vsel %vm5467_vm1, %v5457_v22, %v5460_v12  ;;  %v5473_v33 = vsel %vm5469_vm3, %v5457_v22, %v5472_v60 }
 0x321   : > { %v5481_v59 = vsel %vm5469_vm3, %v5463_v57, %v5480_v42  ;;  %v17017_v15 = vmul.u32.u64.low %v16959_v34, %v5478_v54  ;;  %v17018_v52 = vmul.u32.u64.high %v16959_v34, %v5478_v54, %v17017_v15  ;;  %v6673_v13 = vsub.s32 4, %v6649_v43  ;;  %v17059_v42 = vld [vmem:[%s13979_s12 + $0x10] sm:$0xff] }
 0x322   : > { %v6655_v18 = vclz %v12837_v53  ;;  %v5840_v1 = vadd.s32 3, %v17004_v5  ;;  %v5482_v0 = vsel %vm5468_vm14, %v5479_v63, %v5481_v59  ;;  %v6279_v24 = vshrl.u32 %v6278_v50, 23  ;;  %20867 = vst [vmem:[#allocation7_spill] sm:$0xff] %v17059_v42 }
 0x323   : > { %v5474_v23 = vsel %vm5468_vm14, %v5471_v39, %v5473_v33  ;;  %v17025_v32 = vmul.u32.u64.low %v16959_v34, %v5482_v0  ;;  %v17026_v22 = vmul.u32.u64.high %v16959_v34, %v5482_v0, %v17025_v32  ;;  %vm6589_vm4 = vcmp.lt.s32.totalorder %v16732_v61, 0 }
 0x324   : > { %v12838_v9 = vadd.s32 4294967294, %v6655_v18  ;;  %v6275_v62 = vand.u32 2147483647, %v16994_v20  ;;  %v12824_v31 = vadd.s32 4294967169, %v6279_v24  ;;  %v6643_v55 = vadd.s32 %v16928_v37, %v16934_v46 }
 0x325   : > { %v6674_v30 = vsel %vm6589_vm4, %v6673_v13, %v6649_v43  ;;  %v5493_v14 = vadd.s32 1, %v17018_v52  ;;  %v17035_v25 = vand.u32 3, %v5840_v1  ;;  %v5490_v57 = vmul.u32 %v16959_v34, %v5474_v23 }
 0x326   : > { %vm12839_vm7 = vcmp.lt.s32.totalorder %v12838_v9, 0  ;;  %v6285_v3 = vadd.s32 1, %v12824_v31  ;;  %vm17042_vm6 = vcmp.le.f32.partialorder %v6587_v8, 0.7853982  ;;  %vm5492_vm5 = vc.u32 %v17026_v22, %v17017_v15 }
 0x327   : > { %v6658_v12 = vsel %vm12839_vm7, 0, %v12838_v9  ;;  %v17038_v10 = vpop.eup %13632  ;;  %v17051_v60 = vsel %vm17042_vm6, 0, %v6674_v30  ;;  %v6282_v34 = vand.u32 8388607, %v6275_v62  ;;  %v5494_v28 = vsel %vm5492_vm5, %v5493_v14, %v17018_v52 }
 0x328   : > { %v6659_v37 = vsub.s32 32, %v6658_v12  ;;  %v6660_v46 = vshll.u32 %v16999_v36, %v6658_v12  ;;  %v6663_v43 = vsub.s32 4294967266, %v6658_v12  ;;  %v17047_v4 = vpop.eup %13634  ;;  %vm6286_vm8 = vcmp.gt.s32.totalorder %v6285_v3, 0 }
 0x329   : > { %v5646_v36 = vand.u32 2139095040, %v17059_v42  ;;  %vm5843_vm15 = vcmp.eq.s32.totalorder %v17035_v25, 0  ;;  %vm5846_vm9 = vcmp.eq.s32.totalorder %v17035_v25, 2  ;;  %v5495_v50 = vadd.s32 %v5494_v28, %v5490_v57 }
 0x32a   : > { %v6661_v8 = vshrl.u32 %v6643_v55, %v6659_v37  ;;  %v6664_v48 = vadd.s32 127, %v6663_v43  ;;  %v6287_v53 = vsel %vm6286_vm8, %v6285_v3, 0  ;;  %v6680_v63 = vadd.s32 3, %v17051_v60 }
 0x32b   : > { %v6289_v33 = vand.u32 31, %v6287_v53  ;;  %v20427_v59 = vxor.u32 2147483648, %v17047_v4  ;;  %v20426_v18 = vxor.u32 2147483648, %v17038_v10  ;;  %v5496_v52 = vadd.s32 536870912, %v5495_v50 }
 0x32c   : > { %v6662_v39 = vor.u32 %v6661_v8, %v6660_v46  ;;  %v6665_v54 = vshll.u32 %v6664_v48, 23  ;;  %v6283_v13 = vor.u32 8388608, %v6282_v34  ;;  %vm5842_vm13 = vcmp.lt.s32.totalorder %v17035_v25, 2 }
 0x32d   : > { %v6290_v24 = vsub.s32 32, %v6289_v33  ;;  %v5647_v9 = vshrl.u32 %v5646_v36, 23  ;;  %v17068_v23 = vshrl.u32 %v5496_v52, 30  ;;  %v6288_v32 = vshrl.u32 %v6287_v53, 5 }
 0x32e   : > { %v6666_v1 = vor.u32 4788187, %v6665_v54  ;;  %v6669_v0 = vcvt.s32.f32 %v6662_v39  ;;  %v6292_v31 = vshll.u32 %v20638_v19, %v6289_v33  ;;  %v6295_v55 = vshll.u32 %v20853_v51, %v6289_v33 }
 0x32f   : > { %v6293_v14 = vshrl.u32 %v20853_v51, %v6290_v24  ;;  %v6296_v12 = vshrl.u32 %v20854_v29, %v6290_v24  ;;  %v6301_v57 = vshll.u32 %v20855_v26, %v6289_v33  ;;  %v5498_v3 = vshll.u32 %v17068_v23, 30 }
 0x330   : > { %v6667_v30 = vand.u32 2147483647, %v6666_v1  ;;  %v6298_v37 = vshll.u32 %v20854_v29, %v6289_v33  ;;  %v6299_v46 = vshrl.u32 %v20855_v26, %v6290_v24  ;;  %v6302_v43 = vshrl.u32 %v20655_v56, %v6290_v24 }
 0x331   : > { %v5848_v34 = vsel %vm5846_vm9, %v20426_v18, %v17047_v4  ;;  %v17084_v48 = vand.u32 3, %v6680_v63  ;;  %v17086_v28 = vshll.u32 %v6283_v13, 8  ;;  %v5845_v36 = vsel %vm5843_vm15, %v17038_v10, %v20427_v59 }
 0x332   : > { %v6670_v8 = vmul.f32 %v6669_v0, %v6667_v30  ;;  %v17093_v53 = vsub.s32 %v5495_v50, %v5498_v3  ;;  %v6294_v39 = vor.u32 %v6293_v14, %v6292_v31  ;;  %v6304_v54 = vshll.u32 %v20655_v56, %v6289_v33 }
 0x333   : > { %v6297_v1 = vor.u32 %v6296_v12, %v6295_v55  ;;  %v6303_v2 = vor.u32 %v6302_v43, %v6301_v57  ;;  %v6305_v0 = vshrl.u32 %v20630_v17, %v6290_v24  ;;  %v6300_v13 = vor.u32 %v6299_v46, %v6298_v37 }
 0x334   : > { %v6671_v52 = vxor.u32 2147483648, %v6670_v8  ;;  %v5501_v63 = vsub.s32 0, %v17093_v53  ;;  %vm6307_vm12 = vcmp.lt.s32.totalorder %v6288_v32, 1  ;;  %v12800_v30 = vadd.s32 4294967169, %v5647_v9 }
 0x335   : > { %v6291_v59 = vshrl.u32 %v20638_v19, %v6290_v24  ;;  %vm6309_vm0 = vcmp.lt.s32.totalorder %v6288_v32, 3  ;;  %vm6310_vm1 = vcmp.lt.s32.totalorder %v6288_v32, 4  ;;  %vm5839_vm3 = vweird.f32 %v16656_v38 }
 0x336   : > { %v6672_v18 = vsel %vm6589_vm4, %v6671_v52, %v6670_v8  ;;  %v12793_v33 = vmin.u32 %v5501_v63, %v17093_v53  ;;  %v6306_v31 = vor.u32 %v6305_v0, %v6304_v54  ;;  %v6312_v55 = vsel %vm6310_vm1, %v6300_v13, 2102212464 }
 0x337   : > { %v6675_v50 = vsel %vm17042_vm6, %v16732_v61, %v6672_v18  ;;  %vm6308_vm14 = vcmp.lt.s32.totalorder %v6288_v32, 2  ;;  %v6315_v9 = vsel %vm6307_vm12, %v6294_v39, %v6297_v1  ;;  %v6316_v14 = vsel %vm6310_vm1, %v6303_v2, 920167782 }
 0x338   : > { %13636 = vcosq.f32 %v6675_v50  ;;  %v5849_v24 = vsel %vm5842_vm13, %v5845_v36, %v5848_v34  ;;  %v5503_v12 = vclz %v12793_v33  ;;  %v20434_v57 = vand.u32 2147483647, %v17059_v42 }
 0x339   : > { %13638 = vsinq.f32 %v6675_v50  ;;  %v6311_v27 = vsel %vm6307_vm12, %v6291_v59, %v6294_v39  ;;  %v6313_v18 = vsel %vm6309_vm0, %v6297_v1, %v6312_v55  ;;  %v6317_v3 = vsel %vm6309_vm0, %v6300_v13, %v6316_v14 }
 0x33a   : > { %v6319_v37 = vsel %vm6307_vm12, %v6297_v1, %v6300_v13  ;;  %vm5437_vm11 = vcmp.lt.s32.totalorder %v16820_v7, 0  ;;  %v5491_v46 = vadd.s32 %v17017_v15, %v17026_v22  ;;  %v12794_v43 = vadd.s32 4294967294, %v5503_v12 }
 0x33b   : > { %v6318_v25 = vsel %vm6308_vm14, %v6315_v9, %v6317_v3  ;;  %v6320_v34 = vsel %vm6310_vm1, %v6306_v31, 1326507024  ;;  %v5653_v39 = vadd.s32 1, %v12800_v30  ;;  %vm20560_vm4 = vweird.f32 %v16732_v61 }
 0x33c   : > { %v6321_v8 = vsel %vm6309_vm0, %v6303_v2, %v6320_v34  ;;  %v17123_v59 = vmul.u32.u64.low %v17086_v28, %v6318_v25  ;;  %v17124_v36 = vmul.u32.u64.high %v17086_v28, %v6318_v25, %v17123_v59  ;;  %vm12795_vm7 = vcmp.lt.s32.totalorder %v12794_v43, 0 }
 0x33d   : > { %v6314_v54 = vsel %vm6308_vm14, %v6311_v27, %v6313_v18  ;;  %v6322_v15 = vsel %vm6308_vm14, %v6319_v37, %v6321_v8  ;;  %v17132_v22 = vand.u32 8388607, %v20434_v57  ;;  %v5506_v52 = vsel %vm12795_vm7, 0, %v12794_v43 }
 0x33e   : > { %v17135_v2 = vmul.u32.u64.low %v17086_v28, %v6322_v15  ;;  %v17136_v1 = vmul.u32.u64.high %v17086_v28, %v6322_v15, %v17135_v2  ;;  %vm5654_vm6 = vcmp.gt.s32.totalorder %v5653_v39, 0  ;;  %v5507_v0 = vsub.s32 32, %v5506_v52 }
 0x33f   : > { %v5508_v63 = vshll.u32 %v17093_v53, %v5506_v52  ;;  %v5511_v13 = vsub.s32 4294967266, %v5506_v52  ;;  %v5655_v30 = vsel %vm5654_vm6, %v5653_v39, 0  ;;  %v5521_v50 = vsub.s32 4, %v17068_v23 }
 0x340   : > { %v6330_v32 = vmul.u32 %v17086_v28, %v6314_v54  ;;  %v6333_v33 = vadd.s32 1, %v17124_v36  ;;  %v5657_v31 = vand.u32 31, %v5655_v30  ;;  %vm6682_vm5 = vcmp.lt.s32.totalorder %v17084_v48, 2 }
 0x341   : > { %vm6683_vm8 = vcmp.eq.s32.totalorder %v17084_v48, 0  ;;  %vm17146_vm15 = vcmp.le.f32.partialorder %v5435_v21, 0.7853982  ;;  %v5509_v53 = vshrl.u32 %v5491_v46, %v5507_v0  ;;  %v5512_v9 = vadd.s32 127, %v5511_v13 }
 0x342   : > { %v17150_v14 = vpop.eup %13636  ;;  %v5850_v28 = vsel %vm5839_vm3, nan, %v5849_v24  ;;  %vm6686_vm9 = vcmp.eq.s32.totalorder %v17084_v48, 2  ;;  %vm6332_vm13 = vc.u32 %v17136_v1, %v17123_v59  ;;  %v5658_v12 = vsub.s32 32, %v5657_v31 }
 0x343   : > { %v17157_v27 = vpop.eup %13638  ;;  %v20428_v21 = vxor.u32 2147483648, %v17150_v14  ;;  %v5510_v18 = vor.u32 %v5509_v53, %v5508_v63  ;;  %v5513_v3 = vshll.u32 %v5512_v9, 23  ;;  %v6334_v37 = vsel %vm6332_vm13, %v6333_v33, %v17124_v36 }
 0x344   : > { %v20429_v46 = vxor.u32 2147483648, %v17157_v27  ;;  %v5522_v24 = vsel %vm5437_vm11, %v5521_v50, %v17068_v23  ;;  %v6335_v43 = vadd.s32 %v6334_v37, %v6330_v32  ;;  %v5651_v25 = vor.u32 8388608, %v17132_v22 }
 0x345   : > { %v6688_v34 = vsel %vm6686_vm9, %v20428_v21, %v17157_v27  ;;  %v5514_v8 = vor.u32 4788187, %v5513_v3  ;;  %v5517_v39 = vcvt.s32.f32 %v5510_v18  ;;  %v5660_v54 = vshll.u32 %v20638_v19, %v5657_v31 }
 0x346   : > { %v6685_v36 = vsel %vm6683_vm8, %v17150_v14, %v20429_v46  ;;  %v6336_v15 = vadd.s32 536870912, %v6335_v43  ;;  %v5661_v23 = vshrl.u32 %v20853_v51, %v5658_v12  ;;  %v5663_v52 = vshll.u32 %v20853_v51, %v5657_v31 }
 0x347   : > { %v6689_v22 = vsel %vm6682_vm5, %v6685_v36, %v6688_v34  ;;  %v5515_v2 = vand.u32 2147483647, %v5514_v8  ;;  %v5664_v0 = vshrl.u32 %v20854_v29, %v5658_v12  ;;  %v5666_v63 = vshll.u32 %v20854_v29, %v5657_v31 }
 0x348   : > { %v6690_v13 = vsel %vm20560_vm4, nan, %v6689_v22  ;;  %v6337_v50 = vshrl.u32 %v6336_v15, 30  ;;  %v5667_v32 = vshrl.u32 %v20855_v26, %v5658_v12  ;;  %v5669_v33 = vshll.u32 %v20855_v26, %v5657_v31 }
 0x349   : > { %v13131_v53 = vpack.c.bf16 %v6690_v13, %v5850_v28  ;;  %v5518_v9 = vmul.f32 %v5517_v39, %v5515_v2  ;;  %vm6277_vm12 = vcmp.lt.s32.totalorder %v16994_v20, 0  ;;  %v5656_v18 = vshrl.u32 %v5655_v30, 5 }
 0x34a   : > { %v5670_v48 = vshrl.u32 %v20655_v56, %v5658_v12  ;;  %v17189_v3 = vsel %vm17146_vm15, 0, %v5522_v24  ;;  %v6338_v37 = vshll.u32 %v6337_v50, 30  ;;  %v5672_v34 = vshll.u32 %v20655_v56, %v5657_v31 }
 0x34b   : > { %v5673_v8 = vshrl.u32 %v20630_v17, %v5658_v12  ;;  %13132 = vmatprep.subr.bf16.mxu1 %v13131_v53  ;;  %v5519_v36 = vxor.u32 2147483648, %v5518_v9  ;;  %v5659_v15 = vshrl.u32 %v20638_v19, %v5658_v12  ;;  %v17195_v39 = vmul.f32 2.0, %v17059_v42 }
 0x34c   : > { %v5671_v28 = vor.u32 %v5670_v48, %v5669_v33  ;;  %v17197_v30 = vsub.s32 %v6335_v43, %v6338_v37  ;;  %v5662_v22 = vor.u32 %v5661_v23, %v5660_v54  ;;  %v5665_v2 = vor.u32 %v5664_v0, %v5663_v52 }
 0x34d   : > { %20870 = vst [vmem:[#allocation9_spill] sm:$0xff] %v17195_v39  ;;  %v5668_v13 = vor.u32 %v5667_v32, %v5666_v63  ;;  %v5674_v24 = vor.u32 %v5673_v8, %v5672_v34  ;;  %vm5675_vm0 = vcmp.lt.s32.totalorder %v5656_v18, 1  ;;  %vm5678_vm1 = vcmp.lt.s32.totalorder %v5656_v18, 4 }
 0x34e   : > { %v5691_v21 = vshll.u32 %v5651_v25, 8  ;;  %v6341_v31 = vsub.s32 0, %v17197_v30  ;;  %v6361_v46 = vsub.s32 4, %v6337_v50  ;;  %vm5677_vm14 = vcmp.lt.s32.totalorder %v5656_v18, 3 }
 0x34f   : > { %v5680_v53 = vsel %vm5678_vm1, %v5668_v13, 2102212464  ;;  %v5520_v12 = vsel %vm5437_vm11, %v5519_v36, %v5518_v9  ;;  %vm5676_vm7 = vcmp.lt.s32.totalorder %v5656_v18, 2  ;;  %v5684_v43 = vsel %vm5678_vm1, %v5671_v28, 920167782 }
 0x350   : > { %v6486_v54 = vand.u32 2139095040, %v17195_v39  ;;  %v12825_v23 = vmin.u32 %v6341_v31, %v17197_v30  ;;  %v5679_v52 = vsel %vm5675_vm0, %v5659_v15, %v5662_v22  ;;  %v5681_v25 = vsel %vm5677_vm14, %v5665_v2, %v5680_v53 }
 0x351   : > { %v5683_v0 = vsel %vm5675_vm0, %v5662_v22, %v5665_v2  ;;  %vm17211_vm6 = vcmp.le.f32.partialorder %v6275_v62, 0.7853982  ;;  %v5685_v32 = vsel %vm5677_vm14, %v5668_v13, %v5684_v43  ;;  %v5687_v33 = vsel %vm5675_vm0, %v5665_v2, %v5668_v13 }
 0x352   : > { %v5688_v9 = vsel %vm5678_vm1, %v5674_v24, 1326507024  ;;  %v5523_v48 = vsel %vm17146_vm15, %v16820_v7, %v5520_v12  ;;  %v5528_v37 = vadd.s32 3, %v17189_v3  ;;  %v6343_v34 = vclz %v12825_v23 }
 0x353   : > { %v6362_v8 = vsel %vm6277_vm12, %v6361_v46, %v6337_v50  ;;  %v5682_v62 = vsel %vm5676_vm7, %v5679_v52, %v5681_v25  ;;  %v5686_v36 = vsel %vm5676_vm7, %v5683_v0, %v5685_v32  ;;  %v5689_v15 = vsel %vm5677_vm14, %v5671_v28, %v5688_v9 }
 0x354   : > { %v6487_v22 = vshrl.u32 %v6486_v54, 23  ;;  %v12826_v2 = vadd.s32 4294967294, %v6343_v34  ;;  %v5690_v13 = vsel %vm5676_vm7, %v5687_v33, %v5689_v15  ;;  %v20433_v12 = vand.u32 2147483647, %v17195_v39 }
 0x355   : > { %v17228_v24 = vmul.u32.u64.low %v5691_v21, %v5686_v36  ;;  %v17229_v31 = vmul.u32.u64.high %v5691_v21, %v5686_v36, %v17228_v24  ;;  %v17232_v55 = vmul.u32.u64.low %v5691_v21, %v5690_v13  ;;  %v17233_v53 = vmul.u32.u64.high %v5691_v21, %v5690_v13, %v17232_v55 }
 0x356   : > { %v12832_v46 = vadd.s32 4294967169, %v6487_v22  ;;  %13640 = vcosq.f32 %v5523_v48  ;;  %v6331_v50 = vadd.s32 %v17123_v59, %v17136_v1  ;;  %vm12827_vm11 = vcmp.lt.s32.totalorder %v12826_v2, 0 }
 0x357   : > { %v17240_v28 = vsel %vm17211_vm6, 0, %v6362_v8  ;;  %13642 = vsinq.f32 %v5523_v48  ;;  %v6346_v18 = vsel %vm12827_vm11, 0, %v12826_v2  ;;  %v5698_v43 = vmul.u32 %v5691_v21, %v5682_v62 }
 0x358   : > { %v6493_v54 = vadd.s32 1, %v12832_v46  ;;  %v6347_v23 = vsub.s32 32, %v6346_v18  ;;  %v6348_v52 = vshll.u32 %v17197_v30, %v6346_v18  ;;  %v6351_v25 = vsub.s32 4294967266, %v6346_v18 }
 0x359   : > { %v5701_v0 = vadd.s32 1, %v17229_v31  ;;  %vm5700_vm5 = vc.u32 %v17233_v53, %v17228_v24  ;;  %v6368_v33 = vadd.s32 3, %v17240_v28  ;;  %v6490_v21 = vand.u32 8388607, %v20433_v12 }
 0x35a   : > { %vm6494_vm8 = vcmp.gt.s32.totalorder %v6493_v54, 0  ;;  %v6349_v59 = vshrl.u32 %v6331_v50, %v6347_v23  ;;  %v6352_v1 = vadd.s32 127, %v6351_v25  ;;  %v17250_v34 = vand.u32 3, %v5528_v37 }
 0x35b   : > { %v5702_v32 = vsel %vm5700_vm5, %v5701_v0, %v17229_v31  ;;  %v6495_v48 = vsel %vm6494_vm8, %v6493_v54, 0  ;;  %v17252_v2 = vand.u32 3, %v6368_v33  ;;  %v6491_v31 = vor.u32 8388608, %v6490_v21 }
 0x35c   : > { %v5703_v9 = vadd.s32 %v5702_v32, %v5698_v43  ;;  %v6350_v30 = vor.u32 %v6349_v59, %v6348_v52  ;;  %v6353_v8 = vshll.u32 %v6352_v1, 23  ;;  %v6497_v36 = vand.u32 31, %v6495_v48 }
 0x35d   : > { %vm5534_vm15 = vcmp.eq.s32.totalorder %v17250_v34, 2  ;;  %v6496_v18 = vshrl.u32 %v6495_v48, 5  ;;  %vm5531_vm9 = vcmp.eq.s32.totalorder %v17250_v34, 0  ;;  %vm5530_vm13 = vcmp.lt.s32.totalorder %v17250_v34, 2 }
 0x35e   : > { %v5704_v62 = vadd.s32 536870912, %v5703_v9  ;;  %v6354_v15 = vor.u32 4788187, %v6353_v8  ;;  %v6357_v22 = vcvt.s32.f32 %v6350_v30  ;;  %v6498_v55 = vsub.s32 32, %v6497_v36  ;;  %v17277_v8 = vld [vmem:[%s13979_s12 + $0x8] sm:$0xff] }
 0x35f   : > { %v6500_v37 = vshll.u32 %v20638_v19, %v6497_v36  ;;  %v6503_v43 = vshll.u32 %v20853_v51, %v6497_v36  ;;  %v6506_v25 = vshll.u32 %v20854_v29, %v6497_v36  ;;  %v6509_v0 = vshll.u32 %v20855_v26, %v6497_v36 }
 0x360   : > { %v17254_v13 = vshrl.u32 %v5704_v62, 30  ;;  %v17256_v46 = vpop.eup %13640  ;;  %v6355_v50 = vand.u32 2147483647, %v6354_v15  ;;  %v6501_v52 = vshrl.u32 %v20853_v51, %v6498_v55  ;;  %v6504_v1 = vshrl.u32 %v20854_v29, %v6498_v55 }
 0x361   : > { %20873 = vst [vmem:[#allocation17_spill] sm:$0xff] %v17256_v46  ;;  %v17261_v54 = vpop.eup %13642  ;;  %v6507_v32 = vshrl.u32 %v20855_v26, %v6498_v55  ;;  %v6510_v33 = vshrl.u32 %v20655_v56, %v6498_v55  ;;  %v6512_v48 = vshll.u32 %v20655_v56, %v6497_v36  ;;  %v17274_v30 = vshll.u32 %v6491_v31, 8 }
 0x362   : > { %20874 = vst [vmem:[#allocation16_spill] sm:$0xff] %v17261_v54  ;;  %v5706_v23 = vshll.u32 %v17254_v13, 30  ;;  %v6358_v59 = vmul.f32 %v6357_v22, %v6355_v50  ;;  %v17280_v62 = vmul.f32 4.0, %v17277_v8  ;;  %v6499_v58 = vshrl.u32 %v20638_v19, %v6498_v55 }
 0x363   : > { %v6505_v36 = vor.u32 %v6504_v1, %v6503_v43  ;;  %v6513_v31 = vshrl.u32 %v20630_v17, %v6498_v55  ;;  %v6508_v16 = vor.u32 %v6507_v32, %v6506_v25  ;;  %v6511_v12 = vor.u32 %v6510_v33, %v6509_v0 }
 0x364   : > { %v17271_v21 = vsub.s32 %v5703_v9, %v5706_v23  ;;  %20875 = vst [vmem:[#allocation18_spill] sm:$0xff] %v17280_v62  ;;  %v6359_v50 = vxor.u32 2147483648, %v6358_v59  ;;  %v6502_v23 = vor.u32 %v6501_v52, %v6500_v37  ;;  %vm6515_vm0 = vcmp.lt.s32.totalorder %v6496_v18, 1 }
 0x365   : > { %v6514_v22 = vor.u32 %v6513_v31, %v6512_v48  ;;  %vm6518_vm1 = vcmp.lt.s32.totalorder %v6496_v18, 4  ;;  %vm6516_vm14 = vcmp.lt.s32.totalorder %v6496_v18, 2  ;;  %vm6517_vm7 = vcmp.lt.s32.totalorder %v6496_v18, 3 }
 0x366   : > { %v5709_v9 = vsub.s32 0, %v17271_v21  ;;  %v6360_v40 = vsel %vm6277_vm12, %v6359_v50, %v6358_v59  ;;  %v6520_v37 = vsel %vm6518_vm1, %v6508_v16, 2102212464  ;;  %vm20485_vm11 = vweird.f32 %v16820_v7 }
 0x367   : > { %v6363_v57 = vsel %vm17211_vm6, %v16994_v20, %v6360_v40  ;;  %v6519_v43 = vsel %vm6515_vm0, %v6499_v58, %v6502_v23  ;;  %v6523_v52 = vsel %vm6515_vm0, %v6502_v23, %v6505_v36  ;;  %v5699_v40 = vadd.s32 %v17228_v24, %v17233_v53 }
 0x368   : > { %v12801_v15 = vmin.u32 %v5709_v9, %v17271_v21  ;;  %13644 = vcosq.f32 %v6363_v57  ;;  %v6521_v63 = vsel %vm6517_vm7, %v6505_v36, %v6520_v37  ;;  %v6524_v25 = vsel %vm6518_vm1, %v6511_v12, 920167782 }
 0x369   : > { %13646 = vsinq.f32 %v6363_v57  ;;  %v6527_v0 = vsel %vm6515_vm0, %v6505_v36, %v6508_v16  ;;  %v20876_v59 = vxor.u32 2147483648, %v17256_v46  ;;  %v6525_v58 = vsel %vm6517_vm7, %v6508_v16, %v6524_v25 }
 0x36a   : > { %v5711_v55 = vclz %v12801_v15  ;;  %v6528_v32 = vsel %vm6518_vm1, %v6514_v22, 1326507024  ;;  %v20877_v33 = vxor.u32 2147483648, %v17261_v54  ;;  %vm6370_vm12 = vcmp.lt.s32.totalorder %v17252_v2, 2 }
 0x36b   : > { %v5536_v57 = vsel %vm5534_vm15, %v20876_v59, %v17261_v54  ;;  %vm5645_vm6 = vcmp.lt.s32.totalorder %v17059_v42, 0  ;;  %v6522_v53 = vsel %vm6516_vm14, %v6519_v43, %v6521_v63  ;;  %v6526_v48 = vsel %vm6516_vm14, %v6523_v52, %v6525_v58 }
 0x36c   : > { %v12802_v1 = vadd.s32 4294967294, %v5711_v55  ;;  %v5533_v24 = vsel %vm5531_vm9, %v17256_v46, %v20877_v33  ;;  %v6529_v15 = vsel %vm6517_vm7, %v6511_v12, %v6528_v32  ;;  %vm20484_vm5 = vweird.f32 %v16994_v20 }
 0x36d   : > { %v6530_v16 = vsel %vm6516_vm14, %v6527_v0, %v6529_v15  ;;  %v17323_v22 = vmul.u32.u64.low %v17274_v30, %v6526_v48  ;;  %v17324_v50 = vmul.u32.u64.high %v17274_v30, %v6526_v48, %v17323_v22  ;;  %v7222_v31 = vand.u32 2139095040, %v17280_v62 }
 0x36e   : > { %vm12803_vm8 = vcmp.lt.s32.totalorder %v12802_v1, 0  ;;  %v17328_v23 = vmul.u32.u64.low %v17274_v30, %v6530_v16  ;;  %v17329_v36 = vmul.u32.u64.high %v17274_v30, %v6530_v16, %v17328_v23  ;;  %vm6371_vm15 = vcmp.eq.s32.totalorder %v17252_v2, 0 }
 0x36f   : > { %v5714_v9 = vsel %vm12803_vm8, 0, %v12802_v1  ;;  %v5537_v18 = vsel %vm5530_vm13, %v5533_v24, %v5536_v57  ;;  %vm6374_vm9 = vcmp.eq.s32.totalorder %v17252_v2, 2  ;;  %v6538_v43 = vmul.u32 %v17274_v30, %v6522_v53 }
 0x370   : > { %v5715_v12 = vsub.s32 32, %v5714_v9  ;;  %v5716_v37 = vshll.u32 %v17271_v21, %v5714_v9  ;;  %v5719_v55 = vsub.s32 4294967266, %v5714_v9  ;;  %v7223_v52 = vshrl.u32 %v7222_v31, 23 }
 0x371   : > { %v5729_v0 = vsub.s32 4, %v17254_v13  ;;  %v6541_v59 = vadd.s32 1, %v17324_v50  ;;  %vm6540_vm0 = vc.u32 %v17329_v36, %v17323_v22  ;;  %v20438_v21 = vand.u32 2147483647, %v17280_v62 }
 0x372   : > { %v5717_v63 = vshrl.u32 %v5699_v40, %v5715_v12  ;;  %v5720_v25 = vadd.s32 127, %v5719_v55  ;;  %v17340_v1 = vpop.eup %13644  ;;  %v12860_v34 = vadd.s32 4294967169, %v7223_v52  ;;  %v17346_v57 = vmul.f32 8.0, %v17277_v8 }
 0x373   : > { %20878 = vst [vmem:[#allocation20_spill] sm:$0xff] %v17340_v1  ;;  %v17348_v58 = vpop.eup %13646  ;;  %v20435_v30 = vxor.u32 2147483648, %v17340_v1  ;;  %v6542_v33 = vsel %vm6540_vm0, %v6541_v59, %v17324_v50  ;;  %v5538_v24 = vsel %vm20485_vm11, nan, %v5537_v18  ;;  %v5730_v23 = vsel %vm5645_vm6, %v5729_v0, %v17254_v13 }
 0x374   : > { %20879 = vst [vmem:[#allocation27_spill] sm:$0xff] %v17346_v57  ;;  %20880 = vst [vmem:[#allocation28_spill] sm:$0xff] %v17348_v58  ;;  %v5718_v40 = vor.u32 %v5717_v63, %v5716_v37  ;;  %v5721_v32 = vshll.u32 %v5720_v25, 23  ;;  %v20436_v53 = vxor.u32 2147483648, %v17348_v58  ;;  %v6543_v48 = vadd.s32 %v6542_v33, %v6538_v43 }
 0x375   : > { %v7229_v15 = vadd.s32 1, %v12860_v34  ;;  %v6376_v8 = vsel %vm6374_vm9, %v20435_v30, %v17348_v58  ;;  %v7226_v12 = vand.u32 8388607, %v20438_v21  ;;  %v8062_v43 = vand.u32 2139095040, %v17346_v57 }
 0x376   : > { %v5722_v16 = vor.u32 4788187, %v5721_v32  ;;  %v5725_v9 = vcvt.s32.f32 %v5718_v40  ;;  %v6373_v50 = vsel %vm6371_vm15, %v17340_v1, %v20436_v53  ;;  %v6544_v31 = vadd.s32 536870912, %v6543_v48 }
 0x377   : > { %vm7230_vm13 = vcmp.gt.s32.totalorder %v7229_v15, 0  ;;  %v6377_v37 = vsel %vm6370_vm12, %v6373_v50, %v6376_v8  ;;  %v20881_v52 = vand.u32 2147483647, %v17059_v42  ;;  %v7227_v32 = vor.u32 8388608, %v7226_v12 }
 0x378   : > { %v5723_v55 = vand.u32 2147483647, %v5722_v16  ;;  %v7231_v18 = vsel %vm7230_vm13, %v7229_v15, 0  ;;  %v6378_v13 = vsel %vm20484_vm5, nan, %v6377_v37  ;;  %v6545_v25 = vshrl.u32 %v6544_v31, 30 }
 0x379   : > { %vm17377_vm1 = vcmp.le.f32.partialorder %v20881_v52, 0.7853982  ;;  %v7233_v0 = vand.u32 31, %v7231_v18  ;;  %v13081_v59 = vpack.c.bf16 %v6378_v13, %v5538_v24  ;;  %v20437_v15 = vand.u32 2147483647, %v17346_v57 }
 0x37a   : > { %v5726_v34 = vmul.f32 %v5725_v9, %v5723_v55  ;;  %v17383_v2 = vsel %vm17377_vm1, 0, %v5730_v23  ;;  %v6546_v40 = vshll.u32 %v6545_v25, 30  ;;  %v7232_v16 = vshrl.u32 %v7231_v18, 5 }
 0x37b   : > { %20884 = vst [vmem:[#allocation35_spill] sm:$0xff] %v17383_v2  ;;  %v7234_v33 = vsub.s32 32, %v7233_v0  ;;  %13082 = vmatpush1.bf16.msra.mxu0 %v13081_v59  ;;  %v7236_v50 = vshll.u32 %v20638_v19, %v7233_v0  ;;  %v8063_v37 = vshrl.u32 %v8062_v43, 23  ;;  %v7239_v9 = vshll.u32 %v20853_v51, %v7233_v0 }
 0x37c   : > { %v5727_v8 = vxor.u32 2147483648, %v5726_v34  ;;  %v17387_v52 = vsub.s32 %v6543_v48, %v6546_v40  ;;  %v7242_v23 = vshll.u32 %v20854_v29, %v7233_v0  ;;  %vm6485_vm14 = vcmp.lt.s32.totalorder %v17195_v39, 0 }
 0x37d   : > { %v7237_v24 = vshrl.u32 %v20853_v51, %v7234_v33  ;;  %v7240_v12 = vshrl.u32 %v20854_v29, %v7234_v33  ;;  %v7243_v55 = vshrl.u32 %v20855_v26, %v7234_v33  ;;  %v7245_v18 = vshll.u32 %v20855_v26, %v7233_v0 }
 0x37e   : > { %v5728_v31 = vsel %vm5645_vm6, %v5727_v8, %v5726_v34  ;;  %v6539_v48 = vadd.s32 %v17323_v22, %v17329_v36  ;;  %v6549_v43 = vsub.s32 0, %v17387_v52  ;;  %v17401_v13 = vshll.u32 %v7227_v32, 8 }
 0x37f   : > { %v17405_v59 = vand.u32 8388607, %v20437_v15  ;;  %v5731_v34 = vsel %vm17377_vm1, %v17059_v42, %v5728_v31  ;;  %v7235_v40 = vshrl.u32 %v20638_v19, %v7234_v33  ;;  %v7246_v8 = vshrl.u32 %v20655_v56, %v7234_v33 }
 0x380   : > { %v12892_v30 = vadd.s32 4294967169, %v8063_v37  ;;  %v20885_v53 = vand.u32 2147483647, %v17195_v39  ;;  %v12833_v36 = vmin.u32 %v6549_v43, %v17387_v52  ;;  %v7238_v32 = vor.u32 %v7237_v24, %v7236_v50 }
 0x381   : > { %v7241_v15 = vor.u32 %v7240_v12, %v7239_v9  ;;  %v7248_v21 = vshll.u32 %v20655_v56, %v7233_v0  ;;  %v7244_v20 = vor.u32 %v7243_v55, %v7242_v23  ;;  %v7247_v63 = vor.u32 %v7246_v8, %v7245_v18 }
 0x382   : > { %vm17414_vm7 = vcmp.le.f32.partialorder %v20885_v53, 0.7853982  ;;  %v7249_v31 = vshrl.u32 %v20630_v17, %v7234_v33  ;;  %vm7251_vm12 = vcmp.lt.s32.totalorder %v7232_v16, 1  ;;  %13648 = vcosq.f32 %v5731_v34 }
 0x383   : > { %v6551_v1 = vclz %v12833_v36  ;;  %v6569_v37 = vsub.s32 4, %v6545_v25  ;;  %vm7252_vm6 = vcmp.lt.s32.totalorder %v7232_v16, 2  ;;  %vm7253_vm8 = vcmp.lt.s32.totalorder %v7232_v16, 3 }
 0x384   : > { %v7250_v58 = vor.u32 %v7249_v31, %v7248_v21  ;;  %vm7254_vm15 = vcmp.lt.s32.totalorder %v7232_v16, 4  ;;  %v7255_v53 = vsel %vm7251_vm12, %v7235_v40, %v7238_v32  ;;  %v7259_v43 = vsel %vm7251_vm12, %v7238_v32, %v7241_v15 }
 0x385   : > { %v12834_v7 = vadd.s32 4294967294, %v6551_v1  ;;  %v7256_v61 = vsel %vm7254_vm15, %v7244_v20, 2102212464  ;;  %v7260_v50 = vsel %vm7254_vm15, %v7247_v63, 920167782  ;;  %v7263_v0 = vsel %vm7251_vm12, %v7241_v15, %v7244_v20 }
 0x386   : > { %v7257_v24 = vsel %vm7253_vm8, %v7241_v15, %v7256_v61  ;;  %v7261_v9 = vsel %vm7253_vm8, %v7244_v20, %v7260_v50  ;;  %v7264_v23 = vsel %vm7254_vm15, %v7250_v58, 1326507024  ;;  %v6570_v33 = vsel %vm6485_vm14, %v6569_v37, %v6545_v25 }
 0x387   : > { %vm12835_vm9 = vcmp.lt.s32.totalorder %v12834_v7, 0  ;;  %v7262_v12 = vsel %vm7252_vm6, %v7259_v43, %v7261_v9  ;;  %v7265_v55 = vsel %vm7253_vm8, %v7247_v63, %v7264_v23  ;;  %v7258_v58 = vsel %vm7252_vm6, %v7255_v53, %v7257_v24 }
 0x388   : > { %v6554_v18 = vsel %vm12835_vm9, 0, %v12834_v7  ;;  %v7266_v21 = vsel %vm7252_vm6, %v7263_v0, %v7265_v55  ;;  %v17426_v40 = vmul.u32.u64.low %v17401_v13, %v7262_v12  ;;  %v17427_v1 = vmul.u32.u64.high %v17401_v13, %v7262_v12, %v17426_v40 }
 0x389   : > { %v6555_v8 = vsub.s32 32, %v6554_v18  ;;  %v6556_v61 = vshll.u32 %v17387_v52, %v6554_v18  ;;  %v6559_v20 = vsub.s32 4294967266, %v6554_v18  ;;  %v17434_v25 = vsel %vm17414_vm7, 0, %v6570_v33  ;;  %v17455_v33 = vld [vmem:[%s13979_s12 + $0x18] sm:$0xff] }
 0x38a   : > { %20888 = vst [vmem:[#allocation8_spill] sm:$0xff] %v17434_v25  ;;  %v17437_v15 = vmul.u32.u64.low %v17401_v13, %v7266_v21  ;;  %v17438_v7 = vmul.u32.u64.high %v17401_v13, %v7266_v21, %v17437_v15  ;;  %v8069_v36 = vadd.s32 1, %v12892_v30  ;;  %13650 = vsinq.f32 %v5731_v34 }
 0x38b   : > { %v5736_v32 = vadd.s32 3, %v17383_v2  ;;  %v6557_v63 = vshrl.u32 %v6539_v48, %v6555_v8  ;;  %v6560_v31 = vadd.s32 127, %v6559_v20  ;;  %v7274_v37 = vmul.u32 %v17401_v13, %v7258_v58 }
 0x38c   : > { %v7277_v52 = vadd.s32 1, %v17427_v1  ;;  %v8067_v16 = vor.u32 8388608, %v17405_v59  ;;  %vm8070_vm0 = vcmp.gt.s32.totalorder %v8069_v36, 0  ;;  %v17444_v53 = vpop.eup %13648  ;;  %v6576_v24 = vadd.s32 3, %v17434_v25 }
 0x38d   : > { %20889 = vst [vmem:[#allocation23_spill] sm:$0xff] %v17444_v53  ;;  %v6558_v43 = vor.u32 %v6557_v63, %v6556_v61  ;;  %v6561_v50 = vshll.u32 %v6560_v31, 23  ;;  %v8071_v30 = vsel %vm8070_vm0, %v8069_v36, 0  ;;  %vm7276_vm13 = vc.u32 %v17438_v7, %v17426_v40 }
 0x38e   : > { %v17449_v48 = vand.u32 3, %v5736_v32  ;;  %v7278_v9 = vsel %vm7276_vm13, %v7277_v52, %v17427_v1  ;;  %v17452_v23 = vshrl.u32 %v8071_v30, 5  ;;  %v8073_v59 = vand.u32 31, %v8071_v30 }
 0x38f   : > { %v6562_v34 = vor.u32 4788187, %v6561_v50  ;;  %v6565_v13 = vcvt.s32.f32 %v6558_v43  ;;  %v7279_v0 = vadd.s32 %v7278_v9, %v7274_v37  ;;  %v17458_v12 = vmul.f32 4.0, %v17455_v33 }
 0x390   : > { %v17461_v21 = vand.u32 3, %v6576_v24  ;;  %v17463_v8 = vshll.u32 %v8067_v16, 8  ;;  %v8074_v20 = vsub.s32 32, %v8073_v59  ;;  %v8076_v1 = vshll.u32 %v20638_v19, %v8073_v59 }
 0x391   : > { %20890 = vst [vmem:[#allocation21_spill] sm:$0xff] %v17458_v12  ;;  %v6563_v18 = vand.u32 2147483647, %v6562_v34  ;;  %v7280_v61 = vadd.s32 536870912, %v7279_v0  ;;  %v8079_v58 = vshll.u32 %v20853_v51, %v8073_v59  ;;  %vm5739_vm1 = vcmp.eq.s32.totalorder %v17449_v48, 0 }
 0x392   : > { %vm5742_vm12 = vcmp.eq.s32.totalorder %v17449_v48, 2  ;;  %v8082_v36 = vshll.u32 %v20854_v29, %v8073_v59  ;;  %v8085_v32 = vshll.u32 %v20855_v26, %v8073_v59  ;;  %v8088_v63 = vshll.u32 %v20655_v56, %v8073_v59 }
 0x393   : > { %v6566_v15 = vmul.f32 %v6565_v13, %v6563_v18  ;;  %v7281_v31 = vshrl.u32 %v7280_v61, 30  ;;  %v8077_v37 = vshrl.u32 %v20853_v51, %v8074_v20  ;;  %v8080_v52 = vshrl.u32 %v20854_v29, %v8074_v20 }
 0x394   : > { %vm8091_vm6 = vcmp.lt.s32.totalorder %v17452_v23, 1  ;;  %v17475_v16 = vpop.eup %13650  ;;  %v8083_v50 = vshrl.u32 %v20855_v26, %v8074_v20  ;;  %v8086_v24 = vshrl.u32 %v20655_v56, %v8074_v20  ;;  %v8089_v30 = vshrl.u32 %v20630_v17, %v8074_v20 }
 0x395   : > { %20891 = vst [vmem:[#allocation10_spill] sm:$0xff] %v17475_v16  ;;  %v6567_v43 = vxor.u32 2147483648, %v6566_v15  ;;  %v7282_v34 = vshll.u32 %v7281_v31, 30  ;;  %v8075_v13 = vshrl.u32 %v20638_v19, %v8074_v20  ;;  %v8078_v9 = vor.u32 %v8077_v37, %v8076_v1 }
 0x396   : > { %v8081_v59 = vor.u32 %v8080_v52, %v8079_v58  ;;  %v8084_v61 = vor.u32 %v8083_v50, %v8082_v36  ;;  %v8087_v55 = vor.u32 %v8086_v24, %v8085_v32  ;;  %v8090_v25 = vor.u32 %v8089_v30, %v8088_v63 }
 0x397   : > { %v6568_v18 = vsel %vm6485_vm14, %v6567_v43, %v6566_v15  ;;  %v20454_v2 = vxor.u32 2147483648, %v17475_v16  ;;  %v17487_v54 = vsub.s32 %v7279_v0, %v7282_v34  ;;  %vm8094_vm8 = vcmp.lt.s32.totalorder %v17452_v23, 4 }
 0x398   : > { %v6571_v46 = vsel %vm17414_vm7, %v17195_v39, %v6568_v18  ;;  %vm8092_vm15 = vcmp.lt.s32.totalorder %v17452_v23, 2  ;;  %vm8093_vm9 = vcmp.lt.s32.totalorder %v17452_v23, 3  ;;  %v8096_v20 = vsel %vm8094_vm8, %v8084_v61, 2102212464 }
 0x399   : > { %13652 = vcosq.f32 %v6571_v46  ;;  %v20892_v1 = vand.u32 2147483647, %v17280_v62  ;;  %v7285_v22 = vsub.s32 0, %v17487_v54  ;;  %v8095_v0 = vsel %vm8091_vm6, %v8075_v13, %v8078_v9 }
 0x39a   : > { %13654 = vsinq.f32 %v6571_v46  ;;  %v8099_v15 = vsel %vm8091_vm6, %v8078_v9, %v8081_v59  ;;  %v8097_v36 = vsel %vm8093_vm9, %v8081_v59, %v8096_v20  ;;  %v8100_v32 = vsel %vm8094_vm8, %v8087_v55, 920167782 }
 0x39b   : > { %vm17494_vm14 = vcmp.le.f32.partialorder %v20892_v1, 0.7853982  ;;  %v8103_v63 = vsel %vm8091_vm6, %v8081_v59, %v8084_v61  ;;  %v8104_v46 = vsel %vm8094_vm8, %v8090_v25, 1326507024  ;;  %vm20468_vm7 = vweird.f32 %v17059_v42 }
 0x39c   : > { %v12861_v37 = vmin.u32 %v7285_v22, %v17487_v54  ;;  %v7305_v52 = vsub.s32 4, %v7281_v31  ;;  %v8101_v43 = vsel %vm8093_vm9, %v8084_v61, %v8100_v32  ;;  %v8105_v50 = vsel %vm8093_vm9, %v8087_v55, %v8104_v46 }
 0x39d   : > { %vm5738_vm0 = vcmp.lt.s32.totalorder %v17449_v48, 2  ;;  %vm7221_vm13 = vcmp.lt.s32.totalorder %v17280_v62, 0  ;;  %v8102_v24 = vsel %vm8092_vm15, %v8099_v15, %v8101_v43  ;;  %v8106_v30 = vsel %vm8092_vm15, %v8103_v63, %v8105_v50 }
 0x39e   : > { %v5741_v25 = vsel %vm5739_vm1, %v17444_v53, %v20454_v2  ;;  %v20895_v34 = vxor.u32 2147483648, %v17444_v53  ;;  %vm20467_vm6 = vweird.f32 %v17195_v39  ;;  %v7287_v13 = vclz %v12861_v37 }
 0x39f   : > { %v8098_v9 = vsel %vm8092_vm15, %v8095_v0, %v8097_v36  ;;  %v17527_v59 = vmul.u32.u64.low %v17463_v8, %v8106_v30  ;;  %v17528_v18 = vmul.u32.u64.high %v17463_v8, %v8106_v30, %v17527_v59  ;;  %vm6578_vm1 = vcmp.lt.s32.totalorder %v17461_v21, 2 }
 0x3a0   : > { %v5744_v55 = vsel %vm5742_vm12, %v20895_v34, %v17475_v16  ;;  %v17531_v61 = vmul.u32.u64.low %v17463_v8, %v8102_v24  ;;  %v17532_v20 = vmul.u32.u64.high %v17463_v8, %v8102_v24, %v17531_v61  ;;  %v12862_v1 = vadd.s32 4294967294, %v7287_v13 }
 0x3a1   : > { %v7306_v22 = vsel %vm7221_vm13, %v7305_v52, %v7281_v31  ;;  %v7430_v15 = vand.u32 2139095040, %v17458_v12  ;;  %vm6579_vm12 = vcmp.eq.s32.totalorder %v17461_v21, 0  ;;  %vm6582_vm8 = vcmp.eq.s32.totalorder %v17461_v21, 2 }
 0x3a2   : > { %v7275_v23 = vadd.s32 %v17426_v40, %v17438_v7  ;;  %v20455_v0 = vand.u32 2147483647, %v17458_v12  ;;  %v5745_v36 = vsel %vm5738_vm0, %v5741_v25, %v5744_v55  ;;  %vm12863_vm15 = vcmp.lt.s32.totalorder %v12862_v1, 0 }
 0x3a3   : > { %v8114_v32 = vmul.u32 %v17463_v8, %v8098_v9  ;;  %v7431_v63 = vshrl.u32 %v7430_v15, 23  ;;  %v17546_v46 = vpop.eup %13652  ;;  %v7290_v31 = vsel %vm12863_vm15, 0, %v12862_v1  ;;  %v17550_v37 = vsel %vm17494_vm14, 0, %v7306_v22 }
 0x3a4   : > { %20896 = vst [vmem:[#allocation26_spill] sm:$0xff] %v17546_v46  ;;  %20897 = vst [vmem:[#allocation25_spill] sm:$0xff] %v17550_v37  ;;  %vm8116_vm9 = vc.u32 %v17528_v18, %v17531_v61  ;;  %v8117_v40 = vadd.s32 1, %v17532_v20  ;;  %v17554_v7 = vpop.eup %13654  ;;  %v20452_v48 = vxor.u32 2147483648, %v17546_v46  ;;  %v7291_v52 = vsub.s32 32, %v7290_v31 }
 0x3a5   : > { %20898 = vst [vmem:[#allocation11_spill] sm:$0xff] %v17554_v7  ;;  %v7292_v43 = vshll.u32 %v17487_v54, %v7290_v31  ;;  %v7295_v8 = vsub.s32 4294967266, %v7290_v31  ;;  %v20453_v50 = vxor.u32 2147483648, %v17554_v7  ;;  %v12868_v30 = vadd.s32 4294967169, %v7431_v63 }
 0x3a6   : > { %v8118_v24 = vsel %vm8116_vm9, %v8117_v40, %v17532_v20  ;;  %v17561_v25 = vmul.f32 8.0, %v17455_v33  ;;  %v6584_v34 = vsel %vm6582_vm8, %v20452_v48, %v17554_v7  ;;  %v7293_v55 = vshrl.u32 %v7275_v23, %v7291_v52 }
 0x3a7   : > { %v7296_v13 = vadd.s32 127, %v7295_v8  ;;  %v8119_v9 = vadd.s32 %v8118_v24, %v8114_v32  ;;  %v5746_v54 = vsel %vm20468_vm7, nan, %v5745_v36  ;;  %v6581_v59 = vsel %vm6579_vm12, %v17546_v46, %v20453_v50 }
 0x3a8   : > { %20899 = vst [vmem:[#allocation31_spill] sm:$0xff] %v17561_v25  ;;  %v7434_v33 = vand.u32 8388607, %v20455_v0  ;;  %v7437_v20 = vadd.s32 1, %v12868_v30  ;;  %v6585_v1 = vsel %vm6578_vm1, %v6581_v59, %v6584_v34  ;;  %v7294_v22 = vor.u32 %v7293_v55, %v7292_v43 }
 0x3a9   : > { %v7297_v15 = vshll.u32 %v7296_v13, 23  ;;  %v8120_v23 = vadd.s32 536870912, %v8119_v9  ;;  %v6586_v32 = vsel %vm20467_vm6, nan, %v6585_v1  ;;  %v7312_v36 = vadd.s32 3, %v17550_v37 }
 0x3aa   : > { %vm7438_vm0 = vcmp.gt.s32.totalorder %v7437_v20, 0  ;;  %v8270_v63 = vand.u32 2139095040, %v17561_v25  ;;  %v13133_v31 = vpack.c.bf16 %v6586_v32, %v5746_v54  ;;  %v7301_v52 = vcvt.s32.f32 %v7294_v22 }
 0x3ab   : > { %v7298_v40 = vor.u32 4788187, %v7297_v15  ;;  %v8121_v8 = vshrl.u32 %v8120_v23, 30  ;;  %v7435_v24 = vor.u32 8388608, %v7434_v33  ;;  %v7439_v30 = vsel %vm7438_vm0, %v7437_v20, 0 }
 0x3ac   : > { %13134 = vmatpush1.bf16.msra.mxu1 %v13133_v31  ;;  %v17583_v43 = vand.u32 3, %v7312_v36  ;;  %vm8061_vm1 = vcmp.lt.s32.totalorder %v17346_v57, 0  ;;  %v8115_v55 = vadd.s32 %v17531_v61, %v17528_v18  ;;  %v7441_v13 = vand.u32 31, %v7439_v30 }
 0x3ad   : > { %v7299_v21 = vand.u32 2147483647, %v7298_v40  ;;  %v8122_v34 = vshll.u32 %v8121_v8, 30  ;;  %v20456_v54 = vand.u32 2147483647, %v17561_v25  ;;  %v8271_v15 = vshrl.u32 %v8270_v63, 23 }
 0x3ae   : > { %v8145_v22 = vsub.s32 4, %v8121_v8  ;;  %v7440_v23 = vshrl.u32 %v7439_v30, 5  ;;  %v7442_v33 = vsub.s32 32, %v7441_v13  ;;  %v17590_v20 = vshll.u32 %v7435_v24, 8 }
 0x3af   : > { %v7302_v59 = vmul.f32 %v7301_v52, %v7299_v21  ;;  %v17587_v1 = vsub.s32 %v8119_v9, %v8122_v34  ;;  %v7444_v31 = vshll.u32 %v20638_v19, %v7441_v13  ;;  %v7447_v40 = vshll.u32 %v20853_v51, %v7441_v13 }
 0x3b0   : > { %v7445_v18 = vshrl.u32 %v20853_v51, %v7442_v33  ;;  %v7448_v61 = vshrl.u32 %v20854_v29, %v7442_v33  ;;  %v7450_v9 = vshll.u32 %v20854_v29, %v7441_v13  ;;  %v7451_v63 = vshrl.u32 %v20855_v26, %v7442_v33 }
 0x3b1   : > { %v7303_v32 = vxor.u32 2147483648, %v7302_v59  ;;  %v8125_v36 = vsub.s32 0, %v17587_v1  ;;  %v12900_v30 = vadd.s32 4294967169, %v8271_v15  ;;  %v17604_v21 = vand.u32 8388607, %v20456_v54 }
 0x3b2   : > { %v8146_v48 = vsel %vm8061_vm1, %v8145_v22, %v8121_v8  ;;  %v7443_v50 = vshrl.u32 %v20638_v19, %v7442_v33  ;;  %v7453_v2 = vshll.u32 %v20855_v26, %v7441_v13  ;;  %v7452_v15 = vor.u32 %v7451_v63, %v7450_v9 }
 0x3b3   : > { %v7304_v52 = vsel %vm7221_vm13, %v7303_v32, %v7302_v59  ;;  %v12893_v24 = vmin.u32 %v8125_v36, %v17587_v1  ;;  %v7446_v59 = vor.u32 %v7445_v18, %v7444_v31  ;;  %v7449_v32 = vor.u32 %v7448_v61, %v7447_v40 }
 0x3b4   : > { %v7307_v34 = vsel %vm17494_vm14, %v17280_v62, %v7304_v52  ;;  %vm7459_vm13 = vcmp.lt.s32.totalorder %v7440_v23, 1  ;;  %v7454_v36 = vshrl.u32 %v20655_v56, %v7442_v33  ;;  %v7456_v54 = vshll.u32 %v20655_v56, %v7441_v13 }
 0x3b5   : > { %v8127_v0 = vclz %v12893_v24  ;;  %13656 = vcosq.f32 %v7307_v34  ;;  %v20900_v58 = vand.u32 2147483647, %v17346_v57  ;;  %v7457_v22 = vshrl.u32 %v20630_v17, %v7442_v33 }
 0x3b6   : > { %13658 = vsinq.f32 %v7307_v34  ;;  %vm7460_vm12 = vcmp.lt.s32.totalorder %v7440_v23, 2  ;;  %v7455_v31 = vor.u32 %v7454_v36, %v7453_v2  ;;  %vm7461_vm8 = vcmp.lt.s32.totalorder %v7440_v23, 3 }
 0x3b7   : > { %vm17617_vm14 = vcmp.le.f32.partialorder %v20900_v58, 0.7853982  ;;  %v12894_v8 = vadd.s32 4294967294, %v8127_v0  ;;  %vm7462_vm15 = vcmp.lt.s32.totalorder %v7440_v23, 4  ;;  %v7463_v40 = vsel %vm7459_vm13, %v7443_v50, %v7446_v59 }
 0x3b8   : > { %v7458_v18 = vor.u32 %v7457_v22, %v7456_v54  ;;  %v7464_v13 = vsel %vm7462_vm15, %v7452_v15, 2102212464  ;;  %v7467_v61 = vsel %vm7459_vm13, %v7446_v59, %v7449_v32  ;;  %v7468_v24 = vsel %vm7462_vm15, %v7455_v31, 920167782 }
 0x3b9   : > { %vm12895_vm9 = vcmp.lt.s32.totalorder %v12894_v8, 0  ;;  %v7465_v63 = vsel %vm7461_vm8, %v7449_v32, %v7464_v13  ;;  %v8277_v0 = vadd.s32 1, %v12900_v30  ;;  %v7471_v36 = vsel %vm7459_vm13, %v7449_v32, %v7452_v15 }
 0x3ba   : > { %v8130_v9 = vsel %vm12895_vm9, 0, %v12894_v8  ;;  %v7466_v50 = vsel %vm7460_vm12, %v7463_v40, %v7465_v63  ;;  %v7469_v54 = vsel %vm7461_vm8, %v7452_v15, %v7468_v24  ;;  %v7472_v58 = vsel %vm7462_vm15, %v7458_v18, 1326507024 }
 0x3bb   : > { %v8131_v34 = vsub.s32 32, %v8130_v9  ;;  %v8132_v33 = vshll.u32 %v17587_v1, %v8130_v9  ;;  %v8135_v2 = vsub.s32 4294967266, %v8130_v9  ;;  %vm8278_vm0 = vcmp.gt.s32.totalorder %v8277_v0, 0 }
 0x3bc   : > { %v7470_v22 = vsel %vm7460_vm12, %v7467_v61, %v7469_v54  ;;  %v7473_v13 = vsel %vm7461_vm8, %v7455_v31, %v7472_v58  ;;  %v8279_v32 = vsel %vm8278_vm0, %v8277_v0, 0  ;;  %v17648_v31 = vsel %vm17617_vm14, 0, %v8146_v48  ;;  %v17657_v54 = vld [vmem:[%s13979_s12] sm:$0xff] }
 0x3bd   : > { %v8133_v59 = vshrl.u32 %v8115_v55, %v8131_v34  ;;  %v8136_v8 = vadd.s32 127, %v8135_v2  ;;  %v7474_v30 = vsel %vm7460_vm12, %v7471_v36, %v7473_v13  ;;  %20904 = vst [vmem:[#allocation34_spill] sm:$0xff] %v17648_v31  ;;  %v8281_v23 = vand.u32 31, %v8279_v32 }
 0x3be   : > { %v17636_v1 = vmul.u32.u64.low %v17590_v20, %v7470_v22  ;;  %v17637_v9 = vmul.u32.u64.high %v17590_v20, %v7470_v22, %v17636_v1  ;;  %v17641_v18 = vmul.u32.u64.low %v17590_v20, %v7474_v30  ;;  %v17642_v63 = vmul.u32.u64.high %v17590_v20, %v7474_v30, %v17641_v18 }
 0x3bf   : > { %v8134_v40 = vor.u32 %v8133_v59, %v8132_v33  ;;  %v8137_v15 = vshll.u32 %v8136_v8, 23  ;;  %v17644_v55 = vpop.eup %13656  ;;  %v7482_v2 = vmul.u32 %v17590_v20, %v7466_v50  ;;  %v8275_v0 = vor.u32 8388608, %v17604_v21 }
 0x3c0   : > { %20903 = vst [vmem:[#allocation29_spill] sm:$0xff] %v17644_v55  ;;  %v17650_v61 = vpop.eup %13658  ;;  %vm7318_vm13 = vcmp.eq.s32.totalorder %v17583_v43, 2  ;;  %v7485_v33 = vadd.s32 1, %v17637_v9  ;;  %v8282_v36 = vsub.s32 32, %v8281_v23  ;;  %v17660_v58 = vmul.f32 4.0, %v17657_v54 }
 0x3c1   : > { %20905 = vst [vmem:[#allocation33_spill] sm:$0xff] %v17650_v61  ;;  %v8138_v24 = vor.u32 4788187, %v8137_v15  ;;  %v8141_v34 = vcvt.s32.f32 %v8134_v40  ;;  %v8152_v8 = vadd.s32 3, %v17648_v31  ;;  %vm7484_vm12 = vc.u32 %v17642_v63, %v17636_v1 }
 0x3c2   : > { %20906 = vst [vmem:[#allocation13_spill] sm:$0xff] %v17660_v58  ;;  %vm7315_vm8 = vcmp.eq.s32.totalorder %v17583_v43, 0  ;;  %v7486_v20 = vsel %vm7484_vm12, %v7485_v33, %v17637_v9  ;;  %v8280_v21 = vshrl.u32 %v8279_v32, 5  ;;  %v8284_v50 = vshll.u32 %v20638_v19, %v8281_v23 }
 0x3c3   : > { %v8139_v59 = vand.u32 2147483647, %v8138_v24  ;;  %v8285_v22 = vshrl.u32 %v20853_v51, %v8282_v36  ;;  %v7487_v30 = vadd.s32 %v7486_v20, %v7482_v2  ;;  %v8287_v40 = vshll.u32 %v20853_v51, %v8281_v23 }
 0x3c4   : > { %v17671_v15 = vshll.u32 %v8275_v0, 8  ;;  %v8288_v24 = vshrl.u32 %v20854_v29, %v8282_v36  ;;  %v8290_v48 = vshll.u32 %v20854_v29, %v8281_v23  ;;  %v8291_v39 = vshrl.u32 %v20855_v26, %v8282_v36 }
 0x3c5   : > { %v8142_v13 = vmul.f32 %v8141_v34, %v8139_v59  ;;  %v7488_v32 = vadd.s32 536870912, %v7487_v30  ;;  %v8293_v33 = vshll.u32 %v20855_v26, %v8281_v23  ;;  %v8294_v31 = vshrl.u32 %v20655_v56, %v8282_v36 }
 0x3c6   : > { %vm7314_vm15 = vcmp.lt.s32.totalorder %v17583_v43, 2  ;;  %v8286_v34 = vor.u32 %v8285_v22, %v8284_v50  ;;  %v8289_v2 = vor.u32 %v8288_v24, %v8287_v40  ;;  %v8296_v0 = vshll.u32 %v20655_v56, %v8281_v23 }
 0x3c7   : > { %v8143_v9 = vxor.u32 2147483648, %v8142_v13  ;;  %v8297_v59 = vshrl.u32 %v20630_v17, %v8282_v36  ;;  %v7489_v18 = vshrl.u32 %v7488_v32, 30  ;;  %v8295_v46 = vor.u32 %v8294_v31, %v8293_v33 }
 0x3c8   : > { %vm8299_vm9 = vcmp.lt.s32.totalorder %v8280_v21, 1  ;;  %v8283_v42 = vshrl.u32 %v20638_v19, %v8282_v36  ;;  %v8292_v37 = vor.u32 %v8291_v39, %v8290_v48  ;;  %vm20483_vm0 = vweird.f32 %v17280_v62 }
 0x3c9   : > { %v8144_v20 = vsel %vm8061_vm1, %v8143_v9, %v8142_v13  ;;  %v8298_v53 = vor.u32 %v8297_v59, %v8296_v0  ;;  %v7490_v23 = vshll.u32 %v7489_v18, 30  ;;  %vm8301_vm12 = vcmp.lt.s32.totalorder %v8280_v21, 3 }
 0x3ca   : > { %v8147_v7 = vsel %vm17617_vm14, %v17346_v57, %v8144_v20  ;;  %vm8302_vm6 = vcmp.lt.s32.totalorder %v8280_v21, 4  ;;  %vm8300_vm7 = vcmp.lt.s32.totalorder %v8280_v21, 2  ;;  %v8307_v31 = vsel %vm8299_vm9, %v8286_v34, %v8289_v2 }
 0x3cb   : > { %13660 = vcosq.f32 %v8147_v7  ;;  %v8304_v50 = vsel %vm8302_vm6, %v8292_v37, 2102212464  ;;  %v20907_v52 = vxor.u32 2147483648, %v17644_v55  ;;  %v8153_v39 = vand.u32 3, %v8152_v8 }
 0x3cc   : > { %13662 = vsinq.f32 %v8147_v7  ;;  %v17696_v48 = vsub.s32 %v7487_v30, %v7490_v23  ;;  %v8308_v22 = vsel %vm8302_vm6, %v8295_v46, 920167782  ;;  %v20908_v13 = vand.u32 2147483647, %v17458_v12 }
 0x3cd   : > { %v7320_v36 = vsel %vm7318_vm13, %v20907_v52, %v17650_v61  ;;  %v8303_v40 = vsel %vm8299_vm9, %v8283_v42, %v8286_v34  ;;  %v8305_v24 = vsel %vm8301_vm12, %v8289_v2, %v8304_v50  ;;  %v8309_v9 = vsel %vm8301_vm12, %v8292_v37, %v8308_v22 }
 0x3ce   : > { %vm17701_vm1 = vcmp.le.f32.partialorder %v20908_v13, 0.7853982  ;;  %v8311_v32 = vsel %vm8299_vm9, %v8289_v2, %v8292_v37  ;;  %v20911_v8 = vxor.u32 2147483648, %v17650_v61  ;;  %v7493_v33 = vsub.s32 0, %v17696_v48 }
 0x3cf   : > { %v8310_v0 = vsel %vm8300_vm7, %v8307_v31, %v8309_v9  ;;  %v8312_v59 = vsel %vm8302_vm6, %v8298_v53, 1326507024  ;;  %vm20482_vm14 = vweird.f32 %v17346_v57  ;;  %v7513_v42 = vsub.s32 4, %v7489_v18 }
 0x3d0   : > { %v7317_v30 = vsel %vm7315_vm8, %v17644_v55, %v20911_v8  ;;  %v8313_v34 = vsel %vm8301_vm12, %v8295_v46, %v8312_v59  ;;  %v17720_v20 = vmul.u32.u64.low %v17671_v15, %v8310_v0  ;;  %v17721_v37 = vmul.u32.u64.high %v17671_v15, %v8310_v0, %v17720_v20 }
 0x3d1   : > { %vm7429_vm13 = vcmp.lt.s32.totalorder %v17458_v12, 0  ;;  %v12869_v2 = vmin.u32 %v7493_v33, %v17696_v48  ;;  %v8306_v23 = vsel %vm8300_vm7, %v8303_v40, %v8305_v24  ;;  %v8314_v50 = vsel %vm8300_vm7, %v8311_v32, %v8313_v34 }
 0x3d2   : > { %v17728_v31 = vmul.u32.u64.low %v17671_v15, %v8314_v50  ;;  %v17729_v53 = vmul.u32.u64.high %v17671_v15, %v8314_v50, %v17728_v31  ;;  %v7118_v52 = vand.u32 2139095040, %v17660_v58  ;;  %v17733_v46 = vmul.f32 8.0, %v17657_v54 }
 0x3d3   : > { %v7321_v22 = vsel %vm7314_vm15, %v7317_v30, %v7320_v36  ;;  %vm8154_vm6 = vcmp.lt.s32.totalorder %v8153_v39, 2  ;;  %v7495_v13 = vclz %v12869_v2  ;;  %v20471_v9 = vand.u32 2147483647, %v17660_v58 }
 0x3d4   : > { %20912 = vst [vmem:[#allocation39_spill] sm:$0xff] %v17733_v46  ;;  %v7514_v21 = vsel %vm7429_vm13, %v7513_v42, %v7489_v18  ;;  %v8322_v40 = vmul.u32 %v17671_v15, %v8306_v23  ;;  %v8325_v24 = vadd.s32 1, %v17721_v37  ;;  %v7119_v32 = vshrl.u32 %v7118_v52, 23 }
 0x3d5   : > { %v17742_v8 = vpop.eup %13660  ;;  %vm8155_vm7 = vcmp.eq.s32.totalorder %v8153_v39, 0  ;;  %vm8158_vm8 = vcmp.eq.s32.totalorder %v8153_v39, 2  ;;  %v7483_v43 = vadd.s32 %v17636_v1, %v17642_v63  ;;  %v12870_v54 = vadd.s32 4294967294, %v7495_v13 }
 0x3d6   : > { %20913 = vst [vmem:[#allocation37_spill] sm:$0xff] %v17742_v8  ;;  %v17746_v36 = vpop.eup %13662  ;;  %v7322_v30 = vsel %vm20483_vm0, nan, %v7321_v22  ;;  %v20469_v18 = vxor.u32 2147483648, %v17742_v8  ;;  %vm8324_vm15 = vc.u32 %v17729_v53, %v17720_v20  ;;  %v12856_v15 = vadd.s32 4294967169, %v7119_v32 }
 0x3d7   : > { %20914 = vst [vmem:[#allocation38_spill] sm:$0xff] %v17746_v36  ;;  %v20470_v33 = vxor.u32 2147483648, %v17746_v36  ;;  %vm12871_vm9 = vcmp.lt.s32.totalorder %v12870_v54, 0  ;;  %v17755_v0 = vsel %vm17701_vm1, 0, %v7514_v21  ;;  %v8326_v1 = vsel %vm8324_vm15, %v8325_v24, %v17721_v37 }
 0x3d8   : > { %20915 = vst [vmem:[#allocation19_spill] sm:$0xff] %v17755_v0  ;;  %v8160_v63 = vsel %vm8158_vm8, %v20469_v18, %v17746_v36  ;;  %v7498_v59 = vsel %vm12871_vm9, 0, %v12870_v54  ;;  %v8327_v42 = vadd.s32 %v8326_v1, %v8322_v40  ;;  %v7125_v34 = vadd.s32 1, %v12856_v15 }
 0x3d9   : > { %v8157_v2 = vsel %vm8155_vm7, %v17742_v8, %v20470_v33  ;;  %v7499_v23 = vsub.s32 32, %v7498_v59  ;;  %v7500_v50 = vshll.u32 %v17696_v48, %v7498_v59  ;;  %v7503_v31 = vsub.s32 4294967266, %v7498_v59 }
 0x3da   : > { %v8161_v52 = vsel %vm8154_vm6, %v8157_v2, %v8160_v63  ;;  %v8328_v22 = vadd.s32 536870912, %v8327_v42  ;;  %v7122_v37 = vand.u32 8388607, %v20471_v9  ;;  %vm7126_vm12 = vcmp.gt.s32.totalorder %v7125_v34, 0 }
 0x3db   : > { %v8162_v13 = vsel %vm20482_vm14, nan, %v8161_v52  ;;  %v7501_v21 = vshrl.u32 %v7483_v43, %v7499_v23  ;;  %v7504_v40 = vadd.s32 127, %v7503_v31  ;;  %v7127_v24 = vsel %vm7126_vm12, %v7125_v34, 0 }
 0x3dc   : > { %v13083_v32 = vpack.c.bf16 %v8162_v13, %v7322_v30  ;;  %v8329_v54 = vshrl.u32 %v8328_v22, 30  ;;  %v7129_v15 = vand.u32 31, %v7127_v24  ;;  %v17772_v48 = vadd.s32 3, %v17755_v0 }
 0x3dd   : > { %v7502_v1 = vor.u32 %v7501_v21, %v7500_v50  ;;  %v7505_v18 = vshll.u32 %v7504_v40, 23  ;;  %vm8269_vm6 = vcmp.lt.s32.totalorder %v17561_v25, 0  ;;  %v7123_v63 = vor.u32 8388608, %v7122_v37 }
 0x3de   : > { %13084 = vmatprep.subr.bf16.mxu0 %v13083_v32  ;;  %v8330_v39 = vshll.u32 %v8329_v54, 30  ;;  %v7130_v59 = vsub.s32 32, %v7129_v15  ;;  %v8323_v34 = vadd.s32 %v17720_v20, %v17729_v53  ;;  %v7958_v30 = vand.u32 2139095040, %v17733_v46 }
 0x3df   : > { %v7506_v52 = vor.u32 4788187, %v7505_v18  ;;  %v7509_v43 = vcvt.s32.f32 %v7502_v1  ;;  %v20916_v23 = vand.u32 2147483647, %v17561_v25  ;;  %v8353_v22 = vsub.s32 4, %v8329_v54 }
 0x3e0   : > { %v8331_v31 = vsub.s32 %v8327_v42, %v8330_v39  ;;  %v7128_v13 = vshrl.u32 %v7127_v24, 5  ;;  %v7132_v37 = vshll.u32 %v20638_v19, %v7129_v15  ;;  %v7133_v40 = vshrl.u32 %v20853_v51, %v7130_v59 }
 0x3e1   : > { %vm17780_vm7 = vcmp.le.f32.partialorder %v20916_v23, 0.7853982  ;;  %v7507_v21 = vand.u32 2147483647, %v7506_v52  ;;  %v7135_v18 = vshll.u32 %v20853_v51, %v7129_v15  ;;  %v7136_v20 = vshrl.u32 %v20854_v29, %v7130_v59 }
 0x3e2   : > { %v8333_v53 = vsub.s32 0, %v8331_v31  ;;  %v7138_v32 = vshll.u32 %v20854_v29, %v7129_v15  ;;  %v7139_v1 = vshrl.u32 %v20855_v26, %v7130_v59  ;;  %v7141_v23 = vshll.u32 %v20855_v26, %v7129_v15 }
 0x3e3   : > { %v7510_v33 = vmul.f32 %v7509_v43, %v7507_v21  ;;  %v7142_v42 = vshrl.u32 %v20655_v56, %v7130_v59  ;;  %v17792_v24 = vshll.u32 %v7123_v63, 8  ;;  %v7959_v39 = vshrl.u32 %v7958_v30, 23 }
 0x3e4   : > { %v12901_v52 = vmin.u32 %v8333_v53, %v8331_v31  ;;  %v7131_v9 = vshrl.u32 %v20638_v19, %v7130_v59  ;;  %v7144_v2 = vshll.u32 %v20655_v56, %v7129_v15  ;;  %v7145_v57 = vshrl.u32 %v20630_v17, %v7130_v59 }
 0x3e5   : > { %v7511_v8 = vxor.u32 2147483648, %v7510_v33  ;;  %v7134_v36 = vor.u32 %v7133_v40, %v7132_v37  ;;  %v7137_v0 = vor.u32 %v7136_v20, %v7135_v18  ;;  %v7143_v62 = vor.u32 %v7142_v42, %v7141_v23 }
 0x3e6   : > { %v8335_v55 = vclz %v12901_v52  ;;  %v8354_v43 = vsel %vm8269_vm6, %v8353_v22, %v8329_v54  ;;  %v7140_v21 = vor.u32 %v7139_v1, %v7138_v32  ;;  %vm7147_vm8 = vcmp.lt.s32.totalorder %v7128_v13, 1 }
 0x3e7   : > { %v7512_v63 = vsel %vm7429_vm13, %v7511_v8, %v7510_v33  ;;  %v7146_v30 = vor.u32 %v7145_v57, %v7144_v2  ;;  %vm7149_vm15 = vcmp.lt.s32.totalorder %v7128_v13, 3  ;;  %vm7150_vm9 = vcmp.lt.s32.totalorder %v7128_v13, 4 }
 0x3e8   : > { %v7515_v15 = vsel %vm17701_vm1, %v17458_v12, %v7512_v63  ;;  %v12902_v59 = vadd.s32 4294967294, %v8335_v55  ;;  %vm7148_vm12 = vcmp.lt.s32.totalorder %v7128_v13, 2  ;;  %v7152_v37 = vsel %vm7150_vm9, %v7140_v21, 2102212464  ;;  %v17832_v13 = vld [vmem:[%s13979_s12 + $0x10] sm:$0xff] }
 0x3e9   : > { %v17807_v40 = vsel %vm17780_vm7, 0, %v8354_v43  ;;  %v7151_v54 = vsel %vm7147_vm8, %v7131_v9, %v7134_v36  ;;  %v7155_v22 = vsel %vm7147_vm8, %v7134_v36, %v7137_v0  ;;  %v7156_v57 = vsel %vm7150_vm9, %v7143_v62, 920167782 }
 0x3ea   : > { %20919 = vst [vmem:[#allocation43_spill] sm:$0xff] %v17807_v40  ;;  %13664 = vcosq.f32 %v7515_v15  ;;  %vm12903_vm13 = vcmp.lt.s32.totalorder %v12902_v59, 0  ;;  %v7153_v8 = vsel %vm7149_vm15, %v7137_v0, %v7152_v37  ;;  %v7157_v7 = vsel %vm7149_vm15, %v7140_v21, %v7156_v57 }
 0x3eb   : > { %v8338_v55 = vsel %vm12903_vm13, 0, %v12902_v59  ;;  %v7158_v33 = vsel %vm7148_vm12, %v7155_v22, %v7157_v7  ;;  %v7159_v2 = vsel %vm7147_vm8, %v7137_v0, %v7140_v21  ;;  %v7160_v18 = vsel %vm7150_vm9, %v7146_v30, 1326507024 }
 0x3ec   : > { %v8339_v20 = vsub.s32 32, %v8338_v55  ;;  %v8340_v9 = vshll.u32 %v8331_v31, %v8338_v55  ;;  %v8343_v53 = vsub.s32 4294967266, %v8338_v55  ;;  %v7161_v36 = vsel %vm7149_vm15, %v7143_v62, %v7160_v18 }
 0x3ed   : > { %v7154_v32 = vsel %vm7148_vm12, %v7151_v54, %v7153_v8  ;;  %v7162_v1 = vsel %vm7148_vm12, %v7159_v2, %v7161_v36  ;;  %v17821_v23 = vmul.u32.u64.low %v17792_v24, %v7158_v33  ;;  %v17822_v42 = vmul.u32.u64.high %v17792_v24, %v7158_v33, %v17821_v23 }
 0x3ee   : > { %v8341_v52 = vshrl.u32 %v8323_v34, %v8339_v20  ;;  %v8344_v43 = vadd.s32 127, %v8343_v53  ;;  %v17825_v0 = vmul.u32.u64.low %v17792_v24, %v7162_v1  ;;  %v17826_v21 = vmul.u32.u64.high %v17792_v24, %v7162_v1, %v17825_v0 }
 0x3ef   : > { %v12888_v63 = vadd.s32 4294967169, %v7959_v39  ;;  %v20920_v31 = vand.u32 2147483647, %v17733_v46  ;;  %v7170_v37 = vmul.u32 %v17792_v24, %v7154_v32  ;;  %v17835_v54 = vmul.f32 4.0, %v17832_v13 }
 0x3f0   : > { %v8342_v59 = vor.u32 %v8341_v52, %v8340_v9  ;;  %v8345_v62 = vshll.u32 %v8344_v43, 23  ;;  %v17838_v34 = vand.u32 3, %v17772_v48  ;;  %v8360_v22 = vadd.s32 3, %v17807_v40 }
 0x3f1   : > { %v7962_v30 = vand.u32 8388607, %v20920_v31  ;;  %20921 = vst [vmem:[#allocation22_spill] sm:$0xff] %v17835_v54  ;;  %v7173_v57 = vadd.s32 1, %v17822_v42  ;;  %v7965_v39 = vadd.s32 1, %v12888_v63  ;;  %13666 = vsinq.f32 %v7515_v15 }
 0x3f2   : > { %v8346_v8 = vor.u32 4788187, %v8345_v62  ;;  %v8349_v7 = vcvt.s32.f32 %v8342_v59  ;;  %vm7172_vm1 = vc.u32 %v17826_v21, %v17821_v23  ;;  %v7326_v20 = vand.u32 2139095040, %v17835_v54 }
 0x3f3   : > { %v7174_v24 = vsel %vm7172_vm1, %v7173_v57, %v17822_v42  ;;  %v7963_v55 = vor.u32 8388608, %v7962_v30  ;;  %vm7966_vm8 = vcmp.gt.s32.totalorder %v7965_v39, 0  ;;  %vm7526_vm15 = vcmp.eq.s32.totalorder %v17838_v34, 2 }
 0x3f4   : > { %v17844_v33 = vpop.eup %13664  ;;  %v8347_v2 = vand.u32 2147483647, %v8346_v8  ;;  %v7175_v18 = vadd.s32 %v7174_v24, %v7170_v37  ;;  %v7967_v48 = vsel %vm7966_vm8, %v7965_v39, 0  ;;  %v17848_v15 = vand.u32 3, %v8360_v22 }
 0x3f5   : > { %20922 = vst [vmem:[#allocation41_spill] sm:$0xff] %v17844_v33  ;;  %v7969_v9 = vand.u32 31, %v7967_v48  ;;  %v17851_v32 = vadd.s32 %v17821_v23, %v17826_v21  ;;  %v17853_v42 = vshll.u32 %v7963_v55, 8  ;;  %v20481_v52 = vand.u32 2147483647, %v17835_v54 }
 0x3f6   : > { %v8350_v53 = vmul.f32 %v8349_v7, %v8347_v2  ;;  %v7176_v36 = vadd.s32 536870912, %v7175_v18  ;;  %v7327_v31 = vshrl.u32 %v7326_v20, 23  ;;  %vm7523_vm9 = vcmp.eq.s32.totalorder %v17838_v34, 0 }
 0x3f7   : > { %v7970_v1 = vsub.s32 32, %v7969_v9  ;;  %v7972_v63 = vshll.u32 %v20638_v19, %v7969_v9  ;;  %v7968_v30 = vshrl.u32 %v7967_v48, 5  ;;  %v7975_v62 = vshll.u32 %v20853_v51, %v7969_v9 }
 0x3f8   : > { %v8351_v43 = vxor.u32 2147483648, %v8350_v53  ;;  %v17856_v0 = vshrl.u32 %v7176_v36, 30  ;;  %v7978_v22 = vshll.u32 %v20854_v29, %v7969_v9  ;;  %v20486_v39 = vxor.u32 2147483648, %v17844_v33 }
 0x3f9   : > { %v7973_v59 = vshrl.u32 %v20853_v51, %v7970_v1  ;;  %v7976_v23 = vshrl.u32 %v20854_v29, %v7970_v1  ;;  %v7979_v57 = vshrl.u32 %v20855_v26, %v7970_v1  ;;  %v7981_v7 = vshll.u32 %v20855_v26, %v7969_v9 }
 0x3fa   : > { %v8352_v21 = vsel %vm8269_vm6, %v8351_v43, %v8350_v53  ;;  %v7178_v37 = vshll.u32 %v17856_v0, 30  ;;  %v17875_v24 = vand.u32 8388607, %v20481_v52  ;;  %vm7522_vm6 = vcmp.lt.s32.totalorder %v17838_v34, 2 }
 0x3fb   : > { %v8355_v8 = vsel %vm17780_vm7, %v17561_v25, %v8352_v21  ;;  %v17877_v55 = vpop.eup %13666  ;;  %v7971_v48 = vshrl.u32 %v20638_v19, %v7970_v1  ;;  %v7974_v20 = vor.u32 %v7973_v59, %v7972_v63  ;;  %v7977_v53 = vor.u32 %v7976_v23, %v7975_v62 }
 0x3fc   : > { %20923 = vst [vmem:[#allocation40_spill] sm:$0xff] %v17877_v55  ;;  %13668 = vcosq.f32 %v8355_v8  ;;  %v17880_v2 = vsub.s32 %v7175_v18, %v7178_v37  ;;  %v7982_v50 = vshrl.u32 %v20655_v56, %v7970_v1  ;;  %v7984_v36 = vshll.u32 %v20655_v56, %v7969_v9 }
 0x3fd   : > { %13670 = vsinq.f32 %v8355_v8  ;;  %vm8366_vm7 = vcmp.eq.s32.totalorder %v17848_v15, 2  ;;  %v7980_v21 = vor.u32 %v7979_v57, %v7978_v22  ;;  %v7985_v52 = vshrl.u32 %v20630_v17, %v7970_v1 }
 0x3fe   : > { %v7181_v43 = vsub.s32 0, %v17880_v2  ;;  %vm7987_vm12 = vcmp.lt.s32.totalorder %v7968_v30, 1  ;;  %vm20559_vm13 = vweird.f32 %v17458_v12  ;;  %v20489_v18 = vxor.u32 2147483648, %v17877_v55 }
 0x3ff   : > { %vm8363_vm1 = vcmp.eq.s32.totalorder %v17848_v15, 0  ;;  %v7983_v63 = vor.u32 %v7982_v50, %v7981_v7  ;;  %vm7990_vm8 = vcmp.lt.s32.totalorder %v7968_v30, 4  ;;  %v12864_v59 = vadd.s32 4294967169, %v7327_v31 }
 0x400   : > { %v7528_v9 = vsel %vm7526_vm15, %v20486_v39, %v17877_v55  ;;  %vm8362_vm14 = vcmp.lt.s32.totalorder %v17848_v15, 2  ;;  %v12857_v1 = vmin.u32 %v7181_v43, %v17880_v2  ;;  %v7986_v62 = vor.u32 %v7985_v52, %v7984_v36 }
 0x401   : > { %vm7989_vm0 = vcmp.lt.s32.totalorder %v7968_v30, 3  ;;  %vm20547_vm5 = vweird.f32 %v17561_v25  ;;  %vm7988_vm11 = vcmp.lt.s32.totalorder %v7968_v30, 2  ;;  %v7992_v23 = vsel %vm7990_vm8, %v7980_v21, 2102212464 }
 0x402   : > { %v7995_v37 = vsel %vm7987_vm12, %v7974_v20, %v7977_v53  ;;  %v7996_v31 = vsel %vm7990_vm8, %v7983_v63, 920167782  ;;  %v7183_v22 = vclz %v12857_v1  ;;  %v7991_v57 = vsel %vm7987_vm12, %v7971_v48, %v7974_v20 }
 0x403   : > { %v7999_v8 = vsel %vm7987_vm12, %v7977_v53, %v7980_v21  ;;  %v7993_v50 = vsel %vm7989_vm0, %v7977_v53, %v7992_v23  ;;  %v7997_v52 = vsel %vm7989_vm0, %v7980_v21, %v7996_v31  ;;  %v8000_v36 = vsel %vm7990_vm8, %v7986_v62, 1326507024 }
 0x404   : > { %v7333_v43 = vadd.s32 1, %v12864_v59  ;;  %v7525_v39 = vsel %vm7523_vm9, %v17844_v33, %v20489_v18  ;;  %v12858_v1 = vadd.s32 4294967294, %v7183_v22  ;;  %v7998_v48 = vsel %vm7988_vm11, %v7995_v37, %v7997_v52 }
 0x405   : > { %v8001_v20 = vsel %vm7989_vm0, %v7983_v63, %v8000_v36  ;;  %v7994_v7 = vsel %vm7988_vm11, %v7991_v57, %v7993_v50  ;;  %v17918_v21 = vmul.u32.u64.low %v17853_v42, %v7998_v48  ;;  %v17919_v23 = vmul.u32.u64.high %v17853_v42, %v7998_v48, %v17918_v21 }
 0x406   : > { %v8002_v53 = vsel %vm7988_vm11, %v7999_v8, %v8001_v20  ;;  %v17922_v59 = vpop.eup %13668  ;;  %vm12859_vm15 = vcmp.lt.s32.totalorder %v12858_v1, 0  ;;  %vm7334_vm9 = vcmp.gt.s32.totalorder %v7333_v43, 0  ;;  %v7529_v63 = vsel %vm7522_vm6, %v7525_v39, %v7528_v9 }
 0x407   : > { %20924 = vst [vmem:[#allocation46_spill] sm:$0xff] %v17922_v59  ;;  %v17925_v62 = vmul.u32.u64.low %v17853_v42, %v8002_v53  ;;  %v17926_v31 = vmul.u32.u64.high %v17853_v42, %v8002_v53, %v17925_v62  ;;  %v17928_v37 = vpop.eup %13670  ;;  %v20487_v30 = vxor.u32 2147483648, %v17922_v59  ;;  %v7186_v22 = vsel %vm12859_vm15, 0, %v12858_v1 }
 0x408   : > { %20925 = vst [vmem:[#allocation44_spill] sm:$0xff] %v17928_v37  ;;  %v7335_v57 = vsel %vm7334_vm9, %v7333_v43, 0  ;;  %v20488_v8 = vxor.u32 2147483648, %v17928_v37  ;;  %v7187_v50 = vsub.s32 32, %v7186_v22  ;;  %v7188_v52 = vshll.u32 %v17880_v2, %v7186_v22 }
 0x409   : > { %v7191_v36 = vsub.s32 4294967266, %v7186_v22  ;;  %v8368_v48 = vsel %vm8366_vm7, %v20487_v30, %v17928_v37  ;;  %v8010_v20 = vmul.u32 %v17853_v42, %v7994_v7  ;;  %v8013_v34 = vadd.s32 1, %v17919_v23 }
 0x40a   : > { %v7337_v39 = vand.u32 31, %v7335_v57  ;;  %v7530_v9 = vsel %vm20559_vm13, nan, %v7529_v63  ;;  %v8365_v2 = vsel %vm8363_vm1, %v17922_v59, %v20488_v8  ;;  %v7189_v43 = vshrl.u32 %v17851_v32, %v7187_v50 }
 0x40b   : > { %v7192_v1 = vadd.s32 127, %v7191_v36  ;;  %v8369_v53 = vsel %vm8362_vm14, %v8365_v2, %v8368_v48  ;;  %vm8012_vm11 = vc.u32 %v17926_v31, %v17918_v21  ;;  %v20926_v63 = vand.u32 2147483647, %v17660_v58 }
 0x40c   : > { %v7338_v42 = vsub.s32 32, %v7337_v39  ;;  %v7340_v7 = vshll.u32 %v20638_v19, %v7337_v39  ;;  %v8370_v62 = vsel %vm20547_vm5, nan, %v8369_v53  ;;  %v7190_v32 = vor.u32 %v7189_v43, %v7188_v52 }
 0x40d   : > { %vm17959_vm0 = vcmp.le.f32.partialorder %v20926_v63, 0.7853982  ;;  %v7193_v50 = vshll.u32 %v7192_v1, 23  ;;  %v8014_v15 = vsel %vm8012_vm11, %v8013_v34, %v17919_v23  ;;  %v13135_v36 = vpack.c.bf16 %v8370_v62, %v7530_v9 }
 0x40e   : > { %v8015_v48 = vadd.s32 %v8014_v15, %v8010_v20  ;;  %v7336_v2 = vshrl.u32 %v7335_v57, 5  ;;  %v7341_v30 = vshrl.u32 %v20853_v51, %v7338_v42  ;;  %v7197_v18 = vcvt.s32.f32 %v7190_v32 }
 0x40f   : > { %v7194_v8 = vor.u32 4788187, %v7193_v50  ;;  %v7343_v25 = vshll.u32 %v20853_v51, %v7337_v39  ;;  %v7344_v53 = vshrl.u32 %v20854_v29, %v7338_v42  ;;  %13136 = vmatprep.subr.bf16.mxu1 %v13135_v36  ;;  %v7201_v63 = vsub.s32 4, %v17856_v0 }
 0x410   : > { %v8016_v59 = vadd.s32 536870912, %v8015_v48  ;;  %v7346_v52 = vshll.u32 %v20854_v29, %v7337_v39  ;;  %v7347_v43 = vshrl.u32 %v20855_v26, %v7338_v42  ;;  %v7342_v34 = vor.u32 %v7341_v30, %v7340_v7 }
 0x411   : > { %v7195_v23 = vand.u32 2147483647, %v7194_v8  ;;  %v7349_v57 = vshll.u32 %v20855_v26, %v7337_v39  ;;  %v7350_v20 = vshrl.u32 %v20655_v56, %v7338_v42  ;;  %v7345_v1 = vor.u32 %v7344_v53, %v7343_v25 }
 0x412   : > { %v8017_v9 = vshrl.u32 %v8016_v59, 30  ;;  %v7352_v62 = vshll.u32 %v20655_v56, %v7337_v39  ;;  %v7353_v32 = vshrl.u32 %v20630_v17, %v7338_v42  ;;  %v7348_v15 = vor.u32 %v7347_v43, %v7346_v52 }
 0x413   : > { %v7198_v50 = vmul.f32 %v7197_v18, %v7195_v23  ;;  %v7351_v36 = vor.u32 %v7350_v20, %v7349_v57  ;;  %vm7355_vm14 = vcmp.lt.s32.totalorder %v7336_v2, 1  ;;  %vm7117_vm6 = vcmp.lt.s32.totalorder %v17660_v58, 0 }
 0x414   : > { %v8018_v37 = vshll.u32 %v8017_v9, 30  ;;  %v7339_v8 = vshrl.u32 %v20638_v19, %v7338_v42  ;;  %vm7357_vm7 = vcmp.lt.s32.totalorder %v7336_v2, 3  ;;  %v7354_v7 = vor.u32 %v7353_v32, %v7352_v62 }
 0x415   : > { %v7199_v30 = vxor.u32 2147483648, %v7198_v50  ;;  %vm7356_vm12 = vcmp.lt.s32.totalorder %v7336_v2, 2  ;;  %vm7358_vm1 = vcmp.lt.s32.totalorder %v7336_v2, 4  ;;  %v7363_v39 = vsel %vm7355_vm14, %v7342_v34, %v7345_v1 }
 0x416   : > { %v17976_v59 = vsub.s32 %v8015_v48, %v8018_v37  ;;  %v7360_v25 = vsel %vm7358_vm1, %v7348_v15, 2102212464  ;;  %v7364_v18 = vsel %vm7358_vm1, %v7351_v36, 920167782  ;;  %v7202_v52 = vsel %vm7117_vm6, %v7201_v63, %v17856_v0 }
 0x417   : > { %v7200_v53 = vsel %vm7117_vm6, %v7199_v30, %v7198_v50  ;;  %v7365_v43 = vsel %vm7357_vm7, %v7348_v15, %v7364_v18  ;;  %v20929_v42 = vor.u32 8388608, %v17875_v24  ;;  %v7359_v48 = vsel %vm7355_vm14, %v7339_v8, %v7342_v34 }
 0x418   : > { %v7203_v57 = vsel %vm17959_vm0, %v17660_v58, %v7200_v53  ;;  %v8021_v37 = vsub.s32 0, %v17976_v59  ;;  %v7361_v20 = vsel %vm7357_vm7, %v7345_v1, %v7360_v25  ;;  %v7366_v62 = vsel %vm7356_vm12, %v7363_v39, %v7365_v43 }
 0x419   : > { %v7371_v23 = vshll.u32 %v20929_v42, 8  ;;  %13672 = vcosq.f32 %v7203_v57  ;;  %v7367_v0 = vsel %vm7355_vm14, %v7345_v1, %v7348_v15  ;;  %v7368_v63 = vsel %vm7358_vm1, %v7354_v7, 1326507024 }
 0x41a   : > { %v17996_v24 = vsel %vm17959_vm0, 0, %v7202_v52  ;;  %13674 = vsinq.f32 %v7203_v57  ;;  %v12889_v32 = vmin.u32 %v8021_v37, %v17976_v59  ;;  %v7369_v50 = vsel %vm7357_vm7, %v7351_v36, %v7368_v63  ;;  %v13786_v37 = vld [vmem:[%s13979_s12 + $0x8] sm:$0xff] }
 0x41b   : > { %20930 = vst [vmem:[#allocation24_spill] sm:$0xff] %v17996_v24  ;;  %v7370_v34 = vsel %vm7356_vm12, %v7367_v0, %v7369_v50  ;;  %v18001_v8 = vmul.u32.u64.low %v7371_v23, %v7366_v62  ;;  %v18002_v30 = vmul.u32.u64.high %v7371_v23, %v7366_v62, %v18001_v8  ;;  %v8041_v1 = vsub.s32 4, %v8017_v9 }
 0x41c   : > { %v8023_v25 = vclz %v12889_v32  ;;  %v7362_v15 = vsel %vm7356_vm12, %v7359_v48, %v7361_v20  ;;  %v7208_v22 = vadd.s32 3, %v17996_v24  ;;  %v18011_v18 = vmul.f32 8.0, %v17832_v13 }
 0x41d   : > { %v18007_v7 = vmul.u32.u64.low %v7371_v23, %v7370_v34  ;;  %v18008_v39 = vmul.u32.u64.high %v7371_v23, %v7370_v34, %v18007_v7  ;;  %vm7957_vm8 = vcmp.lt.s32.totalorder %v17733_v46, 0  ;;  %v8011_v53 = vadd.s32 %v17918_v21, %v17926_v31 }
 0x41e   : > { %20931 = vst [vmem:[#allocation30_spill] sm:$0xff] %v18011_v18  ;;  %v12890_v36 = vadd.s32 4294967294, %v8023_v25  ;;  %v7378_v52 = vmul.u32 %v7371_v23, %v7362_v15  ;;  %v7381_v43 = vadd.s32 1, %v18002_v30  ;;  %v8166_v2 = vand.u32 2139095040, %v18011_v18 }
 0x41f   : > { %v8042_v42 = vsel %vm7957_vm8, %v8041_v1, %v8017_v9  ;;  %v20495_v57 = vand.u32 2147483647, %v18011_v18  ;;  %v18022_v13 = vmul.f32 16.0, %v13786_v37  ;;  %v7209_v48 = vand.u32 3, %v7208_v22 }
 0x420   : > { %vm12891_vm15 = vcmp.lt.s32.totalorder %v12890_v36, 0  ;;  %v20933_v20 = vand.u32 2147483647, %v17733_v46  ;;  %vm7380_vm11 = vc.u32 %v18008_v39, %v18001_v8  ;;  %v8167_v34 = vshrl.u32 %v8166_v2, 23 }
 0x421   : > { %20932 = vst [vmem:[#allocation49_spill] sm:$0xff] %v18022_v13  ;;  %v8026_v21 = vsel %vm12891_vm15, 0, %v12890_v36  ;;  %v7382_v0 = vsel %vm7380_vm11, %v7381_v43, %v18002_v30  ;;  %v8170_v22 = vand.u32 8388607, %v20495_v57  ;;  %vm7211_vm0 = vcmp.eq.s32.totalorder %v7209_v48, 0 }
 0x422   : > { %vm18026_vm9 = vcmp.le.f32.partialorder %v20933_v20, 0.7853982  ;;  %v8027_v31 = vsub.s32 32, %v8026_v21  ;;  %v8028_v23 = vshll.u32 %v17976_v59, %v8026_v21  ;;  %v8031_v9 = vsub.s32 4294967266, %v8026_v21 }
 0x423   : > { %v18034_v63 = vpop.eup %13672  ;;  %v18038_v32 = vsel %vm18026_vm9, 0, %v8042_v42  ;;  %v7383_v50 = vadd.s32 %v7382_v0, %v7378_v52  ;;  %v8902_v59 = vand.u32 2139095040, %v18022_v13  ;;  %v12896_v36 = vadd.s32 4294967169, %v8167_v34 }
 0x424   : > { %20936 = vst [vmem:[#allocation48_spill] sm:$0xff] %v18034_v63  ;;  %20937 = vst [vmem:[#allocation50_spill] sm:$0xff] %v18038_v32  ;;  %v18040_v25 = vpop.eup %13674  ;;  %v8029_v1 = vshrl.u32 %v8011_v53, %v8027_v31  ;;  %v8032_v15 = vadd.s32 127, %v8031_v9  ;;  %v20500_v30 = vxor.u32 2147483648, %v18034_v63  ;;  %vm7214_vm14 = vcmp.eq.s32.totalorder %v7209_v48, 2 }
 0x425   : > { %20938 = vst [vmem:[#allocation53_spill] sm:$0xff] %v18040_v25  ;;  %v7384_v7 = vadd.s32 536870912, %v7383_v50  ;;  %v20497_v43 = vxor.u32 2147483648, %v18040_v25  ;;  %v8903_v52 = vshrl.u32 %v8902_v59, 23  ;;  %v8048_v2 = vadd.s32 3, %v18038_v32 }
 0x426   : > { %v8030_v42 = vor.u32 %v8029_v1, %v8028_v23  ;;  %v8033_v20 = vshll.u32 %v8032_v15, 23  ;;  %v8173_v21 = vadd.s32 1, %v12896_v36  ;;  %vm20506_vm6 = vweird.f32 %v17660_v58 }
 0x427   : > { %v18048_v53 = vshrl.u32 %v7384_v7, 30  ;;  %v8171_v0 = vor.u32 8388608, %v8170_v22  ;;  %vm7210_vm7 = vcmp.lt.s32.totalorder %v7209_v48, 2  ;;  %v12924_v34 = vadd.s32 4294967169, %v8903_v52 }
 0x428   : > { %v8034_v31 = vor.u32 4788187, %v8033_v20  ;;  %v8037_v9 = vcvt.s32.f32 %v8030_v42  ;;  %vm8174_vm12 = vcmp.gt.s32.totalorder %v8173_v21, 0  ;;  %v7213_v23 = vsel %vm7211_vm0, %v18034_v63, %v20497_v43 }
 0x429   : > { %v7386_v57 = vshll.u32 %v18048_v53, 30  ;;  %v7216_v1 = vsel %vm7214_vm14, %v20500_v30, %v18040_v25  ;;  %v8175_v59 = vsel %vm8174_vm12, %v8173_v21, 0  ;;  %v18059_v7 = vand.u32 3, %v8048_v2 }
 0x42a   : > { %v8035_v15 = vand.u32 2147483647, %v8034_v31  ;;  %v8177_v22 = vand.u32 31, %v8175_v59  ;;  %v18063_v42 = vmul.f32 32.0, %v13786_v37  ;;  %v7379_v52 = vadd.s32 %v18001_v8, %v18008_v39 }
 0x42b   : > { %v18061_v36 = vsub.s32 %v7383_v50, %v7386_v57  ;;  %v18067_v12 = vshll.u32 %v8171_v0, 8  ;;  %v7217_v63 = vsel %vm7210_vm7, %v7213_v23, %v7216_v1  ;;  %v8909_v2 = vadd.s32 1, %v12924_v34 }
 0x42c   : > { %20939 = vst [vmem:[#allocation55_spill] sm:$0xff] %v18063_v42  ;;  %v8038_v20 = vmul.f32 %v8037_v9, %v8035_v15  ;;  %v8178_v21 = vsub.s32 32, %v8177_v22  ;;  %v8176_v57 = vshrl.u32 %v8175_v59, 5  ;;  %v8180_v50 = vshll.u32 %v20638_v19, %v8177_v22 }
 0x42d   : > { %v7389_v31 = vsub.s32 0, %v18061_v36  ;;  %v8183_v37 = vshll.u32 %v20853_v51, %v8177_v22  ;;  %v8186_v39 = vshll.u32 %v20854_v29, %v8177_v22  ;;  %v8189_v0 = vshll.u32 %v20855_v26, %v8177_v22 }
 0x42e   : > { %v8039_v30 = vxor.u32 2147483648, %v8038_v20  ;;  %v8181_v8 = vshrl.u32 %v20853_v51, %v8178_v21  ;;  %v8184_v23 = vshrl.u32 %v20854_v29, %v8178_v21  ;;  %v8187_v34 = vshrl.u32 %v20855_v26, %v8178_v21 }
 0x42f   : > { %v12865_v9 = vmin.u32 %v7389_v31, %v18061_v36  ;;  %v8190_v1 = vshrl.u32 %v20655_v56, %v8178_v21  ;;  %v18085_v15 = vsel %vm20506_vm6, nan, %v7217_v63  ;;  %v8179_v43 = vshrl.u32 %v20638_v19, %v8178_v21 }
 0x430   : > { %v8040_v48 = vsel %vm7957_vm8, %v8039_v30, %v8038_v20  ;;  %v8182_v25 = vor.u32 %v8181_v8, %v8180_v50  ;;  %v8185_v30 = vor.u32 %v8184_v23, %v8183_v37  ;;  %vm8910_vm1 = vcmp.gt.s32.totalorder %v8909_v2, 0 }
 0x431   : > { %v8043_v59 = vsel %vm18026_vm9, %v17733_v46, %v8040_v48  ;;  %v7391_v31 = vclz %v12865_v9  ;;  %v8188_v32 = vor.u32 %v8187_v34, %v8186_v39  ;;  %v8191_v24 = vor.u32 %v8190_v1, %v8189_v0 }
 0x432   : > { %13676 = vcosq.f32 %v8043_v59  ;;  %vm8054_vm8 = vcmp.eq.s32.totalorder %v18059_v7, 2  ;;  %v8192_v63 = vshll.u32 %v20655_v56, %v8177_v22  ;;  %v8193_v58 = vshrl.u32 %v20630_v17, %v8178_v21 }
 0x433   : > { %13678 = vsinq.f32 %v8043_v59  ;;  %v12866_v20 = vadd.s32 4294967294, %v7391_v31  ;;  %vm8195_vm15 = vcmp.lt.s32.totalorder %v8176_v57, 1  ;;  %vm8196_vm11 = vcmp.lt.s32.totalorder %v8176_v57, 2 }
 0x434   : > { %vm8051_vm9 = vcmp.eq.s32.totalorder %v18059_v7, 0  ;;  %vm8197_vm14 = vcmp.lt.s32.totalorder %v8176_v57, 3  ;;  %vm8198_vm7 = vcmp.lt.s32.totalorder %v8176_v57, 4  ;;  %v8199_v62 = vsel %vm8195_vm15, %v8179_v43, %v8182_v25 }
 0x435   : > { %vm12867_vm0 = vcmp.lt.s32.totalorder %v12866_v20, 0  ;;  %vm8050_vm12 = vcmp.lt.s32.totalorder %v18059_v7, 2  ;;  %v8194_v37 = vor.u32 %v8193_v58, %v8192_v63  ;;  %v8200_v9 = vsel %vm8198_vm7, %v8188_v32, 2102212464 }
 0x436   : > { %v7394_v50 = vsel %vm12867_vm0, 0, %v12866_v20  ;;  %v8203_v8 = vsel %vm8195_vm15, %v8182_v25, %v8185_v30  ;;  %vm20546_vm6 = vweird.f32 %v17733_v46  ;;  %v8201_v0 = vsel %vm8197_vm14, %v8185_v30, %v8200_v9 }
 0x437   : > { %v7395_v22 = vsub.s32 32, %v7394_v50  ;;  %v7396_v21 = vshll.u32 %v18061_v36, %v7394_v50  ;;  %v7399_v39 = vsub.s32 4294967266, %v7394_v50  ;;  %v8204_v48 = vsel %vm8198_vm7, %v8191_v24, 920167782 }
 0x438   : > { %v8207_v23 = vsel %vm8195_vm15, %v8185_v30, %v8188_v32  ;;  %v8208_v34 = vsel %vm8198_vm7, %v8194_v37, 1326507024  ;;  %v20940_v43 = vand.u32 2147483647, %v18022_v13  ;;  %v8205_v31 = vsel %vm8197_vm14, %v8188_v32, %v8204_v48 }
 0x439   : > { %v7397_v59 = vshrl.u32 %v7379_v52, %v7395_v22  ;;  %v7400_v58 = vadd.s32 127, %v7399_v39  ;;  %v8209_v25 = vsel %vm8197_vm14, %v8191_v24, %v8208_v34  ;;  %vm7325_vm0 = vcmp.lt.s32.totalorder %v17835_v54, 0 }
 0x43a   : > { %v8906_v1 = vand.u32 8388607, %v20940_v43  ;;  %v8202_v36 = vsel %vm8196_vm11, %v8199_v62, %v8201_v0  ;;  %v8206_v20 = vsel %vm8196_vm11, %v8203_v8, %v8205_v31  ;;  %v8210_v63 = vsel %vm8196_vm11, %v8207_v23, %v8209_v25 }
 0x43b   : > { %v8911_v30 = vsel %vm8910_vm1, %v8909_v2, 0  ;;  %v7398_v50 = vor.u32 %v7397_v59, %v7396_v21  ;;  %v7401_v37 = vshll.u32 %v7400_v58, 23  ;;  %v7409_v24 = vsub.s32 4, %v18048_v53 }
 0x43c   : > { %v18112_v9 = vmul.u32.u64.low %v18067_v12, %v8210_v63  ;;  %v18113_v52 = vmul.u32.u64.high %v18067_v12, %v8210_v63, %v18112_v9  ;;  %v18115_v22 = vpop.eup %13676  ;;  %v18119_v32 = vmul.u32.u64.low %v18067_v12, %v8206_v20  ;;  %v18120_v39 = vmul.u32.u64.high %v18067_v12, %v8206_v20, %v18119_v32 }
 0x43d   : > { %20941 = vst [vmem:[#allocation59_spill] sm:$0xff] %v18115_v22  ;;  %v8913_v62 = vand.u32 31, %v8911_v30  ;;  %v18123_v57 = vpop.eup %13678  ;;  %v20507_v2 = vxor.u32 2147483648, %v18115_v22  ;;  %v20943_v8 = vand.u32 2147483647, %v17835_v54  ;;  %v7405_v48 = vcvt.s32.f32 %v7398_v50 }
 0x43e   : > { %20942 = vst [vmem:[#allocation32_spill] sm:$0xff] %v18123_v57  ;;  %v7402_v0 = vor.u32 4788187, %v7401_v37  ;;  %v8907_v23 = vor.u32 8388608, %v8906_v1  ;;  %v20508_v34 = vxor.u32 2147483648, %v18123_v57  ;;  %v8218_v43 = vmul.u32 %v18067_v12, %v8202_v36 }
 0x43f   : > { %vm18128_vm1 = vcmp.le.f32.partialorder %v20943_v8, 0.7853982  ;;  %v8912_v59 = vshrl.u32 %v8911_v30, 5  ;;  %v8914_v58 = vsub.s32 32, %v8913_v62  ;;  %v8056_v31 = vsel %vm8054_vm8, %v20507_v2, %v18123_v57 }
 0x440   : > { %v7403_v25 = vand.u32 2147483647, %v7402_v0  ;;  %vm8220_vm15 = vc.u32 %v18113_v52, %v18119_v32  ;;  %v8916_v20 = vshll.u32 %v20638_v19, %v8913_v62  ;;  %v8053_v12 = vsel %vm8051_vm9, %v18115_v22, %v20508_v34 }
 0x441   : > { %v8221_v1 = vadd.s32 1, %v18120_v39  ;;  %v8917_v36 = vshrl.u32 %v20853_v51, %v8914_v58  ;;  %v8919_v63 = vshll.u32 %v20853_v51, %v8913_v62  ;;  %v8057_v30 = vsel %vm8050_vm12, %v8053_v12, %v8056_v31 }
 0x442   : > { %v7406_v50 = vmul.f32 %v7405_v48, %v7403_v25  ;;  %v8915_v37 = vshrl.u32 %v20638_v19, %v8914_v58  ;;  %v8920_v9 = vshrl.u32 %v20854_v29, %v8914_v58  ;;  %v8058_v8 = vsel %vm20546_vm6, nan, %v8057_v30 }
 0x443   : > { %v8222_v0 = vsel %vm8220_vm15, %v8221_v1, %v18120_v39  ;;  %v8922_v2 = vshll.u32 %v20854_v29, %v8913_v62  ;;  %v8923_v34 = vshrl.u32 %v20855_v26, %v8914_v58  ;;  %v13085_v22 = vpack.c.bf16 %v8058_v8, %v18085_v15 }
 0x444   : > { %v7407_v57 = vxor.u32 2147483648, %v7406_v50  ;;  %v8223_v40 = vadd.s32 %v8222_v0, %v8218_v43  ;;  %v8918_v7 = vor.u32 %v8917_v36, %v8916_v20  ;;  %v8921_v31 = vor.u32 %v8920_v9, %v8919_v63 }
 0x445   : > { %v8925_v48 = vshll.u32 %v20855_v26, %v8913_v62  ;;  %v8926_v25 = vshrl.u32 %v20655_v56, %v8914_v58  ;;  %v8928_v12 = vshll.u32 %v20655_v56, %v8913_v62  ;;  %13086 = vmatpush1.bf16.msra.mxu0 %v13085_v22  ;;  %v8929_v30 = vshrl.u32 %v20630_v17, %v8914_v58 }
 0x446   : > { %v7408_v39 = vsel %vm7325_vm0, %v7407_v57, %v7406_v50  ;;  %v8224_v1 = vadd.s32 536870912, %v8223_v40  ;;  %vm8931_vm8 = vcmp.lt.s32.totalorder %v8912_v59, 1  ;;  %v7410_v15 = vsel %vm7325_vm0, %v7409_v24, %v18048_v53 }
 0x447   : > { %v8924_v43 = vor.u32 %v8923_v34, %v8922_v2  ;;  %v8927_v20 = vor.u32 %v8926_v25, %v8925_v48  ;;  %v8947_v36 = vshll.u32 %v8907_v23, 8  ;;  %v8930_v9 = vor.u32 %v8929_v30, %v8928_v12 }
 0x448   : > { %v8225_v63 = vshrl.u32 %v8224_v1, 30  ;;  %vm8933_vm11 = vcmp.lt.s32.totalorder %v8912_v59, 3  ;;  %vm8934_vm9 = vcmp.lt.s32.totalorder %v8912_v59, 4  ;;  %v7411_v22 = vsel %vm18128_vm1, %v17835_v54, %v7408_v39 }
 0x449   : > { %vm8932_vm14 = vcmp.lt.s32.totalorder %v8912_v59, 2  ;;  %v8936_v62 = vsel %vm8934_vm9, %v8924_v43, 2102212464  ;;  %v8939_v57 = vsel %vm8931_vm8, %v8918_v7, %v8921_v31  ;;  %v18175_v58 = vsel %vm18128_vm1, 0, %v7410_v15 }
 0x44a   : > { %20946 = vst [vmem:[#allocation52_spill] sm:$0xff] %v18175_v58  ;;  %v8226_v53 = vshll.u32 %v8225_v63, 30  ;;  %v8935_v24 = vsel %vm8931_vm8, %v8915_v37, %v8918_v7  ;;  %v8940_v2 = vsel %vm8934_vm9, %v8927_v20, 920167782  ;;  %v8937_v23 = vsel %vm8933_vm11, %v8921_v31, %v8936_v62 }
 0x44b   : > { %v8941_v34 = vsel %vm8933_vm11, %v8924_v43, %v8940_v2  ;;  %v8943_v50 = vsel %vm8931_vm8, %v8921_v31, %v8924_v43  ;;  %v8944_v8 = vsel %vm8934_vm9, %v8930_v9, 1326507024  ;;  %13680 = vcosq.f32 %v7411_v22 }
 0x44c   : > { %v8227_v0 = vsub.s32 %v8223_v40, %v8226_v53  ;;  %v8942_v48 = vsel %vm8932_vm14, %v8939_v57, %v8941_v34  ;;  %v8945_v25 = vsel %vm8933_vm11, %v8927_v20, %v8944_v8  ;;  %13682 = vsinq.f32 %v7411_v22 }
 0x44d   : > { %v8946_v21 = vsel %vm8932_vm14, %v8943_v50, %v8945_v25  ;;  %v18184_v12 = vmul.u32.u64.low %v8947_v36, %v8942_v48  ;;  %v18185_v39 = vmul.u32.u64.high %v8947_v36, %v8942_v48, %v18184_v12  ;;  %v8938_v7 = vsel %vm8932_vm14, %v8935_v24, %v8937_v23  ;;  %v18213_v25 = vld [vmem:[%s13979_s12 + $0x18] sm:$0xff] }
 0x44e   : > { %v8229_v37 = vsub.s32 0, %v8227_v0  ;;  %v18188_v1 = vmul.u32.u64.low %v8947_v36, %v8946_v21  ;;  %v18189_v30 = vmul.u32.u64.high %v8947_v36, %v8946_v21, %v18188_v1  ;;  %v7416_v31 = vadd.s32 3, %v18175_v58 }
 0x44f   : > { %v9742_v40 = vand.u32 2139095040, %v18063_v42  ;;  %v8249_v43 = vsub.s32 4, %v8225_v63  ;;  %v8954_v9 = vmul.u32 %v8947_v36, %v8938_v7  ;;  %v8957_v20 = vadd.s32 1, %v18185_v39 }
 0x450   : > { %v12897_v15 = vmin.u32 %v8229_v37, %v8227_v0  ;;  %v18194_v62 = vand.u32 3, %v7416_v31  ;;  %vm8956_vm7 = vc.u32 %v18189_v30, %v18184_v12  ;;  %vm8165_vm12 = vcmp.lt.s32.totalorder %v18011_v18, 0 }
 0x451   : > { %v9743_v59 = vshrl.u32 %v9742_v40, 23  ;;  %v8958_v53 = vsel %vm8956_vm7, %v8957_v20, %v18185_v39  ;;  %v8250_v24 = vsel %vm8165_vm12, %v8249_v43, %v8225_v63  ;;  %v20516_v36 = vand.u32 2147483647, %v18063_v42 }
 0x452   : > { %v8231_v22 = vclz %v12897_v15  ;;  %v8959_v2 = vadd.s32 %v8958_v53, %v8954_v9  ;;  %v20948_v50 = vand.u32 2147483647, %v18011_v18  ;;  %v8219_v48 = vadd.s32 %v18119_v32, %v18113_v52 }
 0x453   : > { %v12956_v23 = vadd.s32 4294967169, %v9743_v59  ;;  %v18216_v63 = vmul.f32 16.0, %v18213_v25  ;;  %vm7422_vm15 = vcmp.eq.s32.totalorder %v18194_v62, 2  ;;  %v9746_v43 = vand.u32 8388607, %v20516_v36 }
 0x454   : > { %v12898_v57 = vadd.s32 4294967294, %v8231_v22  ;;  %vm18206_vm0 = vcmp.le.f32.partialorder %v20948_v50, 0.7853982  ;;  %v8960_v37 = vadd.s32 536870912, %v8959_v2  ;;  %vm7419_vm11 = vcmp.eq.s32.totalorder %v18194_v62, 0 }
 0x455   : > { %v18202_v34 = vpop.eup %13680  ;;  %20951 = vst [vmem:[#allocation63_spill] sm:$0xff] %v18216_v63  ;;  %v9749_v7 = vadd.s32 1, %v12956_v23  ;;  %v18223_v40 = vsel %vm18206_vm0, 0, %v8250_v24  ;;  %v18237_v50 = vadd.s32 %v18184_v12, %v18189_v30  ;;  %v9110_v12 = vand.u32 2139095040, %v18216_v63 }
 0x456   : > { %20947 = vst [vmem:[#allocation51_spill] sm:$0xff] %v18202_v34  ;;  %vm12899_vm1 = vcmp.lt.s32.totalorder %v12898_v57, 0  ;;  %v18218_v21 = vpop.eup %13682  ;;  %20953 = vst [vmem:[#allocation56_spill] sm:$0xff] %v18223_v40  ;;  %v20514_v52 = vxor.u32 2147483648, %v18202_v34  ;;  %v18226_v32 = vshrl.u32 %v8960_v37, 30  ;;  %v18234_v23 = vadd.s32 3, %v18223_v40 }
 0x457   : > { %20952 = vst [vmem:[#allocation57_spill] sm:$0xff] %v18218_v21  ;;  %v8234_v39 = vsel %vm12899_vm1, 0, %v12898_v57  ;;  %vm9750_vm8 = vcmp.gt.s32.totalorder %v9749_v7, 0  ;;  %v20515_v9 = vxor.u32 2147483648, %v18218_v21  ;;  %v9747_v37 = vor.u32 8388608, %v9746_v43 }
 0x458   : > { %v8235_v1 = vsub.s32 32, %v8234_v39  ;;  %v8236_v31 = vshll.u32 %v8227_v0, %v8234_v39  ;;  %v8239_v15 = vsub.s32 4294967266, %v8234_v39  ;;  %v9751_v59 = vsel %vm9750_vm8, %v9749_v7, 0 }
 0x459   : > { %v8962_v0 = vshll.u32 %v18226_v32, 30  ;;  %v9753_v57 = vand.u32 31, %v9751_v59  ;;  %v18263_v46 = vshll.u32 %v9747_v37, 8  ;;  %v9111_v58 = vshrl.u32 %v9110_v12, 23 }
 0x45a   : > { %v8237_v20 = vshrl.u32 %v8219_v48, %v8235_v1  ;;  %v8240_v22 = vadd.s32 127, %v8239_v15  ;;  %v18244_v48 = vsel %vm7422_vm15, %v20514_v52, %v18218_v21  ;;  %v18251_v1 = vsel %vm7419_vm11, %v18202_v34, %v20515_v9 }
 0x45b   : > { %v18246_v39 = vsub.s32 %v8959_v2, %v8962_v0  ;;  %v9754_v7 = vsub.s32 32, %v9753_v57  ;;  %v9759_v2 = vshll.u32 %v20853_v51, %v9753_v57  ;;  %v9762_v52 = vshll.u32 %v20854_v29, %v9753_v57 }
 0x45c   : > { %v8238_v53 = vor.u32 %v8237_v20, %v8236_v31  ;;  %v8241_v24 = vshll.u32 %v8240_v22, 23  ;;  %v9756_v20 = vshll.u32 %v20638_v19, %v9753_v57  ;;  %v9765_v36 = vshll.u32 %v20855_v26, %v9753_v57 }
 0x45d   : > { %v8965_v30 = vsub.s32 0, %v18246_v39  ;;  %v9757_v22 = vshrl.u32 %v20853_v51, %v9754_v7  ;;  %v9760_v43 = vshrl.u32 %v20854_v29, %v9754_v7  ;;  %v9763_v9 = vshrl.u32 %v20855_v26, %v9754_v7 }
 0x45e   : > { %v8242_v31 = vor.u32 4788187, %v8241_v24  ;;  %v8245_v15 = vcvt.s32.f32 %v8238_v53  ;;  %v9752_v53 = vshrl.u32 %v9751_v59, 5  ;;  %v9755_v34 = vshrl.u32 %v20638_v19, %v9754_v7 }
 0x45f   : > { %v12925_v24 = vmin.u32 %v8965_v30, %v18246_v39  ;;  %v9766_v21 = vshrl.u32 %v20655_v56, %v9754_v7  ;;  %v9758_v33 = vor.u32 %v9757_v22, %v9756_v20  ;;  %v9761_v55 = vor.u32 %v9760_v43, %v9759_v2 }
 0x460   : > { %v8243_v0 = vand.u32 2147483647, %v8242_v31  ;;  %v9764_v61 = vor.u32 %v9763_v9, %v9762_v52  ;;  %vm7418_vm9 = vcmp.lt.s32.totalorder %v18194_v62, 2  ;;  %v9768_v59 = vshll.u32 %v20655_v56, %v9753_v57 }
 0x461   : > { %v8967_v31 = vclz %v12925_v24  ;;  %v9767_v38 = vor.u32 %v9766_v21, %v9765_v36  ;;  %v9769_v30 = vshrl.u32 %v20630_v17, %v9754_v7  ;;  %vm9771_vm14 = vcmp.lt.s32.totalorder %v9752_v53, 1 }
 0x462   : > { %v8246_v40 = vmul.f32 %v8245_v15, %v8243_v0  ;;  %vm9772_vm7 = vcmp.lt.s32.totalorder %v9752_v53, 2  ;;  %vm9773_vm1 = vcmp.lt.s32.totalorder %v9752_v53, 3  ;;  %vm9774_vm15 = vcmp.lt.s32.totalorder %v9752_v53, 4 }
 0x463   : > { %v12926_v37 = vadd.s32 4294967294, %v8967_v31  ;;  %v9770_v12 = vor.u32 %v9769_v30, %v9768_v59  ;;  %v9775_v20 = vsel %vm9771_vm14, %v9755_v34, %v9758_v33  ;;  %v9776_v36 = vsel %vm9774_vm15, %v9764_v61, 2102212464 }
 0x464   : > { %v8247_v16 = vxor.u32 2147483648, %v8246_v40  ;;  %v9779_v21 = vsel %vm9771_vm14, %v9758_v33, %v9761_v55  ;;  %v9777_v57 = vsel %vm9773_vm1, %v9761_v55, %v9776_v36  ;;  %v9780_v7 = vsel %vm9774_vm15, %v9767_v38, 920167782 }
 0x465   : > { %vm12927_vm8 = vcmp.lt.s32.totalorder %v12926_v37, 0  ;;  %v12932_v22 = vadd.s32 4294967169, %v9111_v58  ;;  %v9781_v8 = vsel %vm9773_vm1, %v9764_v61, %v9780_v7  ;;  %v9783_v2 = vsel %vm9771_vm14, %v9761_v55, %v9764_v61 }
 0x466   : > { %v8248_v15 = vsel %vm8165_vm12, %v8247_v16, %v8246_v40  ;;  %v8970_v9 = vsel %vm12927_vm8, 0, %v12926_v37  ;;  %v9784_v0 = vsel %vm9774_vm15, %v9770_v12, 1326507024  ;;  %v9778_v33 = vsel %vm9772_vm7, %v9775_v20, %v9777_v57 }
 0x467   : > { %v8251_v52 = vsel %vm18206_vm0, %v18011_v18, %v8248_v15  ;;  %v8971_v16 = vsub.s32 32, %v8970_v9  ;;  %v8975_v40 = vsub.s32 4294967266, %v8970_v9  ;;  %v8972_v34 = vshll.u32 %v18246_v39, %v8970_v9 }
 0x468   : > { %13684 = vcosq.f32 %v8251_v52  ;;  %v9782_v24 = vsel %vm9772_vm7, %v9779_v21, %v9781_v8  ;;  %v9785_v31 = vsel %vm9773_vm1, %v9767_v38, %v9784_v0  ;;  %v8257_v15 = vand.u32 3, %v18234_v23 }
 0x469   : > { %13686 = vsinq.f32 %v8251_v52  ;;  %v8976_v43 = vadd.s32 127, %v8975_v40  ;;  %v8973_v59 = vshrl.u32 %v18237_v50, %v8971_v16  ;;  %v9786_v30 = vsel %vm9772_vm7, %v9783_v2, %v9785_v31 }
 0x46a   : > { %v18290_v58 = vmul.u32.u64.low %v18263_v46, %v9782_v24  ;;  %v18291_v39 = vmul.u32.u64.high %v18263_v46, %v9782_v24, %v18290_v58  ;;  %v18295_v61 = vmul.u32.u64.low %v18263_v46, %v9786_v30  ;;  %v18296_v55 = vmul.u32.u64.high %v18263_v46, %v9786_v30, %v18295_v61 }
 0x46b   : > { %v8977_v37 = vshll.u32 %v8976_v43, 23  ;;  %v9117_v12 = vadd.s32 1, %v12932_v22  ;;  %vm20545_vm12 = vweird.f32 %v17835_v54  ;;  %v7425_v38 = vsel %vm7418_vm9, %v18251_v1, %v18244_v48 }
 0x46c   : > { %v9794_v50 = vmul.u32 %v18263_v46, %v9778_v33  ;;  %v8974_v53 = vor.u32 %v8973_v59, %v8972_v34  ;;  %v9797_v52 = vadd.s32 1, %v18291_v39  ;;  %vm20544_vm11 = vweird.f32 %v18011_v18 }
 0x46d   : > { %v8978_v20 = vor.u32 4788187, %v8977_v37  ;;  %vm9118_vm0 = vcmp.gt.s32.totalorder %v9117_v12, 0  ;;  %vm9796_vm14 = vc.u32 %v18296_v55, %v18290_v58  ;;  %v20536_v23 = vand.u32 2147483647, %v18216_v63 }
 0x46e   : > { %v9119_v36 = vsel %vm9118_vm0, %v9117_v12, 0  ;;  %vm8258_vm7 = vcmp.lt.s32.totalorder %v8257_v15, 2  ;;  %vm8262_vm1 = vcmp.eq.s32.totalorder %v8257_v15, 2  ;;  %v9798_v62 = vsel %vm9796_vm14, %v9797_v52, %v18291_v39 }
 0x46f   : > { %v9121_v46 = vand.u32 31, %v9119_v36  ;;  %v7426_v1 = vsel %vm20545_vm12, nan, %v7425_v38  ;;  %vm8259_vm9 = vcmp.eq.s32.totalorder %v8257_v15, 0  ;;  %v9799_v57 = vadd.s32 %v9798_v62, %v9794_v50 }
 0x470   : > { %v8979_v16 = vand.u32 2147483647, %v8978_v20  ;;  %v8981_v40 = vcvt.s32.f32 %v8974_v53  ;;  %vm8901_vm15 = vcmp.lt.s32.totalorder %v18022_v13, 0  ;;  %v9114_v2 = vand.u32 8388607, %v20536_v23 }
 0x471   : > { %v9122_v22 = vsub.s32 32, %v9121_v46  ;;  %v9800_v8 = vadd.s32 536870912, %v9799_v57  ;;  %v18326_v0 = vmul.f32 32.0, %v18213_v25  ;;  %v9120_v33 = vshrl.u32 %v9119_v36, 5 }
 0x472   : > { %v18310_v21 = vpop.eup %13684  ;;  %v9124_v24 = vshll.u32 %v20638_v19, %v9121_v46  ;;  %v9127_v39 = vshll.u32 %v20853_v51, %v9121_v46  ;;  %v8982_v61 = vmul.f32 %v8981_v40, %v8979_v16  ;;  %v9130_v12 = vshll.u32 %v20854_v29, %v9121_v46 }
 0x473   : > { %20954 = vst [vmem:[#allocation36_spill] sm:$0xff] %v18310_v21  ;;  %v18313_v48 = vpop.eup %13686  ;;  %v20533_v9 = vxor.u32 2147483648, %v18310_v21  ;;  %20956 = vst [vmem:[#allocation58_spill] sm:$0xff] %v18326_v0  ;;  %v9125_v31 = vshrl.u32 %v20853_v51, %v9122_v22  ;;  %v18334_v30 = vshrl.u32 %v9800_v8, 30  ;;  %v9128_v37 = vshrl.u32 %v20854_v29, %v9122_v22 }
 0x474   : > { %20955 = vst [vmem:[#allocation60_spill] sm:$0xff] %v18313_v48  ;;  %v20534_v7 = vxor.u32 2147483648, %v18313_v48  ;;  %v9131_v38 = vshrl.u32 %v20855_v26, %v9122_v22  ;;  %v8985_v53 = vsub.s32 4, %v18226_v32  ;;  %v9115_v20 = vor.u32 8388608, %v9114_v2 }
 0x475   : > { %v8264_v34 = vsel %vm8262_vm1, %v20533_v9, %v18313_v48  ;;  %v9802_v15 = vshll.u32 %v18334_v30, 30  ;;  %v9126_v52 = vor.u32 %v9125_v31, %v9124_v24  ;;  %v9133_v36 = vshll.u32 %v20855_v26, %v9121_v46 }
 0x476   : > { %v8261_v43 = vsel %vm8259_vm9, %v18310_v21, %v20534_v7  ;;  %v9134_v62 = vshrl.u32 %v20655_v56, %v9122_v22  ;;  %v20957_v16 = vand.u32 2147483647, %v18022_v13  ;;  %v9129_v8 = vor.u32 %v9128_v37, %v9127_v39 }
 0x477   : > { %v8265_v59 = vsel %vm8258_vm7, %v8261_v43, %v8264_v34  ;;  %v9950_v34 = vand.u32 2139095040, %v18326_v0  ;;  %v9136_v43 = vshll.u32 %v20655_v56, %v9121_v46  ;;  %v9137_v2 = vshrl.u32 %v20630_v17, %v9122_v22 }
 0x478   : > { %v8266_v25 = vsel %vm20544_vm11, nan, %v8265_v59  ;;  %vm18349_vm8 = vcmp.le.f32.partialorder %v20957_v16, 0.7853982  ;;  %v8983_v24 = vxor.u32 2147483648, %v8982_v61  ;;  %v9132_v31 = vor.u32 %v9131_v38, %v9130_v12 }
 0x479   : > { %v13137_v50 = vpack.c.bf16 %v8266_v25, %v7426_v1  ;;  %v18353_v1 = vsub.s32 %v9799_v57, %v9802_v15  ;;  %v9135_v59 = vor.u32 %v9134_v62, %v9133_v36  ;;  %vm9139_vm0 = vcmp.lt.s32.totalorder %v9120_v33, 1 }
 0x47a   : > { %v9138_v9 = vor.u32 %v9137_v2, %v9136_v43  ;;  %vm9141_vm14 = vcmp.lt.s32.totalorder %v9120_v33, 3  ;;  %v8986_v57 = vsel %vm8901_vm15, %v8985_v53, %v18226_v32  ;;  %vm9140_vm7 = vcmp.lt.s32.totalorder %v9120_v33, 2 }
 0x47b   : > { %13138 = vmatpush1.bf16.msra.mxu1 %v13137_v50  ;;  %v9805_v25 = vsub.s32 0, %v18353_v1  ;;  %v9123_v50 = vshrl.u32 %v20638_v19, %v9122_v22  ;;  %vm9142_vm1 = vcmp.lt.s32.totalorder %v9120_v33, 4  ;;  %v9155_v39 = vshll.u32 %v9115_v20, 8 }
 0x47c   : > { %v9144_v37 = vsel %vm9142_vm1, %v9132_v31, 2102212464  ;;  %v9147_v12 = vsel %vm9139_vm0, %v9126_v52, %v9129_v8  ;;  %v9148_v38 = vsel %vm9142_vm1, %v9135_v59, 920167782  ;;  %v9151_v36 = vsel %vm9139_vm0, %v9129_v8, %v9132_v31 }
 0x47d   : > { %v12957_v46 = vmin.u32 %v9805_v25, %v18353_v1  ;;  %v9149_v15 = vsel %vm9141_vm14, %v9132_v31, %v9148_v38  ;;  %v9152_v22 = vsel %vm9142_vm1, %v9138_v9, 1326507024  ;;  %v9951_v62 = vshrl.u32 %v9950_v34, 23 }
 0x47e   : > { %v8984_v16 = vsel %vm8901_vm15, %v8983_v24, %v8982_v61  ;;  %v9143_v32 = vsel %vm9139_vm0, %v9123_v50, %v9126_v52  ;;  %v9145_v53 = vsel %vm9141_vm14, %v9129_v8, %v9144_v37  ;;  %v9825_v20 = vsub.s32 4, %v18334_v30 }
 0x47f   : > { %v9807_v43 = vclz %v12957_v46  ;;  %v9150_v2 = vsel %vm9140_vm7, %v9147_v12, %v9149_v15  ;;  %v9153_v25 = vsel %vm9141_vm14, %v9135_v59, %v9152_v22  ;;  %v12964_v7 = vadd.s32 4294967169, %v9951_v62 }
 0x480   : > { %v9154_v31 = vsel %vm9140_vm7, %v9151_v36, %v9153_v25  ;;  %v18374_v9 = vmul.u32.u64.low %v9155_v39, %v9150_v2  ;;  %v18375_v34 = vmul.u32.u64.high %v9155_v39, %v9150_v2, %v18374_v9  ;;  %vm9741_vm9 = vcmp.lt.s32.totalorder %v18063_v42, 0 }
 0x481   : > { %v12958_v38 = vadd.s32 4294967294, %v9807_v43  ;;  %v9146_v61 = vsel %vm9140_vm7, %v9143_v32, %v9145_v53  ;;  %v18380_v52 = vmul.u32.u64.low %v9155_v39, %v9154_v31  ;;  %v18381_v8 = vmul.u32.u64.high %v9155_v39, %v9154_v31, %v18380_v52 }
 0x482   : > { %v18385_v24 = vsel %vm18349_vm8, 0, %v8986_v57  ;;  %v9795_v59 = vadd.s32 %v18290_v58, %v18296_v55  ;;  %v20535_v50 = vand.u32 2147483647, %v18326_v0  ;;  %v8987_v46 = vsel %vm18349_vm8, %v18022_v13, %v8984_v16 }
 0x483   : > { %vm12959_vm15 = vcmp.lt.s32.totalorder %v12958_v38, 0  ;;  %v9826_v33 = vsel %vm9741_vm9, %v9825_v20, %v18334_v30  ;;  %v9957_v12 = vadd.s32 1, %v12964_v7  ;;  %v9162_v22 = vmul.u32 %v9155_v39, %v9146_v61 }
 0x484   : > { %v9810_v37 = vsel %vm12959_vm15, 0, %v12958_v38  ;;  %v8992_v58 = vadd.s32 3, %v18385_v24  ;;  %vm9164_vm0 = vc.u32 %v18381_v8, %v18374_v9  ;;  %v9165_v55 = vadd.s32 1, %v18375_v34  ;;  %v18417_v38 = vld [vmem:[%s13979_s12] sm:$0xff] }
 0x485   : > { %v9811_v15 = vsub.s32 32, %v9810_v37  ;;  %v9812_v57 = vshll.u32 %v18353_v1, %v9810_v37  ;;  %v9815_v36 = vsub.s32 4294967266, %v9810_v37  ;;  %13688 = vcosq.f32 %v8987_v46 }
 0x486   : > { %v20960_v40 = vand.u32 2147483647, %v18063_v42  ;;  %v9166_v39 = vsel %vm9164_vm0, %v9165_v55, %v18375_v34  ;;  %v9954_v16 = vand.u32 8388607, %v20535_v50  ;;  %vm9958_vm14 = vcmp.gt.s32.totalorder %v9957_v12, 0 }
 0x487   : > { %v9813_v7 = vshrl.u32 %v9795_v59, %v9811_v15  ;;  %v9816_v30 = vadd.s32 127, %v9815_v36  ;;  %v9167_v53 = vadd.s32 %v9166_v39, %v9162_v22  ;;  %v9959_v20 = vsel %vm9958_vm14, %v9957_v12, 0 }
 0x488   : > { %vm18403_vm8 = vcmp.le.f32.partialorder %v20960_v40, 0.7853982  ;;  %13690 = vsinq.f32 %v8987_v46  ;;  %v18414_v2 = vand.u32 3, %v8992_v58  ;;  %v9961_v25 = vand.u32 31, %v9959_v20 }
 0x489   : > { %v18409_v1 = vsel %vm18403_vm8, 0, %v9826_v33  ;;  %v9814_v43 = vor.u32 %v9813_v7, %v9812_v57  ;;  %v9817_v32 = vshll.u32 %v9816_v30, 23  ;;  %v18420_v31 = vmul.f32 16.0, %v18417_v38 }
 0x48a   : > { %20963 = vst [vmem:[#allocation42_spill] sm:$0xff] %v18409_v1  ;;  %v9832_v34 = vadd.s32 3, %v18409_v1  ;;  %v9168_v59 = vadd.s32 536870912, %v9167_v53  ;;  %v9955_v37 = vor.u32 8388608, %v9954_v16  ;;  %v18423_v33 = vshrl.u32 %v9959_v20, 5 }
 0x48b   : > { %v9818_v61 = vor.u32 4788187, %v9817_v32  ;;  %v9821_v52 = vcvt.s32.f32 %v9814_v43  ;;  %v9962_v15 = vsub.s32 32, %v9961_v25  ;;  %v9964_v12 = vshll.u32 %v20638_v19, %v9961_v25 }
 0x48c   : > { %v18426_v57 = vshrl.u32 %v9168_v59, 30  ;;  %v9967_v36 = vshll.u32 %v20853_v51, %v9961_v25  ;;  %v9970_v22 = vshll.u32 %v20854_v29, %v9961_v25  ;;  %v9973_v7 = vshll.u32 %v20855_v26, %v9961_v25 }
 0x48d   : > { %v9819_v46 = vand.u32 2147483647, %v9818_v61  ;;  %v9965_v58 = vshrl.u32 %v20853_v51, %v9962_v15  ;;  %v9968_v55 = vshrl.u32 %v20854_v29, %v9962_v15  ;;  %v9971_v40 = vshrl.u32 %v20855_v26, %v9962_v15 }
 0x48e   : > { %v9170_v39 = vshll.u32 %v18426_v57, 30  ;;  %v9974_v16 = vshrl.u32 %v20655_v56, %v9962_v15  ;;  %v9976_v43 = vshll.u32 %v20655_v56, %v9961_v25  ;;  %v18437_v32 = vand.u32 3, %v9832_v34 }
 0x48f   : > { %v9822_v30 = vmul.f32 %v9821_v52, %v9819_v46  ;;  %v9977_v20 = vshrl.u32 %v20630_v17, %v9962_v15  ;;  %v18440_v61 = vshll.u32 %v9955_v37, 8  ;;  %v18442_v59 = vpop.eup %13688  ;;  %vm8995_vm7 = vcmp.eq.s32.totalorder %v18414_v2, 0 }
 0x490   : > { %v18445_v23 = vsub.s32 %v9167_v53, %v9170_v39  ;;  %v9963_v52 = vshrl.u32 %v20638_v19, %v9962_v15  ;;  %v8798_v46 = vand.u32 2139095040, %v18420_v31  ;;  %v9966_v18 = vor.u32 %v9965_v58, %v9964_v12 }
 0x491   : > { %v9823_v50 = vxor.u32 2147483648, %v9822_v30  ;;  %v9969_v21 = vor.u32 %v9968_v55, %v9967_v36  ;;  %v9972_v25 = vor.u32 %v9971_v40, %v9970_v22  ;;  %v9975_v34 = vor.u32 %v9974_v16, %v9973_v7 }
 0x492   : > { %v9173_v37 = vsub.s32 0, %v18445_v23  ;;  %v9978_v54 = vor.u32 %v9977_v20, %v9976_v43  ;;  %vm9979_vm1 = vcmp.lt.s32.totalorder %v18423_v33, 1  ;;  %v18453_v1 = vpop.eup %13690  ;;  %vm8994_vm15 = vcmp.lt.s32.totalorder %v18414_v2, 2 }
 0x493   : > { %v9824_v48 = vsel %vm9741_vm9, %v9823_v50, %v9822_v30  ;;  %vm9980_vm0 = vcmp.lt.s32.totalorder %v18423_v33, 2  ;;  %vm9981_vm14 = vcmp.lt.s32.totalorder %v18423_v33, 3  ;;  %vm9982_vm11 = vcmp.lt.s32.totalorder %v18423_v33, 4 }
 0x494   : > { %v9827_v53 = vsel %vm18403_vm8, %v18063_v42, %v9824_v48  ;;  %v12933_v50 = vmin.u32 %v9173_v37, %v18445_v23  ;;  %v9983_v15 = vsel %vm9979_vm1, %v9963_v52, %v9966_v18  ;;  %v9984_v12 = vsel %vm9982_vm11, %v9972_v25, 2102212464 }
 0x495   : > { %13692 = vcosq.f32 %v9827_v53  ;;  %v9985_v62 = vsel %vm9981_vm14, %v9969_v21, %v9984_v12  ;;  %v9987_v48 = vsel %vm9979_vm1, %v9966_v18, %v9969_v21  ;;  %v9988_v36 = vsel %vm9982_vm11, %v9975_v34, 920167782 }
 0x496   : > { %13694 = vsinq.f32 %v9827_v53  ;;  %vm20558_vm9 = vweird.f32 %v18022_v13  ;;  %vm8998_vm8 = vcmp.eq.s32.totalorder %v18414_v2, 2  ;;  %v20550_v22 = vxor.u32 2147483648, %v18442_v59 }
 0x497   : > { %v9175_v58 = vclz %v12933_v50  ;;  %v9991_v55 = vsel %vm9979_vm1, %v9969_v21, %v9972_v25  ;;  %v20551_v40 = vxor.u32 2147483648, %v18453_v1  ;;  %vm9835_vm12 = vcmp.eq.s32.totalorder %v18437_v32, 0 }
 0x498   : > { %v9989_v18 = vsel %vm9981_vm14, %v9972_v25, %v9988_v36  ;;  %v9992_v7 = vsel %vm9982_vm11, %v9978_v54, 1326507024  ;;  %v8799_v30 = vshrl.u32 %v8798_v46, 23  ;;  %vm9834_vm6 = vcmp.lt.s32.totalorder %v18437_v32, 2 }
 0x499   : > { %vm9109_vm5 = vcmp.lt.s32.totalorder %v18216_v63, 0  ;;  %v12934_v39 = vadd.s32 4294967294, %v9175_v58  ;;  %v9986_v16 = vsel %vm9980_vm0, %v9983_v15, %v9985_v62  ;;  %v9990_v21 = vsel %vm9980_vm0, %v9987_v48, %v9989_v18 }
 0x49a   : > { %v9993_v43 = vsel %vm9981_vm14, %v9975_v34, %v9992_v7  ;;  %vm20557_vm1 = vweird.f32 %v18063_v42  ;;  %v18496_v20 = vmul.u32.u64.low %v18440_v61, %v9990_v21  ;;  %v18497_v52 = vmul.u32.u64.high %v18440_v61, %v9990_v21, %v18496_v20 }
 0x49b   : > { %v9994_v54 = vsel %vm9980_vm0, %v9991_v55, %v9993_v43  ;;  %v12920_v46 = vadd.s32 4294967169, %v8799_v30  ;;  %v9163_v25 = vadd.s32 %v18374_v9, %v18381_v8  ;;  %vm12935_vm11 = vcmp.lt.s32.totalorder %v12934_v39, 0 }
 0x49c   : > { %v18503_v37 = vmul.u32.u64.low %v18440_v61, %v9994_v54  ;;  %v18504_v53 = vmul.u32.u64.high %v18440_v61, %v9994_v54, %v18503_v37  ;;  %v8997_v33 = vsel %vm8995_vm7, %v18442_v59, %v20551_v40  ;;  %v9000_v34 = vsel %vm8998_vm8, %v20550_v22, %v18453_v1 }
 0x49d   : > { %v20964_v50 = vand.u32 2147483647, %v18216_v63  ;;  %v9178_v8 = vsel %vm12935_vm11, 0, %v12934_v39  ;;  %v8805_v15 = vadd.s32 1, %v12920_v46  ;;  %v10002_v36 = vmul.u32 %v18440_v61, %v9986_v16 }
 0x49e   : > { %v9179_v12 = vsub.s32 32, %v9178_v8  ;;  %v9180_v62 = vshll.u32 %v18445_v23, %v9178_v8  ;;  %v9183_v48 = vsub.s32 4294967266, %v9178_v8  ;;  %vm9838_vm7 = vcmp.eq.s32.totalorder %v18437_v32, 2 }
 0x49f   : > { %vm18518_vm0 = vcmp.le.f32.partialorder %v20964_v50, 0.7853982  ;;  %v9193_v58 = vsub.s32 4, %v18426_v57  ;;  %v10005_v55 = vadd.s32 1, %v18497_v52  ;;  %vm8806_vm14 = vcmp.gt.s32.totalorder %v8805_v15, 0  ;;  %v18527_v18 = vpop.eup %13692 }
 0x4a0   : > { %20967 = vst [vmem:[#allocation62_spill] sm:$0xff] %v18527_v18  ;;  %v9001_v7 = vsel %vm8994_vm15, %v8997_v33, %v9000_v34  ;;  %v9181_v30 = vshrl.u32 %v9163_v25, %v9179_v12  ;;  %v9184_v39 = vadd.s32 127, %v9183_v48  ;;  %vm10004_vm8 = vc.u32 %v18504_v53, %v18496_v20  ;;  %v18533_v23 = vpop.eup %13694 }
 0x4a1   : > { %v20548_v61 = vxor.u32 2147483648, %v18527_v18  ;;  %v10006_v16 = vsel %vm10004_vm8, %v10005_v55, %v18497_v52  ;;  %v20552_v21 = vand.u32 2147483647, %v18420_v31  ;;  %v8807_v43 = vsel %vm8806_vm14, %v8805_v15, 0 }
 0x4a2   : > { %v20549_v54 = vxor.u32 2147483648, %v18533_v23  ;;  %v9182_v46 = vor.u32 %v9181_v30, %v9180_v62  ;;  %v9185_v37 = vshll.u32 %v9184_v39, 23  ;;  %v10007_v2 = vadd.s32 %v10006_v16, %v10002_v36 }
 0x4a3   : > { %v9002_v25 = vsel %vm20558_vm9, nan, %v9001_v7  ;;  %v9840_v33 = vsel %vm9838_vm7, %v20548_v61, %v18533_v23  ;;  %v9194_v52 = vsel %vm9109_vm5, %v9193_v58, %v18426_v57  ;;  %v8809_v34 = vand.u32 31, %v8807_v43 }
 0x4a4   : > { %v9837_v50 = vsel %vm9835_vm12, %v18527_v18, %v20549_v54  ;;  %v9186_v8 = vor.u32 4788187, %v9185_v37  ;;  %v9189_v15 = vcvt.s32.f32 %v9182_v46  ;;  %v10008_v12 = vadd.s32 536870912, %v10007_v2 }
 0x4a5   : > { %v9841_v62 = vsel %vm9834_vm6, %v9837_v50, %v9840_v33  ;;  %v8802_v48 = vand.u32 8388607, %v20552_v21  ;;  %v8810_v36 = vsub.s32 32, %v8809_v34  ;;  %v18559_v55 = vmul.f32 32.0, %v18417_v38 }
 0x4a6   : > { %v9842_v57 = vsel %vm20557_vm1, nan, %v9841_v62  ;;  %v9187_v58 = vand.u32 2147483647, %v9186_v8  ;;  %v18565_v7 = vsel %vm18518_vm0, 0, %v9194_v52  ;;  %v18567_v30 = vshrl.u32 %v10008_v12, 30 }
 0x4a7   : > { %20968 = vst [vmem:[#allocation61_spill] sm:$0xff] %v18565_v7  ;;  %v13087_v39 = vpack.c.bf16 %v9842_v57, %v9002_v25  ;;  %v8808_v32 = vshrl.u32 %v8807_v43, 5  ;;  %v8812_v16 = vshll.u32 %v20638_v19, %v8809_v34  ;;  %v8815_v46 = vshll.u32 %v20853_v51, %v8809_v34 }
 0x4a8   : > { %v9190_v37 = vmul.f32 %v9189_v15, %v9187_v58  ;;  %v10010_v38 = vshll.u32 %v18567_v30, 30  ;;  %v8813_v33 = vshrl.u32 %v20853_v51, %v8810_v36  ;;  %v8816_v50 = vshrl.u32 %v20854_v29, %v8810_v36 }
 0x4a9   : > { %13088 = vmatprep.subr.bf16.mxu0 %v13087_v39  ;;  %v8818_v8 = vshll.u32 %v20854_v29, %v8809_v34  ;;  %v8819_v52 = vshrl.u32 %v20855_v26, %v8810_v36  ;;  %v8821_v12 = vshll.u32 %v20855_v26, %v8809_v34  ;;  %v8822_v43 = vshrl.u32 %v20655_v56, %v8810_v36 }
 0x4aa   : > { %v9191_v25 = vxor.u32 2147483648, %v9190_v37  ;;  %v18578_v62 = vsub.s32 %v10007_v2, %v10010_v38  ;;  %v8803_v57 = vor.u32 8388608, %v8802_v48  ;;  %v8811_v58 = vshrl.u32 %v20638_v19, %v8810_v36 }
 0x4ab   : > { %v8824_v61 = vshll.u32 %v20655_v56, %v8809_v34  ;;  %v8825_v39 = vshrl.u32 %v20630_v17, %v8810_v36  ;;  %v9638_v54 = vand.u32 2139095040, %v18559_v55  ;;  %v8814_v21 = vor.u32 %v8813_v33, %v8812_v16 }
 0x4ac   : > { %v9192_v22 = vsel %vm9109_vm5, %v9191_v25, %v9190_v37  ;;  %v10013_v40 = vsub.s32 0, %v18578_v62  ;;  %v8817_v42 = vor.u32 %v8816_v50, %v8815_v46  ;;  %v8820_v2 = vor.u32 %v8819_v52, %v8818_v8 }
 0x4ad   : > { %v8823_v38 = vor.u32 %v8822_v43, %v8821_v12  ;;  %v8826_v48 = vor.u32 %v8825_v39, %v8824_v61  ;;  %vm8827_vm6 = vcmp.lt.s32.totalorder %v8808_v32, 1  ;;  %v10003_v15 = vadd.s32 %v18496_v20, %v18504_v53 }
 0x4ae   : > { %v12965_v34 = vmin.u32 %v10013_v40, %v18578_v62  ;;  %vm8830_vm12 = vcmp.lt.s32.totalorder %v8808_v32, 4  ;;  %v8843_v36 = vshll.u32 %v8803_v57, 8  ;;  %v9195_v13 = vsel %vm18518_vm0, %v18216_v63, %v9192_v22 }
 0x4af   : > { %vm8829_vm5 = vcmp.lt.s32.totalorder %v8808_v32, 3  ;;  %v8832_v37 = vsel %vm8830_vm12, %v8820_v2, 2102212464  ;;  %v9639_v25 = vshrl.u32 %v9638_v54, 23  ;;  %vm8828_vm15 = vcmp.lt.s32.totalorder %v8808_v32, 2 }
 0x4b0   : > { %v10015_v16 = vclz %v12965_v34  ;;  %v8831_v46 = vsel %vm8827_vm6, %v8811_v58, %v8814_v21  ;;  %v8835_v33 = vsel %vm8827_vm6, %v8814_v21, %v8817_v42  ;;  %v8833_v61 = vsel %vm8829_vm5, %v8817_v42, %v8832_v37 }
 0x4b1   : > { %v8836_v50 = vsel %vm8830_vm12, %v8823_v38, 920167782  ;;  %v8839_v8 = vsel %vm8827_vm6, %v8817_v42, %v8820_v2  ;;  %v8840_v52 = vsel %vm8830_vm12, %v8826_v48, 1326507024  ;;  %v10033_v40 = vsub.s32 4, %v18567_v30 }
 0x4b2   : > { %v12966_v20 = vadd.s32 4294967294, %v10015_v16  ;;  %v8837_v53 = vsel %vm8829_vm5, %v8820_v2, %v8836_v50  ;;  %v8841_v12 = vsel %vm8829_vm5, %v8823_v38, %v8840_v52  ;;  %13696 = vcosq.f32 %v9195_v13 }
 0x4b3   : > { %v8838_v9 = vsel %vm8828_vm15, %v8835_v33, %v8837_v53  ;;  %v8842_v22 = vsel %vm8828_vm15, %v8839_v8, %v8841_v12  ;;  %v12952_v43 = vadd.s32 4294967169, %v9639_v25  ;;  %v8834_v54 = vsel %vm8828_vm15, %v8831_v46, %v8833_v61 }
 0x4b4   : > { %vm12967_vm11 = vcmp.lt.s32.totalorder %v12966_v20, 0  ;;  %v18598_v57 = vmul.u32.u64.low %v8843_v36, %v8842_v22  ;;  %v18599_v21 = vmul.u32.u64.high %v8843_v36, %v8842_v22, %v18598_v57  ;;  %vm9949_vm0 = vcmp.lt.s32.totalorder %v18326_v0, 0 }
 0x4b5   : > { %v10018_v58 = vsel %vm12967_vm11, 0, %v12966_v20  ;;  %v18601_v42 = vmul.u32.u64.low %v8843_v36, %v8838_v9  ;;  %v18602_v39 = vmul.u32.u64.high %v8843_v36, %v8838_v9, %v18601_v42  ;;  %v9645_v48 = vadd.s32 1, %v12952_v43 }
 0x4b6   : > { %v10019_v2 = vsub.s32 32, %v10018_v58  ;;  %v10020_v38 = vshll.u32 %v18578_v62, %v10018_v58  ;;  %v10023_v34 = vsub.s32 4294967266, %v10018_v58  ;;  %13698 = vsinq.f32 %v9195_v13 }
 0x4b7   : > { %v9200_v37 = vadd.s32 3, %v18565_v7  ;;  %v10034_v32 = vsel %vm9949_vm0, %v10033_v40, %v18567_v30  ;;  %vm9646_vm7 = vcmp.gt.s32.totalorder %v9645_v48, 0  ;;  %v8850_v46 = vmul.u32 %v8843_v36, %v8834_v54 }
 0x4b8   : > { %v10021_v25 = vshrl.u32 %v10003_v15, %v10019_v2  ;;  %v10024_v16 = vadd.s32 127, %v10023_v34  ;;  %vm8852_vm14 = vc.u32 %v18599_v21, %v18601_v42  ;;  %v20969_v33 = vand.u32 2147483647, %v18326_v0 }
 0x4b9   : > { %v8853_v13 = vadd.s32 1, %v18602_v39  ;;  %v20972_v62 = vand.u32 2147483647, %v18559_v55  ;;  %v9647_v8 = vsel %vm9646_vm7, %v9645_v48, 0  ;;  %v18626_v36 = vand.u32 3, %v9200_v37 }
 0x4ba   : > { %vm18615_vm8 = vcmp.le.f32.partialorder %v20969_v33, 0.7853982  ;;  %v10022_v30 = vor.u32 %v10021_v25, %v10020_v38  ;;  %v10025_v52 = vshll.u32 %v10024_v16, 23  ;;  %v9649_v40 = vand.u32 31, %v9647_v8 }
 0x4bb   : > { %v9642_v50 = vand.u32 8388607, %v20972_v62  ;;  %v18624_v15 = vsel %vm18615_vm8, 0, %v10034_v32  ;;  %v8854_v20 = vsel %vm8852_vm14, %v8853_v13, %v18602_v39  ;;  %v18632_v57 = vshrl.u32 %v9647_v8, 5 }
 0x4bc   : > { %20973 = vst [vmem:[#allocation45_spill] sm:$0xff] %v18624_v15  ;;  %v10026_v53 = vor.u32 4788187, %v10025_v52  ;;  %v10029_v12 = vcvt.s32.f32 %v10022_v30  ;;  %v8855_v9 = vadd.s32 %v8854_v20, %v8850_v46  ;;  %v18629_v22 = vpop.eup %13696  ;;  %v10040_v43 = vadd.s32 3, %v18624_v15 }
 0x4bd   : > { %20974 = vst [vmem:[#allocation47_spill] sm:$0xff] %v18629_v22  ;;  %v9643_v54 = vor.u32 8388608, %v9642_v50  ;;  %v9650_v58 = vsub.s32 32, %v9649_v40  ;;  %v9652_v38 = vshll.u32 %v20638_v19, %v9649_v40  ;;  %v9655_v34 = vshll.u32 %v20853_v51, %v9649_v40 }
 0x4be   : > { %v10027_v48 = vand.u32 2147483647, %v10026_v53  ;;  %v8856_v2 = vadd.s32 536870912, %v8855_v9  ;;  %vm9203_vm6 = vcmp.eq.s32.totalorder %v18626_v36, 0  ;;  %vm9206_vm12 = vcmp.eq.s32.totalorder %v18626_v36, 2 }
 0x4bf   : > { %v9653_v39 = vshrl.u32 %v20853_v51, %v9650_v58  ;;  %v9656_v37 = vshrl.u32 %v20854_v29, %v9650_v58  ;;  %v9658_v32 = vshll.u32 %v20854_v29, %v9649_v40  ;;  %v9659_v25 = vshrl.u32 %v20855_v26, %v9650_v58 }
 0x4c0   : > { %v10030_v16 = vmul.f32 %v10029_v12, %v10027_v48  ;;  %v8857_v46 = vshrl.u32 %v8856_v2, 30  ;;  %v9661_v33 = vshll.u32 %v20855_v26, %v9649_v40  ;;  %v9662_v13 = vshrl.u32 %v20655_v56, %v9650_v58  ;;  %v18644_v62 = vpop.eup %13698 }
 0x4c1   : > { %20975 = vst [vmem:[#allocation66_spill] sm:$0xff] %v18644_v62  ;;  %v18647_v8 = vand.u32 3, %v10040_v43  ;;  %v9664_v30 = vshll.u32 %v20655_v56, %v9649_v40  ;;  %v18650_v52 = vshll.u32 %v9643_v54, 8  ;;  %vm8797_vm5 = vcmp.lt.s32.totalorder %v18420_v31, 0 }
 0x4c2   : > { %v10031_v20 = vxor.u32 2147483648, %v10030_v16  ;;  %v8858_v53 = vshll.u32 %v8857_v46, 30  ;;  %v9651_v12 = vshrl.u32 %v20638_v19, %v9650_v58  ;;  %v9654_v48 = vor.u32 %v9653_v39, %v9652_v38 }
 0x4c3   : > { %vm9202_vm15 = vcmp.lt.s32.totalorder %v18626_v36, 2  ;;  %v9657_v2 = vor.u32 %v9656_v37, %v9655_v34  ;;  %v9660_v15 = vor.u32 %v9659_v25, %v9658_v32  ;;  %v9663_v7 = vor.u32 %v9662_v13, %v9661_v33 }
 0x4c4   : > { %v9665_v50 = vshrl.u32 %v20630_v17, %v9650_v58  ;;  %v10032_v43 = vsel %vm9949_vm0, %v10031_v20, %v10030_v16  ;;  %v18658_v40 = vsub.s32 %v8855_v9, %v8858_v53  ;;  %vm9667_vm11 = vcmp.lt.s32.totalorder %v18632_v57, 1 }
 0x4c5   : > { %vm9670_vm7 = vcmp.lt.s32.totalorder %v18632_v57, 4  ;;  %v20561_v54 = vxor.u32 2147483648, %v18644_v62  ;;  %v10035_v38 = vsel %vm18615_vm8, %v18326_v0, %v10032_v43  ;;  %v20976_v34 = vand.u32 2147483647, %v18420_v31 }
 0x4c6   : > { %v9666_v58 = vor.u32 %v9665_v50, %v9664_v30  ;;  %vm9669_vm0 = vcmp.lt.s32.totalorder %v18632_v57, 3  ;;  %vm20586_vm1 = vweird.f32 %v18216_v63  ;;  %13700 = vcosq.f32 %v10035_v38  ;;  %v13789_v50 = vld [vmem:[%s13979_s12 + $0x10] sm:$0xff]  ;;  %s20199_s12 = scalar_lea.sflag [#allocation4], %s367_s20 }
 0x4c7   : > { %vm18668_vm14 = vcmp.le.f32.partialorder %v20976_v34, 0.7853982  ;;  %v8861_v9 = vsub.s32 0, %v18658_v40  ;;  %vm9668_vm9 = vcmp.lt.s32.totalorder %v18632_v57, 2  ;;  %v9672_v61 = vsel %vm9670_vm7, %v9660_v15, 2102212464 }
 0x4c8   : > { %13702 = vsinq.f32 %v10035_v38  ;;  %v8881_v37 = vsub.s32 4, %v8857_v46  ;;  %v9675_v32 = vsel %vm9667_vm11, %v9654_v48, %v9657_v2  ;;  %v9676_v25 = vsel %vm9670_vm7, %v9663_v7, 920167782 }
 0x4c9   : > { %vm10046_vm8 = vcmp.eq.s32.totalorder %v18647_v8, 2  ;;  %v12921_v16 = vmin.u32 %v8861_v9, %v18658_v40  ;;  %v9671_v33 = vsel %vm9667_vm11, %v9651_v12, %v9654_v48  ;;  %v9677_v13 = vsel %vm9669_vm0, %v9660_v15, %v9676_v25 }
 0x4ca   : > { %v18689_v30 = vmul.f32 16.0, %v13789_v50  ;;  %vm10043_vm13 = vcmp.eq.s32.totalorder %v18647_v8, 0  ;;  %v9673_v20 = vsel %vm9669_vm0, %v9657_v2, %v9672_v61  ;;  %v9678_v53 = vsel %vm9668_vm9, %v9675_v32, %v9677_v13 }
 0x4cb   : > { %v9679_v43 = vsel %vm9667_vm11, %v9657_v2, %v9660_v15  ;;  %v9680_v12 = vsel %vm9670_vm7, %v9666_v58, 1326507024  ;;  %v9205_v48 = vsel %vm9203_vm6, %v18629_v22, %v20561_v54  ;;  %v20979_v38 = vxor.u32 2147483648, %v18629_v22 }
 0x4cc   : > { %vm10042_vm4 = vcmp.lt.s32.totalorder %v18647_v8, 2  ;;  %v8863_v9 = vclz %v12921_v16  ;;  %v20563_v15 = vand.u32 2147483647, %v18689_v30  ;;  %vm20585_vm11 = vweird.f32 %v18326_v0 }
 0x4cd   : > { %v9208_v34 = vsel %vm9206_vm12, %v20979_v38, %v18644_v62  ;;  %v8882_v2 = vsel %vm8797_vm5, %v8881_v37, %v8857_v46  ;;  %v9681_v58 = vsel %vm9669_vm0, %v9663_v7, %v9680_v12  ;;  %v9674_v13 = vsel %vm9668_vm9, %v9671_v33, %v9673_v20 }
 0x4ce   : > { %v18718_v61 = vmul.u32.u64.low %v18650_v52, %v9678_v53  ;;  %v18719_v32 = vmul.u32.u64.high %v18650_v52, %v9678_v53, %v18718_v61  ;;  %v12922_v25 = vadd.s32 4294967294, %v8863_v9  ;;  %v9682_v16 = vsel %vm9668_vm9, %v9679_v43, %v9681_v58 }
 0x4cf   : > { %v9006_v38 = vand.u32 2139095040, %v18689_v30  ;;  %v8851_v54 = vadd.s32 %v18601_v42, %v18599_v21  ;;  %v18729_v46 = vmul.u32.u64.low %v18650_v52, %v9682_v16  ;;  %v18730_v37 = vmul.u32.u64.high %v18650_v52, %v9682_v16, %v18729_v46 }
 0x4d0   : > { %v18732_v7 = vmul.f32 32.0, %v13789_v50  ;;  %v9209_v53 = vsel %vm9202_vm15, %v9205_v48, %v9208_v34  ;;  %vm12923_vm6 = vcmp.lt.s32.totalorder %v12922_v25, 0  ;;  %v18738_v33 = vsel %vm18668_vm14, 0, %v8882_v2  ;;  %v18744_v12 = vpop.eup %13700 }
 0x4d1   : > { %20980 = vst [vmem:[#allocation65_spill] sm:$0xff] %v18738_v33  ;;  %v9007_v57 = vshrl.u32 %v9006_v38, 23  ;;  %v8866_v20 = vsel %vm12923_vm6, 0, %v12922_v25  ;;  %v9690_v43 = vmul.u32 %v18650_v52, %v9674_v13  ;;  %v9693_v21 = vadd.s32 1, %v18719_v32  ;;  %20981 = vst [vmem:[#allocation64_spill] sm:$0xff] %v18744_v12 }
 0x4d2   : > { %v9010_v42 = vand.u32 8388607, %v20563_v15  ;;  %v8867_v50 = vsub.s32 32, %v8866_v20  ;;  %v8868_v36 = vshll.u32 %v18658_v40, %v8866_v20  ;;  %v8871_v48 = vsub.s32 4294967266, %v8866_v20  ;;  %v18747_v9 = vpop.eup %13702 }
 0x4d3   : > { %v12928_v34 = vadd.s32 4294967169, %v9007_v57  ;;  %20982 = vst [vmem:[#allocation54_spill] sm:$0xff] %v18747_v9  ;;  %v9210_v2 = vsel %vm20586_vm1, nan, %v9209_v53  ;;  %v20562_v58 = vxor.u32 2147483648, %v18744_v12  ;;  %v8888_v52 = vadd.s32 3, %v18738_v33 }
 0x4d4   : > { %vm9692_vm9 = vc.u32 %v18730_v37, %v18718_v61  ;;  %v20564_v25 = vxor.u32 2147483648, %v18747_v9  ;;  %v8869_v13 = vshrl.u32 %v8851_v54, %v8867_v50  ;;  %v8872_v16 = vadd.s32 127, %v8871_v48 }
 0x4d5   : > { %v9694_v38 = vsel %vm9692_vm9, %v9693_v21, %v18719_v32  ;;  %v10048_v40 = vsel %vm10046_vm8, %v20562_v58, %v18747_v9  ;;  %v9013_v53 = vadd.s32 1, %v12928_v34  ;;  %v9011_v48 = vor.u32 8388608, %v9010_v42 }
 0x4d6   : > { %v9695_v46 = vadd.s32 %v9694_v38, %v9690_v43  ;;  %v10045_v20 = vsel %vm10043_vm13, %v18744_v12, %v20564_v25  ;;  %v8870_v54 = vor.u32 %v8869_v13, %v8868_v36  ;;  %v8873_v50 = vshll.u32 %v8872_v16, 23 }
 0x4d7   : > { %v10049_v32 = vsel %vm10042_vm4, %v10045_v20, %v10048_v40  ;;  %vm9014_vm12 = vcmp.gt.s32.totalorder %v9013_v53, 0  ;;  %v9846_v58 = vand.u32 2139095040, %v18732_v7  ;;  %vm9637_vm15 = vcmp.lt.s32.totalorder %v18559_v55, 0 }
 0x4d8   : > { %v9696_v21 = vadd.s32 536870912, %v9695_v46  ;;  %v10050_v43 = vsel %vm20585_vm11, nan, %v10049_v32  ;;  %v8874_v34 = vor.u32 4788187, %v8873_v50  ;;  %v8877_v38 = vcvt.s32.f32 %v8870_v54 }
 0x4d9   : > { %v9015_v15 = vsel %vm9014_vm12, %v9013_v53, 0  ;;  %v13139_v57 = vpack.c.bf16 %v10050_v43, %v9210_v2  ;;  %v18773_v42 = vand.u32 3, %v8888_v52  ;;  %v20983_v8 = vand.u32 2147483647, %v18559_v55 }
 0x4da   : > { %v9697_v25 = vshrl.u32 %v9696_v21, 30  ;;  %v9017_v36 = vand.u32 31, %v9015_v15  ;;  %v8875_v13 = vand.u32 2147483647, %v8874_v34  ;;  %v18782_v40 = vadd.s32 %v18718_v61, %v18730_v37 }
 0x4db   : > { %vm18777_vm4 = vcmp.le.f32.partialorder %v20983_v8, 0.7853982  ;;  %v18784_v20 = vshll.u32 %v9011_v48, 8  ;;  %13140 = vmatprep.subr.bf16.mxu1 %v13139_v57  ;;  %v9847_v50 = vshrl.u32 %v9846_v58, 23  ;;  %v9016_v21 = vshrl.u32 %v9015_v15, 5 }
 0x4dc   : > { %v9698_v2 = vshll.u32 %v9697_v25, 30  ;;  %v9721_v53 = vsub.s32 4, %v9697_v25  ;;  %v9018_v54 = vsub.s32 32, %v9017_v36  ;;  %v8878_v32 = vmul.f32 %v8877_v38, %v8875_v13 }
 0x4dd   : > { %v9020_v52 = vshll.u32 %v20638_v19, %v9017_v36  ;;  %v20986_v43 = vand.u32 2147483647, %v18732_v7  ;;  %v9023_v37 = vshll.u32 %v20853_v51, %v9017_v36  ;;  %v9026_v57 = vshll.u32 %v20854_v29, %v9017_v36 }
 0x4de   : > { %v18791_v8 = vsub.s32 %v9695_v46, %v9698_v2  ;;  %v9021_v61 = vshrl.u32 %v20853_v51, %v9018_v54  ;;  %v8879_v48 = vxor.u32 2147483648, %v8878_v32  ;;  %v9024_v0 = vshrl.u32 %v20854_v29, %v9018_v54 }
 0x4df   : > { %v18789_v34 = vand.u32 8388607, %v20986_v43  ;;  %v9027_v58 = vshrl.u32 %v20855_v26, %v9018_v54  ;;  %v9029_v15 = vshll.u32 %v20855_v26, %v9017_v36  ;;  %v9722_v13 = vsel %vm9637_vm15, %v9721_v53, %v9697_v25 }
 0x4e0   : > { %v9701_v38 = vsub.s32 0, %v18791_v8  ;;  %v9030_v46 = vshrl.u32 %v20655_v56, %v9018_v54  ;;  %v12960_v2 = vadd.s32 4294967169, %v9847_v50  ;;  %v8880_v43 = vsel %vm8797_vm5, %v8879_v48, %v8878_v32 }
 0x4e1   : > { %v9019_v63 = vshrl.u32 %v20638_v19, %v9018_v54  ;;  %v9022_v12 = vor.u32 %v9021_v61, %v9020_v52  ;;  %v9032_v9 = vshll.u32 %v20655_v56, %v9017_v36  ;;  %v8883_v22 = vsel %vm18668_vm14, %v18420_v31, %v8880_v43 }
 0x4e2   : > { %v12953_v62 = vmin.u32 %v9701_v38, %v18791_v8  ;;  %v9025_v33 = vor.u32 %v9024_v0, %v9023_v37  ;;  %v9028_v18 = vor.u32 %v9027_v58, %v9026_v57  ;;  %13704 = vcosq.f32 %v8883_v22 }
 0x4e3   : > { %v9031_v25 = vor.u32 %v9030_v46, %v9029_v15  ;;  %v9033_v53 = vshrl.u32 %v20630_v17, %v9018_v54  ;;  %vm9035_vm13 = vcmp.lt.s32.totalorder %v9016_v21, 1  ;;  %13706 = vsinq.f32 %v8883_v22 }
 0x4e4   : > { %v9703_v50 = vclz %v12953_v62  ;;  %v18814_v32 = vsel %vm18777_vm4, 0, %v9722_v13  ;;  %v9851_v36 = vor.u32 8388608, %v18789_v34  ;;  %vm9036_vm5 = vcmp.lt.s32.totalorder %v9016_v21, 2 }
 0x4e5   : > { %v9034_v52 = vor.u32 %v9033_v53, %v9032_v9  ;;  %vm9037_vm7 = vcmp.lt.s32.totalorder %v9016_v21, 3  ;;  %vm9038_vm14 = vcmp.lt.s32.totalorder %v9016_v21, 4  ;;  %v9039_v0 = vsel %vm9035_vm13, %v9019_v63, %v9022_v12 }
 0x4e6   : > { %v12954_v39 = vadd.s32 4294967294, %v9703_v50  ;;  %v9040_v61 = vsel %vm9038_vm14, %v9028_v18, 2102212464  ;;  %v9043_v37 = vsel %vm9035_vm13, %v9022_v12, %v9025_v33  ;;  %v9044_v48 = vsel %vm9038_vm14, %v9031_v25, 920167782 }
 0x4e7   : > { %v9041_v57 = vsel %vm9037_vm7, %v9025_v33, %v9040_v61  ;;  %v9047_v54 = vsel %vm9035_vm13, %v9025_v33, %v9028_v18  ;;  %v9048_v58 = vsel %vm9038_vm14, %v9034_v52, 1326507024  ;;  %v9728_v22 = vadd.s32 3, %v18814_v32 }
 0x4e8   : > { %vm12955_vm0 = vcmp.lt.s32.totalorder %v12954_v39, 0  ;;  %v9045_v62 = vsel %vm9037_vm7, %v9028_v18, %v9044_v48  ;;  %v9049_v15 = vsel %vm9037_vm7, %v9031_v25, %v9048_v58  ;;  %v9042_v34 = vsel %vm9036_vm5, %v9039_v0, %v9041_v57 }
 0x4e9   : > { %v9706_v38 = vsel %vm12955_vm0, 0, %v12954_v39  ;;  %v9046_v9 = vsel %vm9036_vm5, %v9043_v37, %v9045_v62  ;;  %v9050_v13 = vsel %vm9036_vm5, %v9047_v54, %v9049_v15  ;;  %v9853_v43 = vadd.s32 1, %v12960_v2 }
 0x4ea   : > { %v9707_v46 = vsub.s32 32, %v9706_v38  ;;  %v9708_v63 = vshll.u32 %v18791_v8, %v9706_v38  ;;  %v9711_v12 = vsub.s32 4294967266, %v9706_v38  ;;  %vm8891_vm6 = vcmp.eq.s32.totalorder %v18773_v42, 0 }
 0x4eb   : > { %v18823_v33 = vmul.u32.u64.low %v18784_v20, %v9050_v13  ;;  %v18824_v53 = vmul.u32.u64.high %v18784_v20, %v9050_v13, %v18823_v33  ;;  %v18827_v50 = vmul.u32.u64.low %v18784_v20, %v9046_v9  ;;  %v18828_v18 = vmul.u32.u64.high %v18784_v20, %v9046_v9, %v18827_v50 }
 0x4ec   : > { %v9709_v25 = vshrl.u32 %v18782_v40, %v9707_v46  ;;  %v9712_v52 = vadd.s32 127, %v9711_v12  ;;  %vm9854_vm8 = vcmp.gt.s32.totalorder %v9853_v43, 0  ;;  %v18832_v21 = vpop.eup %13704  ;;  %vm8894_vm9 = vcmp.eq.s32.totalorder %v18773_v42, 2 }
 0x4ed   : > { %20987 = vst [vmem:[#allocation67_spill] sm:$0xff] %v18832_v21  ;;  %v18836_v8 = vand.u32 3, %v9728_v22  ;;  %v9855_v2 = vsel %vm9854_vm8, %v9853_v43, 0  ;;  %v18838_v39 = vpop.eup %13706  ;;  %v20578_v0 = vxor.u32 2147483648, %v18832_v21  ;;  %v9058_v57 = vmul.u32 %v18784_v20, %v9042_v34 }
 0x4ee   : > { %20988 = vst [vmem:[#allocation68_spill] sm:$0xff] %v18838_v39  ;;  %v9710_v61 = vor.u32 %v9709_v25, %v9708_v63  ;;  %v9713_v37 = vshll.u32 %v9712_v52, 23  ;;  %v20579_v40 = vxor.u32 2147483648, %v18838_v39  ;;  %vm9060_vm12 = vc.u32 %v18824_v53, %v18827_v50 }
 0x4ef   : > { %v9061_v48 = vadd.s32 1, %v18828_v18  ;;  %v18846_v54 = vshll.u32 %v9851_v36, 8  ;;  %vm8890_vm13 = vcmp.lt.s32.totalorder %v18773_v42, 2  ;;  %v18849_v62 = vshrl.u32 %v9855_v2, 5 }
 0x4f0   : > { %v9714_v58 = vor.u32 4788187, %v9713_v37  ;;  %v9717_v22 = vcvt.s32.f32 %v9710_v61  ;;  %v9857_v15 = vand.u32 31, %v9855_v2  ;;  %vm9005_vm5 = vcmp.lt.s32.totalorder %v18689_v30, 0 }
 0x4f1   : > { %v9062_v20 = vsel %vm9060_vm12, %v9061_v48, %v18828_v18  ;;  %v18854_v38 = vand.u32 3, %v16789_v47  ;;  %v18857_v34 = vand.u32 3, %v16829_v44  ;;  %v18860_v36 = vand.u32 3, %v17004_v5  ;;  %v21015_v18 = vld [vmem:[#allocation20_spill] sm:$0xff] }
 0x4f2   : > { %v8896_v9 = vsel %vm8894_vm9, %v20578_v0, %v18838_v39  ;;  %v9715_v13 = vand.u32 2147483647, %v9714_v58  ;;  %v9063_v46 = vadd.s32 %v9062_v20, %v9058_v57  ;;  %v9858_v63 = vsub.s32 32, %v9857_v15 }
 0x4f3   : > { %v8893_v47 = vsel %vm8891_vm6, %v18832_v21, %v20579_v40  ;;  %v9860_v44 = vshll.u32 %v20638_v19, %v9857_v15  ;;  %v9863_v5 = vshll.u32 %v20853_v51, %v9857_v15  ;;  %v9866_v12 = vshll.u32 %v20854_v29, %v9857_v15 }
 0x4f4   : > { %v9718_v43 = vmul.f32 %v9717_v22, %v9715_v13  ;;  %v20989_v33 = vand.u32 2147483647, %v18689_v30  ;;  %v9064_v25 = vadd.s32 536870912, %v9063_v46  ;;  %v9861_v52 = vshrl.u32 %v20853_v51, %v9858_v63 }
 0x4f5   : > { %vm9875_vm14 = vcmp.lt.s32.totalorder %v18849_v62, 1  ;;  %vm20584_vm0 = vweird.f32 %v18420_v31  ;;  %v9864_v2 = vshrl.u32 %v20854_v29, %v9858_v63  ;;  %v9867_v61 = vshrl.u32 %v20855_v26, %v9858_v63 }
 0x4f6   : > { %vm18877_vm7 = vcmp.le.f32.partialorder %v20989_v33, 0.7853982  ;;  %v9869_v37 = vshll.u32 %v20855_v26, %v9857_v15  ;;  %v9870_v57 = vshrl.u32 %v20655_v56, %v9858_v63  ;;  %v9719_v48 = vxor.u32 2147483648, %v9718_v43 }
 0x4f7   : > { %v9065_v58 = vshrl.u32 %v9064_v25, 30  ;;  %v9859_v22 = vshrl.u32 %v20638_v19, %v9858_v63  ;;  %v9872_v20 = vshll.u32 %v20655_v56, %v9857_v15  ;;  %v9862_v13 = vor.u32 %v9861_v52, %v9860_v44 }
 0x4f8   : > { %v9865_v51 = vor.u32 %v9864_v2, %v9863_v5  ;;  %v9868_v33 = vor.u32 %v9867_v61, %v9866_v12  ;;  %v9873_v0 = vshrl.u32 %v20630_v17, %v9858_v63  ;;  %v9720_v29 = vsel %vm9637_vm15, %v9719_v48, %v9718_v43 }
 0x4f9   : > { %v9066_v40 = vshll.u32 %v9065_v58, 30  ;;  %v9089_v21 = vsub.s32 4, %v9065_v58  ;;  %v9871_v39 = vor.u32 %v9870_v57, %v9869_v37  ;;  %v9723_v26 = vsel %vm18777_vm4, %v18559_v55, %v9720_v29 }
 0x4fa   : > { %v9874_v25 = vor.u32 %v9873_v0, %v9872_v20  ;;  %vm9877_vm8 = vcmp.lt.s32.totalorder %v18849_v62, 3  ;;  %vm9878_vm6 = vcmp.lt.s32.totalorder %v18849_v62, 4  ;;  %13708 = vcosq.f32 %v9723_v26 }
 0x4fb   : > { %v18898_v19 = vsub.s32 %v9063_v46, %v9066_v40  ;;  %v9090_v17 = vsel %vm9005_vm5, %v9089_v21, %v9065_v58  ;;  %v9880_v56 = vsel %vm9878_vm6, %v9868_v33, 2102212464  ;;  %v8897_v15 = vsel %vm8890_vm13, %v8893_v47, %v8896_v9 }
 0x4fc   : > { %13710 = vsinq.f32 %v9723_v26  ;;  %vm9876_vm15 = vcmp.lt.s32.totalorder %v18849_v62, 2  ;;  %v9883_v16 = vsel %vm9875_vm14, %v9862_v13, %v9865_v51  ;;  %vm9734_vm4 = vcmp.eq.s32.totalorder %v18836_v8, 2 }
 0x4fd   : > { %v9069_v0 = vsub.s32 0, %v18898_v19  ;;  %v9879_v40 = vsel %vm9875_vm14, %v9859_v22, %v9862_v13  ;;  %v9881_v21 = vsel %vm9877_vm8, %v9865_v51, %v9880_v56  ;;  %v9884_v42 = vsel %vm9878_vm6, %v9871_v39, 920167782 }
 0x4fe   : > { %vm9731_vm9 = vcmp.eq.s32.totalorder %v18836_v8, 0  ;;  %v18920_v9 = vsel %vm18877_vm7, 0, %v9090_v17  ;;  %v9885_v46 = vsel %vm9877_vm8, %v9868_v33, %v9884_v42  ;;  %v9887_v63 = vsel %vm9875_vm14, %v9865_v51, %v9868_v33 }
 0x4ff   : > { %v9888_v47 = vsel %vm9878_vm6, %v9874_v25, 1326507024  ;;  %vm9730_vm12 = vcmp.lt.s32.totalorder %v18836_v8, 2  ;;  %v9059_v44 = vadd.s32 %v18827_v50, %v18824_v53  ;;  %v12929_v5 = vmin.u32 %v9069_v0, %v18898_v19 }
 0x500   : > { %v9886_v12 = vsel %vm9876_vm15, %v9883_v16, %v9885_v46  ;;  %v9889_v43 = vsel %vm9877_vm8, %v9871_v39, %v9888_v47  ;;  %vm9727_vm13 = vweird.f32 %v18559_v55  ;;  %v9882_v52 = vsel %vm9876_vm15, %v9879_v40, %v9881_v21  ;;  %v10607_v55 = vld [vmem:[%s20243_s3] sm:$0xff] }
 0x501   : > { %v9890_v2 = vsel %vm9876_vm15, %v9887_v63, %v9889_v43  ;;  %v18942_v61 = vmul.u32.u64.low %v18846_v54, %v9886_v12  ;;  %v18943_v37 = vmul.u32.u64.high %v18846_v54, %v9886_v12, %v18942_v61  ;;  %v8898_v53 = vsel %vm20584_vm0, nan, %v8897_v15 }
 0x502   : > { %v9071_v50 = vclz %v12929_v5  ;;  %v9096_v57 = vadd.s32 3, %v18920_v9  ;;  %vm6052_vm14 = vcmp.lt.s32.totalorder %v18854_v38, 2  ;;  %vm6053_vm8 = vcmp.eq.s32.totalorder %v18854_v38, 0 }
 0x503   : > { %v18951_v39 = vmul.u32.u64.low %v18846_v54, %v9890_v2  ;;  %v18952_v48 = vmul.u32.u64.high %v18846_v54, %v9890_v2, %v18951_v39  ;;  %vm6056_vm6 = vcmp.eq.s32.totalorder %v18854_v38, 2  ;;  %v9898_v58 = vmul.u32 %v18846_v54, %v9882_v52 }
 0x504   : > { %v12930_v62 = vadd.s32 4294967294, %v9071_v50  ;;  %v20992_v22 = vxor.u32 2147483648, %v16873_v45  ;;  %v20993_v13 = vxor.u32 2147483648, %v16867_v6  ;;  %v9901_v33 = vadd.s32 1, %v18943_v37  ;;  %v18966_v26 = vpop.eup %13708 }
 0x505   : > { %vm6893_vm15 = vcmp.eq.s32.totalorder %v18857_v34, 0  ;;  %vm6896_vm0 = vcmp.eq.s32.totalorder %v18857_v34, 2  ;;  %vm6892_vm1 = vcmp.lt.s32.totalorder %v18857_v34, 2  ;;  %v20994_v54 = vxor.u32 2147483648, %v16952_v49 }
 0x506   : > { %v6055_v20 = vsel %vm6053_vm8, %v16867_v6, %v20992_v22  ;;  %v6058_v51 = vsel %vm6056_vm6, %v20993_v13, %v16873_v45  ;;  %vm12931_vm11 = vcmp.lt.s32.totalorder %v12930_v62, 0  ;;  %v20995_v6 = vxor.u32 2147483648, %v16947_v41  ;;  %v18975_v25 = vpop.eup %13710 }
 0x507   : > { %v6059_v29 = vsel %vm6052_vm14, %v6055_v20, %v6058_v51  ;;  %v6895_v38 = vsel %vm6893_vm15, %v16947_v41, %v20994_v54  ;;  %v9735_v17 = vxor.u32 2147483648, %v18966_v26  ;;  %v9074_v56 = vsel %vm12931_vm11, 0, %v12930_v62 }
 0x508   : > { %v6898_v45 = vsel %vm6896_vm0, %v20995_v6, %v16952_v49  ;;  %vm9900_vm14 = vc.u32 %v18952_v48, %v18942_v61  ;;  %v6060_v15 = vsel %vm5631_vm10, nan, %v6059_v29  ;;  %v9732_v34 = vxor.u32 2147483648, %v18975_v25 }
 0x509   : > { %v9075_v16 = vsub.s32 32, %v9074_v56  ;;  %v9076_v0 = vshll.u32 %v18898_v19, %v9074_v56  ;;  %v9079_v40 = vsub.s32 4294967266, %v9074_v56  ;;  %v9736_v41 = vsel %vm9734_vm4, %v9735_v17, %v18975_v25 }
 0x50a   : > { %vm9845_vm11 = vcmp.lt.s32.totalorder %v18732_v7, 0  ;;  %v9902_v49 = vsel %vm9900_vm14, %v9901_v33, %v18943_v37  ;;  %v6899_v21 = vsel %vm6892_vm1, %v6895_v38, %v6898_v45  ;;  %vm6258_vm0 = vcmp.lt.s32.totalorder %v18860_v36, 2 }
 0x50b   : > { %v9733_v35 = vsel %vm9731_vm9, %v18966_v26, %v9732_v34  ;;  %v9077_v19 = vshrl.u32 %v9059_v44, %v9075_v16  ;;  %v9080_v42 = vadd.s32 127, %v9079_v40  ;;  %v9903_v46 = vadd.s32 %v9902_v49, %v9898_v58 }
 0x50c   : > { %v9737_v63 = vsel %vm9730_vm12, %v9733_v35, %v9736_v41  ;;  %v6900_v47 = vsel %vm6471_vm2, nan, %v6899_v21  ;;  %vm6259_vm10 = vcmp.eq.s32.totalorder %v18860_v36, 0  ;;  %vm6262_vm1 = vcmp.eq.s32.totalorder %v18860_v36, 2  ;;  %v21004_v21 = vld [vmem:[#allocation16_spill] sm:$0xff] }
 0x50d   : > { %v9738_v5 = vsel %vm9727_vm13, nan, %v9737_v63  ;;  %v9078_v12 = vor.u32 %v9077_v19, %v9076_v0  ;;  %v9081_v43 = vshll.u32 %v9080_v42, 23  ;;  %v9904_v52 = vadd.s32 536870912, %v9903_v46  ;;  %v21006_v19 = vld [vmem:[#allocation17_spill] sm:$0xff] }
 0x50e   : > { %v13089_v2 = vpack.c.bf16 %v9738_v5, %v8898_v53  ;;  %v13091_v44 = vpack.c.bf16 %v6900_v47, %v6060_v15  ;;  %v20996_v37 = vxor.u32 2147483648, %v17047_v4  ;;  %v20997_v11 = vxor.u32 2147483648, %v17038_v10  ;;  %v21008_v47 = vld [vmem:[#allocation15_spill] sm:$0xff] }
 0x50f   : > { %v9082_v39 = vor.u32 4788187, %v9081_v43  ;;  %v9085_v62 = vcvt.s32.f32 %v9078_v12  ;;  %v20998_v58 = vand.u32 2147483647, %v18732_v7  ;;  %v9905_v20 = vshrl.u32 %v9904_v52, 30 }
 0x510   : > { %v6261_v8 = vsel %vm6259_vm10, %v17038_v10, %v20996_v37  ;;  %v6264_v50 = vsel %vm6262_vm1, %v20997_v11, %v17047_v4  ;;  %13090 = vmatpush1.bf16.msra.mxu0 %v13089_v2  ;;  %v19017_v53 = vand.u32 3, %v9096_v57  ;;  %v7097_v51 = vand.u32 3, %v17051_v60  ;;  %v21011_v37 = vld [vmem:[#allocation14_spill] sm:$0xff]  ;;  %v21013_v11 = vld [vmem:[#allocation28_spill] sm:$0xff] }
 0x511   : > { %vm19013_vm2 = vcmp.le.f32.partialorder %v20998_v58, 0.7853982  ;;  %v6265_v13 = vsel %vm6258_vm0, %v6261_v8, %v6264_v50  ;;  %v5948_v10 = vand.u32 3, %v17189_v3  ;;  %v9083_v4 = vand.u32 2147483647, %v9082_v39  ;;  %13092 = vmatprep.subr.bf16.mxu0 %v13091_v44 }
 0x512   : > { %v9906_v33 = vshll.u32 %v9905_v20, 30  ;;  %v9929_v29 = vsub.s32 4, %v9905_v20  ;;  %v6788_v54 = vand.u32 3, %v17240_v28  ;;  %vm7098_vm4 = vcmp.lt.s32.totalorder %v7097_v51, 2 }
 0x513   : > { %vm7099_vm9 = vcmp.eq.s32.totalorder %v7097_v51, 0  ;;  %vm7102_vm12 = vcmp.eq.s32.totalorder %v7097_v51, 2  ;;  %vm5949_vm8 = vcmp.lt.s32.totalorder %v5948_v10, 2  ;;  %v9086_v38 = vmul.f32 %v9085_v62, %v9083_v4  ;;  %v21017_v51 = vld [vmem:[#allocation10_spill] sm:$0xff]  ;;  %v21019_v4 = vld [vmem:[#allocation23_spill] sm:$0xff] }
 0x514   : > { %v19024_v57 = vsub.s32 %v9903_v46, %v9906_v33  ;;  %v9930_v36 = vsel %vm9845_vm11, %v9929_v29, %v9905_v20  ;;  %v21001_v60 = vxor.u32 2147483648, %v17157_v27  ;;  %v21002_v28 = vxor.u32 2147483648, %v17150_v14  ;;  %v21020_v29 = vld [vmem:[#allocation8_spill] sm:$0xff] }
 0x515   : > { %v19033_v6 = vsel %vm19013_vm2, 0, %v9930_v36  ;;  %vm5950_vm6 = vcmp.eq.s32.totalorder %v5948_v10, 0  ;;  %vm5953_vm15 = vcmp.eq.s32.totalorder %v5948_v10, 2  ;;  %v9087_v56 = vxor.u32 2147483648, %v9086_v38 }
 0x516   : > { %v7101_v3 = vsel %vm7099_vm9, %v17150_v14, %v21001_v60  ;;  %v7104_v45 = vsel %vm7102_vm12, %v21002_v28, %v17157_v27  ;;  %v9909_v15 = vsub.s32 0, %v19024_v57  ;;  %v9936_v16 = vadd.s32 3, %v19033_v6  ;;  %v21024_v28 = vld [vmem:[#allocation25_spill] sm:$0xff] }
 0x517   : > { %v7105_v0 = vsel %vm7098_vm4, %v7101_v3, %v7104_v45  ;;  %v9899_v40 = vadd.s32 %v18942_v61, %v18952_v48  ;;  %v19044_v49 = vsel %vm5839_vm3, nan, %v6265_v13  ;;  %v21005_v35 = vxor.u32 2147483648, %v21004_v21  ;;  %v21010_v48 = vld [vmem:[#allocation35_spill] sm:$0xff] }
 0x518   : > { %v21007_v27 = vxor.u32 2147483648, %v21006_v19  ;;  %v9088_v46 = vsel %vm9005_vm5, %v9087_v56, %v9086_v38  ;;  %v12961_v63 = vmin.u32 %v9909_v15, %v19024_v57  ;;  %vm21009_vm14 = vweird.f32 %v21008_v47  ;;  %v21021_v38 = vld [vmem:[#allocation12_spill] sm:$0xff] }
 0x519   : > { %v5952_v14 = vsel %vm5950_vm6, %v21006_v19, %v21005_v35  ;;  %v19057_v61 = vsel %vm21009_vm14, nan, %v7105_v0  ;;  %v6154_v5 = vand.u32 3, %v21010_v48  ;;  %v9091_v12 = vsel %vm18877_vm7, %v18689_v30, %v9088_v46  ;;  %v21025_v35 = vld [vmem:[#allocation7_spill] sm:$0xff] }
 0x51a   : > { %v5955_v42 = vsel %vm5953_vm15, %v21007_v27, %v21004_v21  ;;  %vm6790_vm3 = vcmp.eq.s32.totalorder %v6788_v54, 0  ;;  %vm6793_vm0 = vcmp.eq.s32.totalorder %v6788_v54, 2  ;;  %13712 = vcosq.f32 %v9091_v12 }
 0x51b   : > { %v5956_v43 = vsel %vm5949_vm8, %v5952_v14, %v5955_v42  ;;  %v9911_v52 = vclz %v12961_v63  ;;  %v19064_v2 = vand.u32 3, %v9936_v16  ;;  %vm6789_vm5 = vcmp.lt.s32.totalorder %v6788_v54, 2  ;;  %v21027_v42 = vld [vmem:[#allocation11_spill] sm:$0xff]  ;;  %v21029_v63 = vld [vmem:[#allocation26_spill] sm:$0xff] }
 0x51c   : > { %13714 = vsinq.f32 %v9091_v12  ;;  %v13143_v44 = vpack.c.bf16 %v19057_v61, %v19044_v49  ;;  %vm21012_vm10 = vweird.f32 %v21011_v37  ;;  %v21014_v50 = vxor.u32 2147483648, %v21013_v11  ;;  %v21031_v12 = vld [vmem:[#allocation33_spill] sm:$0xff] }
 0x51d   : > { %v5957_v8 = vsel %vm21012_vm10, nan, %v5956_v43  ;;  %vm9102_vm7 = vcmp.eq.s32.totalorder %v19017_v53, 2  ;;  %v12962_v62 = vadd.s32 4294967294, %v9911_v52  ;;  %v21016_v58 = vxor.u32 2147483648, %v21015_v18  ;;  %v21033_v52 = vld [vmem:[#allocation29_spill] sm:$0xff] }
 0x51e   : > { %v6792_v39 = vsel %vm6790_vm3, %v21015_v18, %v21014_v50  ;;  %vm6155_vm1 = vcmp.lt.s32.totalorder %v6154_v5, 2  ;;  %vm6156_vm4 = vcmp.eq.s32.totalorder %v6154_v5, 0  ;;  %vm9099_vm9 = vcmp.eq.s32.totalorder %v19017_v53, 0 }
 0x51f   : > { %v6795_v20 = vsel %vm6793_vm0, %v21016_v58, %v21013_v11  ;;  %v21018_v10 = vxor.u32 2147483648, %v21017_v51  ;;  %vm6159_vm12 = vcmp.eq.s32.totalorder %v6154_v5, 2  ;;  %v6994_v54 = vand.u32 3, %v21020_v29 }
 0x520   : > { %v6796_v13 = vsel %vm6789_vm5, %v6792_v39, %v6795_v20  ;;  %vm9098_vm8 = vcmp.lt.s32.totalorder %v19017_v53, 2  ;;  %vm12963_vm6 = vcmp.lt.s32.totalorder %v12962_v62, 0  ;;  %vm21022_vm15 = vweird.f32 %v21021_v38  ;;  %v21035_v39 = vld [vmem:[#allocation9_spill] sm:$0xff]  ;;  %v21038_v38 = vld [vmem:[#allocation18_spill] sm:$0xff] }
 0x521   : > { %v6158_v33 = vsel %vm6156_vm4, %v21019_v4, %v21018_v10  ;;  %v6797_v36 = vsel %vm21022_vm15, nan, %v6796_v13  ;;  %v21023_v60 = vxor.u32 2147483648, %v21019_v4  ;;  %v7731_v45 = vand.u32 3, %v21024_v28 }
 0x522   : > { %vm9095_vm14 = vweird.f32 %v18689_v30  ;;  %v9914_v56 = vsel %vm12963_vm6, 0, %v12962_v62  ;;  %v13093_v15 = vpack.c.bf16 %v6797_v36, %v5957_v8  ;;  %vm6995_vm3 = vcmp.lt.s32.totalorder %v6994_v54, 2  ;;  %v21034_v8 = vld [vmem:[#allocation34_spill] sm:$0xff] }
 0x523   : > { %v6161_v3 = vsel %vm6159_vm12, %v21023_v60, %v21017_v51  ;;  %v9915_v0 = vsub.s32 32, %v9914_v56  ;;  %v9916_v41 = vshll.u32 %v19024_v57, %v9914_v56  ;;  %v9919_v21 = vsub.s32 4294967266, %v9914_v56 }
 0x524   : > { %v6162_v16 = vsel %vm6155_vm1, %v6158_v33, %v6161_v3  ;;  %vm21026_vm0 = vweird.f32 %v21025_v35  ;;  %13094 = vmatpush1.bf16.msra.mxu0 %v13093_v15  ;;  %vm6996_vm5 = vcmp.eq.s32.totalorder %v6994_v54, 0  ;;  %vm6999_vm10 = vcmp.eq.s32.totalorder %v6994_v54, 2  ;;  %v19105_v50 = vpop.eup %13712  ;;  %v21040_v3 = vld [vmem:[#allocation19_spill] sm:$0xff]  ;;  %v21041_v15 = vld [vmem:[#allocation38_spill] sm:$0xff] }
 0x525   : > { %v19093_v19 = vsel %vm21026_vm0, nan, %v6162_v16  ;;  %vm7732_vm4 = vcmp.lt.s32.totalorder %v7731_v45, 2  ;;  %vm7733_vm12 = vcmp.eq.s32.totalorder %v7731_v45, 0  ;;  %v9917_v14 = vshrl.u32 %v9899_v40, %v9915_v0  ;;  %v21043_v0 = vld [vmem:[#allocation37_spill] sm:$0xff] }
 0x526   : > { %v9920_v27 = vadd.s32 127, %v9919_v21  ;;  %v21028_v46 = vxor.u32 2147483648, %v21027_v42  ;;  %v21030_v48 = vxor.u32 2147483648, %v21029_v63  ;;  %v21032_v43 = vxor.u32 2147483648, %v21031_v12  ;;  %v19114_v13 = vpop.eup %13714 }
 0x527   : > { %vm7736_vm1 = vcmp.eq.s32.totalorder %v7731_v45, 2  ;;  %v8571_v11 = vand.u32 3, %v21034_v8  ;;  %v9918_v40 = vor.u32 %v9917_v14, %v9916_v41  ;;  %vm21036_vm6 = vweird.f32 %v21035_v39  ;;  %v21053_v39 = vld [vmem:[#allocation50_spill] sm:$0xff] }
 0x528   : > { %v6998_v47 = vsel %vm6996_vm5, %v21029_v63, %v21028_v46  ;;  %v7001_v57 = vsel %vm6999_vm10, %v21030_v48, %v21027_v42  ;;  %v7735_v37 = vsel %vm7733_vm12, %v21033_v52, %v21032_v43  ;;  %v9921_v18 = vshll.u32 %v9920_v27, 23  ;;  %v21045_v63 = vld [vmem:[#allocation27_spill] sm:$0xff]  ;;  %v21047_v48 = vld [vmem:[#allocation40_spill] sm:$0xff] }
 0x529   : > { %v7002_v5 = vsel %vm6995_vm3, %v6998_v47, %v7001_v57  ;;  %v21037_v58 = vxor.u32 2147483648, %v21033_v52  ;;  %v9103_v51 = vxor.u32 2147483648, %v19105_v50  ;;  %vm8572_vm15 = vcmp.lt.s32.totalorder %v8571_v11, 2  ;;  %v21050_v52 = vld [vmem:[#allocation43_spill] sm:$0xff] }
 0x52a   : > { %v19109_v62 = vsel %vm21036_vm6, nan, %v7002_v5  ;;  %v9100_v33 = vxor.u32 2147483648, %v19114_v13  ;;  %v9922_v29 = vor.u32 4788187, %v9921_v18  ;;  %v9925_v54 = vcvt.s32.f32 %v9918_v40  ;;  %v21049_v5 = vld [vmem:[#allocation41_spill] sm:$0xff] }
 0x52b   : > { %v7738_v20 = vsel %vm7736_vm1, %v21037_v58, %v21031_v12  ;;  %v13145_v10 = vpack.c.bf16 %v19109_v62, %v19093_v19  ;;  %vm21039_vm3 = vweird.f32 %v21038_v38  ;;  %v9104_v60 = vsel %vm9102_vm7, %v9103_v51, %v19114_v13  ;;  %v21055_v38 = vld [vmem:[#allocation21_spill] sm:$0xff] }
 0x52c   : > { %v7739_v4 = vsel %vm7732_vm4, %v7735_v37, %v7738_v20  ;;  %vm8573_vm0 = vcmp.eq.s32.totalorder %v8571_v11, 0  ;;  %vm8576_vm5 = vcmp.eq.s32.totalorder %v8571_v11, 2  ;;  %v7937_v28 = vand.u32 3, %v21040_v3  ;;  %v21051_v37 = vld [vmem:[#allocation24_spill] sm:$0xff] }
 0x52d   : > { %v7740_v36 = vsel %vm21039_vm3, nan, %v7739_v4  ;;  %v9101_v45 = vsel %vm9099_vm9, %v19105_v50, %v9100_v33  ;;  %v9923_v56 = vand.u32 2147483647, %v9922_v29  ;;  %v21042_v16 = vxor.u32 2147483648, %v21041_v15  ;;  %v21054_v20 = vld [vmem:[#allocation52_spill] sm:$0xff] }
 0x52e   : > { %v21044_v21 = vxor.u32 2147483648, %v21043_v0  ;;  %v9105_v14 = vsel %vm9098_vm8, %v9101_v45, %v9104_v60  ;;  %vm7938_vm7 = vcmp.lt.s32.totalorder %v7937_v28, 2  ;;  %vm7939_vm10 = vcmp.eq.s32.totalorder %v7937_v28, 0  ;;  %v21057_v60 = vld [vmem:[#allocation44_spill] sm:$0xff] }
 0x52f   : > { %v8575_v41 = vsel %vm8573_vm0, %v21043_v0, %v21042_v16  ;;  %v19144_v42 = vsel %vm9095_vm14, nan, %v9105_v14  ;;  %v9926_v46 = vmul.f32 %v9925_v54, %v9923_v56  ;;  %vm21046_vm9 = vweird.f32 %v21045_v63 }
 0x530   : > { %v8578_v35 = vsel %vm8576_vm5, %v21044_v21, %v21041_v15  ;;  %v21048_v57 = vxor.u32 2147483648, %v21047_v48  ;;  %vm7942_vm4 = vcmp.eq.s32.totalorder %v7937_v28, 2  ;;  %v8777_v53 = vand.u32 3, %v21050_v52  ;;  %v21059_v28 = vld [vmem:[#allocation46_spill] sm:$0xff]  ;;  %v21071_v52 = vld [vmem:[#allocation59_spill] sm:$0xff] }
 0x531   : > { %v8579_v27 = vsel %vm8572_vm15, %v8575_v41, %v8578_v35  ;;  %v7628_v8 = vand.u32 3, %v21051_v37  ;;  %v9927_v11 = vxor.u32 2147483648, %v9926_v46  ;;  %v21052_v40 = vxor.u32 2147483648, %v21049_v5  ;;  %v21061_v41 = vld [vmem:[#allocation31_spill] sm:$0xff]  ;;  %v21063_v35 = vld [vmem:[#allocation53_spill] sm:$0xff] }
 0x532   : > { %v8580_v47 = vsel %vm21046_vm9, nan, %v8579_v27  ;;  %v7941_v12 = vsel %vm7939_vm10, %v21049_v5, %v21048_v57  ;;  %v8468_v58 = vand.u32 3, %v21053_v39  ;;  %v7834_v4 = vand.u32 3, %v21054_v20  ;;  %v21065_v27 = vld [vmem:[#allocation48_spill] sm:$0xff]  ;;  %v21067_v57 = vld [vmem:[#allocation13_spill] sm:$0xff]  ;;  %v21075_v39 = vld [vmem:[#allocation51_spill] sm:$0xff] }
 0x533   : > { %v13095_v43 = vpack.c.bf16 %v8580_v47, %v7740_v36  ;;  %v7944_v18 = vsel %vm7942_vm4, %v21052_v40, %v21047_v48  ;;  %vm8778_vm8 = vcmp.lt.s32.totalorder %v8777_v53, 2  ;;  %vm8779_vm12 = vcmp.eq.s32.totalorder %v8777_v53, 0  ;;  %v21073_v40 = vld [vmem:[#allocation57_spill] sm:$0xff]  ;;  %v21076_v20 = vld [vmem:[#allocation56_spill] sm:$0xff] }
 0x534   : > { %v7945_v29 = vsel %vm7938_vm7, %v7941_v12, %v7944_v18  ;;  %vm8782_vm1 = vcmp.eq.s32.totalorder %v8777_v53, 2  ;;  %v9928_v54 = vsel %vm9845_vm11, %v9927_v11, %v9926_v46  ;;  %vm21056_vm6 = vweird.f32 %v21055_v38  ;;  %v21069_v12 = vld [vmem:[#allocation32_spill] sm:$0xff] }
 0x535   : > { %13096 = vmatprep.subr.bf16.mxu0 %v13095_v43  ;;  %v19162_v36 = vsel %vm21056_vm6, nan, %v7945_v29  ;;  %v21058_v3 = vxor.u32 2147483648, %v21057_v60  ;;  %v21060_v56 = vxor.u32 2147483648, %v21059_v28  ;;  %v9931_v16 = vsel %vm19013_vm2, %v18732_v7, %v9928_v54  ;;  %v21077_v54 = vld [vmem:[#allocation39_spill] sm:$0xff] }
 0x536   : > { %vm7629_vm15 = vcmp.lt.s32.totalorder %v7628_v8, 2  ;;  %vm7630_vm3 = vcmp.eq.s32.totalorder %v7628_v8, 0  ;;  %13716 = vcosq.f32 %v9931_v16  ;;  %vm21062_vm11 = vweird.f32 %v21061_v41 }
 0x537   : > { %v8781_v45 = vsel %vm8779_vm12, %v21059_v28, %v21058_v3  ;;  %v8784_v15 = vsel %vm8782_vm1, %v21060_v56, %v21057_v60  ;;  %v21064_v14 = vxor.u32 2147483648, %v21063_v35  ;;  %vm7633_vm0 = vcmp.eq.s32.totalorder %v7628_v8, 2 }
 0x538   : > { %v8785_v0 = vsel %vm8778_vm8, %v8781_v45, %v8784_v15  ;;  %13718 = vsinq.f32 %v9931_v16  ;;  %v21066_v22 = vxor.u32 2147483648, %v21065_v27  ;;  %vm8469_vm2 = vcmp.lt.s32.totalorder %v8468_v58, 2  ;;  %v21080_v45 = vld [vmem:[#allocation42_spill] sm:$0xff] }
 0x539   : > { %v19175_v21 = vsel %vm21062_vm11, nan, %v8785_v0  ;;  %v7632_v46 = vsel %vm7630_vm3, %v21065_v27, %v21064_v14  ;;  %vm9942_vm5 = vcmp.eq.s32.totalorder %v19064_v2, 2  ;;  %vm8470_vm7 = vcmp.eq.s32.totalorder %v8468_v58, 0  ;;  %v21081_v0 = vld [vmem:[#allocation22_spill] sm:$0xff]  ;;  %v21085_v27 = vld [vmem:[#allocation36_spill] sm:$0xff] }
 0x53a   : > { %v13147_v63 = vpack.c.bf16 %v19175_v21, %v19162_v36  ;;  %v7635_v47 = vsel %vm7633_vm0, %v21066_v22, %v21063_v35  ;;  %vm8473_vm10 = vcmp.eq.s32.totalorder %v8468_v58, 2  ;;  %vm7835_vm9 = vcmp.lt.s32.totalorder %v7834_v4, 2  ;;  %v21083_v35 = vld [vmem:[#allocation60_spill] sm:$0xff] }
 0x53b   : > { %v7636_v48 = vsel %vm7629_vm15, %v7632_v46, %v7635_v47  ;;  %vm9939_vm4 = vcmp.eq.s32.totalorder %v19064_v2, 0  ;;  %vm21068_vm8 = vweird.f32 %v21067_v57  ;;  %v21070_v43 = vxor.u32 2147483648, %v21069_v12  ;;  %v10577_v21 = vld [vmem:[%s20242_s2 + $0x10] sm:$0xff] }
 0x53c   : > { %v7637_v5 = vsel %vm21068_vm8, nan, %v7636_v48  ;;  %v21072_v37 = vxor.u32 2147483648, %v21071_v52  ;;  %vm7836_vm12 = vcmp.eq.s32.totalorder %v7834_v4, 0  ;;  %vm9938_vm1 = vcmp.lt.s32.totalorder %v19064_v2, 2 }
 0x53d   : > { %v8472_v53 = vsel %vm8470_vm7, %v21071_v52, %v21070_v43  ;;  %v21074_v18 = vxor.u32 2147483648, %v21073_v40  ;;  %vm7839_vm6 = vcmp.eq.s32.totalorder %v7834_v4, 2  ;;  %v8674_v29 = vand.u32 3, %v21076_v20  ;;  %v21089_v43 = vld [vmem:[#allocation30_spill] sm:$0xff] }
 0x53e   : > { %v8475_v8 = vsel %vm8473_vm10, %v21072_v37, %v21069_v12  ;;  %vm9935_vm15 = vweird.f32 %v18732_v7  ;;  %vm21078_vm3 = vweird.f32 %v21077_v54  ;;  %v21079_v60 = vxor.u32 2147483648, %v21075_v39  ;;  %v10580_v7 = vld [vmem:[%s20242_s2 + $0x28] sm:$0xff] }
 0x53f   : > { %v8476_v11 = vsel %vm8469_vm2, %v8472_v53, %v8475_v8  ;;  %v7838_v58 = vsel %vm7836_vm12, %v21075_v39, %v21074_v18  ;;  %v9411_v28 = vand.u32 3, %v18385_v24  ;;  %v10251_v56 = vand.u32 3, %v21080_v45  ;;  %v21092_v8 = vld [vmem:[#allocation62_spill] sm:$0xff] }
 0x540   : > { %v8477_v38 = vsel %vm21078_vm3, nan, %v8476_v11  ;;  %v7841_v3 = vsel %vm7839_vm6, %v21079_v60, %v21073_v40  ;;  %vm8675_vm11 = vcmp.lt.s32.totalorder %v8674_v29, 2  ;;  %vm8676_vm0 = vcmp.eq.s32.totalorder %v8674_v29, 0  ;;  %v19225_v12 = vpop.eup %13716 }
 0x541   : > { %v13097_v15 = vpack.c.bf16 %v8477_v38, %v7637_v5  ;;  %v7842_v16 = vsel %vm7835_vm9, %v7838_v58, %v7841_v3  ;;  %vm21082_vm2 = vweird.f32 %v21081_v0  ;;  %v21084_v14 = vxor.u32 2147483648, %v21083_v35  ;;  %v21096_v38 = vld [vmem:[#allocation61_spill] sm:$0xff] }
 0x542   : > { %v19211_v41 = vsel %vm21082_vm2, nan, %v7842_v16  ;;  %vm8679_vm7 = vcmp.eq.s32.totalorder %v8674_v29, 2  ;;  %vm9412_vm10 = vcmp.lt.s32.totalorder %v9411_v28, 2  ;;  %v21086_v24 = vxor.u32 2147483648, %v21085_v27  ;;  %v19234_v40 = vpop.eup %13718  ;;  %v21097_v3 = vld [vmem:[#allocation45_spill] sm:$0xff] }
 0x543   : > { %v8678_v46 = vsel %vm8676_vm0, %v21085_v27, %v21084_v14  ;;  %13098 = vmatpush1.bf16.msra.mxu0 %v13097_v15  ;;  %vm9413_vm8 = vcmp.eq.s32.totalorder %v9411_v28, 0  ;;  %vm9416_vm12 = vcmp.eq.s32.totalorder %v9411_v28, 2  ;;  %vm10252_vm9 = vcmp.lt.s32.totalorder %v10251_v56, 2  ;;  %v21098_v15 = vld [vmem:[#allocation55_spill] sm:$0xff]  ;;  %v21100_v0 = vld [vmem:[#allocation65_spill] sm:$0xff] }
 0x544   : > { %v8681_v22 = vsel %vm8679_vm7, %v21086_v24, %v21083_v35  ;;  %v21087_v47 = vxor.u32 2147483648, %v18453_v1  ;;  %v21088_v57 = vxor.u32 2147483648, %v18442_v59  ;;  %vm10253_vm6 = vcmp.eq.s32.totalorder %v10251_v56, 0 }
 0x545   : > { %v8682_v4 = vsel %vm8675_vm11, %v8678_v46, %v8681_v22  ;;  %vm21090_vm3 = vweird.f32 %v21089_v43  ;;  %v21091_v37 = vxor.u32 2147483648, %v18533_v23  ;;  %vm10256_vm11 = vcmp.eq.s32.totalorder %v10251_v56, 2  ;;  %v21101_v46 = vld [vmem:[#allocation66_spill] sm:$0xff]  ;;  %v21103_v22 = vld [vmem:[#allocation47_spill] sm:$0xff] }
 0x546   : > { %v9415_v48 = vsel %vm9413_vm8, %v18442_v59, %v21087_v47  ;;  %v9418_v5 = vsel %vm9416_vm12, %v21088_v57, %v18453_v1  ;;  %v19229_v52 = vsel %vm21090_vm3, nan, %v8682_v4  ;;  %v9943_v18 = vxor.u32 2147483648, %v19225_v12  ;;  %v21093_v59 = vld [vmem:[#allocation49_spill] sm:$0xff] }
 0x547   : > { %v9419_v53 = vsel %vm9412_vm10, %v9415_v48, %v9418_v5  ;;  %v10255_v11 = vsel %vm10253_vm6, %v21092_v8, %v21091_v37  ;;  %v13149_v1 = vpack.c.bf16 %v19229_v52, %v19211_v41  ;;  %vm21094_vm0 = vweird.f32 %v21093_v59  ;;  %v21105_v5 = vld [vmem:[#allocation54_spill] sm:$0xff]  ;;  %v21109_v59 = vld [vmem:[#allocation63_spill] sm:$0xff] }
 0x548   : > { %v9420_v39 = vsel %vm21094_vm0, nan, %v9419_v53  ;;  %v21095_v58 = vxor.u32 2147483648, %v21092_v8  ;;  %v9940_v29 = vxor.u32 2147483648, %v19234_v40  ;;  %v9617_v60 = vand.u32 3, %v21096_v38  ;;  %v21107_v53 = vld [vmem:[#allocation64_spill] sm:$0xff]  ;;  %v10611_v41 = vld [vmem:[%s20243_s3 + $0x20] sm:$0xff] }
 0x549   : > { %v10457_v28 = vand.u32 3, %v21097_v3  ;;  %v9944_v45 = vsel %vm9942_vm5, %v9943_v18, %v19234_v40  ;;  %vm21099_vm2 = vweird.f32 %v21098_v15  ;;  %v9308_v35 = vand.u32 3, %v21100_v0  ;;  %v10612_v52 = vld [vmem:[%s20243_s3 + $0x28] sm:$0xff] }
 0x54a   : > { %v10258_v20 = vsel %vm10256_vm11, %v21095_v58, %v18533_v23  ;;  %v10148_v23 = vand.u32 3, %v18814_v32  ;;  %v9941_v56 = vsel %vm9939_vm4, %v19225_v12, %v9940_v29  ;;  %vm9618_vm7 = vcmp.lt.s32.totalorder %v9617_v60, 2 }
 0x54b   : > { %v10259_v54 = vsel %vm10252_vm9, %v10255_v11, %v10258_v20  ;;  %vm9619_vm10 = vcmp.eq.s32.totalorder %v9617_v60, 0  ;;  %v9945_v27 = vsel %vm9938_vm1, %v9941_v56, %v9944_v45  ;;  %v21102_v24 = vxor.u32 2147483648, %v21101_v46  ;;  %v21111_v20 = vld [vmem:[#allocation58_spill] sm:$0xff] }
 0x54c   : > { %v10260_v16 = vsel %vm21099_vm2, nan, %v10259_v54  ;;  %vm9622_vm5 = vcmp.eq.s32.totalorder %v9617_v60, 2  ;;  %vm10458_vm8 = vcmp.lt.s32.totalorder %v10457_v28, 2  ;;  %v9946_v32 = vsel %vm9935_vm15, nan, %v9945_v27  ;;  %v21115_v60 = vld [vmem:[#allocation67_spill] sm:$0xff]  ;;  %v10615_v27 = vld [vmem:[%s20243_s3 + $0x40] sm:$0xff] }
 0x54d   : > { %v13099_v14 = vpack.c.bf16 %v10260_v16, %v9420_v39  ;;  %v9621_v4 = vsel %vm9619_vm10, %v21103_v22, %v21102_v24  ;;  %v21104_v47 = vxor.u32 2147483648, %v21103_v22  ;;  %vm10459_vm4 = vcmp.eq.s32.totalorder %v10457_v28, 0  ;;  %v10576_v16 = vld [vmem:[%s20242_s2 + $0x8] sm:$0xff]  ;;  %v10586_v22 = vld [vmem:[%s20242_s2 + $0x58] sm:$0xff] }
 0x54e   : > { %vm10462_vm12 = vcmp.eq.s32.totalorder %v10457_v28, 2  ;;  %v13141_v57 = vpack.c.bf16 %v9946_v32, %v19144_v42  ;;  %v21106_v43 = vxor.u32 2147483648, %v21105_v5  ;;  %v21108_v8 = vxor.u32 2147483648, %v21107_v53  ;;  %v21113_v42 = vld [vmem:[#allocation68_spill] sm:$0xff]  ;;  %v10616_v24 = vld [vmem:[%s20243_s3 + $0x48] sm:$0xff] }
 0x54f   : > { %13100 = vmatprep.subr.bf16.mxu0 %v13099_v14  ;;  %v9624_v48 = vsel %vm9622_vm5, %v21104_v47, %v21101_v46  ;;  %vm21110_vm1 = vweird.f32 %v21109_v59  ;;  %vm9309_vm9 = vcmp.lt.s32.totalorder %v9308_v35, 2  ;;  %vm9310_vm6 = vcmp.eq.s32.totalorder %v9308_v35, 0  ;;  %v10584_v14 = vld [vmem:[%s20242_s2 + $0x48] sm:$0xff]  ;;  %v10583_v46 = vld [vmem:[%s20242_s2 + $0x40] sm:$0xff]  ;;  %v10585_v32 = vld [vmem:[%s20242_s2 + $0x50] sm:$0xff] }
 0x550   : > { %v9625_v2 = vsel %vm9618_vm7, %v9621_v4, %v9624_v48  ;;  %v10461_v37 = vsel %vm10459_vm4, %v21107_v53, %v21106_v43  ;;  %v10464_v11 = vsel %vm10462_vm12, %v21108_v8, %v21105_v5  ;;  %13142 = vmatpush1.bf16.msra.mxu1 %v13141_v57  ;;  %vm21112_vm3 = vweird.f32 %v21111_v20  ;;  %v10617_v4 = vld [vmem:[%s20243_s3 + $0x50] sm:$0xff]  ;;  %v10618_v47 = vld [vmem:[%s20243_s3 + $0x58] sm:$0xff]  ;;  %v10588_v48 = vld [vmem:[%s20242_s2 + $0x68] sm:$0xff] }
 0x551   : > { %v9626_v39 = vsel %vm21110_vm1, nan, %v9625_v2  ;;  %v10465_v58 = vsel %vm10458_vm8, %v10461_v37, %v10464_v11  ;;  %v21114_v38 = vxor.u32 2147483648, %v21113_v42  ;;  %vm9313_vm11 = vcmp.eq.s32.totalorder %v9308_v35, 2  ;;  %13144 = vmatprep.subr.bf16.mxu1 %v13143_v44  ;;  %v10619_v57 = vld [vmem:[%s20243_s3 + $0x60] sm:$0xff]  ;;  %v10620_v5 = vld [vmem:[%s20243_s3 + $0x68] sm:$0xff]  ;;  %v10590_v43 = vld [vmem:[%s20242_s2 + $0x78] sm:$0xff] }
 0x552   : > { %v10466_v54 = vsel %vm21112_vm3, nan, %v10465_v58  ;;  %vm10149_vm0 = vcmp.lt.s32.totalorder %v10148_v23, 2  ;;  %v21116_v45 = vxor.u32 2147483648, %v21115_v60  ;;  %vm10150_vm2 = vcmp.eq.s32.totalorder %v10148_v23, 0  ;;  %v10587_v2 = vld [vmem:[%s20242_s2 + $0x60] sm:$0xff]  ;;  %v10621_v53 = vld [vmem:[%s20243_s3 + $0x70] sm:$0xff] }
 0x553   : > { %v9312_v3 = vsel %vm9310_vm6, %v21115_v60, %v21114_v38  ;;  %v13151_v28 = vpack.c.bf16 %v10466_v54, %v9626_v39  ;;  %vm10153_vm7 = vcmp.eq.s32.totalorder %v10148_v23, 2  ;;  %v10152_v35 = vsel %vm10150_vm2, %v18966_v26, %v9732_v34  ;;  %v10589_v37 = vld [vmem:[%s20242_s2 + $0x70] sm:$0xff]  ;;  %v10622_v8 = vld [vmem:[%s20243_s3 + $0x78] sm:$0xff]  ;;  %v10592_v11 = vld [vmem:[%s20242_s2 + $0x88] sm:$0xff] }
 0x554   : > { %v9315_v15 = vsel %vm9313_vm11, %v21116_v45, %v21113_v42  ;;  %v10155_v49 = vsel %vm10153_vm7, %v9735_v17, %v18975_v25  ;;  %v9514_v61 = vand.u32 3, %v18920_v9  ;;  %vm21117_vm10 = vweird.f32 %v18420_v31  ;;  %13146 = vmatpush1.bf16.msra.mxu1 %v13145_v10  ;;  %v11282_v59 = vld [vmem:[%s20245_s5] sm:$0xff]  ;;  %v11283_v58 = vld [vmem:[%s20245_s5 + $0x8] sm:$0xff]  ;;  %v10594_v20 = vld [vmem:[%s20242_s2 + $0x98] sm:$0xff] }
 0x555   : > { %v9316_v0 = vsel %vm9309_vm9, %v9312_v3, %v9315_v15  ;;  %v10156_v56 = vsel %vm10149_vm0, %v10152_v35, %v10155_v49  ;;  %v10354_v23 = vand.u32 3, %v19033_v6  ;;  %vm10703_vm5 = vcmask 654336   ;;  %13148 = vmatprep.subr.bf16.mxu1 %v13147_v63  ;;  %v10610_v63 = vld [vmem:[%s20243_s3 + $0x18] sm:$0xff]  ;;  %v10591_v39 = vld [vmem:[%s20242_s2 + $0x80] sm:$0xff]  ;;  %v11284_v54 = vld [vmem:[%s20245_s5 + $0x10] sm:$0xff] }
 0x556   : > { %v9317_v44 = vsel %vm21117_vm10, nan, %v9316_v0  ;;  %v10157_v34 = vsel %vm9727_vm13, nan, %v10156_v56  ;;  %vm9515_vm8 = vcmp.lt.s32.totalorder %v9514_v61, 2  ;;  %vm9516_vm4 = vcmp.eq.s32.totalorder %v9514_v61, 0  ;;  %12984 = vmatprep.mubr.msk.f32.mxu0 %vm10703_vm5, %v10576_v16  ;;  %13000 = vmatprep.mubr.msk.f32.mxu1 %vm10703_vm5, %v10576_v16  ;;  %v10593_v42 = vld [vmem:[%s20242_s2 + $0x90] sm:$0xff]  ;;  %v11285_v38 = vld [vmem:[%s20245_s5 + $0x18] sm:$0xff] }
 0x557   : > { %vm9519_vm12 = vcmp.eq.s32.totalorder %v9514_v61, 2  ;;  %v13101_v31 = vpack.c.bf16 %v10157_v34, %v9317_v44  ;;  %v9518_v9 = vsel %vm9516_vm4, %v19105_v50, %v9100_v33  ;;  %vm10355_vm1 = vcmp.lt.s32.totalorder %v10354_v23, 2  ;;  %v10575_v50 = vld [vmem:[%s20242_s2] sm:$0xff]  ;;  %v10608_v33 = vld [vmem:[%s20243_s3 + $0x8] sm:$0xff]  ;;  %v10598_v15 = vld [vmem:[%s20242_s2 + $0xb8] sm:$0xff] }
 0x558   : > { %v9521_v26 = vsel %vm9519_vm12, %v9103_v51, %v19114_v13  ;;  %vm10356_vm13 = vcmp.eq.s32.totalorder %v10354_v23, 0  ;;  %vm10359_vm9 = vcmp.eq.s32.totalorder %v10354_v23, 2  ;;  %v13860_v62 = vmov 0   ;;  %v10609_v13 = vld [vmem:[%s20243_s3 + $0x10] sm:$0xff]  ;;  %13150 = vmatpush1.bf16.msra.mxu1 %v13149_v1  ;;  %v10578_v51 = vld [vmem:[%s20242_s2 + $0x18] sm:$0xff]  ;;  %v10596_v60 = vld [vmem:[%s20242_s2 + $0xa8] sm:$0xff] }
 0x559   : > { %v9522_v25 = vsel %vm9515_vm8, %v9518_v9, %v9521_v26  ;;  %13102 = vmatpush1.bf16.msra.mxu0 %v13101_v31  ;;  %v10358_v6 = vsel %vm10356_vm13, %v19225_v12, %v9940_v29  ;;  %v10361_v19 = vsel %vm10359_vm9, %v9943_v18, %v19234_v40  ;;  %13526 = vset.pattern.permute.xlu0 %v13860_v62  ;;  %v10579_v12 = vld [vmem:[%s20242_s2 + $0x20] sm:$0xff]  ;;  %v10582_v40 = vld [vmem:[%s20242_s2 + $0x38] sm:$0xff]  ;;  %v10613_v18 = vld [vmem:[%s20243_s3 + $0x30] sm:$0xff] }
 0x55a   : > { %v9523_v17 = vsel %vm9095_vm14, nan, %v9522_v25  ;;  %v10362_v30 = vsel %vm10355_vm1, %v10358_v6, %v10361_v19  ;;  %10625 = vperm.xlu0 %13526, %v10607_v55   ;;  %13152 = vmatprep.subr.bf16.mxu1 %v13151_v28  ;;  %v10581_v1 = vld [vmem:[%s20242_s2 + $0x30] sm:$0xff]  ;;  %v10614_v29 = vld [vmem:[%s20243_s3 + $0x38] sm:$0xff]  ;;  %v11286_v3 = vld [vmem:[%s20245_s5 + $0x20] sm:$0xff] }
 0x55b   : > { %v10363_v10 = vsel %vm9935_vm15, nan, %v10362_v30  ;;  %13527 = vset.pattern.permute.xlu1 %v13860_v62  ;;  %v10595_v28 = vld [vmem:[%s20242_s2 + $0xa0] sm:$0xff]  ;;  %v11287_v45 = vld [vmem:[%s20245_s5 + $0x28] sm:$0xff]  ;;  %v11288_v16 = vld [vmem:[%s20245_s5 + $0x30] sm:$0xff] }
 0x55c   : > { %v13153_v36 = vpack.c.bf16 %v10363_v10, %v9523_v17  ;;  %10817 = vmatmul.mubr.f32.vlgmr.msra.gmra.mrb[0].mxu0 %v10575_v50  ;;  %10635 = vperm.xlu1 %13527, %v10609_v13   ;;  %v10597_v0 = vld [vmem:[%s20242_s2 + $0xb0] sm:$0xff]  ;;  %v11289_v35 = vld [vmem:[%s20245_s5 + $0x38] sm:$0xff]  ;;  %v10600_v49 = vld [vmem:[%s20242_s2 + $0xc8] sm:$0xff] }
 0x55d   : > { %12985 = vmatprep.mubr.msk.f32.mxu0 %vm10703_vm5, %v10578_v51  ;;  %v11290_v61 = vld [vmem:[%s20245_s5 + $0x40] sm:$0xff]  ;;  %v11291_v56 = vld [vmem:[%s20245_s5 + $0x48] sm:$0xff]  ;;  %v10602_v23 = vld [vmem:[%s20242_s2 + $0xd8] sm:$0xff] }
 0x55e   : > { %13154 = vmatpush1.bf16.msra.mxu1 %v13153_v36  ;;  %10630 = vperm.xlu0 %13526, %v10608_v33   ;;  %v10599_v44 = vld [vmem:[%s20242_s2 + $0xc0] sm:$0xff]  ;;  %v11292_v34 = vld [vmem:[%s20245_s5 + $0x50] sm:$0xff]  ;;  %v11293_v9 = vld [vmem:[%s20245_s5 + $0x58] sm:$0xff] }
 0x55f   : > { %v10601_v31 = vld [vmem:[%s20242_s2 + $0xd0] sm:$0xff]  ;;  %v10604_v26 = vld [vmem:[%s20242_s2 + $0xe8] sm:$0xff]  ;;  %v11294_v55 = vld [vmem:[%s20245_s5 + $0x60] sm:$0xff] }
 0x560   : > { %10823 = vmatmul.mubr.f32.gmra.mrb[2].mxu0 %v10577_v21  ;;  %10640 = vperm.xlu1 %13527, %v10610_v63   ;;  %v10603_v25 = vld [vmem:[%s20242_s2 + $0xe0] sm:$0xff]  ;;  %v11295_v17 = vld [vmem:[%s20245_s5 + $0x68] sm:$0xff]  ;;  %v10606_v6 = vld [vmem:[%s20242_s2 + $0xf8] sm:$0xff] }
 0x561   : > { %10978 = vmatmul.mubr.f32.vlgmr.msra.gmra.mrb[0].mxu1 %v10575_v50  ;;  %12986 = vmatprep.mubr.msk.f32.mxu0 %vm10703_vm5, %v10580_v7  ;;  %v11296_v19 = vld [vmem:[%s20245_s5 + $0x70] sm:$0xff]  ;;  %v11297_v62 = vld [vmem:[%s20245_s5 + $0x78] sm:$0xff]  ;;  %v11893_v13 = vld [vmem:[%s20247_s7] sm:$0x7] }
 0x562   : > { %13001 = vmatprep.mubr.msk.f32.mxu1 %vm10703_vm5, %v10578_v51  ;;  %10645 = vperm.xlu0 %13526, %v10611_v41   ;;  %v10605_v50 = vld [vmem:[%s20242_s2 + $0xf0] sm:$0xff]  ;;  %v12103_v30 = vld [vmem:[%s20249_s9] sm:$0x7]  ;;  %v13861_v51 = vmov 0.0  }
 0x564   : > { %10829 = vmatmul.mubr.f32.gmra.mrb[4].mxu0 %v10579_v12  ;;  %10650 = vperm.xlu1 %13527, %v10612_v52  }
 0x565   : > { %10984 = vmatmul.mubr.f32.gmra.mrb[2].mxu1 %v10577_v21  ;;  %12987 = vmatprep.mubr.msk.f32.mxu0 %vm10703_vm5, %v10582_v40 }
 0x566   : > { %13002 = vmatprep.mubr.msk.f32.mxu1 %vm10703_vm5, %v10580_v7  ;;  %10655 = vperm.xlu0 %13526, %v10613_v18  }
 0x568   : > { %10835 = vmatmul.mubr.f32.gmra.mrb[6].mxu0 %v10581_v1  ;;  %10660 = vperm.xlu1 %13527, %v10614_v29  }
 0x569   : > { %10990 = vmatmul.mubr.f32.gmra.mrb[4].mxu1 %v10579_v12  ;;  %12988 = vmatprep.mubr.msk.f32.mxu0 %vm10703_vm5, %v10584_v14 }
 0x56a   : > { %13003 = vmatprep.mubr.msk.f32.mxu1 %vm10703_vm5, %v10582_v40  ;;  %10665 = vperm.xlu0 %13526, %v10615_v27  }
 0x56c   : > { %10841 = vmatmul.mubr.f32.gmra.mrb[8].mxu0 %v10583_v46  ;;  %10670 = vperm.xlu1 %13527, %v10616_v24  }
 0x56d   : > { %10996 = vmatmul.mubr.f32.gmra.mrb[6].mxu1 %v10581_v1  ;;  %12989 = vmatprep.mubr.msk.f32.mxu0 %vm10703_vm5, %v10586_v22 }
 0x56e   : > { %13004 = vmatprep.mubr.msk.f32.mxu1 %vm10703_vm5, %v10584_v14  ;;  %10675 = vperm.xlu0 %13526, %v10617_v4  }
 0x570   : > { %10847 = vmatmul.mubr.f32.gmra.mrb[10].mxu0 %v10585_v32  ;;  %10680 = vperm.xlu1 %13527, %v10618_v47  }
 0x571   : > { %11002 = vmatmul.mubr.f32.gmra.mrb[8].mxu1 %v10583_v46  ;;  %12990 = vmatprep.mubr.msk.f32.mxu0 %vm10703_vm5, %v10588_v48 }
 0x572   : > { %13005 = vmatprep.mubr.msk.f32.mxu1 %vm10703_vm5, %v10586_v22  ;;  %10685 = vperm.xlu0 %13526, %v10619_v57  }
 0x574   : > { %10853 = vmatmul.mubr.f32.gmra.mrb[12].mxu0 %v10587_v2  ;;  %10690 = vperm.xlu1 %13527, %v10620_v5  }
 0x575   : > { %11008 = vmatmul.mubr.f32.gmra.mrb[10].mxu1 %v10585_v32  ;;  %12991 = vmatprep.mubr.msk.f32.mxu0 %vm10703_vm5, %v10590_v43 }
 0x576   : > { %13006 = vmatprep.mubr.msk.f32.mxu1 %vm10703_vm5, %v10588_v48  ;;  %10695 = vperm.xlu0 %13526, %v10621_v53  }
 0x578   : > { %10859 = vmatmul.mubr.f32.gmra.mrb[14].mxu0 %v10589_v37  ;;  %10700 = vperm.xlu1 %13527, %v10622_v8  }
 0x579   : > { %11014 = vmatmul.mubr.f32.gmra.mrb[12].mxu1 %v10587_v2  ;;  %12992 = vmatprep.mubr.msk.f32.mxu0 %vm10703_vm5, %v10592_v11 }
 0x57a   : > { %13007 = vmatprep.mubr.msk.f32.mxu1 %vm10703_vm5, %v10590_v43  ;;  %11300 = vperm.xlu0 %13526, %v11282_v59  }
 0x57c   : > { %10865 = vmatmul.mubr.f32.gmra.mrb[16].mxu0 %v10591_v39  ;;  %11305 = vperm.xlu1 %13527, %v11283_v58  }
 0x57d   : > { %11020 = vmatmul.mubr.f32.gmra.mrb[14].mxu1 %v10589_v37  ;;  %12993 = vmatprep.mubr.msk.f32.mxu0 %vm10703_vm5, %v10594_v20 }
 0x57e   : > { %13008 = vmatprep.mubr.msk.f32.mxu1 %vm10703_vm5, %v10592_v11  ;;  %11310 = vperm.xlu0 %13526, %v11284_v54  }
 0x580   : > { %10871 = vmatmul.mubr.f32.gmra.mrb[18].mxu0 %v10593_v42  ;;  %11315 = vperm.xlu1 %13527, %v11285_v38  }
 0x581   : > { %11026 = vmatmul.mubr.f32.gmra.mrb[16].mxu1 %v10591_v39  ;;  %12994 = vmatprep.mubr.msk.f32.mxu0 %vm10703_vm5, %v10596_v60 }
 0x582   : > { %13009 = vmatprep.mubr.msk.f32.mxu1 %vm10703_vm5, %v10594_v20  ;;  %11320 = vperm.xlu0 %13526, %v11286_v3  }
 0x584   : > { %10877 = vmatmul.mubr.f32.gmra.mrb[20].mxu0 %v10595_v28  ;;  %11325 = vperm.xlu1 %13527, %v11287_v45  }
 0x585   : > { %11032 = vmatmul.mubr.f32.gmra.mrb[18].mxu1 %v10593_v42  ;;  %12995 = vmatprep.mubr.msk.f32.mxu0 %vm10703_vm5, %v10598_v15 }
 0x586   : > { %13010 = vmatprep.mubr.msk.f32.mxu1 %vm10703_vm5, %v10596_v60  ;;  %11330 = vperm.xlu0 %13526, %v11288_v16  }
 0x588   : > { %10883 = vmatmul.mubr.f32.gmra.mrb[22].mxu0 %v10597_v0  ;;  %11335 = vperm.xlu1 %13527, %v11289_v35  }
 0x589   : > { %11038 = vmatmul.mubr.f32.gmra.mrb[20].mxu1 %v10595_v28  ;;  %12996 = vmatprep.mubr.msk.f32.mxu0 %vm10703_vm5, %v10600_v49 }
 0x58a   : > { %13011 = vmatprep.mubr.msk.f32.mxu1 %vm10703_vm5, %v10598_v15  ;;  %11340 = vperm.xlu0 %13526, %v11290_v61  }
 0x58c   : > { %10889 = vmatmul.mubr.f32.gmra.mrb[24].mxu0 %v10599_v44  ;;  %11345 = vperm.xlu1 %13527, %v11291_v56  }
 0x58d   : > { %11044 = vmatmul.mubr.f32.gmra.mrb[22].mxu1 %v10597_v0  ;;  %12997 = vmatprep.mubr.msk.f32.mxu0 %vm10703_vm5, %v10602_v23 }
 0x58e   : > { %13012 = vmatprep.mubr.msk.f32.mxu1 %vm10703_vm5, %v10600_v49  ;;  %11350 = vperm.xlu0 %13526, %v11292_v34  }
 0x590   : > { %10895 = vmatmul.mubr.f32.gmra.mrb[26].mxu0 %v10601_v31  ;;  %11355 = vperm.xlu1 %13527, %v11293_v9  }
 0x591   : > { %11050 = vmatmul.mubr.f32.gmra.mrb[24].mxu1 %v10599_v44  ;;  %12998 = vmatprep.mubr.msk.f32.mxu0 %vm10703_vm5, %v10604_v26 }
 0x592   : > { %13013 = vmatprep.mubr.msk.f32.mxu1 %vm10703_vm5, %v10602_v23  ;;  %11360 = vperm.xlu0 %13526, %v11294_v55  }
 0x594   : > { %10901 = vmatmul.mubr.f32.gmra.mrb[28].mxu0 %v10603_v25  ;;  %11365 = vperm.xlu1 %13527, %v11295_v17  }
 0x595   : > { %11056 = vmatmul.mubr.f32.gmra.mrb[26].mxu1 %v10601_v31  ;;  %12999 = vmatprep.mubr.msk.f32.mxu0 %vm10703_vm5, %v10606_v6 }
 0x596   : > { %13014 = vmatprep.mubr.msk.f32.mxu1 %vm10703_vm5, %v10604_v26  ;;  %11370 = vperm.xlu0 %13526, %v11296_v19  }
 0x598   : > { %10907 = vmatmul.mubr.f32.gmra.mrb[30].mxu0 %v10605_v50  ;;  %11375 = vperm.xlu1 %13527, %v11297_v62  }
 0x599   : > { %11062 = vmatmul.mubr.f32.gmra.mrb[28].mxu1 %v10603_v25  ;;  %11442 = vmatprep.mubr.f32.mxu0 %v13861_v51 }
 0x59a   : > { %13015 = vmatprep.mubr.msk.f32.mxu1 %vm10703_vm5, %v10606_v6  ;;  %11896 = vperm.xlu0 %13526, %v11893_v13  }
 0x59c   : > { %12106 = vperm.xlu1 %13527, %v12103_v30  }
 0x59d   : > { %11068 = vmatmul.mubr.f32.gmra.mrb[30].mxu1 %v10605_v50 }
 0x59e   : > { %11603 = vmatprep.mubr.f32.mxu1 %v13861_v51 }
 0x5d9   : > { %v10626_v10 = vpop.permute.xlu0 %10625 }
 0x5db   : > { %v10636_v1 = vpop.permute.xlu1 %10635 }
 0x5dd   : > { %v10631_v7 = vpop.permute.xlu0 %10630 }
 0x5df   : > { %v10641_v58 = vpop.permute.xlu1 %10640 }
 0x5e1   : > { %v10646_v55 = vpop.permute.xlu0 %10645 }
 0x62f   : > { %v10818_v33 = vpop.f32.mrb[0].mxu0 }
 0x630   : > { %v10819_v36 = vadd.f32 %v10818_v33, %v10626_v10  ;;  %v10820_v21 = vpop.f32.mrb[1].mxu0 }
 0x631   : > { %v10821_v63 = vadd.f32 %v10820_v21, %v10626_v10 }
 0x632   : > { %v11138_v12 = vmul.f32 0.01, %v10819_v36  ;;  %vm11074_vm14 = vcmp.gt.f32.partialorder %v10819_v36, 0.0 }
 0x633   : > { %v10824_v41 = vpop.f32.mrb[2].mxu0  ;;  %v11139_v46 = vmul.f32 0.01, %v10821_v63  ;;  %vm11075_vm6 = vcmp.gt.f32.partialorder %v10821_v63, 0.0 }
 0x634   : > { %v10979_v52 = vpop.f32.mrb[0].mxu1  ;;  %v10825_v40 = vadd.f32 %v10824_v41, %v10631_v7  ;;  %v10826_v18 = vpop.f32.mrb[3].mxu0  ;;  %v11202_v32 = vsel %vm11074_vm14, %v10819_v36, %v11138_v12 }
 0x635   : > { %v10980_v29 = vadd.f32 %v10979_v52, %v10626_v10  ;;  %v10981_v14 = vpop.f32.mrb[1].mxu1  ;;  %v10827_v27 = vadd.f32 %v10826_v18, %v10631_v7  ;;  %v11203_v59 = vsel %vm11075_vm6, %v10821_v63, %v11139_v46  ;;  %v10651_v52 = vpop.permute.xlu1 %10650 }
 0x636   : > { %v10982_v24 = vadd.f32 %v10981_v14, %v10626_v10  ;;  %vm11078_vm15 = vcmp.gt.f32.partialorder %v10825_v40, 0.0  ;;  %v11142_v22 = vmul.f32 0.01, %v10825_v40 }
 0x637   : > { %vm11079_vm3 = vcmp.gt.f32.partialorder %v10827_v27, 0.0  ;;  %v11143_v4 = vmul.f32 0.01, %v10827_v27  ;;  %v11140_v47 = vmul.f32 0.01, %v10980_v29  ;;  %v10830_v2 = vpop.f32.mrb[4].mxu0 }
 0x638   : > { %v11206_v48 = vsel %vm11078_vm15, %v10825_v40, %v11142_v22  ;;  %v10985_v57 = vpop.f32.mrb[2].mxu1  ;;  %vm11076_vm11 = vcmp.gt.f32.partialorder %v10980_v29, 0.0  ;;  %v10831_v37 = vadd.f32 %v10830_v2, %v10636_v1  ;;  %v10832_v8 = vpop.f32.mrb[5].mxu0  ;;  %vm11077_vm0 = vcmp.gt.f32.partialorder %v10982_v24, 0.0 }
 0x639   : > { %v13157_v5 = vpack.c.bf16 %v11206_v48, %v11202_v32  ;;  %v10986_v43 = vadd.f32 %v10985_v57, %v10631_v7  ;;  %v10987_v53 = vpop.f32.mrb[3].mxu1  ;;  %v11207_v39 = vsel %vm11079_vm3, %v10827_v27, %v11143_v4  ;;  %v11141_v20 = vmul.f32 0.01, %v10982_v24 }
 0x63a   : > { %v10988_v11 = vadd.f32 %v10987_v53, %v10631_v7  ;;  %v10833_v42 = vadd.f32 %v10832_v8, %v10636_v1  ;;  %v11204_v38 = vsel %vm11076_vm11, %v10980_v29, %v11140_v47  ;;  %v13155_v45 = vpack.c.bf16 %v11207_v39, %v11203_v59 }
 0x63b   : > { %vm11080_vm2 = vcmp.gt.f32.partialorder %v10986_v43, 0.0  ;;  %v11144_v54 = vmul.f32 0.01, %v10986_v43  ;;  %v10836_v28 = vpop.f32.mrb[6].mxu0  ;;  %vm11082_vm10 = vcmp.gt.f32.partialorder %v10831_v37, 0.0  ;;  %v11205_v31 = vsel %vm11077_vm0, %v10982_v24, %v11141_v20 }
 0x63c   : > { %vm11081_vm7 = vcmp.gt.f32.partialorder %v10988_v11, 0.0  ;;  %v11145_v60 = vmul.f32 0.01, %v10988_v11  ;;  %v10991_v3 = vpop.f32.mrb[4].mxu1  ;;  %v11146_v16 = vmul.f32 0.01, %v10831_v37  ;;  %v10837_v56 = vadd.f32 %v10836_v28, %v10641_v58  ;;  %13156 = vmatprep.subr.bf16.mxu0 %v13155_v45  ;;  %v10661_v28 = vpop.permute.xlu1 %10660 }
 0x63d   : > { %v11208_v15 = vsel %vm11080_vm2, %v10986_v43, %v11144_v54  ;;  %v10992_v0 = vadd.f32 %v10991_v3, %v10636_v1  ;;  %v10993_v35 = vpop.f32.mrb[5].mxu1  ;;  %v10838_v49 = vpop.f32.mrb[7].mxu0  ;;  %vm11083_vm5 = vcmp.gt.f32.partialorder %v10833_v42, 0.0  ;;  %v11147_v34 = vmul.f32 0.01, %v10833_v42  ;;  %13158 = vmatpush1.bf16.msra.mxu0 %v13157_v5 }
 0x63e   : > { %v13189_v61 = vpack.c.bf16 %v11208_v15, %v11204_v38  ;;  %v10994_v44 = vadd.f32 %v10993_v35, %v10636_v1  ;;  %v10839_v23 = vadd.f32 %v10838_v49, %v10641_v58  ;;  %v11209_v9 = vsel %vm11081_vm7, %v10988_v11, %v11145_v60 }
 0x63f   : > { %v10842_v26 = vpop.f32.mrb[8].mxu0  ;;  %vm11084_vm8 = vcmp.gt.f32.partialorder %v10992_v0, 0.0  ;;  %v11148_v25 = vmul.f32 0.01, %v10992_v0  ;;  %vm11086_vm4 = vcmp.gt.f32.partialorder %v10837_v56, 0.0  ;;  %v19566_v6 = vsel %vm11082_vm10, %v10831_v37, %v11146_v16 }
 0x640   : > { %v11150_v17 = vmul.f32 0.01, %v10837_v56  ;;  %v11149_v19 = vmul.f32 0.01, %v10994_v44  ;;  %v10997_v50 = vpop.f32.mrb[6].mxu1  ;;  %v13187_v13 = vpack.c.bf16 %v11209_v9, %v11205_v31  ;;  %v10844_v30 = vpop.f32.mrb[9].mxu0  ;;  %v10843_v21 = vadd.f32 %v10842_v26, %v10646_v55 }
 0x641   : > { %v11151_v62 = vmul.f32 0.01, %v10839_v23  ;;  %v10998_v33 = vadd.f32 %v10997_v50, %v10641_v58  ;;  %vm11087_vm12 = vcmp.gt.f32.partialorder %v10839_v23, 0.0  ;;  %v10999_v36 = vpop.f32.mrb[7].mxu1  ;;  %vm11085_vm1 = vcmp.gt.f32.partialorder %v10994_v44, 0.0 }
 0x642   : > { %v11214_v10 = vsel %vm11086_vm4, %v10837_v56, %v11150_v17  ;;  %v11000_v7 = vadd.f32 %v10999_v36, %v10641_v58  ;;  %13188 = vmatprep.subr.bf16.mxu1 %v13187_v13  ;;  %v11211_v12 = vsel %vm11083_vm5, %v10833_v42, %v11147_v34  ;;  %v19571_v40 = vsel %vm11084_vm8, %v10992_v0, %v11148_v25  ;;  %v10656_v42 = vpop.permute.xlu0 %10655 }
 0x643   : > { %v13161_v63 = vpack.c.bf16 %v11214_v10, %v19566_v6  ;;  %v10848_v41 = vpop.f32.mrb[10].mxu0  ;;  %vm11088_vm13 = vcmp.gt.f32.partialorder %v10998_v33, 0.0  ;;  %v11152_v18 = vmul.f32 0.01, %v10998_v33  ;;  %13190 = vmatpush1.bf16.msra.mxu1 %v13189_v61  ;;  %v11154_v1 = vmul.f32 0.01, %v10843_v21 }
 0x644   : > { %vm11090_vm9 = vcmp.gt.f32.partialorder %v10843_v21, 0.0  ;;  %v11003_v29 = vpop.f32.mrb[8].mxu1  ;;  %v19573_v14 = vadd.f32 %v10844_v30, %v10646_v55  ;;  %v10849_v27 = vadd.f32 %v10848_v41, %v10651_v52  ;;  %v10850_v46 = vpop.f32.mrb[11].mxu0  ;;  %v11215_v24 = vsel %vm11087_vm12, %v10839_v23, %v11151_v62 }
 0x645   : > { %v11216_v22 = vsel %vm11088_vm13, %v10998_v33, %v11152_v18  ;;  %v11153_v4 = vmul.f32 0.01, %v11000_v7  ;;  %v11004_v32 = vadd.f32 %v11003_v29, %v10646_v55  ;;  %v11005_v47 = vpop.f32.mrb[9].mxu1  ;;  %v11213_v48 = vsel %vm11085_vm1, %v10994_v44, %v11149_v19 }
 0x646   : > { %v13193_v57 = vpack.c.bf16 %v11216_v22, %v19571_v40  ;;  %v19578_v2 = vadd.f32 %v11005_v47, %v10646_v55  ;;  %vm11094_vm14 = vcmp.gt.f32.partialorder %v10849_v27, 0.0  ;;  %v11158_v5 = vmul.f32 0.01, %v10849_v27  ;;  %v10666_v40 = vpop.permute.xlu0 %10665 }
 0x647   : > { %v10854_v43 = vpop.f32.mrb[12].mxu0  ;;  %vm11089_vm15 = vcmp.gt.f32.partialorder %v11000_v7, 0.0  ;;  %v19581_v53 = vsel %vm11090_vm9, %v10843_v21, %v11154_v1  ;;  %v11156_v37 = vmul.f32 0.01, %v11004_v32  ;;  %v13159_v11 = vpack.c.bf16 %v11215_v24, %v11211_v12 }
 0x648   : > { %v11009_v8 = vpop.f32.mrb[10].mxu1  ;;  %v10856_v59 = vpop.f32.mrb[13].mxu0  ;;  %vm11092_vm6 = vcmp.gt.f32.partialorder %v11004_v32, 0.0  ;;  %vm11091_vm3 = vcmp.gt.f32.partialorder %v19573_v14, 0.0  ;;  %v19584_v39 = vsel %vm11094_vm14, %v10849_v27, %v11158_v5  ;;  %v10851_v20 = vadd.f32 %v10850_v46, %v10651_v52 }
 0x649   : > { %v11010_v58 = vadd.f32 %v11009_v8, %v10651_v52  ;;  %v11011_v54 = vpop.f32.mrb[11].mxu1  ;;  %v11155_v38 = vmul.f32 0.01, %v19573_v14  ;;  %vm11093_vm11 = vcmp.gt.f32.partialorder %v19578_v2, 0.0  ;;  %v11157_v60 = vmul.f32 0.01, %v19578_v2  ;;  %13160 = vmatprep.subr.bf16.mxu0 %v13159_v11  ;;  %v10671_v8 = vpop.permute.xlu1 %10670 }
 0x64a   : > { %v13165_v3 = vpack.c.bf16 %v19584_v39, %v19581_v53  ;;  %v11012_v15 = vadd.f32 %v11011_v54, %v10651_v52  ;;  %v11217_v16 = vsel %vm11089_vm15, %v11000_v7, %v11153_v4  ;;  %13162 = vmatpush1.bf16.msra.mxu0 %v13161_v63  ;;  %v19593_v35 = vsel %vm11092_vm6, %v11004_v32, %v11156_v37 }
 0x64b   : > { %vm11096_vm0 = vcmp.gt.f32.partialorder %v11010_v58, 0.0  ;;  %v11160_v45 = vmul.f32 0.01, %v11010_v58  ;;  %v10860_v0 = vpop.f32.mrb[14].mxu0  ;;  %v13191_v49 = vpack.c.bf16 %v11217_v16, %v11213_v48  ;;  %v10855_v61 = vadd.f32 %v10854_v43, %v10656_v42 }
 0x64c   : > { %v11015_v44 = vpop.f32.mrb[12].mxu1  ;;  %v10861_v56 = vadd.f32 %v10860_v0, %v10661_v28  ;;  %v10862_v23 = vpop.f32.mrb[15].mxu0  ;;  %vm11095_vm2 = vcmp.gt.f32.partialorder %v10851_v20, 0.0  ;;  %v19597_v9 = vadd.f32 %v10856_v59, %v10656_v42  ;;  %v11159_v25 = vmul.f32 0.01, %v10851_v20 }
 0x64d   : > { %v19595_v34 = vsel %vm11096_vm0, %v11010_v58, %v11160_v45  ;;  %v11016_v31 = vadd.f32 %v11015_v44, %v10656_v42  ;;  %v11017_v26 = vpop.f32.mrb[13].mxu1  ;;  %13192 = vmatprep.subr.bf16.mxu1 %v13191_v49  ;;  %vm11098_vm7 = vcmp.gt.f32.partialorder %v10855_v61, 0.0  ;;  %v11162_v17 = vmul.f32 0.01, %v10855_v61 }
 0x64e   : > { %v13197_v55 = vpack.c.bf16 %v19595_v34, %v19593_v35  ;;  %v11161_v6 = vmul.f32 0.01, %v11012_v15  ;;  %13194 = vmatpush1.bf16.msra.mxu1 %v13193_v57  ;;  %v19601_v50 = vadd.f32 %v11017_v26, %v10656_v42  ;;  %vm11097_vm5 = vcmp.gt.f32.partialorder %v11012_v15, 0.0 }
 0x64f   : > { %vm11100_vm10 = vcmp.gt.f32.partialorder %v11016_v31, 0.0  ;;  %v11164_v19 = vmul.f32 0.01, %v11016_v31  ;;  %v10866_v62 = vpop.f32.mrb[16].mxu0  ;;  %vm11102_vm8 = vcmp.gt.f32.partialorder %v10861_v56, 0.0  ;;  %v10863_v10 = vadd.f32 %v10862_v23, %v10661_v28 }
 0x650   : > { %v11166_v13 = vmul.f32 0.01, %v10861_v56  ;;  %v11021_v30 = vpop.f32.mrb[14].mxu1  ;;  %v10868_v33 = vpop.f32.mrb[17].mxu0  ;;  %v19603_v36 = vsel %vm11098_vm7, %v10855_v61, %v11162_v17  ;;  %vm11099_vm4 = vcmp.gt.f32.partialorder %v19597_v9, 0.0  ;;  %vm11101_vm12 = vcmp.gt.f32.partialorder %v19601_v50, 0.0 }
 0x651   : > { %v19607_v21 = vmul.f32 0.01, %v19597_v9  ;;  %v11022_v63 = vadd.f32 %v11021_v30, %v10661_v28  ;;  %v11023_v7 = vpop.f32.mrb[15].mxu1  ;;  %v19609_v41 = vsel %vm11100_vm10, %v11016_v31, %v11164_v19  ;;  %v19613_v12 = vmul.f32 0.01, %v19601_v50 }
 0x652   : > { %v19615_v52 = vsel %vm11102_vm8, %v10861_v56, %v11166_v13  ;;  %v11167_v29 = vmul.f32 0.01, %v10863_v10  ;;  %v11024_v46 = vadd.f32 %v11023_v7, %v10661_v28  ;;  %v11219_v24 = vsel %vm11091_vm3, %v19573_v14, %v11155_v38 }
 0x653   : > { %v13169_v18 = vpack.c.bf16 %v19615_v52, %v19603_v36  ;;  %vm11104_vm1 = vcmp.gt.f32.partialorder %v11022_v63, 0.0  ;;  %v11168_v1 = vmul.f32 0.01, %v11022_v63  ;;  %v10872_v27 = vpop.f32.mrb[18].mxu0  ;;  %v11223_v22 = vsel %vm11095_vm2, %v10851_v20, %v11159_v25  ;;  %v10676_v25 = vpop.permute.xlu0 %10675 }
 0x654   : > { %v11221_v4 = vsel %vm11093_vm11, %v19578_v2, %v11157_v60  ;;  %v11027_v32 = vpop.f32.mrb[16].mxu1  ;;  %v10874_v47 = vpop.f32.mrb[19].mxu0  ;;  %v13163_v57 = vpack.c.bf16 %v11223_v22, %v11219_v24  ;;  %v11225_v5 = vsel %vm11097_vm5, %v11012_v15, %v11161_v6  ;;  %v10867_v43 = vadd.f32 %v10866_v62, %v10666_v40 }
 0x655   : > { %v19626_v48 = vsel %vm11104_vm1, %v11022_v63, %v11168_v1  ;;  %v11029_v37 = vpop.f32.mrb[17].mxu1  ;;  %v13195_v14 = vpack.c.bf16 %v11225_v5, %v11221_v4  ;;  %v11028_v59 = vadd.f32 %v11027_v32, %v10666_v40  ;;  %v19631_v58 = vadd.f32 %v10868_v33, %v10666_v40  ;;  %v10681_v33 = vpop.permute.xlu1 %10680 }
 0x656   : > { %v13201_v11 = vpack.c.bf16 %v19626_v48, %v19609_v41  ;;  %13164 = vmatprep.subr.bf16.mxu0 %v13163_v57  ;;  %vm11106_vm13 = vcmp.gt.f32.partialorder %v10867_v43, 0.0  ;;  %v11170_v2 = vmul.f32 0.01, %v10867_v43  ;;  %v19633_v20 = vadd.f32 %v11029_v37, %v10666_v40 }
 0x657   : > { %v10873_v54 = vadd.f32 %v10872_v27, %v10671_v8  ;;  %v10878_v42 = vpop.f32.mrb[20].mxu0  ;;  %vm11103_vm9 = vcmp.gt.f32.partialorder %v10863_v10, 0.0  ;;  %v11169_v38 = vmul.f32 0.01, %v11024_v46  ;;  %13196 = vmatprep.subr.bf16.mxu1 %v13195_v14  ;;  %13166 = vmatpush1.bf16.msra.mxu0 %v13165_v3  ;;  %vm11108_vm14 = vcmp.gt.f32.partialorder %v11028_v59, 0.0 }
 0x658   : > { %v11172_v60 = vmul.f32 0.01, %v11028_v59  ;;  %vm11105_vm15 = vcmp.gt.f32.partialorder %v11024_v46, 0.0  ;;  %13198 = vmatpush1.bf16.msra.mxu1 %v13197_v55  ;;  %v19639_v28 = vmul.f32 0.01, %v19631_v58  ;;  %v11033_v45 = vpop.f32.mrb[18].mxu1  ;;  %v19642_v16 = vsel %vm11106_vm13, %v10867_v43, %v11170_v2 }
 0x659   : > { %vm11110_vm6 = vcmp.gt.f32.partialorder %v10873_v54, 0.0  ;;  %v10880_v15 = vpop.f32.mrb[21].mxu0  ;;  %vm11107_vm3 = vcmp.gt.f32.partialorder %v19631_v58, 0.0  ;;  %v11174_v0 = vmul.f32 0.01, %v10873_v54  ;;  %v11034_v35 = vadd.f32 %v11033_v45, %v10671_v8  ;;  %v11035_v53 = vpop.f32.mrb[19].mxu1 }
 0x65a   : > { %v10875_v49 = vadd.f32 %v10874_v47, %v10671_v8  ;;  %v19645_v39 = vsel %vm11108_vm14, %v11028_v59, %v11172_v60  ;;  %vm11109_vm11 = vcmp.gt.f32.partialorder %v19633_v20, 0.0  ;;  %v19649_v3 = vmul.f32 0.01, %v19633_v20  ;;  %v10691_v45 = vpop.permute.xlu1 %10690 }
 0x65b   : > { %v19651_v61 = vadd.f32 %v11035_v53, %v10671_v8  ;;  %v11231_v44 = vsel %vm11103_vm9, %v10863_v10, %v11167_v29  ;;  %v10884_v56 = vpop.f32.mrb[22].mxu0  ;;  %v19654_v23 = vsel %vm11110_vm6, %v10873_v54, %v11174_v0  ;;  %vm11112_vm0 = vcmp.gt.f32.partialorder %v11034_v35, 0.0  ;;  %v10686_v54 = vpop.permute.xlu0 %10685 }
 0x65c   : > { %v11176_v34 = vmul.f32 0.01, %v11034_v35  ;;  %v11227_v31 = vsel %vm11099_vm4, %v19597_v9, %v19607_v21  ;;  %v11039_v26 = vpop.f32.mrb[20].mxu1  ;;  %v10886_v55 = vpop.f32.mrb[23].mxu0  ;;  %v13173_v17 = vpack.c.bf16 %v19654_v23, %v19642_v16  ;;  %vm11111_vm2 = vcmp.gt.f32.partialorder %v10875_v49, 0.0 }
 0x65d   : > { %v11175_v6 = vmul.f32 0.01, %v10875_v49  ;;  %v11229_v19 = vsel %vm11101_vm12, %v19601_v50, %v19613_v12  ;;  %v11041_v62 = vpop.f32.mrb[21].mxu1  ;;  %v13167_v30 = vpack.c.bf16 %v11231_v44, %v11227_v31  ;;  %v11233_v10 = vsel %vm11105_vm15, %v11024_v46, %v11169_v38 }
 0x65e   : > { %v19666_v13 = vsel %vm11112_vm0, %v11034_v35, %v11176_v34  ;;  %v10879_v9 = vadd.f32 %v10878_v42, %v10676_v25  ;;  %v13199_v63 = vpack.c.bf16 %v11233_v10, %v11229_v19  ;;  %v11040_v7 = vadd.f32 %v11039_v26, %v10676_v25 }
 0x65f   : > { %v13205_v21 = vpack.c.bf16 %v19666_v13, %v19645_v39  ;;  %v19671_v40 = vadd.f32 %v10880_v15, %v10676_v25  ;;  %v10890_v1 = vpop.f32.mrb[24].mxu0  ;;  %13168 = vmatprep.subr.bf16.mxu0 %v13167_v30  ;;  %v19673_v50 = vadd.f32 %v11041_v62, %v10676_v25  ;;  %v10885_v12 = vadd.f32 %v10884_v56, %v10681_v33 }
 0x660   : > { %vm11114_vm7 = vcmp.gt.f32.partialorder %v10879_v9, 0.0  ;;  %v11178_v29 = vmul.f32 0.01, %v10879_v9  ;;  %v11045_v27 = vpop.f32.mrb[22].mxu1  ;;  %v10892_v24 = vpop.f32.mrb[25].mxu0  ;;  %vm11113_vm10 = vcmp.gt.f32.partialorder %v19651_v61, 0.0  ;;  %13200 = vmatprep.subr.bf16.mxu1 %v13199_v63  ;;  %13170 = vmatpush1.bf16.msra.mxu0 %v13169_v18  ;;  %v10887_v52 = vadd.f32 %v10886_v55, %v10681_v33 }
 0x661   : > { %v11177_v46 = vmul.f32 0.01, %v19651_v61  ;;  %vm11116_vm5 = vcmp.gt.f32.partialorder %v11040_v7, 0.0  ;;  %v11180_v22 = vmul.f32 0.01, %v11040_v7  ;;  %13202 = vmatpush1.bf16.msra.mxu1 %v13201_v11  ;;  %vm11115_vm8 = vcmp.gt.f32.partialorder %v19671_v40, 0.0 }
 0x662   : > { %v19683_v4 = vsel %vm11114_vm7, %v10879_v9, %v11178_v29  ;;  %v19687_v32 = vmul.f32 0.01, %v19671_v40  ;;  %vm11118_vm4 = vcmp.gt.f32.partialorder %v10885_v12, 0.0  ;;  %v11047_v47 = vpop.f32.mrb[23].mxu1  ;;  %vm11117_vm12 = vcmp.gt.f32.partialorder %v19673_v50, 0.0 }
 0x663   : > { %v11182_v57 = vmul.f32 0.01, %v10885_v12  ;;  %v11046_v36 = vadd.f32 %v11045_v27, %v10681_v33  ;;  %v10896_v18 = vpop.f32.mrb[26].mxu0  ;;  %v19690_v5 = vsel %vm11116_vm5, %v11040_v7, %v11180_v22  ;;  %v11181_v41 = vmul.f32 0.01, %v19673_v50 }
 0x664   : > { %v19693_v48 = vadd.f32 %v11047_v47, %v10681_v33  ;;  %v11239_v43 = vsel %vm11111_vm2, %v10875_v49, %v11175_v6  ;;  %v11051_v37 = vpop.f32.mrb[24].mxu1  ;;  %v10898_v8 = vpop.f32.mrb[27].mxu0  ;;  %v11235_v59 = vsel %vm11107_vm3, %v19631_v58, %v19639_v28  ;;  %vm11119_vm13 = vcmp.gt.f32.partialorder %v10887_v52, 0.0 }
 0x665   : > { %v19696_v11 = vsel %vm11118_vm4, %v10885_v12, %v11182_v57  ;;  %vm11120_vm1 = vcmp.gt.f32.partialorder %v11046_v36, 0.0  ;;  %v11184_v14 = vmul.f32 0.01, %v11046_v36  ;;  %v11053_v2 = vpop.f32.mrb[25].mxu1  ;;  %v11183_v38 = vmul.f32 0.01, %v10887_v52  ;;  %v10696_v12 = vpop.permute.xlu0 %10695 }
 0x666   : > { %v13177_v42 = vpack.c.bf16 %v19696_v11, %v19683_v4  ;;  %v11237_v60 = vsel %vm11109_vm11, %v19633_v20, %v19649_v3  ;;  %v13171_v0 = vpack.c.bf16 %v11239_v43, %v11235_v59  ;;  %v11241_v58 = vsel %vm11113_vm10, %v19651_v61, %v11177_v46  ;;  %v10701_v57 = vpop.permute.xlu1 %10700 }
 0x667   : > { %v19708_v15 = vsel %vm11120_vm1, %v11046_v36, %v11184_v14  ;;  %v10891_v28 = vadd.f32 %v10890_v1, %v10686_v54  ;;  %v10902_v35 = vpop.f32.mrb[28].mxu0  ;;  %v13203_v53 = vpack.c.bf16 %v11241_v58, %v11237_v60  ;;  %v11052_v44 = vadd.f32 %v11051_v37, %v10686_v54 }
 0x668   : > { %v13209_v49 = vpack.c.bf16 %v19708_v15, %v19690_v5  ;;  %v19715_v56 = vadd.f32 %v10892_v24, %v10686_v54  ;;  %v11057_v34 = vpop.f32.mrb[26].mxu1  ;;  %v10904_v31 = vpop.f32.mrb[29].mxu0  ;;  %13172 = vmatprep.subr.bf16.mxu0 %v13171_v0  ;;  %v19717_v3 = vadd.f32 %v11053_v2, %v10686_v54  ;;  %v10897_v26 = vadd.f32 %v10896_v18, %v10691_v45 }
 0x669   : > { %vm11122_vm9 = vcmp.gt.f32.partialorder %v10891_v28, 0.0  ;;  %v11186_v20 = vmul.f32 0.01, %v10891_v28  ;;  %v11059_v55 = vpop.f32.mrb[27].mxu1  ;;  %vm11121_vm14 = vcmp.gt.f32.partialorder %v19693_v48, 0.0  ;;  %13204 = vmatprep.subr.bf16.mxu1 %v13203_v53  ;;  %13174 = vmatpush1.bf16.msra.mxu0 %v13173_v17  ;;  %vm11124_vm15 = vcmp.gt.f32.partialorder %v11052_v44, 0.0 }
 0x66a   : > { %v11185_v61 = vmul.f32 0.01, %v19693_v48  ;;  %v11188_v25 = vmul.f32 0.01, %v11052_v44  ;;  %13206 = vmatpush1.bf16.msra.mxu1 %v13205_v21  ;;  %vm11123_vm6 = vcmp.gt.f32.partialorder %v19715_v56, 0.0  ;;  %vm11126_vm3 = vcmp.gt.f32.partialorder %v10897_v26, 0.0 }
 0x66b   : > { %v19727_v6 = vsel %vm11122_vm9, %v10891_v28, %v11186_v20  ;;  %v11187_v19 = vmul.f32 0.01, %v19715_v56  ;;  %v10908_v62 = vpop.f32.mrb[30].mxu0  ;;  %v19732_v30 = vmul.f32 0.01, %v19717_v3  ;;  %v11058_v16 = vadd.f32 %v11057_v34, %v10691_v45 }
 0x66c   : > { %v11190_v10 = vmul.f32 0.01, %v10897_v26  ;;  %v10899_v23 = vadd.f32 %v10898_v8, %v10691_v45  ;;  %v11063_v17 = vpop.f32.mrb[28].mxu1  ;;  %v10910_v9 = vpop.f32.mrb[31].mxu0  ;;  %v19734_v33 = vsel %vm11124_vm15, %v11052_v44, %v11188_v25  ;;  %v11060_v39 = vadd.f32 %v11059_v55, %v10691_v45 }
 0x66d   : > { %v11243_v13 = vsel %vm11115_vm8, %v19671_v40, %v19687_v32  ;;  %v11247_v21 = vsel %vm11119_vm13, %v10887_v52, %v11183_v38  ;;  %v11065_v63 = vpop.f32.mrb[29].mxu1  ;;  %vm11125_vm11 = vcmp.gt.f32.partialorder %v19717_v3, 0.0  ;;  %vm11128_vm0 = vcmp.gt.f32.partialorder %v11058_v16, 0.0 }
 0x66e   : > { %v19742_v7 = vsel %vm11126_vm3, %v10897_v26, %v11190_v10  ;;  %v11192_v1 = vmul.f32 0.01, %v11058_v16  ;;  %v11245_v29 = vsel %vm11117_vm12, %v19673_v50, %v11181_v41  ;;  %vm11127_vm2 = vcmp.gt.f32.partialorder %v10899_v23, 0.0  ;;  %v11270_v10 = vld [vmem:[%s20244_s4 + $0x20] sm:$0xff] }
 0x66f   : > { %v13181_v27 = vpack.c.bf16 %v19742_v7, %v19727_v6  ;;  %v11191_v24 = vmul.f32 0.01, %v10899_v23  ;;  %vm11129_vm7 = vcmp.gt.f32.partialorder %v11060_v39, 0.0  ;;  %v13175_v46 = vpack.c.bf16 %v11247_v21, %v11243_v13  ;;  %v11277_v13 = vld [vmem:[%s20244_s4 + $0x58] sm:$0xff]  ;;  %v11278_v21 = vld [vmem:[%s20244_s4 + $0x60] sm:$0xff]  ;;  %v11280_v7 = vld [vmem:[%s20244_s4 + $0x70] sm:$0xff] }
 0x670   : > { %v11256_v40 = vsel %vm11128_vm0, %v11058_v16, %v11192_v1  ;;  %v11249_v22 = vsel %vm11121_vm14, %v19693_v48, %v11185_v61  ;;  %v10903_v32 = vadd.f32 %v10902_v35, %v10696_v12  ;;  %v11069_v47 = vpop.f32.mrb[30].mxu1  ;;  %v11064_v50 = vadd.f32 %v11063_v17, %v10696_v12  ;;  %v11271_v16 = vld [vmem:[%s20244_s4 + $0x28] sm:$0xff]  ;;  %v11273_v17 = vld [vmem:[%s20244_s4 + $0x38] sm:$0xff] }
 0x671   : > { %v13213_v36 = vpack.c.bf16 %v11256_v40, %v19734_v33  ;;  %v13207_v52 = vpack.c.bf16 %v11249_v22, %v11245_v29  ;;  %v10905_v18 = vadd.f32 %v10904_v31, %v10696_v12  ;;  %v11071_v41 = vpop.f32.mrb[31].mxu1  ;;  %13176 = vmatprep.subr.bf16.mxu0 %v13175_v46  ;;  %v11066_v37 = vadd.f32 %v11065_v63, %v10696_v12  ;;  %v11275_v33 = vld [vmem:[%s20244_s4 + $0x48] sm:$0xff]  ;;  %v11281_v1 = vld [vmem:[%s20244_s4 + $0x78] sm:$0xff]  ;;  %v11301_v29 = vpop.permute.xlu0 %11300 }
 0x672   : > { %vm11130_vm10 = vcmp.gt.f32.partialorder %v10903_v32, 0.0  ;;  %v11194_v43 = vmul.f32 0.01, %v10903_v32  ;;  %v10909_v8 = vadd.f32 %v10908_v62, %v10701_v57  ;;  %v11193_v14 = vmul.f32 0.01, %v11060_v39  ;;  %13178 = vmatpush1.bf16.msra.mxu0 %v13177_v42  ;;  %v11268_v62 = vld [vmem:[%s20244_s4 + $0x10] sm:$0xff] }
 0x673   : > { %13208 = vmatprep.subr.bf16.mxu1 %v13207_v52  ;;  %vm11132_vm5 = vcmp.gt.f32.partialorder %v11064_v50, 0.0  ;;  %v11196_v48 = vmul.f32 0.01, %v11064_v50  ;;  %vm11131_vm8 = vcmp.gt.f32.partialorder %v10905_v18, 0.0  ;;  %v11195_v2 = vmul.f32 0.01, %v10905_v18 }
 0x674   : > { %13210 = vmatpush1.bf16.msra.mxu1 %v13209_v49  ;;  %v11258_v59 = vsel %vm11130_vm10, %v10903_v32, %v11194_v43  ;;  %vm11133_vm4 = vcmp.gt.f32.partialorder %v11066_v37, 0.0  ;;  %vm11134_vm12 = vcmp.gt.f32.partialorder %v10909_v8, 0.0  ;;  %v11197_v54 = vmul.f32 0.01, %v11066_v37  ;;  %v11279_v63 = vld [vmem:[%s20244_s4 + $0x68] sm:$0xff] }
 0x675   : > { %v11198_v38 = vmul.f32 0.01, %v10909_v8  ;;  %v11070_v60 = vadd.f32 %v11069_v47, %v10701_v57  ;;  %v10911_v45 = vadd.f32 %v10910_v9, %v10701_v57  ;;  %v11260_v0 = vsel %vm11132_vm5, %v11064_v50, %v11196_v48  ;;  %v11274_v9 = vld [vmem:[%s20244_s4 + $0x40] sm:$0xff] }
 0x676   : > { %v11072_v58 = vadd.f32 %v11071_v41, %v10701_v57  ;;  %v11251_v4 = vsel %vm11123_vm6, %v19715_v56, %v11187_v19  ;;  %v11255_v11 = vsel %vm11127_vm2, %v10899_v23, %v11191_v24  ;;  %v11253_v44 = vsel %vm11125_vm11, %v19717_v3, %v19732_v30  ;;  %v11266_v3 = vld [vmem:[%s20244_s4] sm:$0xff]  ;;  %v11267_v19 = vld [vmem:[%s20244_s4 + $0x8] sm:$0xff]  ;;  %v11269_v30 = vld [vmem:[%s20244_s4 + $0x18] sm:$0xff] }
 0x677   : > { %v11262_v42 = vsel %vm11134_vm12, %v10909_v8, %v11198_v38  ;;  %vm11136_vm1 = vcmp.gt.f32.partialorder %v11070_v60, 0.0  ;;  %v11200_v5 = vmul.f32 0.01, %v11070_v60  ;;  %vm11135_vm13 = vcmp.gt.f32.partialorder %v10911_v45, 0.0  ;;  %v11272_v23 = vld [vmem:[%s20244_s4 + $0x30] sm:$0xff]  ;;  %v11311_v38 = vpop.permute.xlu0 %11310 }
 0x678   : > { %v13185_v15 = vpack.c.bf16 %v11262_v42, %v11258_v59  ;;  %v11199_v28 = vmul.f32 0.01, %v10911_v45  ;;  %vm11137_vm9 = vcmp.gt.f32.partialorder %v11072_v58, 0.0  ;;  %v11201_v35 = vmul.f32 0.01, %v11072_v58 }
 0x679   : > { %v11264_v49 = vsel %vm11136_vm1, %v11070_v60, %v11200_v5  ;;  %v13179_v53 = vpack.c.bf16 %v11255_v11, %v11251_v4  ;;  %v11257_v34 = vsel %vm11129_vm7, %v11060_v39, %v11193_v14  ;;  %v11259_v20 = vsel %vm11131_vm8, %v10905_v18, %v11195_v2  ;;  %v11276_v39 = vld [vmem:[%s20244_s4 + $0x50] sm:$0xff] }
 0x67a   : > { %v13217_v56 = vpack.c.bf16 %v11264_v49, %v11260_v0  ;;  %v13211_v31 = vpack.c.bf16 %v11257_v34, %v11253_v44  ;;  %v11263_v26 = vsel %vm11135_vm13, %v10911_v45, %v11199_v28  ;;  %v11261_v61 = vsel %vm11133_vm4, %v11066_v37, %v11197_v54 }
 0x67b   : > { %13180 = vmatprep.subr.bf16.mxu0 %v13179_v53  ;;  %v13183_v55 = vpack.c.bf16 %v11263_v26, %v11259_v20  ;;  %v11265_v25 = vsel %vm11137_vm9, %v11072_v58, %v11201_v35 }
 0x67c   : > { %13212 = vmatprep.subr.bf16.mxu1 %v13211_v31  ;;  %13182 = vmatpush1.bf16.msra.mxu0 %v13181_v27  ;;  %v13215_v6 = vpack.c.bf16 %v11265_v25, %v11261_v61 }
 0x67d   : > { %13214 = vmatpush1.bf16.msra.mxu1 %v13213_v36  ;;  %13184 = vmatprep.subr.bf16.mxu0 %v13183_v55  ;;  %v11306_v36 = vpop.permute.xlu1 %11305 }
 0x67e   : > { %13216 = vmatprep.subr.bf16.mxu1 %v13215_v6  ;;  %v11321_v6 = vpop.permute.xlu0 %11320 }
 0x680   : > { %13186 = vmatpush1.bf16.msra.mxu0 %v13185_v15 }
 0x681   : > { %13218 = vmatpush1.bf16.msra.mxu1 %v13217_v56 }
 0x683   : > { %11443 = vmatmul.mubr.f32.vlgmr.msra.gmra.mrb[32].mxu0 %v11266_v3 }
 0x684   : > { %11604 = vmatmul.mubr.f32.vlgmr.msra.gmra.mrb[32].mxu1 %v11266_v3  ;;  %11448 = vmatprep.mubr.f32.mxu0 %v13861_v51  ;;  %v11316_v3 = vpop.permute.xlu1 %11315 }
 0x685   : > { %11609 = vmatprep.mubr.f32.mxu1 %v13861_v51 }
 0x687   : > { %11449 = vmatmul.mubr.f32.gmra.mrb[34].mxu0 %v11267_v19 }
 0x688   : > { %11610 = vmatmul.mubr.f32.gmra.mrb[34].mxu1 %v11267_v19  ;;  %11454 = vmatprep.mubr.f32.mxu0 %v13861_v51 }
 0x689   : > { %11615 = vmatprep.mubr.f32.mxu1 %v13861_v51 }
 0x68b   : > { %11455 = vmatmul.mubr.f32.gmra.mrb[36].mxu0 %v11268_v62 }
 0x68c   : > { %11616 = vmatmul.mubr.f32.gmra.mrb[36].mxu1 %v11268_v62  ;;  %11460 = vmatprep.mubr.f32.mxu0 %v13861_v51 }
 0x68d   : > { %11621 = vmatprep.mubr.f32.mxu1 %v13861_v51 }
 0x68f   : > { %11461 = vmatmul.mubr.f32.gmra.mrb[38].mxu0 %v11269_v30 }
 0x690   : > { %11622 = vmatmul.mubr.f32.gmra.mrb[38].mxu1 %v11269_v30  ;;  %11466 = vmatprep.mubr.f32.mxu0 %v13861_v51 }
 0x691   : > { %11627 = vmatprep.mubr.f32.mxu1 %v13861_v51 }
 0x693   : > { %11467 = vmatmul.mubr.f32.gmra.mrb[40].mxu0 %v11270_v10 }
 0x694   : > { %11628 = vmatmul.mubr.f32.gmra.mrb[40].mxu1 %v11270_v10  ;;  %11472 = vmatprep.mubr.f32.mxu0 %v13861_v51 }
 0x695   : > { %11633 = vmatprep.mubr.f32.mxu1 %v13861_v51 }
 0x697   : > { %11473 = vmatmul.mubr.f32.gmra.mrb[42].mxu0 %v11271_v16 }
 0x698   : > { %11634 = vmatmul.mubr.f32.gmra.mrb[42].mxu1 %v11271_v16  ;;  %11478 = vmatprep.mubr.f32.mxu0 %v13861_v51 }
 0x699   : > { %11639 = vmatprep.mubr.f32.mxu1 %v13861_v51 }
 0x69b   : > { %11479 = vmatmul.mubr.f32.gmra.mrb[44].mxu0 %v11272_v23 }
 0x69c   : > { %11640 = vmatmul.mubr.f32.gmra.mrb[44].mxu1 %v11272_v23  ;;  %11484 = vmatprep.mubr.f32.mxu0 %v13861_v51 }
 0x69d   : > { %11645 = vmatprep.mubr.f32.mxu1 %v13861_v51 }
 0x69f   : > { %11485 = vmatmul.mubr.f32.gmra.mrb[46].mxu0 %v11273_v17 }
 0x6a0   : > { %11646 = vmatmul.mubr.f32.gmra.mrb[46].mxu1 %v11273_v17  ;;  %11490 = vmatprep.mubr.f32.mxu0 %v13861_v51 }
 0x6a1   : > { %11651 = vmatprep.mubr.f32.mxu1 %v13861_v51 }
 0x6a3   : > { %11491 = vmatmul.mubr.f32.gmra.mrb[48].mxu0 %v11274_v9 }
 0x6a4   : > { %11652 = vmatmul.mubr.f32.gmra.mrb[48].mxu1 %v11274_v9  ;;  %11496 = vmatprep.mubr.f32.mxu0 %v13861_v51 }
 0x6a5   : > { %11657 = vmatprep.mubr.f32.mxu1 %v13861_v51 }
 0x6a7   : > { %11497 = vmatmul.mubr.f32.gmra.mrb[50].mxu0 %v11275_v33 }
 0x6a8   : > { %11658 = vmatmul.mubr.f32.gmra.mrb[50].mxu1 %v11275_v33  ;;  %11502 = vmatprep.mubr.f32.mxu0 %v13861_v51 }
 0x6a9   : > { %11663 = vmatprep.mubr.f32.mxu1 %v13861_v51 }
 0x6ab   : > { %11503 = vmatmul.mubr.f32.gmra.mrb[52].mxu0 %v11276_v39 }
 0x6ac   : > { %11664 = vmatmul.mubr.f32.gmra.mrb[52].mxu1 %v11276_v39  ;;  %11508 = vmatprep.mubr.f32.mxu0 %v13861_v51 }
 0x6ad   : > { %11669 = vmatprep.mubr.f32.mxu1 %v13861_v51 }
 0x6af   : > { %11509 = vmatmul.mubr.f32.gmra.mrb[54].mxu0 %v11277_v13 }
 0x6b0   : > { %11670 = vmatmul.mubr.f32.gmra.mrb[54].mxu1 %v11277_v13  ;;  %11514 = vmatprep.mubr.f32.mxu0 %v13861_v51 }
 0x6b1   : > { %11675 = vmatprep.mubr.f32.mxu1 %v13861_v51 }
 0x6b3   : > { %11515 = vmatmul.mubr.f32.gmra.mrb[56].mxu0 %v11278_v21 }
 0x6b4   : > { %11676 = vmatmul.mubr.f32.gmra.mrb[56].mxu1 %v11278_v21  ;;  %11520 = vmatprep.mubr.f32.mxu0 %v13861_v51 }
 0x6b5   : > { %11681 = vmatprep.mubr.f32.mxu1 %v13861_v51 }
 0x6b7   : > { %11521 = vmatmul.mubr.f32.gmra.mrb[58].mxu0 %v11279_v63 }
 0x6b8   : > { %11682 = vmatmul.mubr.f32.gmra.mrb[58].mxu1 %v11279_v63  ;;  %11526 = vmatprep.mubr.f32.mxu0 %v13861_v51 }
 0x6b9   : > { %11687 = vmatprep.mubr.f32.mxu1 %v13861_v51 }
 0x6bb   : > { %11527 = vmatmul.mubr.f32.gmra.mrb[60].mxu0 %v11280_v7 }
 0x6bc   : > { %11688 = vmatmul.mubr.f32.gmra.mrb[60].mxu1 %v11280_v7  ;;  %11532 = vmatprep.mubr.f32.mxu0 %v13861_v51 }
 0x6bd   : > { %11693 = vmatprep.mubr.f32.mxu1 %v13861_v51 }
 0x6bf   : > { %11533 = vmatmul.mubr.f32.gmra.mrb[62].mxu0 %v11281_v1 }
 0x6c0   : > { %11694 = vmatmul.mubr.f32.gmra.mrb[62].mxu1 %v11281_v1  ;;  %11963 = vmatprep.mubr.f32.mxu0 %v13861_v51 }
 0x6c1   : > { %12034 = vmatprep.mubr.f32.mxu1 %v13861_v51 }
 0x756   : > { %v11444_v12 = vpop.f32.mrb[32].mxu0 }
 0x757   : > { %v11445_v27 = vadd.f32 %v11444_v12, %v11301_v29  ;;  %v11605_v24 = vpop.f32.mrb[32].mxu1  ;;  %v11446_v40 = vpop.f32.mrb[33].mxu0 }
 0x758   : > { %v11606_v46 = vadd.f32 %v11605_v24, %v11301_v29  ;;  %v11447_v22 = vadd.f32 %v11446_v40, %v11301_v29  ;;  %v11607_v32 = vpop.f32.mrb[33].mxu1 }
 0x759   : > { %v11764_v47 = vmul.f32 0.01, %v11445_v27  ;;  %v11608_v57 = vadd.f32 %v11607_v32, %v11301_v29  ;;  %vm11700_vm14 = vcmp.gt.f32.partialorder %v11445_v27, 0.0 }
 0x75a   : > { %vm11702_vm15 = vcmp.gt.f32.partialorder %v11606_v46, 0.0  ;;  %v11766_v52 = vmul.f32 0.01, %v11606_v46  ;;  %v11450_v50 = vpop.f32.mrb[34].mxu0  ;;  %vm11701_vm6 = vcmp.gt.f32.partialorder %v11447_v22, 0.0 }
 0x75b   : > { %v11611_v18 = vpop.f32.mrb[34].mxu1  ;;  %v11765_v41 = vmul.f32 0.01, %v11447_v22  ;;  %v11451_v43 = vadd.f32 %v11450_v50, %v11306_v36  ;;  %v11452_v8 = vpop.f32.mrb[35].mxu0  ;;  %v19850_v48 = vsel %vm11700_vm14, %v11445_v27, %v11764_v47  ;;  %v11767_v59 = vmul.f32 0.01, %v11608_v57 }
 0x75c   : > { %v11612_v37 = vadd.f32 %v11611_v18, %v11306_v36  ;;  %v11613_v14 = vpop.f32.mrb[35].mxu1  ;;  %v11453_v2 = vadd.f32 %v11452_v8, %v11306_v36  ;;  %vm11703_vm0 = vcmp.gt.f32.partialorder %v11608_v57, 0.0  ;;  %v11830_v4 = vsel %vm11702_vm15, %v11606_v46, %v11766_v52 }
 0x75d   : > { %v11614_v54 = vadd.f32 %v11613_v14, %v11306_v36  ;;  %vm11704_vm3 = vcmp.gt.f32.partialorder %v11451_v43, 0.0  ;;  %v11768_v60 = vmul.f32 0.01, %v11451_v43  ;;  %v11829_v61 = vsel %vm11701_vm6, %v11447_v22, %v11765_v41  ;;  %v11326_v36 = vpop.permute.xlu1 %11325 }
 0x75e   : > { %vm11706_vm11 = vcmp.gt.f32.partialorder %v11612_v37, 0.0  ;;  %v11770_v45 = vmul.f32 0.01, %v11612_v37  ;;  %vm11705_vm2 = vcmp.gt.f32.partialorder %v11453_v2, 0.0  ;;  %v11769_v0 = vmul.f32 0.01, %v11453_v2 }
 0x75f   : > { %v11771_v58 = vmul.f32 0.01, %v11614_v54  ;;  %v11832_v11 = vsel %vm11704_vm3, %v11451_v43, %v11768_v60  ;;  %vm11707_vm7 = vcmp.gt.f32.partialorder %v11614_v54, 0.0  ;;  %v11456_v5 = vpop.f32.mrb[36].mxu0  ;;  %v11617_v15 = vpop.f32.mrb[36].mxu1  ;;  %v11831_v62 = vsel %vm11703_vm0, %v11608_v57, %v11767_v59 }
 0x760   : > { %v11834_v42 = vsel %vm11706_vm11, %v11612_v37, %v11770_v45  ;;  %v13221_v28 = vpack.c.bf16 %v11832_v11, %v19850_v48  ;;  %v11457_v49 = vadd.f32 %v11456_v5, %v11311_v38  ;;  %v11618_v53 = vadd.f32 %v11617_v15, %v11311_v38  ;;  %v11458_v44 = vpop.f32.mrb[37].mxu0  ;;  %v11619_v34 = vpop.f32.mrb[37].mxu1 }
 0x761   : > { %v13253_v35 = vpack.c.bf16 %v11834_v42, %v11830_v4  ;;  %v11459_v56 = vadd.f32 %v11458_v44, %v11311_v38  ;;  %v19854_v31 = vadd.f32 %v11619_v34, %v11311_v38  ;;  %v11833_v26 = vsel %vm11705_vm2, %v11453_v2, %v11769_v0 }
 0x762   : > { %v11462_v20 = vpop.f32.mrb[38].mxu0  ;;  %v11772_v55 = vmul.f32 0.01, %v11457_v49  ;;  %v11835_v25 = vsel %vm11707_vm7, %v11614_v54, %v11771_v58  ;;  %vm11708_vm10 = vcmp.gt.f32.partialorder %v11457_v49, 0.0  ;;  %vm11710_vm5 = vcmp.gt.f32.partialorder %v11618_v53, 0.0 }
 0x763   : > { %v11774_v19 = vmul.f32 0.01, %v11618_v53  ;;  %vm11709_vm8 = vcmp.gt.f32.partialorder %v11459_v56, 0.0  ;;  %v11773_v30 = vmul.f32 0.01, %v11459_v56  ;;  %v11463_v10 = vadd.f32 %v11462_v20, %v11316_v3  ;;  %v11623_v16 = vpop.f32.mrb[38].mxu1  ;;  %v11331_v20 = vpop.permute.xlu0 %11330 }
 0x764   : > { %v11464_v23 = vpop.f32.mrb[39].mxu0  ;;  %v13219_v17 = vpack.c.bf16 %v11833_v26, %v11829_v61  ;;  %vm11711_vm4 = vcmp.gt.f32.partialorder %v19854_v31, 0.0  ;;  %v19861_v9 = vmul.f32 0.01, %v19854_v31  ;;  %v11624_v33 = vadd.f32 %v11623_v16, %v11316_v3  ;;  %v11625_v13 = vpop.f32.mrb[39].mxu1 }
 0x765   : > { %v11465_v39 = vadd.f32 %v11464_v23, %v11316_v3  ;;  %v13251_v21 = vpack.c.bf16 %v11835_v25, %v11831_v62  ;;  %v19864_v7 = vsel %vm11708_vm10, %v11457_v49, %v11772_v55  ;;  %vm11712_vm12 = vcmp.gt.f32.partialorder %v11463_v10, 0.0 }
 0x766   : > { %v11468_v63 = vpop.f32.mrb[40].mxu0  ;;  %v11776_v1 = vmul.f32 0.01, %v11463_v10  ;;  %13220 = vmatprep.subr.bf16.mxu0 %v13219_v17  ;;  %v19867_v24 = vsel %vm11710_vm5, %v11618_v53, %v11774_v19  ;;  %vm11714_vm1 = vcmp.gt.f32.partialorder %v11624_v33, 0.0  ;;  %v11778_v40 = vmul.f32 0.01, %v11624_v33 }
 0x767   : > { %v11469_v29 = vadd.f32 %v11468_v63, %v11321_v6  ;;  %v11629_v12 = vpop.f32.mrb[40].mxu1  ;;  %v11470_v27 = vpop.f32.mrb[41].mxu0  ;;  %v11626_v46 = vadd.f32 %v11625_v13, %v11316_v3  ;;  %13252 = vmatprep.subr.bf16.mxu1 %v13251_v21  ;;  %13222 = vmatpush1.bf16.msra.mxu0 %v13221_v28  ;;  %v11777_v32 = vmul.f32 0.01, %v11465_v39  ;;  %v11837_v57 = vsel %vm11709_vm8, %v11459_v56, %v11773_v30 }
 0x768   : > { %v11840_v22 = vsel %vm11712_vm12, %v11463_v10, %v11776_v1  ;;  %13254 = vmatpush1.bf16.msra.mxu1 %v13253_v35  ;;  %v11631_v47 = vpop.f32.mrb[41].mxu1  ;;  %v11842_v50 = vsel %vm11714_vm1, %v11624_v33, %v11778_v40  ;;  %v11630_v41 = vadd.f32 %v11629_v12, %v11321_v6  ;;  %v19872_v8 = vadd.f32 %v11470_v27, %v11321_v6 }
 0x769   : > { %vm11716_vm13 = vcmp.gt.f32.partialorder %v11469_v29, 0.0  ;;  %v13225_v52 = vpack.c.bf16 %v11840_v22, %v19864_v7  ;;  %v11780_v18 = vmul.f32 0.01, %v11469_v29  ;;  %v13257_v37 = vpack.c.bf16 %v11842_v50, %v19867_v24 }
 0x76a   : > { %v11474_v43 = vpop.f32.mrb[42].mxu0  ;;  %v19874_v14 = vadd.f32 %v11631_v47, %v11321_v6  ;;  %vm11713_vm9 = vcmp.gt.f32.partialorder %v11465_v39, 0.0  ;;  %vm11715_vm14 = vcmp.gt.f32.partialorder %v11626_v46, 0.0  ;;  %v11779_v54 = vmul.f32 0.01, %v11626_v46  ;;  %v11336_v6 = vpop.permute.xlu1 %11335 }
 0x76b   : > { %v11475_v48 = vadd.f32 %v11474_v43, %v11326_v36  ;;  %v11635_v59 = vpop.f32.mrb[42].mxu1  ;;  %v11476_v2 = vpop.f32.mrb[43].mxu0  ;;  %v19877_v45 = vsel %vm11716_vm13, %v11469_v29, %v11780_v18  ;;  %vm11718_vm15 = vcmp.gt.f32.partialorder %v11630_v41, 0.0  ;;  %v11782_v0 = vmul.f32 0.01, %v11630_v41 }
 0x76c   : > { %v11636_v38 = vadd.f32 %v11635_v59, %v11326_v36  ;;  %v11637_v60 = vpop.f32.mrb[43].mxu1  ;;  %v11781_v58 = vmul.f32 0.01, %v19872_v8  ;;  %vm11717_vm6 = vcmp.gt.f32.partialorder %v19872_v8, 0.0  ;;  %vm11719_vm0 = vcmp.gt.f32.partialorder %v19874_v14, 0.0 }
 0x76d   : > { %vm11720_vm3 = vcmp.gt.f32.partialorder %v11475_v48, 0.0  ;;  %v11784_v4 = vmul.f32 0.01, %v11475_v48  ;;  %v11477_v5 = vadd.f32 %v11476_v2, %v11326_v36  ;;  %v11841_v15 = vsel %vm11713_vm9, %v11465_v39, %v11777_v32 }
 0x76e   : > { %vm11722_vm11 = vcmp.gt.f32.partialorder %v11636_v38, 0.0  ;;  %v11480_v11 = vpop.f32.mrb[44].mxu0  ;;  %v11786_v42 = vmul.f32 0.01, %v11636_v38  ;;  %v11638_v53 = vadd.f32 %v11637_v60, %v11326_v36  ;;  %v13223_v44 = vpack.c.bf16 %v11841_v15, %v11837_v57 }
 0x76f   : > { %v11641_v28 = vpop.f32.mrb[44].mxu1  ;;  %v11482_v35 = vpop.f32.mrb[45].mxu0  ;;  %v19883_v49 = vsel %vm11720_vm3, %v11475_v48, %v11784_v4  ;;  %v11843_v34 = vsel %vm11715_vm14, %v11626_v46, %v11779_v54  ;;  %v19887_v26 = vsel %vm11718_vm15, %v11630_v41, %v11782_v0  ;;  %v11839_v25 = vsel %vm11711_vm4, %v19854_v31, %v19861_v9 }
 0x770   : > { %v11643_v56 = vpop.f32.mrb[45].mxu1  ;;  %v13229_v55 = vpack.c.bf16 %v19883_v49, %v19877_v45  ;;  %v19892_v61 = vsel %vm11722_vm11, %v11636_v38, %v11786_v42  ;;  %v11783_v3 = vmul.f32 0.01, %v19874_v14  ;;  %vm11721_vm2 = vcmp.gt.f32.partialorder %v11477_v5, 0.0  ;;  %13224 = vmatprep.subr.bf16.mxu0 %v13223_v44  ;;  %v11346_v4 = vpop.permute.xlu1 %11345 }
 0x771   : > { %v13261_v19 = vpack.c.bf16 %v19892_v61, %v19887_v26  ;;  %v13255_v62 = vpack.c.bf16 %v11843_v34, %v11839_v25  ;;  %13226 = vmatpush1.bf16.msra.mxu0 %v13225_v52  ;;  %v11481_v10 = vadd.f32 %v11480_v11, %v11331_v20  ;;  %v11642_v16 = vadd.f32 %v11641_v28, %v11331_v20 }
 0x772   : > { %v11486_v30 = vpop.f32.mrb[46].mxu0  ;;  %v19901_v23 = vadd.f32 %v11482_v35, %v11331_v20  ;;  %v19903_v17 = vadd.f32 %v11643_v56, %v11331_v20  ;;  %v11785_v31 = vmul.f32 0.01, %v11477_v5  ;;  %vm11723_vm7 = vcmp.gt.f32.partialorder %v11638_v53, 0.0 }
 0x773   : > { %v11647_v33 = vpop.f32.mrb[46].mxu1  ;;  %v11488_v39 = vpop.f32.mrb[47].mxu0  ;;  %13256 = vmatprep.subr.bf16.mxu1 %v13255_v62  ;;  %v11487_v9 = vadd.f32 %v11486_v30, %v11336_v6  ;;  %vm11724_vm10 = vcmp.gt.f32.partialorder %v11481_v10, 0.0  ;;  %v11788_v63 = vmul.f32 0.01, %v11481_v10  ;;  %vm11726_vm5 = vcmp.gt.f32.partialorder %v11642_v16, 0.0 }
 0x774   : > { %v11648_v13 = vadd.f32 %v11647_v33, %v11336_v6  ;;  %v11649_v21 = vpop.f32.mrb[47].mxu1  ;;  %13258 = vmatpush1.bf16.msra.mxu1 %v13257_v37  ;;  %v11790_v7 = vmul.f32 0.01, %v11642_v16  ;;  %v11787_v1 = vmul.f32 0.01, %v11638_v53  ;;  %v19911_v27 = vadd.f32 %v11488_v39, %v11336_v6  ;;  %v11341_v37 = vpop.permute.xlu0 %11340 }
 0x775   : > { %v19906_v29 = vmul.f32 0.01, %v19901_v23  ;;  %v19909_v12 = vmul.f32 0.01, %v19903_v17  ;;  %vm11725_vm8 = vcmp.gt.f32.partialorder %v19901_v23, 0.0  ;;  %vm11728_vm4 = vcmp.gt.f32.partialorder %v11487_v9, 0.0 }
 0x776   : > { %v11792_v24 = vmul.f32 0.01, %v11487_v9  ;;  %v11845_v40 = vsel %vm11717_vm6, %v19872_v8, %v11781_v58  ;;  %v11492_v46 = vpop.f32.mrb[48].mxu0  ;;  %v19917_v32 = vsel %vm11724_vm10, %v11481_v10, %v11788_v63  ;;  %v19919_v47 = vsel %vm11726_vm5, %v11642_v16, %v11790_v7 }
 0x777   : > { %v11653_v22 = vpop.f32.mrb[48].mxu1  ;;  %vm11730_vm12 = vcmp.gt.f32.partialorder %v11648_v13, 0.0  ;;  %v11794_v57 = vmul.f32 0.01, %v11648_v13  ;;  %vm11727_vm1 = vcmp.gt.f32.partialorder %v19903_v17, 0.0  ;;  %v19924_v52 = vadd.f32 %v11649_v21, %v11336_v6  ;;  %v11494_v41 = vpop.f32.mrb[49].mxu0 }
 0x778   : > { %v19922_v36 = vsel %vm11728_vm4, %v11487_v9, %v11792_v24  ;;  %v11849_v50 = vsel %vm11721_vm2, %v11477_v5, %v11785_v31  ;;  %v11847_v18 = vsel %vm11719_vm0, %v19874_v14, %v11783_v3  ;;  %v11655_v43 = vpop.f32.mrb[49].mxu1  ;;  %v11851_v2 = vsel %vm11723_vm7, %v11638_v53, %v11787_v1  ;;  %v11351_v6 = vpop.permute.xlu0 %11350 }
 0x779   : > { %v13233_v8 = vpack.c.bf16 %v19922_v36, %v19917_v32  ;;  %v19932_v48 = vsel %vm11730_vm12, %v11648_v13, %v11794_v57  ;;  %v13227_v59 = vpack.c.bf16 %v11849_v50, %v11845_v40  ;;  %vm11729_vm13 = vcmp.gt.f32.partialorder %v19911_v27, 0.0  ;;  %v11356_v40 = vpop.permute.xlu1 %11355 }
 0x77a   : > { %v11498_v54 = vpop.f32.mrb[50].mxu0  ;;  %v13265_v38 = vpack.c.bf16 %v19932_v48, %v19919_v47  ;;  %v11793_v60 = vmul.f32 0.01, %v19911_v27  ;;  %v13259_v14 = vpack.c.bf16 %v11851_v2, %v11847_v18  ;;  %v11493_v11 = vadd.f32 %v11492_v46, %v11341_v37 }
 0x77b   : > { %v11659_v0 = vpop.f32.mrb[50].mxu1  ;;  %v11500_v58 = vpop.f32.mrb[51].mxu0  ;;  %13228 = vmatprep.subr.bf16.mxu0 %v13227_v59  ;;  %v11654_v42 = vadd.f32 %v11653_v22, %v11341_v37  ;;  %v19939_v5 = vadd.f32 %v11494_v41, %v11341_v37  ;;  %v19941_v15 = vadd.f32 %v11655_v43, %v11341_v37  ;;  %vm11731_vm9 = vcmp.gt.f32.partialorder %v19924_v52, 0.0 }
 0x77c   : > { %v11661_v28 = vpop.f32.mrb[51].mxu1  ;;  %13260 = vmatprep.subr.bf16.mxu1 %v13259_v14  ;;  %13230 = vmatpush1.bf16.msra.mxu0 %v13229_v55  ;;  %v11499_v35 = vadd.f32 %v11498_v54, %v11346_v4  ;;  %v11660_v53 = vadd.f32 %v11659_v0, %v11346_v4  ;;  %v19947_v44 = vadd.f32 %v11500_v58, %v11346_v4  ;;  %vm11732_vm14 = vcmp.gt.f32.partialorder %v11493_v11, 0.0 }
 0x77d   : > { %13262 = vmatpush1.bf16.msra.mxu1 %v13261_v19  ;;  %v11796_v34 = vmul.f32 0.01, %v11493_v11  ;;  %vm11734_vm15 = vcmp.gt.f32.partialorder %v11654_v42, 0.0  ;;  %v11798_v56 = vmul.f32 0.01, %v11654_v42  ;;  %vm11733_vm6 = vcmp.gt.f32.partialorder %v19939_v5, 0.0 }
 0x77e   : > { %v11795_v20 = vmul.f32 0.01, %v19924_v52  ;;  %v19954_v25 = vmul.f32 0.01, %v19939_v5  ;;  %v19957_v45 = vmul.f32 0.01, %v19941_v15  ;;  %v19968_v30 = vadd.f32 %v11661_v28, %v11346_v4 }
 0x77f   : > { %v19959_v49 = vsel %vm11732_vm14, %v11493_v11, %v11796_v34  ;;  %vm11736_vm3 = vcmp.gt.f32.partialorder %v11499_v35, 0.0  ;;  %v11800_v55 = vmul.f32 0.01, %v11499_v35  ;;  %v11504_v26 = vpop.f32.mrb[52].mxu0  ;;  %v11665_v61 = vpop.f32.mrb[52].mxu1  ;;  %v19962_v3 = vsel %vm11734_vm15, %v11654_v42, %v11798_v56 }
 0x780   : > { %vm11738_vm11 = vcmp.gt.f32.partialorder %v11660_v53, 0.0  ;;  %v11802_v19 = vmul.f32 0.01, %v11660_v53  ;;  %vm11737_vm0 = vcmp.gt.f32.partialorder %v19947_v44, 0.0  ;;  %vm11735_vm2 = vcmp.gt.f32.partialorder %v19941_v15, 0.0  ;;  %v11506_v33 = vpop.f32.mrb[53].mxu0 }
 0x781   : > { %v19966_v62 = vsel %vm11736_vm3, %v11499_v35, %v11800_v55  ;;  %v11853_v10 = vsel %vm11725_vm8, %v19901_v23, %v19906_v29  ;;  %v11857_v16 = vsel %vm11729_vm13, %v19911_v27, %v11793_v60  ;;  %v11667_v39 = vpop.f32.mrb[53].mxu1  ;;  %v11801_v13 = vmul.f32 0.01, %v19947_v44 }
 0x782   : > { %v13237_v31 = vpack.c.bf16 %v19966_v62, %v19959_v49  ;;  %v19979_v9 = vsel %vm11738_vm11, %v11660_v53, %v11802_v19  ;;  %v13231_v21 = vpack.c.bf16 %v11857_v16, %v11853_v10  ;;  %v11510_v63 = vpop.f32.mrb[54].mxu0  ;;  %vm11739_vm7 = vcmp.gt.f32.partialorder %v19968_v30, 0.0 }
 0x783   : > { %v11671_v7 = vpop.f32.mrb[54].mxu1  ;;  %v13269_v1 = vpack.c.bf16 %v19979_v9, %v19962_v3  ;;  %v11855_v23 = vsel %vm11727_vm1, %v19903_v17, %v19909_v12  ;;  %v11859_v29 = vsel %vm11731_vm9, %v19924_v52, %v11795_v20  ;;  %v11512_v27 = vpop.f32.mrb[55].mxu0  ;;  %v11505_v22 = vadd.f32 %v11504_v26, %v11351_v6 }
 0x784   : > { %v11673_v24 = vpop.f32.mrb[55].mxu1  ;;  %13232 = vmatprep.subr.bf16.mxu0 %v13231_v21  ;;  %v13263_v46 = vpack.c.bf16 %v11859_v29, %v11855_v23  ;;  %v11666_v57 = vadd.f32 %v11665_v61, %v11351_v6  ;;  %v19992_v50 = vadd.f32 %v11506_v33, %v11351_v6  ;;  %v19997_v18 = vadd.f32 %v11667_v39, %v11351_v6  ;;  %v11361_v20 = vpop.permute.xlu0 %11360 }
 0x785   : > { %13234 = vmatpush1.bf16.msra.mxu0 %v13233_v8  ;;  %v11511_v17 = vadd.f32 %v11510_v63, %v11356_v40  ;;  %v11672_v12 = vadd.f32 %v11671_v7, %v11356_v40  ;;  %v19999_v41 = vadd.f32 %v11512_v27, %v11356_v40  ;;  %vm11740_vm10 = vcmp.gt.f32.partialorder %v11505_v22, 0.0  ;;  %v11366_v26 = vpop.permute.xlu1 %11365 }
 0x786   : > { %v11516_v52 = vpop.f32.mrb[56].mxu0  ;;  %13264 = vmatprep.subr.bf16.mxu1 %v13263_v46  ;;  %v11804_v43 = vmul.f32 0.01, %v11505_v22  ;;  %vm11742_vm5 = vcmp.gt.f32.partialorder %v11666_v57, 0.0  ;;  %v11806_v37 = vmul.f32 0.01, %v11666_v57  ;;  %v11861_v0 = vsel %vm11733_vm6, %v19939_v5, %v19954_v25 }
 0x787   : > { %v11803_v59 = vmul.f32 0.01, %v19968_v30  ;;  %13266 = vmatpush1.bf16.msra.mxu1 %v13265_v38  ;;  %v20006_v32 = vmul.f32 0.01, %v19992_v50  ;;  %v20009_v36 = vmul.f32 0.01, %v19997_v18  ;;  %v20020_v38 = vadd.f32 %v11673_v24, %v11356_v40 }
 0x788   : > { %v20011_v8 = vsel %vm11740_vm10, %v11505_v22, %v11804_v43  ;;  %vm11741_vm8 = vcmp.gt.f32.partialorder %v19992_v50, 0.0  ;;  %vm11744_vm4 = vcmp.gt.f32.partialorder %v11511_v17, 0.0  ;;  %v11808_v2 = vmul.f32 0.01, %v11511_v17  ;;  %v11677_v54 = vpop.f32.mrb[56].mxu1  ;;  %v11518_v60 = vpop.f32.mrb[57].mxu0 }
 0x789   : > { %v20014_v14 = vsel %vm11742_vm5, %v11666_v57, %v11806_v37  ;;  %vm11743_vm12 = vcmp.gt.f32.partialorder %v19997_v18, 0.0  ;;  %vm11746_vm1 = vcmp.gt.f32.partialorder %v11672_v12, 0.0  ;;  %v11810_v47 = vmul.f32 0.01, %v11672_v12  ;;  %v11679_v4 = vpop.f32.mrb[57].mxu1 }
 0x78a   : > { %vm11745_vm13 = vcmp.gt.f32.partialorder %v19999_v41, 0.0  ;;  %v20018_v48 = vsel %vm11744_vm4, %v11511_v17, %v11808_v2  ;;  %v11865_v58 = vsel %vm11737_vm0, %v19947_v44, %v11801_v13  ;;  %v11522_v11 = vpop.f32.mrb[58].mxu0  ;;  %v11809_v35 = vmul.f32 0.01, %v19999_v41  ;;  %v11371_v2 = vpop.permute.xlu0 %11370 }
 0x78b   : > { %v13241_v42 = vpack.c.bf16 %v20018_v48, %v20011_v8  ;;  %v20031_v28 = vsel %vm11746_vm1, %v11672_v12, %v11810_v47  ;;  %v13235_v53 = vpack.c.bf16 %v11865_v58, %v11861_v0  ;;  %v11683_v34 = vpop.f32.mrb[58].mxu1  ;;  %v11524_v56 = vpop.f32.mrb[59].mxu0  ;;  %vm11747_vm9 = vcmp.gt.f32.partialorder %v20020_v38, 0.0 }
 0x78c   : > { %v13273_v5 = vpack.c.bf16 %v20031_v28, %v20014_v14  ;;  %v11863_v44 = vsel %vm11735_vm2, %v19941_v15, %v19957_v45  ;;  %v11867_v25 = vsel %vm11739_vm7, %v19968_v30, %v11803_v59  ;;  %v11685_v55 = vpop.f32.mrb[59].mxu1  ;;  %v11517_v6 = vadd.f32 %v11516_v52, %v11361_v20 }
 0x78d   : > { %13236 = vmatprep.subr.bf16.mxu0 %v13235_v53  ;;  %v13267_v61 = vpack.c.bf16 %v11867_v25, %v11863_v44  ;;  %v11678_v19 = vadd.f32 %v11677_v54, %v11361_v20  ;;  %v20044_v10 = vadd.f32 %v11518_v60, %v11361_v20  ;;  %v20049_v33 = vadd.f32 %v11679_v4, %v11361_v20 }
 0x78e   : > { %v11528_v16 = vpop.f32.mrb[60].mxu0  ;;  %13238 = vmatpush1.bf16.msra.mxu0 %v13237_v31  ;;  %v11523_v15 = vadd.f32 %v11522_v11, %v11366_v26  ;;  %v11684_v45 = vadd.f32 %v11683_v34, %v11366_v26  ;;  %v20051_v39 = vadd.f32 %v11524_v56, %v11366_v26  ;;  %vm11748_vm14 = vcmp.gt.f32.partialorder %v11517_v6, 0.0 }
 0x78f   : > { %v11689_v30 = vpop.f32.mrb[60].mxu1  ;;  %v11530_v13 = vpop.f32.mrb[61].mxu0  ;;  %13268 = vmatprep.subr.bf16.mxu1 %v13267_v61  ;;  %v11812_v21 = vmul.f32 0.01, %v11517_v6  ;;  %vm11750_vm15 = vcmp.gt.f32.partialorder %v11678_v19, 0.0  ;;  %vm11749_vm6 = vcmp.gt.f32.partialorder %v20044_v10, 0.0  ;;  %v11686_v40 = vadd.f32 %v11685_v55, %v11366_v26 }
 0x790   : > { %v11814_v63 = vmul.f32 0.01, %v11678_v19  ;;  %v11811_v7 = vmul.f32 0.01, %v20020_v38  ;;  %13270 = vmatpush1.bf16.msra.mxu1 %v13269_v1  ;;  %v11813_v49 = vmul.f32 0.01, %v20044_v10  ;;  %v11869_v46 = vsel %vm11741_vm8, %v19992_v50, %v20006_v32  ;;  %v11376_v32 = vpop.permute.xlu1 %11375 }
 0x791   : > { %v20059_v62 = vmul.f32 0.01, %v20049_v33  ;;  %v20061_v31 = vsel %vm11748_vm14, %v11517_v6, %v11812_v21  ;;  %vm11752_vm3 = vcmp.gt.f32.partialorder %v11523_v15, 0.0  ;;  %v11816_v29 = vmul.f32 0.01, %v11523_v15  ;;  %v11691_v27 = vpop.f32.mrb[61].mxu1 }
 0x792   : > { %v20063_v23 = vsel %vm11750_vm15, %v11678_v19, %v11814_v63  ;;  %v11534_v24 = vpop.f32.mrb[62].mxu0  ;;  %vm11751_vm11 = vcmp.gt.f32.partialorder %v20049_v33, 0.0  ;;  %vm11754_vm0 = vcmp.gt.f32.partialorder %v11684_v45, 0.0  ;;  %v11818_v3 = vmul.f32 0.01, %v11684_v45  ;;  %v11897_v63 = vpop.permute.xlu0 %11896 }
 0x793   : > { %vm11753_vm2 = vcmp.gt.f32.partialorder %v20051_v39, 0.0  ;;  %v11817_v9 = vmul.f32 0.01, %v20051_v39  ;;  %v11880_v1 = vsel %vm11752_vm3, %v11523_v15, %v11816_v29  ;;  %v11873_v22 = vsel %vm11745_vm13, %v19999_v41, %v11809_v35  ;;  %v11695_v57 = vpop.f32.mrb[62].mxu1  ;;  %v11536_v17 = vpop.f32.mrb[63].mxu0 }
 0x794   : > { %v13245_v12 = vpack.c.bf16 %v11880_v1, %v20061_v31  ;;  %v11882_v52 = vsel %vm11754_vm0, %v11684_v45, %v11818_v3  ;;  %v13239_v43 = vpack.c.bf16 %v11873_v22, %v11869_v46  ;;  %v11871_v37 = vsel %vm11743_vm12, %v19997_v18, %v20009_v36  ;;  %v11697_v59 = vpop.f32.mrb[63].mxu1 }
 0x795   : > { %v13277_v54 = vpack.c.bf16 %v11882_v52, %v20063_v23  ;;  %vm11755_vm7 = vcmp.gt.f32.partialorder %v11686_v40, 0.0  ;;  %v11819_v50 = vmul.f32 0.01, %v11686_v40  ;;  %v11875_v41 = vsel %vm11747_vm9, %v20020_v38, %v11811_v7 }
 0x796   : > { %13240 = vmatprep.subr.bf16.mxu0 %v13239_v43  ;;  %v13271_v60 = vpack.c.bf16 %v11875_v41, %v11871_v37  ;;  %v11529_v47 = vadd.f32 %v11528_v16, %v11371_v2  ;;  %v11690_v0 = vadd.f32 %v11689_v30, %v11371_v2  ;;  %v11531_v58 = vadd.f32 %v11530_v13, %v11371_v2 }
 0x797   : > { %13242 = vmatpush1.bf16.msra.mxu0 %v13241_v42  ;;  %v11692_v18 = vadd.f32 %v11691_v27, %v11371_v2  ;;  %v11535_v36 = vadd.f32 %v11534_v24, %v11376_v32  ;;  %v11696_v4 = vadd.f32 %v11695_v57, %v11376_v32  ;;  %v11537_v11 = vadd.f32 %v11536_v17, %v11376_v32 }
 0x798   : > { %13272 = vmatprep.subr.bf16.mxu1 %v13271_v60  ;;  %vm11756_vm10 = vcmp.gt.f32.partialorder %v11529_v47, 0.0  ;;  %v11820_v35 = vmul.f32 0.01, %v11529_v47  ;;  %vm11758_vm5 = vcmp.gt.f32.partialorder %v11690_v0, 0.0  ;;  %v11822_v53 = vmul.f32 0.01, %v11690_v0 }
 0x799   : > { %13274 = vmatpush1.bf16.msra.mxu1 %v13273_v5  ;;  %vm11757_vm8 = vcmp.gt.f32.partialorder %v11531_v58, 0.0  ;;  %v11821_v38 = vmul.f32 0.01, %v11531_v58  ;;  %vm11759_vm4 = vcmp.gt.f32.partialorder %v11692_v18, 0.0  ;;  %v11823_v34 = vmul.f32 0.01, %v11692_v18 }
 0x79a   : > { %v11884_v56 = vsel %vm11756_vm10, %v11529_v47, %v11820_v35  ;;  %v11886_v8 = vsel %vm11758_vm5, %v11690_v0, %v11822_v53  ;;  %vm11760_vm12 = vcmp.gt.f32.partialorder %v11535_v36, 0.0  ;;  %v11824_v48 = vmul.f32 0.01, %v11535_v36 }
 0x79b   : > { %vm11762_vm1 = vcmp.gt.f32.partialorder %v11696_v4, 0.0  ;;  %v11826_v42 = vmul.f32 0.01, %v11696_v4  ;;  %vm11761_vm13 = vcmp.gt.f32.partialorder %v11537_v11, 0.0  ;;  %v11825_v20 = vmul.f32 0.01, %v11537_v11 }
 0x79c   : > { %v11888_v44 = vsel %vm11760_vm12, %v11535_v36, %v11824_v48  ;;  %v11698_v25 = vadd.f32 %v11697_v59, %v11376_v32  ;;  %v11877_v55 = vsel %vm11749_vm6, %v20044_v10, %v11813_v49  ;;  %v11881_v14 = vsel %vm11753_vm2, %v20051_v39, %v11817_v9 }
 0x79d   : > { %v13249_v28 = vpack.c.bf16 %v11888_v44, %v11884_v56  ;;  %v11890_v5 = vsel %vm11762_vm1, %v11696_v4, %v11826_v42  ;;  %v13243_v26 = vpack.c.bf16 %v11881_v14, %v11877_v55  ;;  %v11879_v61 = vsel %vm11751_vm11, %v20049_v33, %v20059_v62  ;;  %v11892_v33 = vld [vmem:[%s20246_s6] sm:$0x7] }
 0x79e   : > { %v13281_v6 = vpack.c.bf16 %v11890_v5, %v11886_v8  ;;  %vm11763_vm9 = vcmp.gt.f32.partialorder %v11698_v25, 0.0  ;;  %v11827_v19 = vmul.f32 0.01, %v11698_v25  ;;  %v11883_v16 = vsel %vm11755_vm7, %v11686_v40, %v11819_v50 }
 0x79f   : > { %13244 = vmatprep.subr.bf16.mxu0 %v13243_v26  ;;  %v13275_v15 = vpack.c.bf16 %v11883_v16, %v11879_v61  ;;  %v11885_v10 = vsel %vm11757_vm8, %v11531_v58, %v11821_v38  ;;  %v11889_v45 = vsel %vm11761_vm13, %v11537_v11, %v11825_v20  ;;  %v11887_v30 = vsel %vm11759_vm4, %v11692_v18, %v11823_v34 }
 0x7a0   : > { %13246 = vmatpush1.bf16.msra.mxu0 %v13245_v12  ;;  %v13247_v39 = vpack.c.bf16 %v11889_v45, %v11885_v10  ;;  %v11891_v13 = vsel %vm11763_vm9, %v11698_v25, %v11827_v19  ;;  %vm12065_vm14 = vcmask 1042432   ;;  %vm12113_vm15 = vcmask 23552  }
 0x7a1   : > { %13276 = vmatprep.subr.bf16.mxu1 %v13275_v15  ;;  %v13279_v21 = vpack.c.bf16 %v11891_v13, %v11887_v30  ;;  %v13862_v13 = vmov 1966171168  }
 0x7a2   : > { %13278 = vmatpush1.bf16.msra.mxu1 %v13277_v54  ;;  %13248 = vmatprep.subr.bf16.mxu0 %v13247_v39  ;;  %v12102_v54 = vld [vmem:[%s20248_s8] sm:$0x7] }
 0x7a3   : > { %13280 = vmatprep.subr.bf16.mxu1 %v13279_v21  ;;  %v12410_v21 = vunpack.c.l.s4 %v13862_v13 }
 0x7a4   : > { %13250 = vmatpush1.bf16.msra.mxu0 %v13249_v28 }
 0x7a6   : > { %13282 = vmatpush1.bf16.msra.mxu1 %v13281_v6 }
 0x7a7   : > { %11964 = vmatmul.mubr.f32.vlgmr.msra.gmra.mrb[64].mxu0 %v11892_v33 }
 0x7a8   : > { %12193 = vmatprep.mubr.f32.mxu0 %v13861_v51 }
 0x7a9   : > { %12035 = vmatmul.mubr.f32.vlgmr.msra.gmra.mrb[64].mxu1 %v11892_v33 }
 0x7aa   : > { %12264 = vmatprep.mubr.f32.mxu1 %v13861_v51 }
 0x87a   : > { %v11965_v7 = vpop.f32.mrb[64].mxu0 }
 0x87b   : > { %v11966_v49 = vadd.f32 %v11965_v7, %v11897_v63  ;;  %v11967_v62 = vpop.f32.mrb[65].mxu0 }
 0x87c   : > { %v12036_v31 = vpop.f32.mrb[64].mxu1  ;;  %v11968_v23 = vadd.f32 %v11967_v62, %v11897_v63  ;;  %v12412_v62 = vlaneseq }
 0x87d   : > { %v13016_v29 = vmul.f32 -1.442695, %v11966_v49  ;;  %v12037_v27 = vadd.f32 %v12036_v31, %v11897_v63  ;;  %v12038_v24 = vpop.f32.mrb[65].mxu1 }
 0x87e   : > { %v13017_v3 = vmul.f32 -1.442695, %v11968_v23  ;;  %v12039_v9 = vadd.f32 %v12038_v24, %v11897_v63  ;;  %vm20157_vm6 = vcmp.lt.s32.totalorder %v12412_v62, 512 }
 0x87f   : > { %13720 = vpow2.f32 %v13016_v29  ;;  %v13018_v1 = vmul.f32 -1.442695, %v12037_v27 }
 0x880   : > { %13722 = vpow2.f32 %v13017_v3  ;;  %v13019_v40 = vmul.f32 -1.442695, %v12039_v9 }
 0x881   : > { %13724 = vpow2.f32 %v13018_v1  ;;  %v12411_v1 = vunpack.c.0.s8 %v12410_v21 }
 0x882   : > { %13726 = vpow2.f32 %v13019_v40 }
 0x889   : > { %v13721_v51 = vpop.eup %13720 }
 0x88a   : > { %v13723_v46 = vpop.eup %13722  ;;  %v12053_v22 = vadd.f32 1.0, %v13721_v51 }
 0x88b   : > { %v13725_v57 = vpop.eup %13724  ;;  %v12054_v17 = vadd.f32 1.0, %v13723_v46 }
 0x88c   : > { %v13727_v12 = vpop.eup %13726  ;;  %13728 = vrcp.f32 %v12053_v22  ;;  %v12055_v52 = vadd.f32 1.0, %v13725_v57  ;;  %v12413_v57 = vshrl.u32 %v12412_v62, 7 }
 0x88d   : > { %13730 = vrcp.f32 %v12054_v17  ;;  %v12056_v43 = vadd.f32 1.0, %v13727_v12 }
 0x88e   : > { %13732 = vrcp.f32 %v12055_v52 }
 0x88f   : > { %13734 = vrcp.f32 %v12056_v43 }
 0x896   : > { %v13729_v37 = vpop.eup %13728 }
 0x897   : > { %v13731_v59 = vpop.eup %13730  ;;  %v12391_v2 = vrot.slane %v13729_v37, 5  ;;  %v12066_v50 = vsel %vm12065_vm14, %v13729_v37, 0.0  ;;  %v13026_v41 = vmul.f32 -24.0, %v13729_v37 }
 0x898   : > { %v13733_v32 = vpop.eup %13732  ;;  %v12392_v60 = vrot.slane %v13731_v59, 5  ;;  %13020 = vmatprep.subr.msk.mxu0 %vm12065_vm14, %v13731_v59  ;;  %v12067_v47 = vrot.slane %v12066_v50, 4  ;;  %v12073_v0 = vsel %vm12065_vm14, %v13731_v59, 0.0  ;;  %v13027_v58 = vmul.f32 -24.0, %v13731_v59 }
 0x899   : > { %v13735_v18 = vpop.eup %13734  ;;  %v12393_v36 = vrot.slane %v13733_v32, 5  ;;  %13021 = vmatpush1.msk.msra.mxu0 %vm12065_vm14, %v13729_v37  ;;  %v12279_v4 = vmul.f32 1.442695, %v13026_v41  ;;  %12399 = vst [vmem:[%s20120_s27] sm:$0x38] %v12391_v2  ;;  %v12080_v11 = vsel %vm12065_vm14, %v13733_v32, 0.0  ;;  %v13028_v35 = vmul.f32 -24.0, %v13733_v32 }
 0x89a   : > { %v12394_v53 = vrot.slane %v13735_v18, 5  ;;  %13023 = vmatprep.subr.msk.mxu1 %vm12065_vm14, %v13735_v18  ;;  %13022 = vmatmul.mubr.msk.f32.vlgmr.msra.gmra.mrb[66].mxu0 %vm12113_vm15, %v12102_v54  ;;  %v12068_v38 = vadd.f32 %v12067_v47, %v12066_v50  ;;  %12400 = vst [vmem:[%s20120_s27 + $0x8] sm:$0x38] %v12392_v60  ;;  %v12081_v34 = vrot.slane %v12080_v11, 4  ;;  %v12074_v56 = vrot.slane %v12073_v0, 4 }
 0x89b   : > { %13024 = vmatpush1.msk.msra.mxu1 %vm12065_vm14, %v13733_v32  ;;  %13736 = vpow2.f32 %v12279_v4  ;;  %12401 = vst [vmem:[%s20120_s27 + $0x10] sm:$0x38] %v12393_v36  ;;  %v12283_v8 = vmul.f32 1.442695, %v13028_v35  ;;  %v12281_v48 = vmul.f32 1.442695, %v13027_v58  ;;  %v20143_v60 = vsub.s32 %v12411_v1, %v12413_v57 }
 0x89c   : > { %v12087_v42 = vsel %vm12065_vm14, %v13735_v18, 0.0  ;;  %13025 = vmatmul.mubr.msk.f32.vlgmr.msra.gmra.mrb[66].mxu1 %vm12113_vm15, %v12102_v54  ;;  %v12069_v20 = vrot.slane %v12068_v38, 2  ;;  %12402 = vst [vmem:[%s20120_s27 + $0x18] sm:$0x38] %v12394_v53  ;;  %v12082_v44 = vadd.f32 %v12081_v34, %v12080_v11  ;;  %v12075_v25 = vadd.f32 %v12074_v56, %v12073_v0 }
 0x89d   : > { %v12088_v55 = vrot.slane %v12087_v42, 4  ;;  %13738 = vpow2.f32 %v12283_v8  ;;  %v13029_v14 = vmul.f32 -24.0, %v13735_v18 }
 0x89e   : > { %v12070_v28 = vadd.f32 %v12069_v20, %v12068_v38  ;;  %v12083_v5 = vrot.slane %v12082_v44, 2  ;;  %v12076_v26 = vrot.slane %v12075_v25, 2  ;;  %13740 = vpow2.f32 %v12281_v48 }
 0x89f   : > { %v12089_v61 = vadd.f32 %v12088_v55, %v12087_v42  ;;  %v12285_v6 = vmul.f32 1.442695, %v13029_v14 }
 0x8a0   : > { %v12071_v19 = vrot.slane %v12070_v28, 1  ;;  %v12084_v16 = vadd.f32 %v12083_v5, %v12082_v44  ;;  %v12077_v15 = vadd.f32 %v12076_v26, %v12075_v25 }
 0x8a1   : > { %v12090_v10 = vrot.slane %v12089_v61, 2  ;;  %13742 = vpow2.f32 %v12285_v6 }
 0x8a2   : > { %v12072_v45 = vadd.f32 %v12071_v19, %v12070_v28  ;;  %v12085_v39 = vrot.slane %v12084_v16, 1  ;;  %v12078_v30 = vrot.slane %v12077_v15, 1 }
 0x8a3   : > { %v12091_v33 = vadd.f32 %v12090_v10, %v12089_v61 }
 0x8a4   : > { %v12094_v63 = vsub.f32 1.0, %v12072_v45  ;;  %v12086_v7 = vadd.f32 %v12085_v39, %v12084_v16  ;;  %v12079_v49 = vadd.f32 %v12078_v30, %v12077_v15 }
 0x8a5   : > { %v13737_v31 = vpop.eup %13736  ;;  %v12092_v23 = vrot.slane %v12091_v33, 1 }
 0x8a6   : > { %v20132_v29 = vmax.f32 %v12094_v63, 0.0  ;;  %v12287_v27 = vadd.f32 1.0, %v13737_v31  ;;  %v12096_v24 = vsub.f32 1.0, %v12086_v7  ;;  %v12095_v3 = vsub.f32 1.0, %v12079_v49 }
 0x8a7   : > { %v13739_v9 = vpop.eup %13738  ;;  %v12093_v40 = vadd.f32 %v12092_v23, %v12091_v33 }
 0x8a8   : > { %v13741_v51 = vpop.eup %13740  ;;  %13744 = vrcp.f32 %v12287_v27  ;;  %v13034_v46 = vmul.f32 -24.0, %v20132_v29  ;;  %v12375_v22 = vadd.f32 %v20132_v29, %v12072_v45  ;;  %v20136_v17 = vmax.f32 %v12096_v24, 0.0 }
 0x8a9   : > { %v12289_v12 = vadd.f32 1.0, %v13739_v9  ;;  %v20138_v52 = vmax.f32 %v12095_v3, 0.0  ;;  %v12288_v43 = vadd.f32 1.0, %v13741_v51  ;;  %v12097_v59 = vsub.f32 1.0, %v12093_v40 }
 0x8aa   : > { %v12343_v37 = vmul.f32 1.442695, %v13034_v46  ;;  %v12379_v54 = vsub.f32 1.0, %v12375_v22  ;;  %v13036_v50 = vmul.f32 -24.0, %v20136_v17  ;;  %v12377_v41 = vadd.f32 %v20136_v17, %v12086_v7 }
 0x8ab   : > { %v13743_v2 = vpop.eup %13742  ;;  %13746 = vrcp.f32 %v12289_v12  ;;  %v13035_v32 = vmul.f32 -24.0, %v20138_v52  ;;  %v12376_v58 = vadd.f32 %v20138_v52, %v12079_v49  ;;  %v12407_v36 = vcombine.low %v20132_v29, %v20138_v52 }
 0x8ac   : > { %13748 = vpow2.f32 %v12343_v37  ;;  %v12347_v47 = vmul.f32 1.442695, %v13036_v50  ;;  %v12381_v0 = vsub.f32 1.0, %v12377_v41  ;;  %v20148_v4 = vmax.f32 %v12097_v59, 0.0 }
 0x8ad   : > { %13750 = vrcp.f32 %v12288_v43  ;;  %v12345_v18 = vmul.f32 1.442695, %v13035_v32  ;;  %v12290_v11 = vadd.f32 1.0, %v13743_v2  ;;  %v12383_v35 = vand.u32 2147483647, %v12379_v54 }
 0x8ae   : > { %13752 = vpow2.f32 %v12347_v47  ;;  %v12380_v53 = vsub.f32 1.0, %v12376_v58  ;;  %v12415_v38 = vrot.slane %v12407_v36, %v20143_v60  ;;  %v13037_v34 = vmul.f32 -24.0, %v20148_v4 }
 0x8af   : > { %13754 = vpow2.f32 %v12345_v18  ;;  %v12378_v8 = vadd.f32 %v20148_v4, %v12093_v40  ;;  %v12408_v48 = vcombine.low %v20136_v17, %v20148_v4  ;;  %v12385_v20 = vand.u32 2147483647, %v12381_v0 }
 0x8b0   : > { %v12384_v56 = vand.u32 2147483647, %v12380_v53  ;;  %13756 = vrcp.f32 %v12290_v11  ;;  %v12349_v44 = vmul.f32 1.442695, %v13037_v34 }
 0x8b1   : > { %v12382_v14 = vsub.f32 1.0, %v12378_v8  ;;  %v12422_v28 = vrot.slane %v12408_v48, %v20143_v60 }
 0x8b2   : > { %v13745_v42 = vpop.eup %13744  ;;  %v12475_v55 = vcombine.low %v12383_v35, %v12384_v56  ;;  %13758 = vpow2.f32 %v12349_v44 }
 0x8b3   : > { %v12299_v25 = vmul.f32 2.0, %v13745_v42  ;;  %v12386_v61 = vand.u32 2147483647, %v12382_v14  ;;  %v12423_v6 = vcombine.low %v12415_v38, %v12422_v28 }
 0x8b4   : > { %v12483_v15 = vrot.slane %v12475_v55, %v20143_v60 }
 0x8b5   : > { %v13747_v5 = vpop.eup %13746  ;;  %v13030_v26 = vadd.f32 -1.0, %v12299_v25  ;;  %v12430_v13 = vrot.slane %v12423_v6, %v20143_v60  ;;  %v12476_v21 = vcombine.low %v12385_v20, %v12386_v61 }
 0x8b6   : > { %v13749_v19 = vpop.eup %13748  ;;  %v12301_v16 = vmul.f32 2.0, %v13747_v5 }
 0x8b7   : > { %v13751_v45 = vpop.eup %13750  ;;  %v12307_v39 = vsel %vm12065_vm14, %v13030_v26, 0.0  ;;  %v12351_v30 = vadd.f32 1.0, %v13749_v19  ;;  %13042 = vst.msk [vmem:[%s20120_s27 + $0x6] ss:$8 sm:$0xf] %vm20157_vm6, %v12430_v13  ;;  %v12490_v62 = vrot.slane %v12476_v21, %v20143_v60 }
 0x8b8   : > { %v12308_v33 = vrot.slane %v12307_v39, 4  ;;  %v13032_v63 = vadd.f32 -1.0, %v12301_v16  ;;  %v12300_v7 = vmul.f32 2.0, %v13751_v45  ;;  %v13753_v49 = vpop.eup %13752 }
 0x8b9   : > { %13760 = vrcp.f32 %v12351_v30  ;;  %v13755_v31 = vpop.eup %13754  ;;  %v12353_v24 = vadd.f32 1.0, %v13753_v49  ;;  %v12491_v51 = vcombine.low %v12483_v15, %v12490_v62 }
 0x8ba   : > { %v12309_v23 = vadd.f32 %v12308_v33, %v12307_v39  ;;  %v12321_v27 = vsel %vm12065_vm14, %v13032_v63, 0.0  ;;  %v13031_v3 = vadd.f32 -1.0, %v12300_v7  ;;  %v13757_v9 = vpop.eup %13756  ;;  %v12352_v40 = vadd.f32 1.0, %v13755_v31 }
 0x8bb   : > { %v12322_v1 = vrot.slane %v12321_v27, 4  ;;  %13762 = vrcp.f32 %v12353_v24  ;;  %v12302_v57 = vmul.f32 2.0, %v13757_v9  ;;  %v12498_v37 = vrot.slane %v12491_v51, %v20143_v60 }
 0x8bc   : > { %v12310_v46 = vrot.slane %v12309_v23, 2  ;;  %v12314_v22 = vsel %vm12065_vm14, %v13031_v3, 0.0  ;;  %13764 = vrcp.f32 %v12352_v40  ;;  %v13759_v59 = vpop.eup %13758 }
 0x8bd   : > { %v12323_v12 = vadd.f32 %v12322_v1, %v12321_v27  ;;  %v12315_v43 = vrot.slane %v12314_v22, 4  ;;  %v13033_v2 = vadd.f32 -1.0, %v12302_v57  ;;  %v12354_v50 = vadd.f32 1.0, %v13759_v59  ;;  %13044 = vst.msk [vmem:[%s20120_s27 + $0x20] ss:$8 sm:$0xf] %vm20157_vm6, %v12498_v37 }
 0x8be   : > { %v12311_v41 = vadd.f32 %v12310_v46, %v12309_v23  ;;  %v12107_v23 = vpop.permute.xlu1 %12106 }
 0x8bf   : > { %v12316_v54 = vadd.f32 %v12315_v43, %v12314_v22  ;;  %v12324_v32 = vrot.slane %v12323_v12, 2  ;;  %v12328_v47 = vsel %vm12065_vm14, %v13033_v2, 0.0  ;;  %13766 = vrcp.f32 %v12354_v50 }
 0x8c0   : > { %v12329_v58 = vrot.slane %v12328_v47, 4  ;;  %v12312_v35 = vrot.slane %v12311_v41, 1  ;;  %v12109_v27 = vmul.f32 %v12107_v23, %v20132_v29  ;;  %v12110_v3 = vmul.f32 %v12107_v23, %v20138_v52 }
 0x8c1   : > { %v12317_v0 = vrot.slane %v12316_v54, 2  ;;  %v12325_v38 = vadd.f32 %v12324_v32, %v12323_v12  ;;  %v12111_v1 = vmul.f32 %v12107_v23, %v20136_v17  ;;  %v12112_v51 = vmul.f32 %v12107_v23, %v20148_v4 }
 0x8c2   : > { %v12330_v11 = vadd.f32 %v12329_v58, %v12328_v47  ;;  %v12313_v25 = vadd.f32 %v12312_v35, %v12311_v41 }
 0x8c3   : > { %v13761_v18 = vpop.eup %13760  ;;  %v12318_v36 = vadd.f32 %v12317_v0, %v12316_v54  ;;  %v12326_v55 = vrot.slane %v12325_v38, 1 }
 0x8c4   : > { %v12363_v53 = vmul.f32 2.0, %v13761_v18  ;;  %v12331_v56 = vrot.slane %v12330_v11, 2 }
 0x8c5   : > { %v12319_v34 = vrot.slane %v12318_v36, 1  ;;  %v13763_v8 = vpop.eup %13762  ;;  %v12327_v16 = vadd.f32 %v12326_v55, %v12325_v38 }
 0x8c6   : > { %v13038_v48 = vadd.f32 -1.0, %v12363_v53  ;;  %v13765_v42 = vpop.eup %13764  ;;  %v12365_v20 = vmul.f32 2.0, %v13763_v8  ;;  %v12332_v44 = vadd.f32 %v12331_v56, %v12330_v11 }
 0x8c7   : > { %v12364_v14 = vmul.f32 2.0, %v13765_v42  ;;  %v12320_v28 = vadd.f32 %v12319_v34, %v12318_v36 }
 0x8c8   : > { %v12371_v5 = vadd.f32 %v13038_v48, %v12313_v25  ;;  %v13040_v26 = vadd.f32 -1.0, %v12365_v20  ;;  %v12333_v6 = vrot.slane %v12332_v44, 1 }
 0x8c9   : > { %v13039_v61 = vadd.f32 -1.0, %v12364_v14  ;;  %v13767_v19 = vpop.eup %13766 }
 0x8ca   : > { %v12366_v45 = vmul.f32 2.0, %v13767_v19  ;;  %v12373_v39 = vadd.f32 %v13040_v26, %v12327_v16  ;;  %v12334_v13 = vadd.f32 %v12333_v6, %v12332_v44 }
 0x8cb   : > { %v12372_v15 = vadd.f32 %v13039_v61, %v12320_v28 }
 0x8cc   : > { %v13041_v21 = vadd.f32 -1.0, %v12366_v45 }
 0x8cd   : > { %v12443_v30 = vcombine.low %v12371_v5, %v12372_v15 }
 0x8ce   : > { %v12374_v33 = vadd.f32 %v13041_v21, %v12334_v13 }
 0x8cf   : > { %v12451_v63 = vrot.slane %v12443_v30, %v20143_v60 }
 0x8d0   : > { %v12444_v7 = vcombine.low %v12373_v39, %v12374_v33 }
 0x8d2   : > { %v12458_v49 = vrot.slane %v12444_v7, %v20143_v60 }
 0x8d4   : > { %v12459_v62 = vcombine.low %v12451_v63, %v12458_v49 }
 0x8d6   : > { %v12466_v31 = vrot.slane %v12459_v62, %v20143_v60 }
 0x8d8   : > { %13043 = vst.msk [vmem:[%s20120_s27 + $0x7] ss:$8 sm:$0xf] %vm20157_vm6, %v12466_v31 }
 0x96d   : > { %v12195_v24 = vpop.f32.mrb[66].mxu0 }
 0x96e   : > { %v12196_v9 = vadd.f32 %v12195_v24, %v12109_v27  ;;  %v12197_v40 = vpop.f32.mrb[67].mxu0 }
 0x96f   : > { %v12266_v60 = vpop.f32.mrb[66].mxu1  ;;  %v12198_v10 = vadd.f32 %v12197_v40, %v12110_v3 }
 0x970   : > { %12387 = vst [vmem:[%s20120_s27] sm:$0x7] %v12196_v9  ;;  %v12267_v29 = vadd.f32 %v12266_v60, %v12111_v1  ;;  %v12268_v52 = vpop.f32.mrb[67].mxu1 }
 0x971   : > { %12388 = vst [vmem:[%s20120_s27 + $0x8] sm:$0x7] %v12198_v10  ;;  %v12269_v17 = vadd.f32 %v12268_v52, %v12112_v51 }
 0x972   : > { %12389 = vst [vmem:[%s20120_s27 + $0x10] sm:$0x7] %v12267_v29 }
 0x973   : > { %12390 = vst [vmem:[%s20120_s27 + $0x18] sm:$0x7] %v12269_v17 }
 0x974   : > { %13803 = shalt.err (!%p13800_p3)
}
 0x975   : > { %s13804_s20 = scalar_lea.hbm %s20189_s17, 1024  ;;  %s13808_s30 = scalar_lea.hbm %s20250_s10, 2048 }
 0x976   : > { %p13805_p4 = scmp.ne.s32.totalorder %s20189_s17, %s13804_s20  ;;  %p13809_p9 = scmp.lt.u32.totalorder %s20189_s17, %s20250_s10 }
 0x977   : > { %p13810_p10 = scmp.lt.u32.totalorder %s13808_s30, %s13804_s20  ;;  %p13812_p12 = scmp.lt.u32.totalorder %s13804_s20, %s20189_s17 }
 0x978   : > { %p13806_p7 = pnand %p13805_p4, %p13960_p5 }
 0x979   : > { %p13811_p11 = por %p13810_p10, %p13809_p9 }
 0x97a   : > { %p13807_p8 = pneg %p13806_p7 }
 0x97b   : > { %p13813_p13 = por %p13812_p12, %p13811_p11 }
 0x97d   : > { %p13814_p0 = pnand %p13813_p13, %p13807_p8 }
 0x97f   : > { %13817 = shalt.err (!%p13814_p0)
}
 0x980   : > { %s13864_s18 = smov 512   ;;  %s13865_s25 = smov 1024  }
 0x981   : > { %s13866_s26 = smov 32  }
 0x982   : > { %13475 = dma.vmem_to_hbm [thread:$0]  (%p13960_p5), %s20192_s29, 1024, %s20189_s17, %s20199_s12, %s13864_s18, %s13865_s25, %s13866_s26  }
 0x983 PF: > { %p13481_p1 = scmp.ge.s32.totalorder %s13852_s16, 2  ;;  %s12532_s27 = sand.u32 1, %s13840_s13  }
 0x984   : > { %s12533_s20 = scalar_lea.sflag [#allocation4], %s12532_s27 }
 0x985   : > { %p13478_p2 = pnand %p13481_p1, %p13964_p6 }
 0x987   : > { %13835 = dma.done.wait (!%p13478_p2), %s12533_s20, 1024  }
 0x988   : > { %13837 = vsyncadd (!%p13478_p2), %s12533_s20, 4294966272  ;;  %p20_p3 = scmp.ge.s32.totalorder %s13947_s19, 4   ;;  %s21120_s13 = smov %s13844_s14 }
 0x989   : > { %s21121_s14 = smov %s13848_s15  ;;  %s21122_s15 = smov %s13958_s22 }
 0x98a   : > { %s21123_s16 = smov %s13947_s19  ;;  %22 = sbr.rel (!%p20_p3) target bundleno = 3 (0x3), region = 101 }
 0x991   :  { %12538 = vsyncpa [#allocation4], 1 }
 0x992   :  { %12540 = vsyncpa [#allocation4 + $0x1], 1 }

</bundles_post_ra>
